<compile_context>
chip_gen: v6e
topology: v6e:2x2x1
jax: 0.10.0
libtpu: 0.0.40
codegen_flags: <defaults>
</compile_context>

<pallas_src>
import functools

import jax
import jax.numpy as jnp
from jax.experimental import pallas as pl
from jax.experimental.pallas import tpu as pltpu

VMEM_SPEC = pl.BlockSpec(memory_space=pltpu.MemorySpace.VMEM)
BN_EPS = 1e-5


# ----------------------------------------------------------------------------- in-kernel helpers

def _conv_bn(cur, k, w_bf16, bias, gamma, beta, *, relu, residual=None):
    """Conv1d(pad=floor(k/2)) + _conv_fit_dim (drop last step for even k) + BatchNorm
    (training-mode batch stats) [+ residual] [+ relu].

    cur: [B, T, C] f32 value.  w_bf16: [k*C, Cout] bf16 (im2col layout, tap-major rows).
    """
    B, T, C = cur.shape
    left = k // 2
    right = (k - 1) - left
    if k == 1:
        cols = cur
    else:
        parts = []
        if left:
            parts.append(jnp.zeros((B, left, C), cur.dtype))
        parts.append(cur)
        if right:
            parts.append(jnp.zeros((B, right, C), cur.dtype))
        xp = jnp.concatenate(parts, axis=1)                              # [B, T+k-1, C]
        cols = jnp.concatenate([xp[:, j:j + T, :] for j in range(k)], axis=-1)

    # Single im2col matmul (contraction dim k*C), bf16 inputs, f32 accumulation.
    y = jnp.dot(cols.reshape(B * T, k * C).astype(jnp.bfloat16), w_bf16,
                preferred_element_type=jnp.float32)
    Cout = y.shape[-1]
    y = y.reshape(B, T, Cout) + bias                                     # conv bias

    # BatchNorm1d over (B, T) per channel: one pass (var = E[x^2] - E[x]^2), folded
    # into a single per-channel scale + shift.
    inv_n = 1.0 / float(B * T)
    s = jnp.sum(y, axis=(0, 1), keepdims=True)
    ss = jnp.sum(y * y, axis=(0, 1), keepdims=True)
    mean = s * inv_n
    var = ss * inv_n - mean * mean
    scale = gamma * jax.lax.rsqrt(var + BN_EPS)
    shift = beta - mean * scale
    y = y * scale + shift

    if residual is not None:
        y = y + residual
    if relu:
        y = jnp.maximum(y, 0.0)
    return y


# ----------------------------------------------------------------------------- kernels

def _conv_stage_kernel(*refs, K, num_highway):
    """Fused: conv bank (chained, as in the reference forward) + maxpool +
    conv_projection_1/2 + residual + highway network."""
    x_ref = refs[0]
    bank_w = refs[1:1 + K]
    (bank_b_ref, bank_g_ref, bank_bt_ref,
     w1_ref, b1_ref, g1_ref, bt1_ref,
     w2_ref, b2_ref, g2_ref, bt2_ref,
     hw_w_ref, hw_b_ref,
     out_ref) = refs[1 + K:]

    B, T, P = x_ref.shape
    x = x_ref[...]

    # --- conv bank (note: reference chains the bank sequentially) ---
    cur = x
    bank_outs = []
    for k in range(1, K + 1):
        cur = _conv_bn(cur, k, bank_w[k - 1][...],
                       bank_b_ref[k - 1], bank_g_ref[k - 1], bank_bt_ref[k - 1],
                       relu=True)
        bank_outs.append(cur)
    cat = jnp.concatenate(bank_outs, axis=-1)                            # [B, T, K*H]

    # --- MaxPool1d(2, stride=1, padding=1) followed by [..., :-1]:
    #     out[t] = max(x[t-1], x[t]) with the t=0 edge clamped to x[0]. ---
    prev = jnp.concatenate([cat[:, :1, :], cat[:, :-1, :]], axis=1)
    pooled = jnp.maximum(cat, prev)

    # --- conv projections ---
    p1 = _conv_bn(pooled, 3, w1_ref[...], b1_ref[...], g1_ref[...], bt1_ref[...],
                  relu=True)
    p2 = _conv_bn(p1, 3, w2_ref[...], b2_ref[...], g2_ref[...], bt2_ref[...],
                  relu=False, residual=x)

    # --- highway: packed [P, 2P] weight -> one matmul per layer ---
    out = p2.reshape(B * T, P)
    for i in range(num_highway):
        hg = jnp.dot(out.astype(jnp.bfloat16), hw_w_ref[i],
                     preferred_element_type=jnp.float32) + hw_b_ref[i]   # [B*T, 2P]
        h = jnp.maximum(hg[:, :P], 0.0)
        tg = jax.nn.sigmoid(hg[:, P:])
        out = h * tg + out * (1.0 - tg)
    out_ref[...] = out.reshape(B, T, P)


def _bigru_layer_kernel(x_ref, wif_ref, whf_ref, bif_ref, bhf_ref,
                        wib_ref, whb_ref, bib_ref, bhb_ref, out_ref):
    """Fused bidirectional single-layer GRU.

    x: [T, B, Cin]; out: [T, B, 2H] (lanes [0:H] forward, [H:2H] backward).
    Packed weights: wih [Cin, 3H] bf16, whh [H, 3H] bf16, biases [1, 3H] f32.
    Gate order (r, z, n) matches PyTorch nn.GRU; n = tanh(x_n + r * (W_hn h + b_hn)).
    """
    T, B, Cin = x_ref.shape
    H = out_ref.shape[-1] // 2

    xb16 = x_ref[...].astype(jnp.bfloat16).reshape(T * B, Cin)
    # Hoisted input projections: one big matmul per direction for all timesteps.
    xf = jnp.dot(xb16, wif_ref[...],
                 preferred_element_type=jnp.float32).reshape(T, B, 3 * H) + bif_ref[...]
    xb = jnp.dot(xb16, wib_ref[...],
                 preferred_element_type=jnp.float32).reshape(T, B, 3 * H) + bib_ref[...]

    whf = whf_ref[...]
    whb = whb_ref[...]
    bhf = bhf_ref[...]
    bhb = bhb_ref[...]

    h_f = jnp.zeros((B, H), jnp.float32)
    h_b = jnp.zeros((B, H), jnp.float32)
    # T is small here, so a static unroll keeps every index/store fully static.
    # TODO(synk): switch to lax.fori_loop with dynamic out_ref stores for large T.
    for t in range(T):
        # forward direction, timestep t
        hh = jnp.dot(h_f.astype(jnp.bfloat16), whf,
                     preferred_element_type=jnp.float32) + bhf           # [B, 3H]
        g = xf[t]
        r = jax.nn.sigmoid(g[:, :H] + hh[:, :H])
        z = jax.nn.sigmoid(g[:, H:2 * H] + hh[:, H:2 * H])
        n = jnp.tanh(g[:, 2 * H:] + r * hh[:, 2 * H:])
        h_f = (1.0 - z) * n + z * h_f
        out_ref[t, :, :H] = h_f

        # backward direction, timestep T-1-t (no wrapper-side reversal needed)
        tb = T - 1 - t
        hhb = jnp.dot(h_b.astype(jnp.bfloat16), whb,
                      preferred_element_type=jnp.float32) + bhb
        gb = xb[tb]
        rb = jax.nn.sigmoid(gb[:, :H] + hhb[:, :H])
        zb = jax.nn.sigmoid(gb[:, H:2 * H] + hhb[:, H:2 * H])
        nb = jnp.tanh(gb[:, 2 * H:] + rb * hhb[:, 2 * H:])
        h_b = (1.0 - zb) * nb + zb * h_b
        out_ref[tb, :, H:] = h_b


# ----------------------------------------------------------------------------- wrappers

def conv_highway_stage(x, bank_w, bank_b, bank_g, bank_bt,
                       w1, b1, g1, bt1, w2, b2, g2, bt2, hw_w, hw_b):
    B, T, P = x.shape
    args = [x, *bank_w, bank_b, bank_g, bank_bt,
            w1, b1, g1, bt1, w2, b2, g2, bt2, hw_w, hw_b]
    return pl.pallas_call(
        functools.partial(_conv_stage_kernel, K=len(bank_w),
                          num_highway=hw_w.shape[0]),
        out_shape=jax.ShapeDtypeStruct((B, T, P), jnp.float32),
        in_specs=[VMEM_SPEC] * len(args),
        out_specs=VMEM_SPEC,
    )(*args)


def bigru_layer(x_tbc, lp, H):
    T, B, _ = x_tbc.shape
    return pl.pallas_call(
        _bigru_layer_kernel,
        out_shape=jax.ShapeDtypeStruct((T, B, 2 * H), jnp.float32),
        in_specs=[VMEM_SPEC] * 9,
        out_specs=VMEM_SPEC,
    )(x_tbc, lp['wih_f'], lp['whh_f'], lp['bih_f'], lp['bhh_f'],
      lp['wib'] if 'wib' in lp else lp['wih_b'], lp['whh_b'], lp['bih_b'], lp['bhh_b'])


def _pack_params(params, K, hidden_size):
    """Reshape/cast PyTorch-style params into kernel-friendly packed layouts
    (im2col conv weights, wl/wg packed highway weights, concatenated GRU gates)."""
    packed = {}
    bank_w, bb, bg, bbt = [], [], [], []
    for k in range(1, K + 1):
        w, b, g, bt = params['bank'][k - 1]
        kk, cin, h = w.shape
        bank_w.append(w.reshape(kk * cin, h).astype(jnp.bfloat16))       # [k*Cin, H]
        bb.append(b.reshape(1, -1))
        bg.append(g.reshape(1, -1))
        bbt.append(bt.reshape(1, -1))
    packed['bank_w'] = bank_w
    packed['bank_b'] = jnp.stack(bb)                                     # [K, 1, H]
    packed['bank_g'] = jnp.stack(bg)
    packed['bank_bt'] = jnp.stack(bbt)

    w1, b1, g1, bt1 = params['proj1']
    packed['proj1'] = (w1.reshape(-1, w1.shape[-1]).astype(jnp.bfloat16), b1, g1, bt1)
    w2, b2, g2, bt2 = params['proj2']
    packed['proj2'] = (w2.reshape(-1, w2.shape[-1]).astype(jnp.bfloat16), b2, g2, bt2)

    wl, bl, wg, bgate = params['highway']
    packed['hw_w'] = jnp.concatenate([wl, wg], axis=-1).astype(jnp.bfloat16)  # [L, P, 2P]
    packed['hw_b'] = jnp.concatenate([bl, bgate], axis=-1)                    # [L, 1, 2P]

    Hg = hidden_size // 2
    glayers = []
    for lp in params['gru']:
        pk = {}
        for d in ('f', 'b'):
            wih = lp['wih_' + d]                                         # [3, Cin, Hg]
            whh = lp['whh_' + d]                                         # [3, Hg, Hg]
            cin = wih.shape[1]
            pk['wih_' + d] = wih.transpose(1, 0, 2).reshape(cin, 3 * Hg).astype(jnp.bfloat16)
            pk['whh_' + d] = whh.transpose(1, 0, 2).reshape(Hg, 3 * Hg).astype(jnp.bfloat16)
            pk['bih_' + d] = lp['bih_' + d].transpose(1, 0, 2).reshape(1, 3 * Hg)
            pk['bhh_' + d] = lp['bhh_' + d].transpose(1, 0, 2).reshape(1, 3 * Hg)
        glayers.append(pk)
    packed['gru'] = glayers
    return packed


def cbhg_forward(x_ncl, params, K, hidden_size):
    """x_ncl: [B, projection_size, T] (PyTorch NCL).  Returns [B, T, hidden_size]."""
    x = jnp.transpose(x_ncl, (0, 2, 1)).astype(jnp.float32)              # [B, T, P]
    pk = _pack_params(params, K, hidden_size)

    hw = conv_highway_stage(
        x, pk['bank_w'], pk['bank_b'], pk['bank_g'], pk['bank_bt'],
        *pk['proj1'], *pk['proj2'], pk['hw_w'], pk['hw_b'])              # [B, T, P]

    Hg = hidden_size // 2
    h = jnp.transpose(hw, (1, 0, 2))                                     # [T, B, P]
    for lp in pk['gru']:
        h = bigru_layer(h, lp, Hg)                                       # [T, B, 2*Hg]
    return jnp.transpose(h, (1, 0, 2))                                   # [B, T, 2*Hg]


# ----------------------------------------------------------------------------- params

def init_params(key, P, H, K, num_gru_layers=2, num_highway=4):
    keys = iter(jax.random.split(key, 256))

    def nrm(shape, scale=0.1):
        return scale * jax.random.normal(next(keys), shape, dtype=jnp.float32)

    params = {}
    bank = []
    cin = P
    for k in range(1, K + 1):
        bank.append((nrm((k, cin, H)), nrm((1, 1, H)),
                     jnp.ones((1, 1, H), jnp.float32), jnp.zeros((1, 1, H), jnp.float32)))
        cin = H
    params['bank'] = bank
    params['proj1'] = (nrm((3, K * H, H)), nrm((1, 1, H)),
                       jnp.ones((1, 1, H), jnp.float32), jnp.zeros((1, 1, H), jnp.float32))
    params['proj2'] = (nrm((3, H, P)), nrm((1, 1, P)),
                       jnp.ones((1, 1, P), jnp.float32), jnp.zeros((1, 1, P), jnp.float32))
    params['highway'] = (nrm((num_highway, P, P)), nrm((num_highway, 1, P)),
                         nrm((num_highway, P, P)), nrm((num_highway, 1, P)))
    Hg = H // 2
    gru_layers = []
    cin = P
    for _ in range(num_gru_layers):
        lp = {}
        for d in ('f', 'b'):
            lp['wih_' + d] = nrm((3, cin, Hg))
            lp['whh_' + d] = nrm((3, Hg, Hg))
            lp['bih_' + d] = nrm((3, 1, Hg))
            lp['bhh_' + d] = nrm((3, 1, Hg))
        gru_layers.append(lp)
        cin = 2 * Hg
    params['gru'] = gru_layers
    return params


# ----------------------------------------------------------------------------- main

if __name__ == "__main__":
    B, P, H, T, K = 2, 32, 32, 16, 8   # batch, projection_size, hidden_size, seq len, bank size
    key = jax.random.PRNGKey(0)
    kx, kp = jax.random.split(key)
    x = jax.random.normal(kx, (B, P, T), dtype=jnp.float32)   # PyTorch NCL input
    params = init_params(kp, P, H, K)

    fwd = jax.jit(functools.partial(cbhg_forward, K=K, hidden_size=H))
    out = jax.block_until_ready(fwd(x, params))
    assert out.shape == (B, T, H), out.shape
    assert jnp.all(jnp.isfinite(out))
    print("KERNEL_OK")
</pallas_src>

<mosaic_0001>
module attributes {stable_mosaic.version = 11 : i64} {
  func.func @_conv_stage_kernel(%arg0: memref<2x16x32xf32, #tpu.memory_space<vmem>>, %arg1: memref<32x32xbf16, #tpu.memory_space<vmem>>, %arg2: memref<64x32xbf16, #tpu.memory_space<vmem>>, %arg3: memref<96x32xbf16, #tpu.memory_space<vmem>>, %arg4: memref<128x32xbf16, #tpu.memory_space<vmem>>, %arg5: memref<160x32xbf16, #tpu.memory_space<vmem>>, %arg6: memref<192x32xbf16, #tpu.memory_space<vmem>>, %arg7: memref<224x32xbf16, #tpu.memory_space<vmem>>, %arg8: memref<256x32xbf16, #tpu.memory_space<vmem>>, %arg9: memref<8x1x32xf32, #tpu.memory_space<vmem>>, %arg10: memref<8x1x32xf32, #tpu.memory_space<vmem>>, %arg11: memref<8x1x32xf32, #tpu.memory_space<vmem>>, %arg12: memref<768x32xbf16, #tpu.memory_space<vmem>>, %arg13: memref<1x1x32xf32, #tpu.memory_space<vmem>>, %arg14: memref<1x1x32xf32, #tpu.memory_space<vmem>>, %arg15: memref<1x1x32xf32, #tpu.memory_space<vmem>>, %arg16: memref<96x32xbf16, #tpu.memory_space<vmem>>, %arg17: memref<1x1x32xf32, #tpu.memory_space<vmem>>, %arg18: memref<1x1x32xf32, #tpu.memory_space<vmem>>, %arg19: memref<1x1x32xf32, #tpu.memory_space<vmem>>, %arg20: memref<4x32x64xbf16, #tpu.memory_space<vmem>>, %arg21: memref<4x1x64xf32, #tpu.memory_space<vmem>>, %arg22: memref<2x16x32xf32, #tpu.memory_space<vmem>>) attributes {dimension_semantics = [], scalar_prefetch = 0 : i64, scratch_operands = 0 : i64, tpu.core_type = #tpu.core_type<tc>} {
    %c0 = arith.constant 0 : index
    %c0_0 = arith.constant 0 : index
    %c0_1 = arith.constant 0 : index
    %0 = vector.load %arg0[%c0, %c0_0, %c0_1] : memref<2x16x32xf32, #tpu.memory_space<vmem>>, vector<2x16x32xf32>
    %c0_2 = arith.constant 0 : index
    %c0_3 = arith.constant 0 : index
    %1 = vector.load %arg1[%c0_2, %c0_3] : memref<32x32xbf16, #tpu.memory_space<vmem>>, vector<32x32xbf16>
    %c0_4 = arith.constant 0 : index
    %c0_5 = arith.constant 0 : index
    %c0_6 = arith.constant 0 : index
    %2 = vector.load %arg9[%c0_4, %c0_5, %c0_6] : memref<8x1x32xf32, #tpu.memory_space<vmem>>, vector<1x1x32xf32>
    %3 = vector.shape_cast %2 : vector<1x1x32xf32> to vector<1x32xf32>
    %c0_7 = arith.constant 0 : index
    %c0_8 = arith.constant 0 : index
    %c0_9 = arith.constant 0 : index
    %4 = vector.load %arg10[%c0_7, %c0_8, %c0_9] : memref<8x1x32xf32, #tpu.memory_space<vmem>>, vector<1x1x32xf32>
    %5 = vector.shape_cast %4 : vector<1x1x32xf32> to vector<1x32xf32>
    %c0_10 = arith.constant 0 : index
    %c0_11 = arith.constant 0 : index
    %c0_12 = arith.constant 0 : index
    %6 = vector.load %arg11[%c0_10, %c0_11, %c0_12] : memref<8x1x32xf32, #tpu.memory_space<vmem>>, vector<1x1x32xf32>
    %7 = vector.shape_cast %6 : vector<1x1x32xf32> to vector<1x32xf32>
    %8 = vector.shape_cast %0 : vector<2x16x32xf32> to vector<32x32xf32>
    %9 = arith.truncf %8 : vector<32x32xf32> to vector<32x32xbf16>
    %cst = arith.constant dense<0.000000e+00> : vector<32x32xf32>
    %10 = tpu.matmul %9, %1, %cst {dimension_numbers = #tpu.dot_dimension_numbers<[1], [0], [0], [1], [0, 0, 1, 1], [], []>} : vector<32x32xbf16>, vector<32x32xbf16>, vector<32x32xf32> -> vector<32x32xf32>
    %11 = vector.shape_cast %10 : vector<32x32xf32> to vector<2x16x32xf32>
    %12 = vector.shape_cast %3 : vector<1x32xf32> to vector<1x1x32xf32>
    %13 = vector.broadcast %12 : vector<1x1x32xf32> to vector<2x16x32xf32>
    %14 = arith.addf %11, %13 : vector<2x16x32xf32>
    %cst_13 = arith.constant dense<0.000000e+00> : vector<32xf32>
    %15 = vector.multi_reduction <add>, %14, %cst_13 [0, 1] : vector<2x16x32xf32> to vector<32xf32>
    %16 = vector.shape_cast %15 : vector<32xf32> to vector<1x1x32xf32>
    %17 = arith.mulf %14, %14 : vector<2x16x32xf32>
    %cst_14 = arith.constant dense<0.000000e+00> : vector<32xf32>
    %18 = vector.multi_reduction <add>, %17, %cst_14 [0, 1] : vector<2x16x32xf32> to vector<32xf32>
    %19 = vector.shape_cast %18 : vector<32xf32> to vector<1x1x32xf32>
    %cst_15 = arith.constant 3.125000e-02 : f32
    %20 = vector.broadcast %cst_15 : f32 to vector<1x1x32xf32>
    %21 = arith.mulf %16, %20 : vector<1x1x32xf32>
    %cst_16 = arith.constant 3.125000e-02 : f32
    %22 = vector.broadcast %cst_16 : f32 to vector<1x1x32xf32>
    %23 = arith.mulf %19, %22 : vector<1x1x32xf32>
    %24 = arith.mulf %21, %21 : vector<1x1x32xf32>
    %25 = arith.subf %23, %24 : vector<1x1x32xf32>
    %cst_17 = arith.constant 9.99999974E-6 : f32
    %26 = vector.broadcast %cst_17 : f32 to vector<1x1x32xf32>
    %27 = arith.addf %25, %26 : vector<1x1x32xf32>
    %28 = math.rsqrt %27 : vector<1x1x32xf32>
    %29 = vector.shape_cast %5 : vector<1x32xf32> to vector<1x1x32xf32>
    %30 = arith.mulf %29, %28 : vector<1x1x32xf32>
    %31 = arith.mulf %21, %30 : vector<1x1x32xf32>
    %32 = vector.shape_cast %7 : vector<1x32xf32> to vector<1x1x32xf32>
    %33 = arith.subf %32, %31 : vector<1x1x32xf32>
    %34 = vector.broadcast %30 : vector<1x1x32xf32> to vector<2x16x32xf32>
    %35 = arith.mulf %14, %34 : vector<2x16x32xf32>
    %36 = vector.broadcast %33 : vector<1x1x32xf32> to vector<2x16x32xf32>
    %37 = arith.addf %35, %36 : vector<2x16x32xf32>
    %cst_18 = arith.constant 0.000000e+00 : f32
    %38 = vector.broadcast %cst_18 : f32 to vector<2x16x32xf32>
    %39 = arith.maximumf %37, %38 : vector<2x16x32xf32>
    %c0_19 = arith.constant 0 : index
    %c0_20 = arith.constant 0 : index
    %40 = vector.load %arg2[%c0_19, %c0_20] : memref<64x32xbf16, #tpu.memory_space<vmem>>, vector<64x32xbf16>
    %c1 = arith.constant 1 : index
    %c0_21 = arith.constant 0 : index
    %c0_22 = arith.constant 0 : index
    %41 = vector.load %arg9[%c1, %c0_21, %c0_22] : memref<8x1x32xf32, #tpu.memory_space<vmem>>, vector<1x1x32xf32>
    %42 = vector.shape_cast %41 : vector<1x1x32xf32> to vector<1x32xf32>
    %c1_23 = arith.constant 1 : index
    %c0_24 = arith.constant 0 : index
    %c0_25 = arith.constant 0 : index
    %43 = vector.load %arg10[%c1_23, %c0_24, %c0_25] : memref<8x1x32xf32, #tpu.memory_space<vmem>>, vector<1x1x32xf32>
    %44 = vector.shape_cast %43 : vector<1x1x32xf32> to vector<1x32xf32>
    %c1_26 = arith.constant 1 : index
    %c0_27 = arith.constant 0 : index
    %c0_28 = arith.constant 0 : index
    %45 = vector.load %arg11[%c1_26, %c0_27, %c0_28] : memref<8x1x32xf32, #tpu.memory_space<vmem>>, vector<1x1x32xf32>
    %46 = vector.shape_cast %45 : vector<1x1x32xf32> to vector<1x32xf32>
    %cst_29 = arith.constant 0.000000e+00 : f32
    %47 = vector.broadcast %cst_29 : f32 to vector<2x1x32xf32>
    %48 = tpu.concatenate %47, %39 in 1 : vector<2x1x32xf32>, vector<2x16x32xf32> -> vector<2x17x32xf32>
    %49 = vector.extract_strided_slice %48 {offsets = [0, 0, 0], sizes = [2, 16, 32], strides = [1, 1, 1]} : vector<2x17x32xf32> to vector<2x16x32xf32>
    %50 = vector.extract_strided_slice %48 {offsets = [0, 1, 0], sizes = [2, 16, 32], strides = [1, 1, 1]} : vector<2x17x32xf32> to vector<2x16x32xf32>
    %51 = tpu.concatenate %49, %50 in 2 : vector<2x16x32xf32>, vector<2x16x32xf32> -> vector<2x16x64xf32>
    %52 = vector.shape_cast %51 : vector<2x16x64xf32> to vector<32x64xf32>
    %53 = arith.truncf %52 : vector<32x64xf32> to vector<32x64xbf16>
    %cst_30 = arith.constant dense<0.000000e+00> : vector<32x32xf32>
    %54 = tpu.matmul %53, %40, %cst_30 {dimension_numbers = #tpu.dot_dimension_numbers<[1], [0], [0], [1], [0, 0, 1, 1], [], []>} : vector<32x64xbf16>, vector<64x32xbf16>, vector<32x32xf32> -> vector<32x32xf32>
    %55 = vector.shape_cast %54 : vector<32x32xf32> to vector<2x16x32xf32>
    %56 = vector.shape_cast %42 : vector<1x32xf32> to vector<1x1x32xf32>
    %57 = vector.broadcast %56 : vector<1x1x32xf32> to vector<2x16x32xf32>
    %58 = arith.addf %55, %57 : vector<2x16x32xf32>
    %cst_31 = arith.constant dense<0.000000e+00> : vector<32xf32>
    %59 = vector.multi_reduction <add>, %58, %cst_31 [0, 1] : vector<2x16x32xf32> to vector<32xf32>
    %60 = vector.shape_cast %59 : vector<32xf32> to vector<1x1x32xf32>
    %61 = arith.mulf %58, %58 : vector<2x16x32xf32>
    %cst_32 = arith.constant dense<0.000000e+00> : vector<32xf32>
    %62 = vector.multi_reduction <add>, %61, %cst_32 [0, 1] : vector<2x16x32xf32> to vector<32xf32>
    %63 = vector.shape_cast %62 : vector<32xf32> to vector<1x1x32xf32>
    %cst_33 = arith.constant 3.125000e-02 : f32
    %64 = vector.broadcast %cst_33 : f32 to vector<1x1x32xf32>
    %65 = arith.mulf %60, %64 : vector<1x1x32xf32>
    %cst_34 = arith.constant 3.125000e-02 : f32
    %66 = vector.broadcast %cst_34 : f32 to vector<1x1x32xf32>
    %67 = arith.mulf %63, %66 : vector<1x1x32xf32>
    %68 = arith.mulf %65, %65 : vector<1x1x32xf32>
    %69 = arith.subf %67, %68 : vector<1x1x32xf32>
    %cst_35 = arith.constant 9.99999974E-6 : f32
    %70 = vector.broadcast %cst_35 : f32 to vector<1x1x32xf32>
    %71 = arith.addf %69, %70 : vector<1x1x32xf32>
    %72 = math.rsqrt %71 : vector<1x1x32xf32>
    %73 = vector.shape_cast %44 : vector<1x32xf32> to vector<1x1x32xf32>
    %74 = arith.mulf %73, %72 : vector<1x1x32xf32>
    %75 = arith.mulf %65, %74 : vector<1x1x32xf32>
    %76 = vector.shape_cast %46 : vector<1x32xf32> to vector<1x1x32xf32>
    %77 = arith.subf %76, %75 : vector<1x1x32xf32>
    %78 = vector.broadcast %74 : vector<1x1x32xf32> to vector<2x16x32xf32>
    %79 = arith.mulf %58, %78 : vector<2x16x32xf32>
    %80 = vector.broadcast %77 : vector<1x1x32xf32> to vector<2x16x32xf32>
    %81 = arith.addf %79, %80 : vector<2x16x32xf32>
    %cst_36 = arith.constant 0.000000e+00 : f32
    %82 = vector.broadcast %cst_36 : f32 to vector<2x16x32xf32>
    %83 = arith.maximumf %81, %82 : vector<2x16x32xf32>
    %c0_37 = arith.constant 0 : index
    %c0_38 = arith.constant 0 : index
    %84 = vector.load %arg3[%c0_37, %c0_38] : memref<96x32xbf16, #tpu.memory_space<vmem>>, vector<96x32xbf16>
    %c2 = arith.constant 2 : index
    %c0_39 = arith.constant 0 : index
    %c0_40 = arith.constant 0 : index
    %85 = vector.load %arg9[%c2, %c0_39, %c0_40] : memref<8x1x32xf32, #tpu.memory_space<vmem>>, vector<1x1x32xf32>
    %86 = vector.shape_cast %85 : vector<1x1x32xf32> to vector<1x32xf32>
    %c2_41 = arith.constant 2 : index
    %c0_42 = arith.constant 0 : index
    %c0_43 = arith.constant 0 : index
    %87 = vector.load %arg10[%c2_41, %c0_42, %c0_43] : memref<8x1x32xf32, #tpu.memory_space<vmem>>, vector<1x1x32xf32>
    %88 = vector.shape_cast %87 : vector<1x1x32xf32> to vector<1x32xf32>
    %c2_44 = arith.constant 2 : index
    %c0_45 = arith.constant 0 : index
    %c0_46 = arith.constant 0 : index
    %89 = vector.load %arg11[%c2_44, %c0_45, %c0_46] : memref<8x1x32xf32, #tpu.memory_space<vmem>>, vector<1x1x32xf32>
    %90 = vector.shape_cast %89 : vector<1x1x32xf32> to vector<1x32xf32>
    %cst_47 = arith.constant 0.000000e+00 : f32
    %91 = vector.broadcast %cst_47 : f32 to vector<2x1x32xf32>
    %cst_48 = arith.constant 0.000000e+00 : f32
    %92 = vector.broadcast %cst_48 : f32 to vector<2x1x32xf32>
    %93 = tpu.concatenate %91, %83, %92 in 1 : vector<2x1x32xf32>, vector<2x16x32xf32>, vector<2x1x32xf32> -> vector<2x18x32xf32>
    %94 = vector.extract_strided_slice %93 {offsets = [0, 0, 0], sizes = [2, 16, 32], strides = [1, 1, 1]} : vector<2x18x32xf32> to vector<2x16x32xf32>
    %95 = vector.extract_strided_slice %93 {offsets = [0, 1, 0], sizes = [2, 16, 32], strides = [1, 1, 1]} : vector<2x18x32xf32> to vector<2x16x32xf32>
    %96 = vector.extract_strided_slice %93 {offsets = [0, 2, 0], sizes = [2, 16, 32], strides = [1, 1, 1]} : vector<2x18x32xf32> to vector<2x16x32xf32>
    %97 = tpu.concatenate %94, %95, %96 in 2 : vector<2x16x32xf32>, vector<2x16x32xf32>, vector<2x16x32xf32> -> vector<2x16x96xf32>
    %98 = vector.shape_cast %97 : vector<2x16x96xf32> to vector<32x96xf32>
    %99 = arith.truncf %98 : vector<32x96xf32> to vector<32x96xbf16>
    %cst_49 = arith.constant dense<0.000000e+00> : vector<32x32xf32>
    %100 = tpu.matmul %99, %84, %cst_49 {dimension_numbers = #tpu.dot_dimension_numbers<[1], [0], [0], [1], [0, 0, 1, 1], [], []>} : vector<32x96xbf16>, vector<96x32xbf16>, vector<32x32xf32> -> vector<32x32xf32>
    %101 = vector.shape_cast %100 : vector<32x32xf32> to vector<2x16x32xf32>
    %102 = vector.shape_cast %86 : vector<1x32xf32> to vector<1x1x32xf32>
    %103 = vector.broadcast %102 : vector<1x1x32xf32> to vector<2x16x32xf32>
    %104 = arith.addf %101, %103 : vector<2x16x32xf32>
    %cst_50 = arith.constant dense<0.000000e+00> : vector<32xf32>
    %105 = vector.multi_reduction <add>, %104, %cst_50 [0, 1] : vector<2x16x32xf32> to vector<32xf32>
    %106 = vector.shape_cast %105 : vector<32xf32> to vector<1x1x32xf32>
    %107 = arith.mulf %104, %104 : vector<2x16x32xf32>
    %cst_51 = arith.constant dense<0.000000e+00> : vector<32xf32>
    %108 = vector.multi_reduction <add>, %107, %cst_51 [0, 1] : vector<2x16x32xf32> to vector<32xf32>
    %109 = vector.shape_cast %108 : vector<32xf32> to vector<1x1x32xf32>
    %cst_52 = arith.constant 3.125000e-02 : f32
    %110 = vector.broadcast %cst_52 : f32 to vector<1x1x32xf32>
    %111 = arith.mulf %106, %110 : vector<1x1x32xf32>
    %cst_53 = arith.constant 3.125000e-02 : f32
    %112 = vector.broadcast %cst_53 : f32 to vector<1x1x32xf32>
    %113 = arith.mulf %109, %112 : vector<1x1x32xf32>
    %114 = arith.mulf %111, %111 : vector<1x1x32xf32>
    %115 = arith.subf %113, %114 : vector<1x1x32xf32>
    %cst_54 = arith.constant 9.99999974E-6 : f32
    %116 = vector.broadcast %cst_54 : f32 to vector<1x1x32xf32>
    %117 = arith.addf %115, %116 : vector<1x1x32xf32>
    %118 = math.rsqrt %117 : vector<1x1x32xf32>
    %119 = vector.shape_cast %88 : vector<1x32xf32> to vector<1x1x32xf32>
    %120 = arith.mulf %119, %118 : vector<1x1x32xf32>
    %121 = arith.mulf %111, %120 : vector<1x1x32xf32>
    %122 = vector.shape_cast %90 : vector<1x32xf32> to vector<1x1x32xf32>
    %123 = arith.subf %122, %121 : vector<1x1x32xf32>
    %124 = vector.broadcast %120 : vector<1x1x32xf32> to vector<2x16x32xf32>
    %125 = arith.mulf %104, %124 : vector<2x16x32xf32>
    %126 = vector.broadcast %123 : vector<1x1x32xf32> to vector<2x16x32xf32>
    %127 = arith.addf %125, %126 : vector<2x16x32xf32>
    %cst_55 = arith.constant 0.000000e+00 : f32
    %128 = vector.broadcast %cst_55 : f32 to vector<2x16x32xf32>
    %129 = arith.maximumf %127, %128 : vector<2x16x32xf32>
    %c0_56 = arith.constant 0 : index
    %c0_57 = arith.constant 0 : index
    %130 = vector.load %arg4[%c0_56, %c0_57] : memref<128x32xbf16, #tpu.memory_space<vmem>>, vector<128x32xbf16>
    %c3 = arith.constant 3 : index
    %c0_58 = arith.constant 0 : index
    %c0_59 = arith.constant 0 : index
    %131 = vector.load %arg9[%c3, %c0_58, %c0_59] : memref<8x1x32xf32, #tpu.memory_space<vmem>>, vector<1x1x32xf32>
    %132 = vector.shape_cast %131 : vector<1x1x32xf32> to vector<1x32xf32>
    %c3_60 = arith.constant 3 : index
    %c0_61 = arith.constant 0 : index
    %c0_62 = arith.constant 0 : index
    %133 = vector.load %arg10[%c3_60, %c0_61, %c0_62] : memref<8x1x32xf32, #tpu.memory_space<vmem>>, vector<1x1x32xf32>
    %134 = vector.shape_cast %133 : vector<1x1x32xf32> to vector<1x32xf32>
    %c3_63 = arith.constant 3 : index
    %c0_64 = arith.constant 0 : index
    %c0_65 = arith.constant 0 : index
    %135 = vector.load %arg11[%c3_63, %c0_64, %c0_65] : memref<8x1x32xf32, #tpu.memory_space<vmem>>, vector<1x1x32xf32>
    %136 = vector.shape_cast %135 : vector<1x1x32xf32> to vector<1x32xf32>
    %cst_66 = arith.constant 0.000000e+00 : f32
    %137 = vector.broadcast %cst_66 : f32 to vector<2x2x32xf32>
    %cst_67 = arith.constant 0.000000e+00 : f32
    %138 = vector.broadcast %cst_67 : f32 to vector<2x1x32xf32>
    %139 = tpu.concatenate %137, %129, %138 in 1 : vector<2x2x32xf32>, vector<2x16x32xf32>, vector<2x1x32xf32> -> vector<2x19x32xf32>
    %140 = vector.extract_strided_slice %139 {offsets = [0, 0, 0], sizes = [2, 16, 32], strides = [1, 1, 1]} : vector<2x19x32xf32> to vector<2x16x32xf32>
    %141 = vector.extract_strided_slice %139 {offsets = [0, 1, 0], sizes = [2, 16, 32], strides = [1, 1, 1]} : vector<2x19x32xf32> to vector<2x16x32xf32>
    %142 = vector.extract_strided_slice %139 {offsets = [0, 2, 0], sizes = [2, 16, 32], strides = [1, 1, 1]} : vector<2x19x32xf32> to vector<2x16x32xf32>
    %143 = vector.extract_strided_slice %139 {offsets = [0, 3, 0], sizes = [2, 16, 32], strides = [1, 1, 1]} : vector<2x19x32xf32> to vector<2x16x32xf32>
    %144 = tpu.concatenate %140, %141, %142, %143 in 2 : vector<2x16x32xf32>, vector<2x16x32xf32>, vector<2x16x32xf32>, vector<2x16x32xf32> -> vector<2x16x128xf32>
    %145 = vector.shape_cast %144 : vector<2x16x128xf32> to vector<32x128xf32>
    %146 = arith.truncf %145 : vector<32x128xf32> to vector<32x128xbf16>
    %cst_68 = arith.constant dense<0.000000e+00> : vector<32x32xf32>
    %147 = tpu.matmul %146, %130, %cst_68 {dimension_numbers = #tpu.dot_dimension_numbers<[1], [0], [0], [1], [0, 0, 1, 1], [], []>} : vector<32x128xbf16>, vector<128x32xbf16>, vector<32x32xf32> -> vector<32x32xf32>
    %148 = vector.shape_cast %147 : vector<32x32xf32> to vector<2x16x32xf32>
    %149 = vector.shape_cast %132 : vector<1x32xf32> to vector<1x1x32xf32>
    %150 = vector.broadcast %149 : vector<1x1x32xf32> to vector<2x16x32xf32>
    %151 = arith.addf %148, %150 : vector<2x16x32xf32>
    %cst_69 = arith.constant dense<0.000000e+00> : vector<32xf32>
    %152 = vector.multi_reduction <add>, %151, %cst_69 [0, 1] : vector<2x16x32xf32> to vector<32xf32>
    %153 = vector.shape_cast %152 : vector<32xf32> to vector<1x1x32xf32>
    %154 = arith.mulf %151, %151 : vector<2x16x32xf32>
    %cst_70 = arith.constant dense<0.000000e+00> : vector<32xf32>
    %155 = vector.multi_reduction <add>, %154, %cst_70 [0, 1] : vector<2x16x32xf32> to vector<32xf32>
    %156 = vector.shape_cast %155 : vector<32xf32> to vector<1x1x32xf32>
    %cst_71 = arith.constant 3.125000e-02 : f32
    %157 = vector.broadcast %cst_71 : f32 to vector<1x1x32xf32>
    %158 = arith.mulf %153, %157 : vector<1x1x32xf32>
    %cst_72 = arith.constant 3.125000e-02 : f32
    %159 = vector.broadcast %cst_72 : f32 to vector<1x1x32xf32>
    %160 = arith.mulf %156, %159 : vector<1x1x32xf32>
    %161 = arith.mulf %158, %158 : vector<1x1x32xf32>
    %162 = arith.subf %160, %161 : vector<1x1x32xf32>
    %cst_73 = arith.constant 9.99999974E-6 : f32
    %163 = vector.broadcast %cst_73 : f32 to vector<1x1x32xf32>
    %164 = arith.addf %162, %163 : vector<1x1x32xf32>
    %165 = math.rsqrt %164 : vector<1x1x32xf32>
    %166 = vector.shape_cast %134 : vector<1x32xf32> to vector<1x1x32xf32>
    %167 = arith.mulf %166, %165 : vector<1x1x32xf32>
    %168 = arith.mulf %158, %167 : vector<1x1x32xf32>
    %169 = vector.shape_cast %136 : vector<1x32xf32> to vector<1x1x32xf32>
    %170 = arith.subf %169, %168 : vector<1x1x32xf32>
    %171 = vector.broadcast %167 : vector<1x1x32xf32> to vector<2x16x32xf32>
    %172 = arith.mulf %151, %171 : vector<2x16x32xf32>
    %173 = vector.broadcast %170 : vector<1x1x32xf32> to vector<2x16x32xf32>
    %174 = arith.addf %172, %173 : vector<2x16x32xf32>
    %cst_74 = arith.constant 0.000000e+00 : f32
    %175 = vector.broadcast %cst_74 : f32 to vector<2x16x32xf32>
    %176 = arith.maximumf %174, %175 : vector<2x16x32xf32>
    %c0_75 = arith.constant 0 : index
    %c0_76 = arith.constant 0 : index
    %177 = vector.load %arg5[%c0_75, %c0_76] : memref<160x32xbf16, #tpu.memory_space<vmem>>, vector<160x32xbf16>
    %c4 = arith.constant 4 : index
    %c0_77 = arith.constant 0 : index
    %c0_78 = arith.constant 0 : index
    %178 = vector.load %arg9[%c4, %c0_77, %c0_78] : memref<8x1x32xf32, #tpu.memory_space<vmem>>, vector<1x1x32xf32>
    %179 = vector.shape_cast %178 : vector<1x1x32xf32> to vector<1x32xf32>
    %c4_79 = arith.constant 4 : index
    %c0_80 = arith.constant 0 : index
    %c0_81 = arith.constant 0 : index
    %180 = vector.load %arg10[%c4_79, %c0_80, %c0_81] : memref<8x1x32xf32, #tpu.memory_space<vmem>>, vector<1x1x32xf32>
    %181 = vector.shape_cast %180 : vector<1x1x32xf32> to vector<1x32xf32>
    %c4_82 = arith.constant 4 : index
    %c0_83 = arith.constant 0 : index
    %c0_84 = arith.constant 0 : index
    %182 = vector.load %arg11[%c4_82, %c0_83, %c0_84] : memref<8x1x32xf32, #tpu.memory_space<vmem>>, vector<1x1x32xf32>
    %183 = vector.shape_cast %182 : vector<1x1x32xf32> to vector<1x32xf32>
    %cst_85 = arith.constant 0.000000e+00 : f32
    %184 = vector.broadcast %cst_85 : f32 to vector<2x2x32xf32>
    %cst_86 = arith.constant 0.000000e+00 : f32
    %185 = vector.broadcast %cst_86 : f32 to vector<2x2x32xf32>
    %186 = tpu.concatenate %184, %176, %185 in 1 : vector<2x2x32xf32>, vector<2x16x32xf32>, vector<2x2x32xf32> -> vector<2x20x32xf32>
    %187 = vector.extract_strided_slice %186 {offsets = [0, 0, 0], sizes = [2, 16, 32], strides = [1, 1, 1]} : vector<2x20x32xf32> to vector<2x16x32xf32>
    %188 = vector.extract_strided_slice %186 {offsets = [0, 1, 0], sizes = [2, 16, 32], strides = [1, 1, 1]} : vector<2x20x32xf32> to vector<2x16x32xf32>
    %189 = vector.extract_strided_slice %186 {offsets = [0, 2, 0], sizes = [2, 16, 32], strides = [1, 1, 1]} : vector<2x20x32xf32> to vector<2x16x32xf32>
    %190 = vector.extract_strided_slice %186 {offsets = [0, 3, 0], sizes = [2, 16, 32], strides = [1, 1, 1]} : vector<2x20x32xf32> to vector<2x16x32xf32>
    %191 = vector.extract_strided_slice %186 {offsets = [0, 4, 0], sizes = [2, 16, 32], strides = [1, 1, 1]} : vector<2x20x32xf32> to vector<2x16x32xf32>
    %192 = tpu.concatenate %187, %188, %189, %190, %191 in 2 : vector<2x16x32xf32>, vector<2x16x32xf32>, vector<2x16x32xf32>, vector<2x16x32xf32>, vector<2x16x32xf32> -> vector<2x16x160xf32>
    %193 = vector.shape_cast %192 : vector<2x16x160xf32> to vector<32x160xf32>
    %194 = arith.truncf %193 : vector<32x160xf32> to vector<32x160xbf16>
    %cst_87 = arith.constant dense<0.000000e+00> : vector<32x32xf32>
    %195 = tpu.matmul %194, %177, %cst_87 {dimension_numbers = #tpu.dot_dimension_numbers<[1], [0], [0], [1], [0, 0, 1, 1], [], []>} : vector<32x160xbf16>, vector<160x32xbf16>, vector<32x32xf32> -> vector<32x32xf32>
    %196 = vector.shape_cast %195 : vector<32x32xf32> to vector<2x16x32xf32>
    %197 = vector.shape_cast %179 : vector<1x32xf32> to vector<1x1x32xf32>
    %198 = vector.broadcast %197 : vector<1x1x32xf32> to vector<2x16x32xf32>
    %199 = arith.addf %196, %198 : vector<2x16x32xf32>
    %cst_88 = arith.constant dense<0.000000e+00> : vector<32xf32>
    %200 = vector.multi_reduction <add>, %199, %cst_88 [0, 1] : vector<2x16x32xf32> to vector<32xf32>
    %201 = vector.shape_cast %200 : vector<32xf32> to vector<1x1x32xf32>
    %202 = arith.mulf %199, %199 : vector<2x16x32xf32>
    %cst_89 = arith.constant dense<0.000000e+00> : vector<32xf32>
    %203 = vector.multi_reduction <add>, %202, %cst_89 [0, 1] : vector<2x16x32xf32> to vector<32xf32>
    %204 = vector.shape_cast %203 : vector<32xf32> to vector<1x1x32xf32>
    %cst_90 = arith.constant 3.125000e-02 : f32
    %205 = vector.broadcast %cst_90 : f32 to vector<1x1x32xf32>
    %206 = arith.mulf %201, %205 : vector<1x1x32xf32>
    %cst_91 = arith.constant 3.125000e-02 : f32
    %207 = vector.broadcast %cst_91 : f32 to vector<1x1x32xf32>
    %208 = arith.mulf %204, %207 : vector<1x1x32xf32>
    %209 = arith.mulf %206, %206 : vector<1x1x32xf32>
    %210 = arith.subf %208, %209 : vector<1x1x32xf32>
    %cst_92 = arith.constant 9.99999974E-6 : f32
    %211 = vector.broadcast %cst_92 : f32 to vector<1x1x32xf32>
    %212 = arith.addf %210, %211 : vector<1x1x32xf32>
    %213 = math.rsqrt %212 : vector<1x1x32xf32>
    %214 = vector.shape_cast %181 : vector<1x32xf32> to vector<1x1x32xf32>
    %215 = arith.mulf %214, %213 : vector<1x1x32xf32>
    %216 = arith.mulf %206, %215 : vector<1x1x32xf32>
    %217 = vector.shape_cast %183 : vector<1x32xf32> to vector<1x1x32xf32>
    %218 = arith.subf %217, %216 : vector<1x1x32xf32>
    %219 = vector.broadcast %215 : vector<1x1x32xf32> to vector<2x16x32xf32>
    %220 = arith.mulf %199, %219 : vector<2x16x32xf32>
    %221 = vector.broadcast %218 : vector<1x1x32xf32> to vector<2x16x32xf32>
    %222 = arith.addf %220, %221 : vector<2x16x32xf32>
    %cst_93 = arith.constant 0.000000e+00 : f32
    %223 = vector.broadcast %cst_93 : f32 to vector<2x16x32xf32>
    %224 = arith.maximumf %222, %223 : vector<2x16x32xf32>
    %c0_94 = arith.constant 0 : index
    %c0_95 = arith.constant 0 : index
    %225 = vector.load %arg6[%c0_94, %c0_95] : memref<192x32xbf16, #tpu.memory_space<vmem>>, vector<192x32xbf16>
    %c5 = arith.constant 5 : index
    %c0_96 = arith.constant 0 : index
    %c0_97 = arith.constant 0 : index
    %226 = vector.load %arg9[%c5, %c0_96, %c0_97] : memref<8x1x32xf32, #tpu.memory_space<vmem>>, vector<1x1x32xf32>
    %227 = vector.shape_cast %226 : vector<1x1x32xf32> to vector<1x32xf32>
    %c5_98 = arith.constant 5 : index
    %c0_99 = arith.constant 0 : index
    %c0_100 = arith.constant 0 : index
    %228 = vector.load %arg10[%c5_98, %c0_99, %c0_100] : memref<8x1x32xf32, #tpu.memory_space<vmem>>, vector<1x1x32xf32>
    %229 = vector.shape_cast %228 : vector<1x1x32xf32> to vector<1x32xf32>
    %c5_101 = arith.constant 5 : index
    %c0_102 = arith.constant 0 : index
    %c0_103 = arith.constant 0 : index
    %230 = vector.load %arg11[%c5_101, %c0_102, %c0_103] : memref<8x1x32xf32, #tpu.memory_space<vmem>>, vector<1x1x32xf32>
    %231 = vector.shape_cast %230 : vector<1x1x32xf32> to vector<1x32xf32>
    %cst_104 = arith.constant 0.000000e+00 : f32
    %232 = vector.broadcast %cst_104 : f32 to vector<2x3x32xf32>
    %cst_105 = arith.constant 0.000000e+00 : f32
    %233 = vector.broadcast %cst_105 : f32 to vector<2x2x32xf32>
    %234 = tpu.concatenate %232, %224, %233 in 1 : vector<2x3x32xf32>, vector<2x16x32xf32>, vector<2x2x32xf32> -> vector<2x21x32xf32>
    %235 = vector.extract_strided_slice %234 {offsets = [0, 0, 0], sizes = [2, 16, 32], strides = [1, 1, 1]} : vector<2x21x32xf32> to vector<2x16x32xf32>
    %236 = vector.extract_strided_slice %234 {offsets = [0, 1, 0], sizes = [2, 16, 32], strides = [1, 1, 1]} : vector<2x21x32xf32> to vector<2x16x32xf32>
    %237 = vector.extract_strided_slice %234 {offsets = [0, 2, 0], sizes = [2, 16, 32], strides = [1, 1, 1]} : vector<2x21x32xf32> to vector<2x16x32xf32>
    %238 = vector.extract_strided_slice %234 {offsets = [0, 3, 0], sizes = [2, 16, 32], strides = [1, 1, 1]} : vector<2x21x32xf32> to vector<2x16x32xf32>
    %239 = vector.extract_strided_slice %234 {offsets = [0, 4, 0], sizes = [2, 16, 32], strides = [1, 1, 1]} : vector<2x21x32xf32> to vector<2x16x32xf32>
    %240 = vector.extract_strided_slice %234 {offsets = [0, 5, 0], sizes = [2, 16, 32], strides = [1, 1, 1]} : vector<2x21x32xf32> to vector<2x16x32xf32>
    %241 = tpu.concatenate %235, %236, %237, %238, %239, %240 in 2 : vector<2x16x32xf32>, vector<2x16x32xf32>, vector<2x16x32xf32>, vector<2x16x32xf32>, vector<2x16x32xf32>, vector<2x16x32xf32> -> vector<2x16x192xf32>
    %242 = vector.shape_cast %241 : vector<2x16x192xf32> to vector<32x192xf32>
    %243 = arith.truncf %242 : vector<32x192xf32> to vector<32x192xbf16>
    %cst_106 = arith.constant dense<0.000000e+00> : vector<32x32xf32>
    %244 = tpu.matmul %243, %225, %cst_106 {dimension_numbers = #tpu.dot_dimension_numbers<[1], [0], [0], [1], [0, 0, 1, 1], [], []>} : vector<32x192xbf16>, vector<192x32xbf16>, vector<32x32xf32> -> vector<32x32xf32>
    %245 = vector.shape_cast %244 : vector<32x32xf32> to vector<2x16x32xf32>
    %246 = vector.shape_cast %227 : vector<1x32xf32> to vector<1x1x32xf32>
    %247 = vector.broadcast %246 : vector<1x1x32xf32> to vector<2x16x32xf32>
    %248 = arith.addf %245, %247 : vector<2x16x32xf32>
    %cst_107 = arith.constant dense<0.000000e+00> : vector<32xf32>
    %249 = vector.multi_reduction <add>, %248, %cst_107 [0, 1] : vector<2x16x32xf32> to vector<32xf32>
    %250 = vector.shape_cast %249 : vector<32xf32> to vector<1x1x32xf32>
    %251 = arith.mulf %248, %248 : vector<2x16x32xf32>
    %cst_108 = arith.constant dense<0.000000e+00> : vector<32xf32>
    %252 = vector.multi_reduction <add>, %251, %cst_108 [0, 1] : vector<2x16x32xf32> to vector<32xf32>
    %253 = vector.shape_cast %252 : vector<32xf32> to vector<1x1x32xf32>
    %cst_109 = arith.constant 3.125000e-02 : f32
    %254 = vector.broadcast %cst_109 : f32 to vector<1x1x32xf32>
    %255 = arith.mulf %250, %254 : vector<1x1x32xf32>
    %cst_110 = arith.constant 3.125000e-02 : f32
    %256 = vector.broadcast %cst_110 : f32 to vector<1x1x32xf32>
    %257 = arith.mulf %253, %256 : vector<1x1x32xf32>
    %258 = arith.mulf %255, %255 : vector<1x1x32xf32>
    %259 = arith.subf %257, %258 : vector<1x1x32xf32>
    %cst_111 = arith.constant 9.99999974E-6 : f32
    %260 = vector.broadcast %cst_111 : f32 to vector<1x1x32xf32>
    %261 = arith.addf %259, %260 : vector<1x1x32xf32>
    %262 = math.rsqrt %261 : vector<1x1x32xf32>
    %263 = vector.shape_cast %229 : vector<1x32xf32> to vector<1x1x32xf32>
    %264 = arith.mulf %263, %262 : vector<1x1x32xf32>
    %265 = arith.mulf %255, %264 : vector<1x1x32xf32>
    %266 = vector.shape_cast %231 : vector<1x32xf32> to vector<1x1x32xf32>
    %267 = arith.subf %266, %265 : vector<1x1x32xf32>
    %268 = vector.broadcast %264 : vector<1x1x32xf32> to vector<2x16x32xf32>
    %269 = arith.mulf %248, %268 : vector<2x16x32xf32>
    %270 = vector.broadcast %267 : vector<1x1x32xf32> to vector<2x16x32xf32>
    %271 = arith.addf %269, %270 : vector<2x16x32xf32>
    %cst_112 = arith.constant 0.000000e+00 : f32
    %272 = vector.broadcast %cst_112 : f32 to vector<2x16x32xf32>
    %273 = arith.maximumf %271, %272 : vector<2x16x32xf32>
    %c0_113 = arith.constant 0 : index
    %c0_114 = arith.constant 0 : index
    %274 = vector.load %arg7[%c0_113, %c0_114] : memref<224x32xbf16, #tpu.memory_space<vmem>>, vector<224x32xbf16>
    %c6 = arith.constant 6 : index
    %c0_115 = arith.constant 0 : index
    %c0_116 = arith.constant 0 : index
    %275 = vector.load %arg9[%c6, %c0_115, %c0_116] : memref<8x1x32xf32, #tpu.memory_space<vmem>>, vector<1x1x32xf32>
    %276 = vector.shape_cast %275 : vector<1x1x32xf32> to vector<1x32xf32>
    %c6_117 = arith.constant 6 : index
    %c0_118 = arith.constant 0 : index
    %c0_119 = arith.constant 0 : index
    %277 = vector.load %arg10[%c6_117, %c0_118, %c0_119] : memref<8x1x32xf32, #tpu.memory_space<vmem>>, vector<1x1x32xf32>
    %278 = vector.shape_cast %277 : vector<1x1x32xf32> to vector<1x32xf32>
    %c6_120 = arith.constant 6 : index
    %c0_121 = arith.constant 0 : index
    %c0_122 = arith.constant 0 : index
    %279 = vector.load %arg11[%c6_120, %c0_121, %c0_122] : memref<8x1x32xf32, #tpu.memory_space<vmem>>, vector<1x1x32xf32>
    %280 = vector.shape_cast %279 : vector<1x1x32xf32> to vector<1x32xf32>
    %cst_123 = arith.constant 0.000000e+00 : f32
    %281 = vector.broadcast %cst_123 : f32 to vector<2x3x32xf32>
    %cst_124 = arith.constant 0.000000e+00 : f32
    %282 = vector.broadcast %cst_124 : f32 to vector<2x3x32xf32>
    %283 = tpu.concatenate %281, %273, %282 in 1 : vector<2x3x32xf32>, vector<2x16x32xf32>, vector<2x3x32xf32> -> vector<2x22x32xf32>
    %284 = vector.extract_strided_slice %283 {offsets = [0, 0, 0], sizes = [2, 16, 32], strides = [1, 1, 1]} : vector<2x22x32xf32> to vector<2x16x32xf32>
    %285 = vector.extract_strided_slice %283 {offsets = [0, 1, 0], sizes = [2, 16, 32], strides = [1, 1, 1]} : vector<2x22x32xf32> to vector<2x16x32xf32>
    %286 = vector.extract_strided_slice %283 {offsets = [0, 2, 0], sizes = [2, 16, 32], strides = [1, 1, 1]} : vector<2x22x32xf32> to vector<2x16x32xf32>
    %287 = vector.extract_strided_slice %283 {offsets = [0, 3, 0], sizes = [2, 16, 32], strides = [1, 1, 1]} : vector<2x22x32xf32> to vector<2x16x32xf32>
    %288 = vector.extract_strided_slice %283 {offsets = [0, 4, 0], sizes = [2, 16, 32], strides = [1, 1, 1]} : vector<2x22x32xf32> to vector<2x16x32xf32>
    %289 = vector.extract_strided_slice %283 {offsets = [0, 5, 0], sizes = [2, 16, 32], strides = [1, 1, 1]} : vector<2x22x32xf32> to vector<2x16x32xf32>
    %290 = vector.extract_strided_slice %283 {offsets = [0, 6, 0], sizes = [2, 16, 32], strides = [1, 1, 1]} : vector<2x22x32xf32> to vector<2x16x32xf32>
    %291 = tpu.concatenate %284, %285, %286, %287, %288, %289, %290 in 2 : vector<2x16x32xf32>, vector<2x16x32xf32>, vector<2x16x32xf32>, vector<2x16x32xf32>, vector<2x16x32xf32>, vector<2x16x32xf32>, vector<2x16x32xf32> -> vector<2x16x224xf32>
    %292 = vector.shape_cast %291 : vector<2x16x224xf32> to vector<32x224xf32>
    %293 = arith.truncf %292 : vector<32x224xf32> to vector<32x224xbf16>
    %cst_125 = arith.constant dense<0.000000e+00> : vector<32x32xf32>
    %294 = tpu.matmul %293, %274, %cst_125 {dimension_numbers = #tpu.dot_dimension_numbers<[1], [0], [0], [1], [0, 0, 1, 1], [], []>} : vector<32x224xbf16>, vector<224x32xbf16>, vector<32x32xf32> -> vector<32x32xf32>
    %295 = vector.shape_cast %294 : vector<32x32xf32> to vector<2x16x32xf32>
    %296 = vector.shape_cast %276 : vector<1x32xf32> to vector<1x1x32xf32>
    %297 = vector.broadcast %296 : vector<1x1x32xf32> to vector<2x16x32xf32>
    %298 = arith.addf %295, %297 : vector<2x16x32xf32>
    %cst_126 = arith.constant dense<0.000000e+00> : vector<32xf32>
    %299 = vector.multi_reduction <add>, %298, %cst_126 [0, 1] : vector<2x16x32xf32> to vector<32xf32>
    %300 = vector.shape_cast %299 : vector<32xf32> to vector<1x1x32xf32>
    %301 = arith.mulf %298, %298 : vector<2x16x32xf32>
    %cst_127 = arith.constant dense<0.000000e+00> : vector<32xf32>
    %302 = vector.multi_reduction <add>, %301, %cst_127 [0, 1] : vector<2x16x32xf32> to vector<32xf32>
    %303 = vector.shape_cast %302 : vector<32xf32> to vector<1x1x32xf32>
    %cst_128 = arith.constant 3.125000e-02 : f32
    %304 = vector.broadcast %cst_128 : f32 to vector<1x1x32xf32>
    %305 = arith.mulf %300, %304 : vector<1x1x32xf32>
    %cst_129 = arith.constant 3.125000e-02 : f32
    %306 = vector.broadcast %cst_129 : f32 to vector<1x1x32xf32>
    %307 = arith.mulf %303, %306 : vector<1x1x32xf32>
    %308 = arith.mulf %305, %305 : vector<1x1x32xf32>
    %309 = arith.subf %307, %308 : vector<1x1x32xf32>
    %cst_130 = arith.constant 9.99999974E-6 : f32
    %310 = vector.broadcast %cst_130 : f32 to vector<1x1x32xf32>
    %311 = arith.addf %309, %310 : vector<1x1x32xf32>
    %312 = math.rsqrt %311 : vector<1x1x32xf32>
    %313 = vector.shape_cast %278 : vector<1x32xf32> to vector<1x1x32xf32>
    %314 = arith.mulf %313, %312 : vector<1x1x32xf32>
    %315 = arith.mulf %305, %314 : vector<1x1x32xf32>
    %316 = vector.shape_cast %280 : vector<1x32xf32> to vector<1x1x32xf32>
    %317 = arith.subf %316, %315 : vector<1x1x32xf32>
    %318 = vector.broadcast %314 : vector<1x1x32xf32> to vector<2x16x32xf32>
    %319 = arith.mulf %298, %318 : vector<2x16x32xf32>
    %320 = vector.broadcast %317 : vector<1x1x32xf32> to vector<2x16x32xf32>
    %321 = arith.addf %319, %320 : vector<2x16x32xf32>
    %cst_131 = arith.constant 0.000000e+00 : f32
    %322 = vector.broadcast %cst_131 : f32 to vector<2x16x32xf32>
    %323 = arith.maximumf %321, %322 : vector<2x16x32xf32>
    %c0_132 = arith.constant 0 : index
    %c0_133 = arith.constant 0 : index
    %324 = vector.load %arg8[%c0_132, %c0_133] : memref<256x32xbf16, #tpu.memory_space<vmem>>, vector<256x32xbf16>
    %c7 = arith.constant 7 : index
    %c0_134 = arith.constant 0 : index
    %c0_135 = arith.constant 0 : index
    %325 = vector.load %arg9[%c7, %c0_134, %c0_135] : memref<8x1x32xf32, #tpu.memory_space<vmem>>, vector<1x1x32xf32>
    %326 = vector.shape_cast %325 : vector<1x1x32xf32> to vector<1x32xf32>
    %c7_136 = arith.constant 7 : index
    %c0_137 = arith.constant 0 : index
    %c0_138 = arith.constant 0 : index
    %327 = vector.load %arg10[%c7_136, %c0_137, %c0_138] : memref<8x1x32xf32, #tpu.memory_space<vmem>>, vector<1x1x32xf32>
    %328 = vector.shape_cast %327 : vector<1x1x32xf32> to vector<1x32xf32>
    %c7_139 = arith.constant 7 : index
    %c0_140 = arith.constant 0 : index
    %c0_141 = arith.constant 0 : index
    %329 = vector.load %arg11[%c7_139, %c0_140, %c0_141] : memref<8x1x32xf32, #tpu.memory_space<vmem>>, vector<1x1x32xf32>
    %330 = vector.shape_cast %329 : vector<1x1x32xf32> to vector<1x32xf32>
    %cst_142 = arith.constant 0.000000e+00 : f32
    %331 = vector.broadcast %cst_142 : f32 to vector<2x4x32xf32>
    %cst_143 = arith.constant 0.000000e+00 : f32
    %332 = vector.broadcast %cst_143 : f32 to vector<2x3x32xf32>
    %333 = tpu.concatenate %331, %323, %332 in 1 : vector<2x4x32xf32>, vector<2x16x32xf32>, vector<2x3x32xf32> -> vector<2x23x32xf32>
    %334 = vector.extract_strided_slice %333 {offsets = [0, 0, 0], sizes = [2, 16, 32], strides = [1, 1, 1]} : vector<2x23x32xf32> to vector<2x16x32xf32>
    %335 = vector.extract_strided_slice %333 {offsets = [0, 1, 0], sizes = [2, 16, 32], strides = [1, 1, 1]} : vector<2x23x32xf32> to vector<2x16x32xf32>
    %336 = vector.extract_strided_slice %333 {offsets = [0, 2, 0], sizes = [2, 16, 32], strides = [1, 1, 1]} : vector<2x23x32xf32> to vector<2x16x32xf32>
    %337 = vector.extract_strided_slice %333 {offsets = [0, 3, 0], sizes = [2, 16, 32], strides = [1, 1, 1]} : vector<2x23x32xf32> to vector<2x16x32xf32>
    %338 = vector.extract_strided_slice %333 {offsets = [0, 4, 0], sizes = [2, 16, 32], strides = [1, 1, 1]} : vector<2x23x32xf32> to vector<2x16x32xf32>
    %339 = vector.extract_strided_slice %333 {offsets = [0, 5, 0], sizes = [2, 16, 32], strides = [1, 1, 1]} : vector<2x23x32xf32> to vector<2x16x32xf32>
    %340 = vector.extract_strided_slice %333 {offsets = [0, 6, 0], sizes = [2, 16, 32], strides = [1, 1, 1]} : vector<2x23x32xf32> to vector<2x16x32xf32>
    %341 = vector.extract_strided_slice %333 {offsets = [0, 7, 0], sizes = [2, 16, 32], strides = [1, 1, 1]} : vector<2x23x32xf32> to vector<2x16x32xf32>
    %342 = tpu.concatenate %334, %335, %336, %337, %338, %339, %340, %341 in 2 : vector<2x16x32xf32>, vector<2x16x32xf32>, vector<2x16x32xf32>, vector<2x16x32xf32>, vector<2x16x32xf32>, vector<2x16x32xf32>, vector<2x16x32xf32>, vector<2x16x32xf32> -> vector<2x16x256xf32>
    %343 = vector.shape_cast %342 : vector<2x16x256xf32> to vector<32x256xf32>
    %344 = arith.truncf %343 : vector<32x256xf32> to vector<32x256xbf16>
    %cst_144 = arith.constant dense<0.000000e+00> : vector<32x32xf32>
    %345 = tpu.matmul %344, %324, %cst_144 {dimension_numbers = #tpu.dot_dimension_numbers<[1], [0], [0], [1], [0, 0, 1, 1], [], []>} : vector<32x256xbf16>, vector<256x32xbf16>, vector<32x32xf32> -> vector<32x32xf32>
    %346 = vector.shape_cast %345 : vector<32x32xf32> to vector<2x16x32xf32>
    %347 = vector.shape_cast %326 : vector<1x32xf32> to vector<1x1x32xf32>
    %348 = vector.broadcast %347 : vector<1x1x32xf32> to vector<2x16x32xf32>
    %349 = arith.addf %346, %348 : vector<2x16x32xf32>
    %cst_145 = arith.constant dense<0.000000e+00> : vector<32xf32>
    %350 = vector.multi_reduction <add>, %349, %cst_145 [0, 1] : vector<2x16x32xf32> to vector<32xf32>
    %351 = vector.shape_cast %350 : vector<32xf32> to vector<1x1x32xf32>
    %352 = arith.mulf %349, %349 : vector<2x16x32xf32>
    %cst_146 = arith.constant dense<0.000000e+00> : vector<32xf32>
    %353 = vector.multi_reduction <add>, %352, %cst_146 [0, 1] : vector<2x16x32xf32> to vector<32xf32>
    %354 = vector.shape_cast %353 : vector<32xf32> to vector<1x1x32xf32>
    %cst_147 = arith.constant 3.125000e-02 : f32
    %355 = vector.broadcast %cst_147 : f32 to vector<1x1x32xf32>
    %356 = arith.mulf %351, %355 : vector<1x1x32xf32>
    %cst_148 = arith.constant 3.125000e-02 : f32
    %357 = vector.broadcast %cst_148 : f32 to vector<1x1x32xf32>
    %358 = arith.mulf %354, %357 : vector<1x1x32xf32>
    %359 = arith.mulf %356, %356 : vector<1x1x32xf32>
    %360 = arith.subf %358, %359 : vector<1x1x32xf32>
    %cst_149 = arith.constant 9.99999974E-6 : f32
    %361 = vector.broadcast %cst_149 : f32 to vector<1x1x32xf32>
    %362 = arith.addf %360, %361 : vector<1x1x32xf32>
    %363 = math.rsqrt %362 : vector<1x1x32xf32>
    %364 = vector.shape_cast %328 : vector<1x32xf32> to vector<1x1x32xf32>
    %365 = arith.mulf %364, %363 : vector<1x1x32xf32>
    %366 = arith.mulf %356, %365 : vector<1x1x32xf32>
    %367 = vector.shape_cast %330 : vector<1x32xf32> to vector<1x1x32xf32>
    %368 = arith.subf %367, %366 : vector<1x1x32xf32>
    %369 = vector.broadcast %365 : vector<1x1x32xf32> to vector<2x16x32xf32>
    %370 = arith.mulf %349, %369 : vector<2x16x32xf32>
    %371 = vector.broadcast %368 : vector<1x1x32xf32> to vector<2x16x32xf32>
    %372 = arith.addf %370, %371 : vector<2x16x32xf32>
    %cst_150 = arith.constant 0.000000e+00 : f32
    %373 = vector.broadcast %cst_150 : f32 to vector<2x16x32xf32>
    %374 = arith.maximumf %372, %373 : vector<2x16x32xf32>
    %375 = tpu.concatenate %39, %83, %129, %176, %224, %273, %323, %374 in 2 : vector<2x16x32xf32>, vector<2x16x32xf32>, vector<2x16x32xf32>, vector<2x16x32xf32>, vector<2x16x32xf32>, vector<2x16x32xf32>, vector<2x16x32xf32>, vector<2x16x32xf32> -> vector<2x16x256xf32>
    %376 = vector.extract_strided_slice %375 {offsets = [0, 0, 0], sizes = [2, 1, 256], strides = [1, 1, 1]} : vector<2x16x256xf32> to vector<2x1x256xf32>
    %377 = vector.extract_strided_slice %375 {offsets = [0, 0, 0], sizes = [2, 15, 256], strides = [1, 1, 1]} : vector<2x16x256xf32> to vector<2x15x256xf32>
    %378 = tpu.concatenate %376, %377 in 1 : vector<2x1x256xf32>, vector<2x15x256xf32> -> vector<2x16x256xf32>
    %379 = arith.maximumf %375, %378 : vector<2x16x256xf32>
    %c0_151 = arith.constant 0 : index
    %c0_152 = arith.constant 0 : index
    %380 = vector.load %arg12[%c0_151, %c0_152] : memref<768x32xbf16, #tpu.memory_space<vmem>>, vector<768x32xbf16>
    %c0_153 = arith.constant 0 : index
    %c0_154 = arith.constant 0 : index
    %c0_155 = arith.constant 0 : index
    %381 = vector.load %arg13[%c0_153, %c0_154, %c0_155] : memref<1x1x32xf32, #tpu.memory_space<vmem>>, vector<1x1x32xf32>
    %c0_156 = arith.constant 0 : index
    %c0_157 = arith.constant 0 : index
    %c0_158 = arith.constant 0 : index
    %382 = vector.load %arg14[%c0_156, %c0_157, %c0_158] : memref<1x1x32xf32, #tpu.memory_space<vmem>>, vector<1x1x32xf32>
    %c0_159 = arith.constant 0 : index
    %c0_160 = arith.constant 0 : index
    %c0_161 = arith.constant 0 : index
    %383 = vector.load %arg15[%c0_159, %c0_160, %c0_161] : memref<1x1x32xf32, #tpu.memory_space<vmem>>, vector<1x1x32xf32>
    %cst_162 = arith.constant 0.000000e+00 : f32
    %384 = vector.broadcast %cst_162 : f32 to vector<2x1x256xf32>
    %cst_163 = arith.constant 0.000000e+00 : f32
    %385 = vector.broadcast %cst_163 : f32 to vector<2x1x256xf32>
    %386 = tpu.concatenate %384, %379, %385 in 1 : vector<2x1x256xf32>, vector<2x16x256xf32>, vector<2x1x256xf32> -> vector<2x18x256xf32>
    %387 = vector.extract_strided_slice %386 {offsets = [0, 0, 0], sizes = [2, 16, 256], strides = [1, 1, 1]} : vector<2x18x256xf32> to vector<2x16x256xf32>
    %388 = vector.extract_strided_slice %386 {offsets = [0, 1, 0], sizes = [2, 16, 256], strides = [1, 1, 1]} : vector<2x18x256xf32> to vector<2x16x256xf32>
    %389 = vector.extract_strided_slice %386 {offsets = [0, 2, 0], sizes = [2, 16, 256], strides = [1, 1, 1]} : vector<2x18x256xf32> to vector<2x16x256xf32>
    %390 = tpu.concatenate %387, %388, %389 in 2 : vector<2x16x256xf32>, vector<2x16x256xf32>, vector<2x16x256xf32> -> vector<2x16x768xf32>
    %391 = vector.shape_cast %390 : vector<2x16x768xf32> to vector<32x768xf32>
    %392 = arith.truncf %391 : vector<32x768xf32> to vector<32x768xbf16>
    %cst_164 = arith.constant dense<0.000000e+00> : vector<32x32xf32>
    %393 = tpu.matmul %392, %380, %cst_164 {dimension_numbers = #tpu.dot_dimension_numbers<[1], [0], [0], [1], [0, 0, 1, 1], [], []>} : vector<32x768xbf16>, vector<768x32xbf16>, vector<32x32xf32> -> vector<32x32xf32>
    %394 = vector.shape_cast %393 : vector<32x32xf32> to vector<2x16x32xf32>
    %395 = vector.broadcast %381 : vector<1x1x32xf32> to vector<2x16x32xf32>
    %396 = arith.addf %394, %395 : vector<2x16x32xf32>
    %cst_165 = arith.constant dense<0.000000e+00> : vector<32xf32>
    %397 = vector.multi_reduction <add>, %396, %cst_165 [0, 1] : vector<2x16x32xf32> to vector<32xf32>
    %398 = vector.shape_cast %397 : vector<32xf32> to vector<1x1x32xf32>
    %399 = arith.mulf %396, %396 : vector<2x16x32xf32>
    %cst_166 = arith.constant dense<0.000000e+00> : vector<32xf32>
    %400 = vector.multi_reduction <add>, %399, %cst_166 [0, 1] : vector<2x16x32xf32> to vector<32xf32>
    %401 = vector.shape_cast %400 : vector<32xf32> to vector<1x1x32xf32>
    %cst_167 = arith.constant 3.125000e-02 : f32
    %402 = vector.broadcast %cst_167 : f32 to vector<1x1x32xf32>
    %403 = arith.mulf %398, %402 : vector<1x1x32xf32>
    %cst_168 = arith.constant 3.125000e-02 : f32
    %404 = vector.broadcast %cst_168 : f32 to vector<1x1x32xf32>
    %405 = arith.mulf %401, %404 : vector<1x1x32xf32>
    %406 = arith.mulf %403, %403 : vector<1x1x32xf32>
    %407 = arith.subf %405, %406 : vector<1x1x32xf32>
    %cst_169 = arith.constant 9.99999974E-6 : f32
    %408 = vector.broadcast %cst_169 : f32 to vector<1x1x32xf32>
    %409 = arith.addf %407, %408 : vector<1x1x32xf32>
    %410 = math.rsqrt %409 : vector<1x1x32xf32>
    %411 = arith.mulf %382, %410 : vector<1x1x32xf32>
    %412 = arith.mulf %403, %411 : vector<1x1x32xf32>
    %413 = arith.subf %383, %412 : vector<1x1x32xf32>
    %414 = vector.broadcast %411 : vector<1x1x32xf32> to vector<2x16x32xf32>
    %415 = arith.mulf %396, %414 : vector<2x16x32xf32>
    %416 = vector.broadcast %413 : vector<1x1x32xf32> to vector<2x16x32xf32>
    %417 = arith.addf %415, %416 : vector<2x16x32xf32>
    %cst_170 = arith.constant 0.000000e+00 : f32
    %418 = vector.broadcast %cst_170 : f32 to vector<2x16x32xf32>
    %419 = arith.maximumf %417, %418 : vector<2x16x32xf32>
    %c0_171 = arith.constant 0 : index
    %c0_172 = arith.constant 0 : index
    %420 = vector.load %arg16[%c0_171, %c0_172] : memref<96x32xbf16, #tpu.memory_space<vmem>>, vector<96x32xbf16>
    %c0_173 = arith.constant 0 : index
    %c0_174 = arith.constant 0 : index
    %c0_175 = arith.constant 0 : index
    %421 = vector.load %arg17[%c0_173, %c0_174, %c0_175] : memref<1x1x32xf32, #tpu.memory_space<vmem>>, vector<1x1x32xf32>
    %c0_176 = arith.constant 0 : index
    %c0_177 = arith.constant 0 : index
    %c0_178 = arith.constant 0 : index
    %422 = vector.load %arg18[%c0_176, %c0_177, %c0_178] : memref<1x1x32xf32, #tpu.memory_space<vmem>>, vector<1x1x32xf32>
    %c0_179 = arith.constant 0 : index
    %c0_180 = arith.constant 0 : index
    %c0_181 = arith.constant 0 : index
    %423 = vector.load %arg19[%c0_179, %c0_180, %c0_181] : memref<1x1x32xf32, #tpu.memory_space<vmem>>, vector<1x1x32xf32>
    %cst_182 = arith.constant 0.000000e+00 : f32
    %424 = vector.broadcast %cst_182 : f32 to vector<2x1x32xf32>
    %cst_183 = arith.constant 0.000000e+00 : f32
    %425 = vector.broadcast %cst_183 : f32 to vector<2x1x32xf32>
    %426 = tpu.concatenate %424, %419, %425 in 1 : vector<2x1x32xf32>, vector<2x16x32xf32>, vector<2x1x32xf32> -> vector<2x18x32xf32>
    %427 = vector.extract_strided_slice %426 {offsets = [0, 0, 0], sizes = [2, 16, 32], strides = [1, 1, 1]} : vector<2x18x32xf32> to vector<2x16x32xf32>
    %428 = vector.extract_strided_slice %426 {offsets = [0, 1, 0], sizes = [2, 16, 32], strides = [1, 1, 1]} : vector<2x18x32xf32> to vector<2x16x32xf32>
    %429 = vector.extract_strided_slice %426 {offsets = [0, 2, 0], sizes = [2, 16, 32], strides = [1, 1, 1]} : vector<2x18x32xf32> to vector<2x16x32xf32>
    %430 = tpu.concatenate %427, %428, %429 in 2 : vector<2x16x32xf32>, vector<2x16x32xf32>, vector<2x16x32xf32> -> vector<2x16x96xf32>
    %431 = vector.shape_cast %430 : vector<2x16x96xf32> to vector<32x96xf32>
    %432 = arith.truncf %431 : vector<32x96xf32> to vector<32x96xbf16>
    %cst_184 = arith.constant dense<0.000000e+00> : vector<32x32xf32>
    %433 = tpu.matmul %432, %420, %cst_184 {dimension_numbers = #tpu.dot_dimension_numbers<[1], [0], [0], [1], [0, 0, 1, 1], [], []>} : vector<32x96xbf16>, vector<96x32xbf16>, vector<32x32xf32> -> vector<32x32xf32>
    %434 = vector.shape_cast %433 : vector<32x32xf32> to vector<2x16x32xf32>
    %435 = vector.broadcast %421 : vector<1x1x32xf32> to vector<2x16x32xf32>
    %436 = arith.addf %434, %435 : vector<2x16x32xf32>
    %cst_185 = arith.constant dense<0.000000e+00> : vector<32xf32>
    %437 = vector.multi_reduction <add>, %436, %cst_185 [0, 1] : vector<2x16x32xf32> to vector<32xf32>
    %438 = vector.shape_cast %437 : vector<32xf32> to vector<1x1x32xf32>
    %439 = arith.mulf %436, %436 : vector<2x16x32xf32>
    %cst_186 = arith.constant dense<0.000000e+00> : vector<32xf32>
    %440 = vector.multi_reduction <add>, %439, %cst_186 [0, 1] : vector<2x16x32xf32> to vector<32xf32>
    %441 = vector.shape_cast %440 : vector<32xf32> to vector<1x1x32xf32>
    %cst_187 = arith.constant 3.125000e-02 : f32
    %442 = vector.broadcast %cst_187 : f32 to vector<1x1x32xf32>
    %443 = arith.mulf %438, %442 : vector<1x1x32xf32>
    %cst_188 = arith.constant 3.125000e-02 : f32
    %444 = vector.broadcast %cst_188 : f32 to vector<1x1x32xf32>
    %445 = arith.mulf %441, %444 : vector<1x1x32xf32>
    %446 = arith.mulf %443, %443 : vector<1x1x32xf32>
    %447 = arith.subf %445, %446 : vector<1x1x32xf32>
    %cst_189 = arith.constant 9.99999974E-6 : f32
    %448 = vector.broadcast %cst_189 : f32 to vector<1x1x32xf32>
    %449 = arith.addf %447, %448 : vector<1x1x32xf32>
    %450 = math.rsqrt %449 : vector<1x1x32xf32>
    %451 = arith.mulf %422, %450 : vector<1x1x32xf32>
    %452 = arith.mulf %443, %451 : vector<1x1x32xf32>
    %453 = arith.subf %423, %452 : vector<1x1x32xf32>
    %454 = vector.broadcast %451 : vector<1x1x32xf32> to vector<2x16x32xf32>
    %455 = arith.mulf %436, %454 : vector<2x16x32xf32>
    %456 = vector.broadcast %453 : vector<1x1x32xf32> to vector<2x16x32xf32>
    %457 = arith.addf %455, %456 : vector<2x16x32xf32>
    %458 = arith.addf %457, %0 : vector<2x16x32xf32>
    %459 = vector.shape_cast %458 : vector<2x16x32xf32> to vector<32x32xf32>
    %460 = arith.truncf %459 : vector<32x32xf32> to vector<32x32xbf16>
    %c0_190 = arith.constant 0 : index
    %c0_191 = arith.constant 0 : index
    %c0_192 = arith.constant 0 : index
    %461 = vector.load %arg20[%c0_190, %c0_191, %c0_192] : memref<4x32x64xbf16, #tpu.memory_space<vmem>>, vector<1x32x64xbf16>
    %462 = vector.shape_cast %461 : vector<1x32x64xbf16> to vector<32x64xbf16>
    %cst_193 = arith.constant dense<0.000000e+00> : vector<32x64xf32>
    %463 = tpu.matmul %460, %462, %cst_193 {dimension_numbers = #tpu.dot_dimension_numbers<[1], [0], [0], [1], [0, 0, 1, 1], [], []>} : vector<32x32xbf16>, vector<32x64xbf16>, vector<32x64xf32> -> vector<32x64xf32>
    %c0_194 = arith.constant 0 : index
    %c0_195 = arith.constant 0 : index
    %c0_196 = arith.constant 0 : index
    %464 = vector.load %arg21[%c0_194, %c0_195, %c0_196] : memref<4x1x64xf32, #tpu.memory_space<vmem>>, vector<1x1x64xf32>
    %465 = vector.shape_cast %464 : vector<1x1x64xf32> to vector<1x64xf32>
    %466 = vector.broadcast %465 : vector<1x64xf32> to vector<32x64xf32>
    %467 = arith.addf %463, %466 : vector<32x64xf32>
    %468 = vector.extract_strided_slice %467 {offsets = [0, 0], sizes = [32, 32], strides = [1, 1]} : vector<32x64xf32> to vector<32x32xf32>
    %cst_197 = arith.constant 0.000000e+00 : f32
    %469 = vector.broadcast %cst_197 : f32 to vector<32x32xf32>
    %470 = arith.maximumf %468, %469 : vector<32x32xf32>
    %471 = vector.extract_strided_slice %467 {offsets = [0, 32], sizes = [32, 32], strides = [1, 1]} : vector<32x64xf32> to vector<32x32xf32>
    %472 = arith.negf %471 : vector<32x32xf32>
    %473 = math.exp %472 : vector<32x32xf32>
    %cst_198 = arith.constant 1.000000e+00 : f32
    %474 = vector.broadcast %cst_198 : f32 to vector<32x32xf32>
    %475 = arith.addf %474, %473 : vector<32x32xf32>
    %476 = arith.divf %474, %475 : vector<32x32xf32>
    %477 = arith.mulf %470, %476 : vector<32x32xf32>
    %cst_199 = arith.constant 1.000000e+00 : f32
    %478 = vector.broadcast %cst_199 : f32 to vector<32x32xf32>
    %479 = arith.subf %478, %476 : vector<32x32xf32>
    %480 = arith.mulf %459, %479 : vector<32x32xf32>
    %481 = arith.addf %477, %480 : vector<32x32xf32>
    %482 = arith.truncf %481 : vector<32x32xf32> to vector<32x32xbf16>
    %c1_200 = arith.constant 1 : index
    %c0_201 = arith.constant 0 : index
    %c0_202 = arith.constant 0 : index
    %483 = vector.load %arg20[%c1_200, %c0_201, %c0_202] : memref<4x32x64xbf16, #tpu.memory_space<vmem>>, vector<1x32x64xbf16>
    %484 = vector.shape_cast %483 : vector<1x32x64xbf16> to vector<32x64xbf16>
    %cst_203 = arith.constant dense<0.000000e+00> : vector<32x64xf32>
    %485 = tpu.matmul %482, %484, %cst_203 {dimension_numbers = #tpu.dot_dimension_numbers<[1], [0], [0], [1], [0, 0, 1, 1], [], []>} : vector<32x32xbf16>, vector<32x64xbf16>, vector<32x64xf32> -> vector<32x64xf32>
    %c1_204 = arith.constant 1 : index
    %c0_205 = arith.constant 0 : index
    %c0_206 = arith.constant 0 : index
    %486 = vector.load %arg21[%c1_204, %c0_205, %c0_206] : memref<4x1x64xf32, #tpu.memory_space<vmem>>, vector<1x1x64xf32>
    %487 = vector.shape_cast %486 : vector<1x1x64xf32> to vector<1x64xf32>
    %488 = vector.broadcast %487 : vector<1x64xf32> to vector<32x64xf32>
    %489 = arith.addf %485, %488 : vector<32x64xf32>
    %490 = vector.extract_strided_slice %489 {offsets = [0, 0], sizes = [32, 32], strides = [1, 1]} : vector<32x64xf32> to vector<32x32xf32>
    %cst_207 = arith.constant 0.000000e+00 : f32
    %491 = vector.broadcast %cst_207 : f32 to vector<32x32xf32>
    %492 = arith.maximumf %490, %491 : vector<32x32xf32>
    %493 = vector.extract_strided_slice %489 {offsets = [0, 32], sizes = [32, 32], strides = [1, 1]} : vector<32x64xf32> to vector<32x32xf32>
    %494 = arith.negf %493 : vector<32x32xf32>
    %495 = math.exp %494 : vector<32x32xf32>
    %cst_208 = arith.constant 1.000000e+00 : f32
    %496 = vector.broadcast %cst_208 : f32 to vector<32x32xf32>
    %497 = arith.addf %496, %495 : vector<32x32xf32>
    %498 = arith.divf %496, %497 : vector<32x32xf32>
    %499 = arith.mulf %492, %498 : vector<32x32xf32>
    %cst_209 = arith.constant 1.000000e+00 : f32
    %500 = vector.broadcast %cst_209 : f32 to vector<32x32xf32>
    %501 = arith.subf %500, %498 : vector<32x32xf32>
    %502 = arith.mulf %481, %501 : vector<32x32xf32>
    %503 = arith.addf %499, %502 : vector<32x32xf32>
    %504 = arith.truncf %503 : vector<32x32xf32> to vector<32x32xbf16>
    %c2_210 = arith.constant 2 : index
    %c0_211 = arith.constant 0 : index
    %c0_212 = arith.constant 0 : index
    %505 = vector.load %arg20[%c2_210, %c0_211, %c0_212] : memref<4x32x64xbf16, #tpu.memory_space<vmem>>, vector<1x32x64xbf16>
    %506 = vector.shape_cast %505 : vector<1x32x64xbf16> to vector<32x64xbf16>
    %cst_213 = arith.constant dense<0.000000e+00> : vector<32x64xf32>
    %507 = tpu.matmul %504, %506, %cst_213 {dimension_numbers = #tpu.dot_dimension_numbers<[1], [0], [0], [1], [0, 0, 1, 1], [], []>} : vector<32x32xbf16>, vector<32x64xbf16>, vector<32x64xf32> -> vector<32x64xf32>
    %c2_214 = arith.constant 2 : index
    %c0_215 = arith.constant 0 : index
    %c0_216 = arith.constant 0 : index
    %508 = vector.load %arg21[%c2_214, %c0_215, %c0_216] : memref<4x1x64xf32, #tpu.memory_space<vmem>>, vector<1x1x64xf32>
    %509 = vector.shape_cast %508 : vector<1x1x64xf32> to vector<1x64xf32>
    %510 = vector.broadcast %509 : vector<1x64xf32> to vector<32x64xf32>
    %511 = arith.addf %507, %510 : vector<32x64xf32>
    %512 = vector.extract_strided_slice %511 {offsets = [0, 0], sizes = [32, 32], strides = [1, 1]} : vector<32x64xf32> to vector<32x32xf32>
    %cst_217 = arith.constant 0.000000e+00 : f32
    %513 = vector.broadcast %cst_217 : f32 to vector<32x32xf32>
    %514 = arith.maximumf %512, %513 : vector<32x32xf32>
    %515 = vector.extract_strided_slice %511 {offsets = [0, 32], sizes = [32, 32], strides = [1, 1]} : vector<32x64xf32> to vector<32x32xf32>
    %516 = arith.negf %515 : vector<32x32xf32>
    %517 = math.exp %516 : vector<32x32xf32>
    %cst_218 = arith.constant 1.000000e+00 : f32
    %518 = vector.broadcast %cst_218 : f32 to vector<32x32xf32>
    %519 = arith.addf %518, %517 : vector<32x32xf32>
    %520 = arith.divf %518, %519 : vector<32x32xf32>
    %521 = arith.mulf %514, %520 : vector<32x32xf32>
    %cst_219 = arith.constant 1.000000e+00 : f32
    %522 = vector.broadcast %cst_219 : f32 to vector<32x32xf32>
    %523 = arith.subf %522, %520 : vector<32x32xf32>
    %524 = arith.mulf %503, %523 : vector<32x32xf32>
    %525 = arith.addf %521, %524 : vector<32x32xf32>
    %526 = arith.truncf %525 : vector<32x32xf32> to vector<32x32xbf16>
    %c3_220 = arith.constant 3 : index
    %c0_221 = arith.constant 0 : index
    %c0_222 = arith.constant 0 : index
    %527 = vector.load %arg20[%c3_220, %c0_221, %c0_222] : memref<4x32x64xbf16, #tpu.memory_space<vmem>>, vector<1x32x64xbf16>
    %528 = vector.shape_cast %527 : vector<1x32x64xbf16> to vector<32x64xbf16>
    %cst_223 = arith.constant dense<0.000000e+00> : vector<32x64xf32>
    %529 = tpu.matmul %526, %528, %cst_223 {dimension_numbers = #tpu.dot_dimension_numbers<[1], [0], [0], [1], [0, 0, 1, 1], [], []>} : vector<32x32xbf16>, vector<32x64xbf16>, vector<32x64xf32> -> vector<32x64xf32>
    %c3_224 = arith.constant 3 : index
    %c0_225 = arith.constant 0 : index
    %c0_226 = arith.constant 0 : index
    %530 = vector.load %arg21[%c3_224, %c0_225, %c0_226] : memref<4x1x64xf32, #tpu.memory_space<vmem>>, vector<1x1x64xf32>
    %531 = vector.shape_cast %530 : vector<1x1x64xf32> to vector<1x64xf32>
    %532 = vector.broadcast %531 : vector<1x64xf32> to vector<32x64xf32>
    %533 = arith.addf %529, %532 : vector<32x64xf32>
    %534 = vector.extract_strided_slice %533 {offsets = [0, 0], sizes = [32, 32], strides = [1, 1]} : vector<32x64xf32> to vector<32x32xf32>
    %cst_227 = arith.constant 0.000000e+00 : f32
    %535 = vector.broadcast %cst_227 : f32 to vector<32x32xf32>
    %536 = arith.maximumf %534, %535 : vector<32x32xf32>
    %537 = vector.extract_strided_slice %533 {offsets = [0, 32], sizes = [32, 32], strides = [1, 1]} : vector<32x64xf32> to vector<32x32xf32>
    %538 = arith.negf %537 : vector<32x32xf32>
    %539 = math.exp %538 : vector<32x32xf32>
    %cst_228 = arith.constant 1.000000e+00 : f32
    %540 = vector.broadcast %cst_228 : f32 to vector<32x32xf32>
    %541 = arith.addf %540, %539 : vector<32x32xf32>
    %542 = arith.divf %540, %541 : vector<32x32xf32>
    %543 = arith.mulf %536, %542 : vector<32x32xf32>
    %cst_229 = arith.constant 1.000000e+00 : f32
    %544 = vector.broadcast %cst_229 : f32 to vector<32x32xf32>
    %545 = arith.subf %544, %542 : vector<32x32xf32>
    %546 = arith.mulf %525, %545 : vector<32x32xf32>
    %547 = arith.addf %543, %546 : vector<32x32xf32>
    %548 = vector.shape_cast %547 : vector<32x32xf32> to vector<2x16x32xf32>
    %c0_230 = arith.constant 0 : index
    %c0_231 = arith.constant 0 : index
    %c0_232 = arith.constant 0 : index
    %549 = vector.load %arg22[%c0_230, %c0_231, %c0_232] : memref<2x16x32xf32, #tpu.memory_space<vmem>>, vector<2x16x32xf32>
    tpu.vector_store %arg22[%c0_230, %c0_231, %c0_232], %548 {strides = array<i32>} : memref<2x16x32xf32, #tpu.memory_space<vmem>>, vector<2x16x32xf32>,
    return
  }
}

module attributes {stable_mosaic.version = 11 : i64} {
  func.func @_bigru_layer_kernel(%arg0: memref<16x2x32xf32, #tpu.memory_space<vmem>>, %arg1: memref<32x48xbf16, #tpu.memory_space<vmem>>, %arg2: memref<16x48xbf16, #tpu.memory_space<vmem>>, %arg3: memref<1x48xf32, #tpu.memory_space<vmem>>, %arg4: memref<1x48xf32, #tpu.memory_space<vmem>>, %arg5: memref<32x48xbf16, #tpu.memory_space<vmem>>, %arg6: memref<16x48xbf16, #tpu.memory_space<vmem>>, %arg7: memref<1x48xf32, #tpu.memory_space<vmem>>, %arg8: memref<1x48xf32, #tpu.memory_space<vmem>>, %arg9: memref<16x2x32xf32, #tpu.memory_space<vmem>>) attributes {dimension_semantics = [], scalar_prefetch = 0 : i64, scratch_operands = 0 : i64, tpu.core_type = #tpu.core_type<tc>} {
    %c0 = arith.constant 0 : index
    %c0_0 = arith.constant 0 : index
    %c0_1 = arith.constant 0 : index
    %0 = vector.load %arg0[%c0, %c0_0, %c0_1] : memref<16x2x32xf32, #tpu.memory_space<vmem>>, vector<16x2x32xf32>
    %1 = arith.truncf %0 : vector<16x2x32xf32> to vector<16x2x32xbf16>
    %2 = vector.shape_cast %1 : vector<16x2x32xbf16> to vector<32x32xbf16>
    %c0_2 = arith.constant 0 : index
    %c0_3 = arith.constant 0 : index
    %3 = vector.load %arg1[%c0_2, %c0_3] : memref<32x48xbf16, #tpu.memory_space<vmem>>, vector<32x48xbf16>
    %cst = arith.constant dense<0.000000e+00> : vector<32x48xf32>
    %4 = tpu.matmul %2, %3, %cst {dimension_numbers = #tpu.dot_dimension_numbers<[1], [0], [0], [1], [0, 0, 1, 1], [], []>} : vector<32x32xbf16>, vector<32x48xbf16>, vector<32x48xf32> -> vector<32x48xf32>
    %5 = vector.shape_cast %4 : vector<32x48xf32> to vector<16x2x48xf32>
    %c0_4 = arith.constant 0 : index
    %c0_5 = arith.constant 0 : index
    %6 = vector.load %arg3[%c0_4, %c0_5] : memref<1x48xf32, #tpu.memory_space<vmem>>, vector<1x48xf32>
    %7 = vector.shape_cast %6 : vector<1x48xf32> to vector<1x1x48xf32>
    %8 = vector.broadcast %7 : vector<1x1x48xf32> to vector<16x2x48xf32>
    %9 = arith.addf %5, %8 : vector<16x2x48xf32>
    %c0_6 = arith.constant 0 : index
    %c0_7 = arith.constant 0 : index
    %10 = vector.load %arg5[%c0_6, %c0_7] : memref<32x48xbf16, #tpu.memory_space<vmem>>, vector<32x48xbf16>
    %cst_8 = arith.constant dense<0.000000e+00> : vector<32x48xf32>
    %11 = tpu.matmul %2, %10, %cst_8 {dimension_numbers = #tpu.dot_dimension_numbers<[1], [0], [0], [1], [0, 0, 1, 1], [], []>} : vector<32x32xbf16>, vector<32x48xbf16>, vector<32x48xf32> -> vector<32x48xf32>
    %12 = vector.shape_cast %11 : vector<32x48xf32> to vector<16x2x48xf32>
    %c0_9 = arith.constant 0 : index
    %c0_10 = arith.constant 0 : index
    %13 = vector.load %arg7[%c0_9, %c0_10] : memref<1x48xf32, #tpu.memory_space<vmem>>, vector<1x48xf32>
    %14 = vector.shape_cast %13 : vector<1x48xf32> to vector<1x1x48xf32>
    %15 = vector.broadcast %14 : vector<1x1x48xf32> to vector<16x2x48xf32>
    %16 = arith.addf %12, %15 : vector<16x2x48xf32>
    %c0_11 = arith.constant 0 : index
    %c0_12 = arith.constant 0 : index
    %17 = vector.load %arg2[%c0_11, %c0_12] : memref<16x48xbf16, #tpu.memory_space<vmem>>, vector<16x48xbf16>
    %c0_13 = arith.constant 0 : index
    %c0_14 = arith.constant 0 : index
    %18 = vector.load %arg6[%c0_13, %c0_14] : memref<16x48xbf16, #tpu.memory_space<vmem>>, vector<16x48xbf16>
    %c0_15 = arith.constant 0 : index
    %c0_16 = arith.constant 0 : index
    %19 = vector.load %arg4[%c0_15, %c0_16] : memref<1x48xf32, #tpu.memory_space<vmem>>, vector<1x48xf32>
    %c0_17 = arith.constant 0 : index
    %c0_18 = arith.constant 0 : index
    %20 = vector.load %arg8[%c0_17, %c0_18] : memref<1x48xf32, #tpu.memory_space<vmem>>, vector<1x48xf32>
    %cst_19 = arith.constant 0.000000e+00 : f32
    %21 = vector.broadcast %cst_19 : f32 to vector<2x16xf32>
    %cst_20 = arith.constant 0.000000e+00 : f32
    %22 = vector.broadcast %cst_20 : f32 to vector<2x16xf32>
    %23 = arith.truncf %21 : vector<2x16xf32> to vector<2x16xbf16>
    %cst_21 = arith.constant dense<0.000000e+00> : vector<2x48xf32>
    %24 = tpu.matmul %23, %17, %cst_21 {dimension_numbers = #tpu.dot_dimension_numbers<[1], [0], [0], [1], [0, 0, 1, 1], [], []>} : vector<2x16xbf16>, vector<16x48xbf16>, vector<2x48xf32> -> vector<2x48xf32>
    %25 = vector.broadcast %19 : vector<1x48xf32> to vector<2x48xf32>
    %26 = arith.addf %24, %25 : vector<2x48xf32>
    %27 = vector.extract_strided_slice %9 {offsets = [0, 0, 0], sizes = [1, 2, 48], strides = [1, 1, 1]} : vector<16x2x48xf32> to vector<1x2x48xf32>
    %28 = vector.shape_cast %27 : vector<1x2x48xf32> to vector<2x48xf32>
    %29 = vector.extract_strided_slice %28 {offsets = [0, 0], sizes = [2, 16], strides = [1, 1]} : vector<2x48xf32> to vector<2x16xf32>
    %30 = vector.extract_strided_slice %26 {offsets = [0, 0], sizes = [2, 16], strides = [1, 1]} : vector<2x48xf32> to vector<2x16xf32>
    %31 = arith.addf %29, %30 : vector<2x16xf32>
    %32 = arith.negf %31 : vector<2x16xf32>
    %33 = math.exp %32 : vector<2x16xf32>
    %cst_22 = arith.constant 1.000000e+00 : f32
    %34 = vector.broadcast %cst_22 : f32 to vector<2x16xf32>
    %35 = arith.addf %34, %33 : vector<2x16xf32>
    %36 = arith.divf %34, %35 : vector<2x16xf32>
    %37 = vector.extract_strided_slice %28 {offsets = [0, 16], sizes = [2, 16], strides = [1, 1]} : vector<2x48xf32> to vector<2x16xf32>
    %38 = vector.extract_strided_slice %26 {offsets = [0, 16], sizes = [2, 16], strides = [1, 1]} : vector<2x48xf32> to vector<2x16xf32>
    %39 = arith.addf %37, %38 : vector<2x16xf32>
    %40 = arith.negf %39 : vector<2x16xf32>
    %41 = math.exp %40 : vector<2x16xf32>
    %cst_23 = arith.constant 1.000000e+00 : f32
    %42 = vector.broadcast %cst_23 : f32 to vector<2x16xf32>
    %43 = arith.addf %42, %41 : vector<2x16xf32>
    %44 = arith.divf %42, %43 : vector<2x16xf32>
    %45 = vector.extract_strided_slice %28 {offsets = [0, 32], sizes = [2, 16], strides = [1, 1]} : vector<2x48xf32> to vector<2x16xf32>
    %46 = vector.extract_strided_slice %26 {offsets = [0, 32], sizes = [2, 16], strides = [1, 1]} : vector<2x48xf32> to vector<2x16xf32>
    %47 = arith.mulf %36, %46 : vector<2x16xf32>
    %48 = arith.addf %45, %47 : vector<2x16xf32>
    %49 = math.tanh %48 : vector<2x16xf32>
    %cst_24 = arith.constant 1.000000e+00 : f32
    %50 = vector.broadcast %cst_24 : f32 to vector<2x16xf32>
    %51 = arith.subf %50, %44 : vector<2x16xf32>
    %52 = arith.mulf %51, %49 : vector<2x16xf32>
    %53 = arith.mulf %44, %21 : vector<2x16xf32>
    %54 = arith.addf %52, %53 : vector<2x16xf32>
    %c0_25 = arith.constant 0 : index
    %c0_26 = arith.constant 0 : index
    %c0_27 = arith.constant 0 : index
    %55 = vector.load %arg9[%c0_25, %c0_26, %c0_27] : memref<16x2x32xf32, #tpu.memory_space<vmem>>, vector<1x2x16xf32>
    %56 = vector.shape_cast %55 : vector<1x2x16xf32> to vector<2x16xf32>
    %57 = vector.shape_cast %54 : vector<2x16xf32> to vector<1x2x16xf32>
    tpu.vector_store %arg9[%c0_25, %c0_26, %c0_27], %57 {strides = array<i32>} : memref<16x2x32xf32, #tpu.memory_space<vmem>>, vector<1x2x16xf32>,
    %58 = arith.truncf %22 : vector<2x16xf32> to vector<2x16xbf16>
    %cst_28 = arith.constant dense<0.000000e+00> : vector<2x48xf32>
    %59 = tpu.matmul %58, %18, %cst_28 {dimension_numbers = #tpu.dot_dimension_numbers<[1], [0], [0], [1], [0, 0, 1, 1], [], []>} : vector<2x16xbf16>, vector<16x48xbf16>, vector<2x48xf32> -> vector<2x48xf32>
    %60 = vector.broadcast %20 : vector<1x48xf32> to vector<2x48xf32>
    %61 = arith.addf %59, %60 : vector<2x48xf32>
    %62 = vector.extract_strided_slice %16 {offsets = [15, 0, 0], sizes = [1, 2, 48], strides = [1, 1, 1]} : vector<16x2x48xf32> to vector<1x2x48xf32>
    %63 = vector.shape_cast %62 : vector<1x2x48xf32> to vector<2x48xf32>
    %64 = vector.extract_strided_slice %63 {offsets = [0, 0], sizes = [2, 16], strides = [1, 1]} : vector<2x48xf32> to vector<2x16xf32>
    %65 = vector.extract_strided_slice %61 {offsets = [0, 0], sizes = [2, 16], strides = [1, 1]} : vector<2x48xf32> to vector<2x16xf32>
    %66 = arith.addf %64, %65 : vector<2x16xf32>
    %67 = arith.negf %66 : vector<2x16xf32>
    %68 = math.exp %67 : vector<2x16xf32>
    %cst_29 = arith.constant 1.000000e+00 : f32
    %69 = vector.broadcast %cst_29 : f32 to vector<2x16xf32>
    %70 = arith.addf %69, %68 : vector<2x16xf32>
    %71 = arith.divf %69, %70 : vector<2x16xf32>
    %72 = vector.extract_strided_slice %63 {offsets = [0, 16], sizes = [2, 16], strides = [1, 1]} : vector<2x48xf32> to vector<2x16xf32>
    %73 = vector.extract_strided_slice %61 {offsets = [0, 16], sizes = [2, 16], strides = [1, 1]} : vector<2x48xf32> to vector<2x16xf32>
    %74 = arith.addf %72, %73 : vector<2x16xf32>
    %75 = arith.negf %74 : vector<2x16xf32>
    %76 = math.exp %75 : vector<2x16xf32>
    %cst_30 = arith.constant 1.000000e+00 : f32
    %77 = vector.broadcast %cst_30 : f32 to vector<2x16xf32>
    %78 = arith.addf %77, %76 : vector<2x16xf32>
    %79 = arith.divf %77, %78 : vector<2x16xf32>
    %80 = vector.extract_strided_slice %63 {offsets = [0, 32], sizes = [2, 16], strides = [1, 1]} : vector<2x48xf32> to vector<2x16xf32>
    %81 = vector.extract_strided_slice %61 {offsets = [0, 32], sizes = [2, 16], strides = [1, 1]} : vector<2x48xf32> to vector<2x16xf32>
    %82 = arith.mulf %71, %81 : vector<2x16xf32>
    %83 = arith.addf %80, %82 : vector<2x16xf32>
    %84 = math.tanh %83 : vector<2x16xf32>
    %cst_31 = arith.constant 1.000000e+00 : f32
    %85 = vector.broadcast %cst_31 : f32 to vector<2x16xf32>
    %86 = arith.subf %85, %79 : vector<2x16xf32>
    %87 = arith.mulf %86, %84 : vector<2x16xf32>
    %88 = arith.mulf %79, %22 : vector<2x16xf32>
    %89 = arith.addf %87, %88 : vector<2x16xf32>
    %c15 = arith.constant 15 : index
    %c0_32 = arith.constant 0 : index
    %c16 = arith.constant 16 : index
    %90 = vector.load %arg9[%c15, %c0_32, %c16] : memref<16x2x32xf32, #tpu.memory_space<vmem>>, vector<1x2x16xf32>
    %91 = vector.shape_cast %90 : vector<1x2x16xf32> to vector<2x16xf32>
    %92 = vector.shape_cast %89 : vector<2x16xf32> to vector<1x2x16xf32>
    tpu.vector_store %arg9[%c15, %c0_32, %c16], %92 {strides = array<i32>} : memref<16x2x32xf32, #tpu.memory_space<vmem>>, vector<1x2x16xf32>,
    %93 = arith.truncf %54 : vector<2x16xf32> to vector<2x16xbf16>
    %cst_33 = arith.constant dense<0.000000e+00> : vector<2x48xf32>
    %94 = tpu.matmul %93, %17, %cst_33 {dimension_numbers = #tpu.dot_dimension_numbers<[1], [0], [0], [1], [0, 0, 1, 1], [], []>} : vector<2x16xbf16>, vector<16x48xbf16>, vector<2x48xf32> -> vector<2x48xf32>
    %95 = vector.broadcast %19 : vector<1x48xf32> to vector<2x48xf32>
    %96 = arith.addf %94, %95 : vector<2x48xf32>
    %97 = vector.extract_strided_slice %9 {offsets = [1, 0, 0], sizes = [1, 2, 48], strides = [1, 1, 1]} : vector<16x2x48xf32> to vector<1x2x48xf32>
    %98 = vector.shape_cast %97 : vector<1x2x48xf32> to vector<2x48xf32>
    %99 = vector.extract_strided_slice %98 {offsets = [0, 0], sizes = [2, 16], strides = [1, 1]} : vector<2x48xf32> to vector<2x16xf32>
    %100 = vector.extract_strided_slice %96 {offsets = [0, 0], sizes = [2, 16], strides = [1, 1]} : vector<2x48xf32> to vector<2x16xf32>
    %101 = arith.addf %99, %100 : vector<2x16xf32>
    %102 = arith.negf %101 : vector<2x16xf32>
    %103 = math.exp %102 : vector<2x16xf32>
    %cst_34 = arith.constant 1.000000e+00 : f32
    %104 = vector.broadcast %cst_34 : f32 to vector<2x16xf32>
    %105 = arith.addf %104, %103 : vector<2x16xf32>
    %106 = arith.divf %104, %105 : vector<2x16xf32>
    %107 = vector.extract_strided_slice %98 {offsets = [0, 16], sizes = [2, 16], strides = [1, 1]} : vector<2x48xf32> to vector<2x16xf32>
    %108 = vector.extract_strided_slice %96 {offsets = [0, 16], sizes = [2, 16], strides = [1, 1]} : vector<2x48xf32> to vector<2x16xf32>
    %109 = arith.addf %107, %108 : vector<2x16xf32>
    %110 = arith.negf %109 : vector<2x16xf32>
    %111 = math.exp %110 : vector<2x16xf32>
    %cst_35 = arith.constant 1.000000e+00 : f32
    %112 = vector.broadcast %cst_35 : f32 to vector<2x16xf32>
    %113 = arith.addf %112, %111 : vector<2x16xf32>
    %114 = arith.divf %112, %113 : vector<2x16xf32>
    %115 = vector.extract_strided_slice %98 {offsets = [0, 32], sizes = [2, 16], strides = [1, 1]} : vector<2x48xf32> to vector<2x16xf32>
    %116 = vector.extract_strided_slice %96 {offsets = [0, 32], sizes = [2, 16], strides = [1, 1]} : vector<2x48xf32> to vector<2x16xf32>
    %117 = arith.mulf %106, %116 : vector<2x16xf32>
    %118 = arith.addf %115, %117 : vector<2x16xf32>
    %119 = math.tanh %118 : vector<2x16xf32>
    %cst_36 = arith.constant 1.000000e+00 : f32
    %120 = vector.broadcast %cst_36 : f32 to vector<2x16xf32>
    %121 = arith.subf %120, %114 : vector<2x16xf32>
    %122 = arith.mulf %121, %119 : vector<2x16xf32>
    %123 = arith.mulf %114, %54 : vector<2x16xf32>
    %124 = arith.addf %122, %123 : vector<2x16xf32>
    %c1 = arith.constant 1 : index
    %c0_37 = arith.constant 0 : index
    %c0_38 = arith.constant 0 : index
    %125 = vector.load %arg9[%c1, %c0_37, %c0_38] : memref<16x2x32xf32, #tpu.memory_space<vmem>>, vector<1x2x16xf32>
    %126 = vector.shape_cast %125 : vector<1x2x16xf32> to vector<2x16xf32>
    %127 = vector.shape_cast %124 : vector<2x16xf32> to vector<1x2x16xf32>
    tpu.vector_store %arg9[%c1, %c0_37, %c0_38], %127 {strides = array<i32>} : memref<16x2x32xf32, #tpu.memory_space<vmem>>, vector<1x2x16xf32>,
    %128 = arith.truncf %89 : vector<2x16xf32> to vector<2x16xbf16>
    %cst_39 = arith.constant dense<0.000000e+00> : vector<2x48xf32>
    %129 = tpu.matmul %128, %18, %cst_39 {dimension_numbers = #tpu.dot_dimension_numbers<[1], [0], [0], [1], [0, 0, 1, 1], [], []>} : vector<2x16xbf16>, vector<16x48xbf16>, vector<2x48xf32> -> vector<2x48xf32>
    %130 = vector.broadcast %20 : vector<1x48xf32> to vector<2x48xf32>
    %131 = arith.addf %129, %130 : vector<2x48xf32>
    %132 = vector.extract_strided_slice %16 {offsets = [14, 0, 0], sizes = [1, 2, 48], strides = [1, 1, 1]} : vector<16x2x48xf32> to vector<1x2x48xf32>
    %133 = vector.shape_cast %132 : vector<1x2x48xf32> to vector<2x48xf32>
    %134 = vector.extract_strided_slice %133 {offsets = [0, 0], sizes = [2, 16], strides = [1, 1]} : vector<2x48xf32> to vector<2x16xf32>
    %135 = vector.extract_strided_slice %131 {offsets = [0, 0], sizes = [2, 16], strides = [1, 1]} : vector<2x48xf32> to vector<2x16xf32>
    %136 = arith.addf %134, %135 : vector<2x16xf32>
    %137 = arith.negf %136 : vector<2x16xf32>
    %138 = math.exp %137 : vector<2x16xf32>
    %cst_40 = arith.constant 1.000000e+00 : f32
    %139 = vector.broadcast %cst_40 : f32 to vector<2x16xf32>
    %140 = arith.addf %139, %138 : vector<2x16xf32>
    %141 = arith.divf %139, %140 : vector<2x16xf32>
    %142 = vector.extract_strided_slice %133 {offsets = [0, 16], sizes = [2, 16], strides = [1, 1]} : vector<2x48xf32> to vector<2x16xf32>
    %143 = vector.extract_strided_slice %131 {offsets = [0, 16], sizes = [2, 16], strides = [1, 1]} : vector<2x48xf32> to vector<2x16xf32>
    %144 = arith.addf %142, %143 : vector<2x16xf32>
    %145 = arith.negf %144 : vector<2x16xf32>
    %146 = math.exp %145 : vector<2x16xf32>
    %cst_41 = arith.constant 1.000000e+00 : f32
    %147 = vector.broadcast %cst_41 : f32 to vector<2x16xf32>
    %148 = arith.addf %147, %146 : vector<2x16xf32>
    %149 = arith.divf %147, %148 : vector<2x16xf32>
    %150 = vector.extract_strided_slice %133 {offsets = [0, 32], sizes = [2, 16], strides = [1, 1]} : vector<2x48xf32> to vector<2x16xf32>
    %151 = vector.extract_strided_slice %131 {offsets = [0, 32], sizes = [2, 16], strides = [1, 1]} : vector<2x48xf32> to vector<2x16xf32>
    %152 = arith.mulf %141, %151 : vector<2x16xf32>
    %153 = arith.addf %150, %152 : vector<2x16xf32>
    %154 = math.tanh %153 : vector<2x16xf32>
    %cst_42 = arith.constant 1.000000e+00 : f32
    %155 = vector.broadcast %cst_42 : f32 to vector<2x16xf32>
    %156 = arith.subf %155, %149 : vector<2x16xf32>
    %157 = arith.mulf %156, %154 : vector<2x16xf32>
    %158 = arith.mulf %149, %89 : vector<2x16xf32>
    %159 = arith.addf %157, %158 : vector<2x16xf32>
    %c14 = arith.constant 14 : index
    %c0_43 = arith.constant 0 : index
    %c16_44 = arith.constant 16 : index
    %160 = vector.load %arg9[%c14, %c0_43, %c16_44] : memref<16x2x32xf32, #tpu.memory_space<vmem>>, vector<1x2x16xf32>
    %161 = vector.shape_cast %160 : vector<1x2x16xf32> to vector<2x16xf32>
    %162 = vector.shape_cast %159 : vector<2x16xf32> to vector<1x2x16xf32>
    tpu.vector_store %arg9[%c14, %c0_43, %c16_44], %162 {strides = array<i32>} : memref<16x2x32xf32, #tpu.memory_space<vmem>>, vector<1x2x16xf32>,
    %163 = arith.truncf %124 : vector<2x16xf32> to vector<2x16xbf16>
    %cst_45 = arith.constant dense<0.000000e+00> : vector<2x48xf32>
    %164 = tpu.matmul %163, %17, %cst_45 {dimension_numbers = #tpu.dot_dimension_numbers<[1], [0], [0], [1], [0, 0, 1, 1], [], []>} : vector<2x16xbf16>, vector<16x48xbf16>, vector<2x48xf32> -> vector<2x48xf32>
    %165 = vector.broadcast %19 : vector<1x48xf32> to vector<2x48xf32>
    %166 = arith.addf %164, %165 : vector<2x48xf32>
    %167 = vector.extract_strided_slice %9 {offsets = [2, 0, 0], sizes = [1, 2, 48], strides = [1, 1, 1]} : vector<16x2x48xf32> to vector<1x2x48xf32>
    %168 = vector.shape_cast %167 : vector<1x2x48xf32> to vector<2x48xf32>
    %169 = vector.extract_strided_slice %168 {offsets = [0, 0], sizes = [2, 16], strides = [1, 1]} : vector<2x48xf32> to vector<2x16xf32>
    %170 = vector.extract_strided_slice %166 {offsets = [0, 0], sizes = [2, 16], strides = [1, 1]} : vector<2x48xf32> to vector<2x16xf32>
    %171 = arith.addf %169, %170 : vector<2x16xf32>
    %172 = arith.negf %171 : vector<2x16xf32>
    %173 = math.exp %172 : vector<2x16xf32>
    %cst_46 = arith.constant 1.000000e+00 : f32
    %174 = vector.broadcast %cst_46 : f32 to vector<2x16xf32>
    %175 = arith.addf %174, %173 : vector<2x16xf32>
    %176 = arith.divf %174, %175 : vector<2x16xf32>
    %177 = vector.extract_strided_slice %168 {offsets = [0, 16], sizes = [2, 16], strides = [1, 1]} : vector<2x48xf32> to vector<2x16xf32>
    %178 = vector.extract_strided_slice %166 {offsets = [0, 16], sizes = [2, 16], strides = [1, 1]} : vector<2x48xf32> to vector<2x16xf32>
    %179 = arith.addf %177, %178 : vector<2x16xf32>
    %180 = arith.negf %179 : vector<2x16xf32>
    %181 = math.exp %180 : vector<2x16xf32>
    %cst_47 = arith.constant 1.000000e+00 : f32
    %182 = vector.broadcast %cst_47 : f32 to vector<2x16xf32>
    %183 = arith.addf %182, %181 : vector<2x16xf32>
    %184 = arith.divf %182, %183 : vector<2x16xf32>
    %185 = vector.extract_strided_slice %168 {offsets = [0, 32], sizes = [2, 16], strides = [1, 1]} : vector<2x48xf32> to vector<2x16xf32>
    %186 = vector.extract_strided_slice %166 {offsets = [0, 32], sizes = [2, 16], strides = [1, 1]} : vector<2x48xf32> to vector<2x16xf32>
    %187 = arith.mulf %176, %186 : vector<2x16xf32>
    %188 = arith.addf %185, %187 : vector<2x16xf32>
    %189 = math.tanh %188 : vector<2x16xf32>
    %cst_48 = arith.constant 1.000000e+00 : f32
    %190 = vector.broadcast %cst_48 : f32 to vector<2x16xf32>
    %191 = arith.subf %190, %184 : vector<2x16xf32>
    %192 = arith.mulf %191, %189 : vector<2x16xf32>
    %193 = arith.mulf %184, %124 : vector<2x16xf32>
    %194 = arith.addf %192, %193 : vector<2x16xf32>
    %c2 = arith.constant 2 : index
    %c0_49 = arith.constant 0 : index
    %c0_50 = arith.constant 0 : index
    %195 = vector.load %arg9[%c2, %c0_49, %c0_50] : memref<16x2x32xf32, #tpu.memory_space<vmem>>, vector<1x2x16xf32>
    %196 = vector.shape_cast %195 : vector<1x2x16xf32> to vector<2x16xf32>
    %197 = vector.shape_cast %194 : vector<2x16xf32> to vector<1x2x16xf32>
    tpu.vector_store %arg9[%c2, %c0_49, %c0_50], %197 {strides = array<i32>} : memref<16x2x32xf32, #tpu.memory_space<vmem>>, vector<1x2x16xf32>,
    %198 = arith.truncf %159 : vector<2x16xf32> to vector<2x16xbf16>
    %cst_51 = arith.constant dense<0.000000e+00> : vector<2x48xf32>
    %199 = tpu.matmul %198, %18, %cst_51 {dimension_numbers = #tpu.dot_dimension_numbers<[1], [0], [0], [1], [0, 0, 1, 1], [], []>} : vector<2x16xbf16>, vector<16x48xbf16>, vector<2x48xf32> -> vector<2x48xf32>
    %200 = vector.broadcast %20 : vector<1x48xf32> to vector<2x48xf32>
    %201 = arith.addf %199, %200 : vector<2x48xf32>
    %202 = vector.extract_strided_slice %16 {offsets = [13, 0, 0], sizes = [1, 2, 48], strides = [1, 1, 1]} : vector<16x2x48xf32> to vector<1x2x48xf32>
    %203 = vector.shape_cast %202 : vector<1x2x48xf32> to vector<2x48xf32>
    %204 = vector.extract_strided_slice %203 {offsets = [0, 0], sizes = [2, 16], strides = [1, 1]} : vector<2x48xf32> to vector<2x16xf32>
    %205 = vector.extract_strided_slice %201 {offsets = [0, 0], sizes = [2, 16], strides = [1, 1]} : vector<2x48xf32> to vector<2x16xf32>
    %206 = arith.addf %204, %205 : vector<2x16xf32>
    %207 = arith.negf %206 : vector<2x16xf32>
    %208 = math.exp %207 : vector<2x16xf32>
    %cst_52 = arith.constant 1.000000e+00 : f32
    %209 = vector.broadcast %cst_52 : f32 to vector<2x16xf32>
    %210 = arith.addf %209, %208 : vector<2x16xf32>
    %211 = arith.divf %209, %210 : vector<2x16xf32>
    %212 = vector.extract_strided_slice %203 {offsets = [0, 16], sizes = [2, 16], strides = [1, 1]} : vector<2x48xf32> to vector<2x16xf32>
    %213 = vector.extract_strided_slice %201 {offsets = [0, 16], sizes = [2, 16], strides = [1, 1]} : vector<2x48xf32> to vector<2x16xf32>
    %214 = arith.addf %212, %213 : vector<2x16xf32>
    %215 = arith.negf %214 : vector<2x16xf32>
    %216 = math.exp %215 : vector<2x16xf32>
    %cst_53 = arith.constant 1.000000e+00 : f32
    %217 = vector.broadcast %cst_53 : f32 to vector<2x16xf32>
    %218 = arith.addf %217, %216 : vector<2x16xf32>
    %219 = arith.divf %217, %218 : vector<2x16xf32>
    %220 = vector.extract_strided_slice %203 {offsets = [0, 32], sizes = [2, 16], strides = [1, 1]} : vector<2x48xf32> to vector<2x16xf32>
    %221 = vector.extract_strided_slice %201 {offsets = [0, 32], sizes = [2, 16], strides = [1, 1]} : vector<2x48xf32> to vector<2x16xf32>
    %222 = arith.mulf %211, %221 : vector<2x16xf32>
    %223 = arith.addf %220, %222 : vector<2x16xf32>
    %224 = math.tanh %223 : vector<2x16xf32>
    %cst_54 = arith.constant 1.000000e+00 : f32
    %225 = vector.broadcast %cst_54 : f32 to vector<2x16xf32>
    %226 = arith.subf %225, %219 : vector<2x16xf32>
    %227 = arith.mulf %226, %224 : vector<2x16xf32>
    %228 = arith.mulf %219, %159 : vector<2x16xf32>
    %229 = arith.addf %227, %228 : vector<2x16xf32>
    %c13 = arith.constant 13 : index
    %c0_55 = arith.constant 0 : index
    %c16_56 = arith.constant 16 : index
    %230 = vector.load %arg9[%c13, %c0_55, %c16_56] : memref<16x2x32xf32, #tpu.memory_space<vmem>>, vector<1x2x16xf32>
    %231 = vector.shape_cast %230 : vector<1x2x16xf32> to vector<2x16xf32>
    %232 = vector.shape_cast %229 : vector<2x16xf32> to vector<1x2x16xf32>
    tpu.vector_store %arg9[%c13, %c0_55, %c16_56], %232 {strides = array<i32>} : memref<16x2x32xf32, #tpu.memory_space<vmem>>, vector<1x2x16xf32>,
    %233 = arith.truncf %194 : vector<2x16xf32> to vector<2x16xbf16>
    %cst_57 = arith.constant dense<0.000000e+00> : vector<2x48xf32>
    %234 = tpu.matmul %233, %17, %cst_57 {dimension_numbers = #tpu.dot_dimension_numbers<[1], [0], [0], [1], [0, 0, 1, 1], [], []>} : vector<2x16xbf16>, vector<16x48xbf16>, vector<2x48xf32> -> vector<2x48xf32>
    %235 = vector.broadcast %19 : vector<1x48xf32> to vector<2x48xf32>
    %236 = arith.addf %234, %235 : vector<2x48xf32>
    %237 = vector.extract_strided_slice %9 {offsets = [3, 0, 0], sizes = [1, 2, 48], strides = [1, 1, 1]} : vector<16x2x48xf32> to vector<1x2x48xf32>
    %238 = vector.shape_cast %237 : vector<1x2x48xf32> to vector<2x48xf32>
    %239 = vector.extract_strided_slice %238 {offsets = [0, 0], sizes = [2, 16], strides = [1, 1]} : vector<2x48xf32> to vector<2x16xf32>
    %240 = vector.extract_strided_slice %236 {offsets = [0, 0], sizes = [2, 16], strides = [1, 1]} : vector<2x48xf32> to vector<2x16xf32>
    %241 = arith.addf %239, %240 : vector<2x16xf32>
    %242 = arith.negf %241 : vector<2x16xf32>
    %243 = math.exp %242 : vector<2x16xf32>
    %cst_58 = arith.constant 1.000000e+00 : f32
    %244 = vector.broadcast %cst_58 : f32 to vector<2x16xf32>
    %245 = arith.addf %244, %243 : vector<2x16xf32>
    %246 = arith.divf %244, %245 : vector<2x16xf32>
    %247 = vector.extract_strided_slice %238 {offsets = [0, 16], sizes = [2, 16], strides = [1, 1]} : vector<2x48xf32> to vector<2x16xf32>
    %248 = vector.extract_strided_slice %236 {offsets = [0, 16], sizes = [2, 16], strides = [1, 1]} : vector<2x48xf32> to vector<2x16xf32>
    %249 = arith.addf %247, %248 : vector<2x16xf32>
    %250 = arith.negf %249 : vector<2x16xf32>
    %251 = math.exp %250 : vector<2x16xf32>
    %cst_59 = arith.constant 1.000000e+00 : f32
    %252 = vector.broadcast %cst_59 : f32 to vector<2x16xf32>
    %253 = arith.addf %252, %251 : vector<2x16xf32>
    %254 = arith.divf %252, %253 : vector<2x16xf32>
    %255 = vector.extract_strided_slice %238 {offsets = [0, 32], sizes = [2, 16], strides = [1, 1]} : vector<2x48xf32> to vector<2x16xf32>
    %256 = vector.extract_strided_slice %236 {offsets = [0, 32], sizes = [2, 16], strides = [1, 1]} : vector<2x48xf32> to vector<2x16xf32>
    %257 = arith.mulf %246, %256 : vector<2x16xf32>
    %258 = arith.addf %255, %257 : vector<2x16xf32>
    %259 = math.tanh %258 : vector<2x16xf32>
    %cst_60 = arith.constant 1.000000e+00 : f32
    %260 = vector.broadcast %cst_60 : f32 to vector<2x16xf32>
    %261 = arith.subf %260, %254 : vector<2x16xf32>
    %262 = arith.mulf %261, %259 : vector<2x16xf32>
    %263 = arith.mulf %254, %194 : vector<2x16xf32>
    %264 = arith.addf %262, %263 : vector<2x16xf32>
    %c3 = arith.constant 3 : index
    %c0_61 = arith.constant 0 : index
    %c0_62 = arith.constant 0 : index
    %265 = vector.load %arg9[%c3, %c0_61, %c0_62] : memref<16x2x32xf32, #tpu.memory_space<vmem>>, vector<1x2x16xf32>
    %266 = vector.shape_cast %265 : vector<1x2x16xf32> to vector<2x16xf32>
    %267 = vector.shape_cast %264 : vector<2x16xf32> to vector<1x2x16xf32>
    tpu.vector_store %arg9[%c3, %c0_61, %c0_62], %267 {strides = array<i32>} : memref<16x2x32xf32, #tpu.memory_space<vmem>>, vector<1x2x16xf32>,
    %268 = arith.truncf %229 : vector<2x16xf32> to vector<2x16xbf16>
    %cst_63 = arith.constant dense<0.000000e+00> : vector<2x48xf32>
    %269 = tpu.matmul %268, %18, %cst_63 {dimension_numbers = #tpu.dot_dimension_numbers<[1], [0], [0], [1], [0, 0, 1, 1], [], []>} : vector<2x16xbf16>, vector<16x48xbf16>, vector<2x48xf32> -> vector<2x48xf32>
    %270 = vector.broadcast %20 : vector<1x48xf32> to vector<2x48xf32>
    %271 = arith.addf %269, %270 : vector<2x48xf32>
    %272 = vector.extract_strided_slice %16 {offsets = [12, 0, 0], sizes = [1, 2, 48], strides = [1, 1, 1]} : vector<16x2x48xf32> to vector<1x2x48xf32>
    %273 = vector.shape_cast %272 : vector<1x2x48xf32> to vector<2x48xf32>
    %274 = vector.extract_strided_slice %273 {offsets = [0, 0], sizes = [2, 16], strides = [1, 1]} : vector<2x48xf32> to vector<2x16xf32>
    %275 = vector.extract_strided_slice %271 {offsets = [0, 0], sizes = [2, 16], strides = [1, 1]} : vector<2x48xf32> to vector<2x16xf32>
    %276 = arith.addf %274, %275 : vector<2x16xf32>
    %277 = arith.negf %276 : vector<2x16xf32>
    %278 = math.exp %277 : vector<2x16xf32>
    %cst_64 = arith.constant 1.000000e+00 : f32
    %279 = vector.broadcast %cst_64 : f32 to vector<2x16xf32>
    %280 = arith.addf %279, %278 : vector<2x16xf32>
    %281 = arith.divf %279, %280 : vector<2x16xf32>
    %282 = vector.extract_strided_slice %273 {offsets = [0, 16], sizes = [2, 16], strides = [1, 1]} : vector<2x48xf32> to vector<2x16xf32>
    %283 = vector.extract_strided_slice %271 {offsets = [0, 16], sizes = [2, 16], strides = [1, 1]} : vector<2x48xf32> to vector<2x16xf32>
    %284 = arith.addf %282, %283 : vector<2x16xf32>
    %285 = arith.negf %284 : vector<2x16xf32>
    %286 = math.exp %285 : vector<2x16xf32>
    %cst_65 = arith.constant 1.000000e+00 : f32
    %287 = vector.broadcast %cst_65 : f32 to vector<2x16xf32>
    %288 = arith.addf %287, %286 : vector<2x16xf32>
    %289 = arith.divf %287, %288 : vector<2x16xf32>
    %290 = vector.extract_strided_slice %273 {offsets = [0, 32], sizes = [2, 16], strides = [1, 1]} : vector<2x48xf32> to vector<2x16xf32>
    %291 = vector.extract_strided_slice %271 {offsets = [0, 32], sizes = [2, 16], strides = [1, 1]} : vector<2x48xf32> to vector<2x16xf32>
    %292 = arith.mulf %281, %291 : vector<2x16xf32>
    %293 = arith.addf %290, %292 : vector<2x16xf32>
    %294 = math.tanh %293 : vector<2x16xf32>
    %cst_66 = arith.constant 1.000000e+00 : f32
    %295 = vector.broadcast %cst_66 : f32 to vector<2x16xf32>
    %296 = arith.subf %295, %289 : vector<2x16xf32>
    %297 = arith.mulf %296, %294 : vector<2x16xf32>
    %298 = arith.mulf %289, %229 : vector<2x16xf32>
    %299 = arith.addf %297, %298 : vector<2x16xf32>
    %c12 = arith.constant 12 : index
    %c0_67 = arith.constant 0 : index
    %c16_68 = arith.constant 16 : index
    %300 = vector.load %arg9[%c12, %c0_67, %c16_68] : memref<16x2x32xf32, #tpu.memory_space<vmem>>, vector<1x2x16xf32>
    %301 = vector.shape_cast %300 : vector<1x2x16xf32> to vector<2x16xf32>
    %302 = vector.shape_cast %299 : vector<2x16xf32> to vector<1x2x16xf32>
    tpu.vector_store %arg9[%c12, %c0_67, %c16_68], %302 {strides = array<i32>} : memref<16x2x32xf32, #tpu.memory_space<vmem>>, vector<1x2x16xf32>,
    %303 = arith.truncf %264 : vector<2x16xf32> to vector<2x16xbf16>
    %cst_69 = arith.constant dense<0.000000e+00> : vector<2x48xf32>
    %304 = tpu.matmul %303, %17, %cst_69 {dimension_numbers = #tpu.dot_dimension_numbers<[1], [0], [0], [1], [0, 0, 1, 1], [], []>} : vector<2x16xbf16>, vector<16x48xbf16>, vector<2x48xf32> -> vector<2x48xf32>
    %305 = vector.broadcast %19 : vector<1x48xf32> to vector<2x48xf32>
    %306 = arith.addf %304, %305 : vector<2x48xf32>
    %307 = vector.extract_strided_slice %9 {offsets = [4, 0, 0], sizes = [1, 2, 48], strides = [1, 1, 1]} : vector<16x2x48xf32> to vector<1x2x48xf32>
    %308 = vector.shape_cast %307 : vector<1x2x48xf32> to vector<2x48xf32>
    %309 = vector.extract_strided_slice %308 {offsets = [0, 0], sizes = [2, 16], strides = [1, 1]} : vector<2x48xf32> to vector<2x16xf32>
    %310 = vector.extract_strided_slice %306 {offsets = [0, 0], sizes = [2, 16], strides = [1, 1]} : vector<2x48xf32> to vector<2x16xf32>
    %311 = arith.addf %309, %310 : vector<2x16xf32>
    %312 = arith.negf %311 : vector<2x16xf32>
    %313 = math.exp %312 : vector<2x16xf32>
    %cst_70 = arith.constant 1.000000e+00 : f32
    %314 = vector.broadcast %cst_70 : f32 to vector<2x16xf32>
    %315 = arith.addf %314, %313 : vector<2x16xf32>
    %316 = arith.divf %314, %315 : vector<2x16xf32>
    %317 = vector.extract_strided_slice %308 {offsets = [0, 16], sizes = [2, 16], strides = [1, 1]} : vector<2x48xf32> to vector<2x16xf32>
    %318 = vector.extract_strided_slice %306 {offsets = [0, 16], sizes = [2, 16], strides = [1, 1]} : vector<2x48xf32> to vector<2x16xf32>
    %319 = arith.addf %317, %318 : vector<2x16xf32>
    %320 = arith.negf %319 : vector<2x16xf32>
    %321 = math.exp %320 : vector<2x16xf32>
    %cst_71 = arith.constant 1.000000e+00 : f32
    %322 = vector.broadcast %cst_71 : f32 to vector<2x16xf32>
    %323 = arith.addf %322, %321 : vector<2x16xf32>
    %324 = arith.divf %322, %323 : vector<2x16xf32>
    %325 = vector.extract_strided_slice %308 {offsets = [0, 32], sizes = [2, 16], strides = [1, 1]} : vector<2x48xf32> to vector<2x16xf32>
    %326 = vector.extract_strided_slice %306 {offsets = [0, 32], sizes = [2, 16], strides = [1, 1]} : vector<2x48xf32> to vector<2x16xf32>
    %327 = arith.mulf %316, %326 : vector<2x16xf32>
    %328 = arith.addf %325, %327 : vector<2x16xf32>
    %329 = math.tanh %328 : vector<2x16xf32>
    %cst_72 = arith.constant 1.000000e+00 : f32
    %330 = vector.broadcast %cst_72 : f32 to vector<2x16xf32>
    %331 = arith.subf %330, %324 : vector<2x16xf32>
    %332 = arith.mulf %331, %329 : vector<2x16xf32>
    %333 = arith.mulf %324, %264 : vector<2x16xf32>
    %334 = arith.addf %332, %333 : vector<2x16xf32>
    %c4 = arith.constant 4 : index
    %c0_73 = arith.constant 0 : index
    %c0_74 = arith.constant 0 : index
    %335 = vector.load %arg9[%c4, %c0_73, %c0_74] : memref<16x2x32xf32, #tpu.memory_space<vmem>>, vector<1x2x16xf32>
    %336 = vector.shape_cast %335 : vector<1x2x16xf32> to vector<2x16xf32>
    %337 = vector.shape_cast %334 : vector<2x16xf32> to vector<1x2x16xf32>
    tpu.vector_store %arg9[%c4, %c0_73, %c0_74], %337 {strides = array<i32>} : memref<16x2x32xf32, #tpu.memory_space<vmem>>, vector<1x2x16xf32>,
    %338 = arith.truncf %299 : vector<2x16xf32> to vector<2x16xbf16>
    %cst_75 = arith.constant dense<0.000000e+00> : vector<2x48xf32>
    %339 = tpu.matmul %338, %18, %cst_75 {dimension_numbers = #tpu.dot_dimension_numbers<[1], [0], [0], [1], [0, 0, 1, 1], [], []>} : vector<2x16xbf16>, vector<16x48xbf16>, vector<2x48xf32> -> vector<2x48xf32>
    %340 = vector.broadcast %20 : vector<1x48xf32> to vector<2x48xf32>
    %341 = arith.addf %339, %340 : vector<2x48xf32>
    %342 = vector.extract_strided_slice %16 {offsets = [11, 0, 0], sizes = [1, 2, 48], strides = [1, 1, 1]} : vector<16x2x48xf32> to vector<1x2x48xf32>
    %343 = vector.shape_cast %342 : vector<1x2x48xf32> to vector<2x48xf32>
    %344 = vector.extract_strided_slice %343 {offsets = [0, 0], sizes = [2, 16], strides = [1, 1]} : vector<2x48xf32> to vector<2x16xf32>
    %345 = vector.extract_strided_slice %341 {offsets = [0, 0], sizes = [2, 16], strides = [1, 1]} : vector<2x48xf32> to vector<2x16xf32>
    %346 = arith.addf %344, %345 : vector<2x16xf32>
    %347 = arith.negf %346 : vector<2x16xf32>
    %348 = math.exp %347 : vector<2x16xf32>
    %cst_76 = arith.constant 1.000000e+00 : f32
    %349 = vector.broadcast %cst_76 : f32 to vector<2x16xf32>
    %350 = arith.addf %349, %348 : vector<2x16xf32>
    %351 = arith.divf %349, %350 : vector<2x16xf32>
    %352 = vector.extract_strided_slice %343 {offsets = [0, 16], sizes = [2, 16], strides = [1, 1]} : vector<2x48xf32> to vector<2x16xf32>
    %353 = vector.extract_strided_slice %341 {offsets = [0, 16], sizes = [2, 16], strides = [1, 1]} : vector<2x48xf32> to vector<2x16xf32>
    %354 = arith.addf %352, %353 : vector<2x16xf32>
    %355 = arith.negf %354 : vector<2x16xf32>
    %356 = math.exp %355 : vector<2x16xf32>
    %cst_77 = arith.constant 1.000000e+00 : f32
    %357 = vector.broadcast %cst_77 : f32 to vector<2x16xf32>
    %358 = arith.addf %357, %356 : vector<2x16xf32>
    %359 = arith.divf %357, %358 : vector<2x16xf32>
    %360 = vector.extract_strided_slice %343 {offsets = [0, 32], sizes = [2, 16], strides = [1, 1]} : vector<2x48xf32> to vector<2x16xf32>
    %361 = vector.extract_strided_slice %341 {offsets = [0, 32], sizes = [2, 16], strides = [1, 1]} : vector<2x48xf32> to vector<2x16xf32>
    %362 = arith.mulf %351, %361 : vector<2x16xf32>
    %363 = arith.addf %360, %362 : vector<2x16xf32>
    %364 = math.tanh %363 : vector<2x16xf32>
    %cst_78 = arith.constant 1.000000e+00 : f32
    %365 = vector.broadcast %cst_78 : f32 to vector<2x16xf32>
    %366 = arith.subf %365, %359 : vector<2x16xf32>
    %367 = arith.mulf %366, %364 : vector<2x16xf32>
    %368 = arith.mulf %359, %299 : vector<2x16xf32>
    %369 = arith.addf %367, %368 : vector<2x16xf32>
    %c11 = arith.constant 11 : index
    %c0_79 = arith.constant 0 : index
    %c16_80 = arith.constant 16 : index
    %370 = vector.load %arg9[%c11, %c0_79, %c16_80] : memref<16x2x32xf32, #tpu.memory_space<vmem>>, vector<1x2x16xf32>
    %371 = vector.shape_cast %370 : vector<1x2x16xf32> to vector<2x16xf32>
    %372 = vector.shape_cast %369 : vector<2x16xf32> to vector<1x2x16xf32>
    tpu.vector_store %arg9[%c11, %c0_79, %c16_80], %372 {strides = array<i32>} : memref<16x2x32xf32, #tpu.memory_space<vmem>>, vector<1x2x16xf32>,
    %373 = arith.truncf %334 : vector<2x16xf32> to vector<2x16xbf16>
    %cst_81 = arith.constant dense<0.000000e+00> : vector<2x48xf32>
    %374 = tpu.matmul %373, %17, %cst_81 {dimension_numbers = #tpu.dot_dimension_numbers<[1], [0], [0], [1], [0, 0, 1, 1], [], []>} : vector<2x16xbf16>, vector<16x48xbf16>, vector<2x48xf32> -> vector<2x48xf32>
    %375 = vector.broadcast %19 : vector<1x48xf32> to vector<2x48xf32>
    %376 = arith.addf %374, %375 : vector<2x48xf32>
    %377 = vector.extract_strided_slice %9 {offsets = [5, 0, 0], sizes = [1, 2, 48], strides = [1, 1, 1]} : vector<16x2x48xf32> to vector<1x2x48xf32>
    %378 = vector.shape_cast %377 : vector<1x2x48xf32> to vector<2x48xf32>
    %379 = vector.extract_strided_slice %378 {offsets = [0, 0], sizes = [2, 16], strides = [1, 1]} : vector<2x48xf32> to vector<2x16xf32>
    %380 = vector.extract_strided_slice %376 {offsets = [0, 0], sizes = [2, 16], strides = [1, 1]} : vector<2x48xf32> to vector<2x16xf32>
    %381 = arith.addf %379, %380 : vector<2x16xf32>
    %382 = arith.negf %381 : vector<2x16xf32>
    %383 = math.exp %382 : vector<2x16xf32>
    %cst_82 = arith.constant 1.000000e+00 : f32
    %384 = vector.broadcast %cst_82 : f32 to vector<2x16xf32>
    %385 = arith.addf %384, %383 : vector<2x16xf32>
    %386 = arith.divf %384, %385 : vector<2x16xf32>
    %387 = vector.extract_strided_slice %378 {offsets = [0, 16], sizes = [2, 16], strides = [1, 1]} : vector<2x48xf32> to vector<2x16xf32>
    %388 = vector.extract_strided_slice %376 {offsets = [0, 16], sizes = [2, 16], strides = [1, 1]} : vector<2x48xf32> to vector<2x16xf32>
    %389 = arith.addf %387, %388 : vector<2x16xf32>
    %390 = arith.negf %389 : vector<2x16xf32>
    %391 = math.exp %390 : vector<2x16xf32>
    %cst_83 = arith.constant 1.000000e+00 : f32
    %392 = vector.broadcast %cst_83 : f32 to vector<2x16xf32>
    %393 = arith.addf %392, %391 : vector<2x16xf32>
    %394 = arith.divf %392, %393 : vector<2x16xf32>
    %395 = vector.extract_strided_slice %378 {offsets = [0, 32], sizes = [2, 16], strides = [1, 1]} : vector<2x48xf32> to vector<2x16xf32>
    %396 = vector.extract_strided_slice %376 {offsets = [0, 32], sizes = [2, 16], strides = [1, 1]} : vector<2x48xf32> to vector<2x16xf32>
    %397 = arith.mulf %386, %396 : vector<2x16xf32>
    %398 = arith.addf %395, %397 : vector<2x16xf32>
    %399 = math.tanh %398 : vector<2x16xf32>
    %cst_84 = arith.constant 1.000000e+00 : f32
    %400 = vector.broadcast %cst_84 : f32 to vector<2x16xf32>
    %401 = arith.subf %400, %394 : vector<2x16xf32>
    %402 = arith.mulf %401, %399 : vector<2x16xf32>
    %403 = arith.mulf %394, %334 : vector<2x16xf32>
    %404 = arith.addf %402, %403 : vector<2x16xf32>
    %c5 = arith.constant 5 : index
    %c0_85 = arith.constant 0 : index
    %c0_86 = arith.constant 0 : index
    %405 = vector.load %arg9[%c5, %c0_85, %c0_86] : memref<16x2x32xf32, #tpu.memory_space<vmem>>, vector<1x2x16xf32>
    %406 = vector.shape_cast %405 : vector<1x2x16xf32> to vector<2x16xf32>
    %407 = vector.shape_cast %404 : vector<2x16xf32> to vector<1x2x16xf32>
    tpu.vector_store %arg9[%c5, %c0_85, %c0_86], %407 {strides = array<i32>} : memref<16x2x32xf32, #tpu.memory_space<vmem>>, vector<1x2x16xf32>,
    %408 = arith.truncf %369 : vector<2x16xf32> to vector<2x16xbf16>
    %cst_87 = arith.constant dense<0.000000e+00> : vector<2x48xf32>
    %409 = tpu.matmul %408, %18, %cst_87 {dimension_numbers = #tpu.dot_dimension_numbers<[1], [0], [0], [1], [0, 0, 1, 1], [], []>} : vector<2x16xbf16>, vector<16x48xbf16>, vector<2x48xf32> -> vector<2x48xf32>
    %410 = vector.broadcast %20 : vector<1x48xf32> to vector<2x48xf32>
    %411 = arith.addf %409, %410 : vector<2x48xf32>
    %412 = vector.extract_strided_slice %16 {offsets = [10, 0, 0], sizes = [1, 2, 48], strides = [1, 1, 1]} : vector<16x2x48xf32> to vector<1x2x48xf32>
    %413 = vector.shape_cast %412 : vector<1x2x48xf32> to vector<2x48xf32>
    %414 = vector.extract_strided_slice %413 {offsets = [0, 0], sizes = [2, 16], strides = [1, 1]} : vector<2x48xf32> to vector<2x16xf32>
    %415 = vector.extract_strided_slice %411 {offsets = [0, 0], sizes = [2, 16], strides = [1, 1]} : vector<2x48xf32> to vector<2x16xf32>
    %416 = arith.addf %414, %415 : vector<2x16xf32>
    %417 = arith.negf %416 : vector<2x16xf32>
    %418 = math.exp %417 : vector<2x16xf32>
    %cst_88 = arith.constant 1.000000e+00 : f32
    %419 = vector.broadcast %cst_88 : f32 to vector<2x16xf32>
    %420 = arith.addf %419, %418 : vector<2x16xf32>
    %421 = arith.divf %419, %420 : vector<2x16xf32>
    %422 = vector.extract_strided_slice %413 {offsets = [0, 16], sizes = [2, 16], strides = [1, 1]} : vector<2x48xf32> to vector<2x16xf32>
    %423 = vector.extract_strided_slice %411 {offsets = [0, 16], sizes = [2, 16], strides = [1, 1]} : vector<2x48xf32> to vector<2x16xf32>
    %424 = arith.addf %422, %423 : vector<2x16xf32>
    %425 = arith.negf %424 : vector<2x16xf32>
    %426 = math.exp %425 : vector<2x16xf32>
    %cst_89 = arith.constant 1.000000e+00 : f32
    %427 = vector.broadcast %cst_89 : f32 to vector<2x16xf32>
    %428 = arith.addf %427, %426 : vector<2x16xf32>
    %429 = arith.divf %427, %428 : vector<2x16xf32>
    %430 = vector.extract_strided_slice %413 {offsets = [0, 32], sizes = [2, 16], strides = [1, 1]} : vector<2x48xf32> to vector<2x16xf32>
    %431 = vector.extract_strided_slice %411 {offsets = [0, 32], sizes = [2, 16], strides = [1, 1]} : vector<2x48xf32> to vector<2x16xf32>
    %432 = arith.mulf %421, %431 : vector<2x16xf32>
    %433 = arith.addf %430, %432 : vector<2x16xf32>
    %434 = math.tanh %433 : vector<2x16xf32>
    %cst_90 = arith.constant 1.000000e+00 : f32
    %435 = vector.broadcast %cst_90 : f32 to vector<2x16xf32>
    %436 = arith.subf %435, %429 : vector<2x16xf32>
    %437 = arith.mulf %436, %434 : vector<2x16xf32>
    %438 = arith.mulf %429, %369 : vector<2x16xf32>
    %439 = arith.addf %437, %438 : vector<2x16xf32>
    %c10 = arith.constant 10 : index
    %c0_91 = arith.constant 0 : index
    %c16_92 = arith.constant 16 : index
    %440 = vector.load %arg9[%c10, %c0_91, %c16_92] : memref<16x2x32xf32, #tpu.memory_space<vmem>>, vector<1x2x16xf32>
    %441 = vector.shape_cast %440 : vector<1x2x16xf32> to vector<2x16xf32>
    %442 = vector.shape_cast %439 : vector<2x16xf32> to vector<1x2x16xf32>
    tpu.vector_store %arg9[%c10, %c0_91, %c16_92], %442 {strides = array<i32>} : memref<16x2x32xf32, #tpu.memory_space<vmem>>, vector<1x2x16xf32>,
    %443 = arith.truncf %404 : vector<2x16xf32> to vector<2x16xbf16>
    %cst_93 = arith.constant dense<0.000000e+00> : vector<2x48xf32>
    %444 = tpu.matmul %443, %17, %cst_93 {dimension_numbers = #tpu.dot_dimension_numbers<[1], [0], [0], [1], [0, 0, 1, 1], [], []>} : vector<2x16xbf16>, vector<16x48xbf16>, vector<2x48xf32> -> vector<2x48xf32>
    %445 = vector.broadcast %19 : vector<1x48xf32> to vector<2x48xf32>
    %446 = arith.addf %444, %445 : vector<2x48xf32>
    %447 = vector.extract_strided_slice %9 {offsets = [6, 0, 0], sizes = [1, 2, 48], strides = [1, 1, 1]} : vector<16x2x48xf32> to vector<1x2x48xf32>
    %448 = vector.shape_cast %447 : vector<1x2x48xf32> to vector<2x48xf32>
    %449 = vector.extract_strided_slice %448 {offsets = [0, 0], sizes = [2, 16], strides = [1, 1]} : vector<2x48xf32> to vector<2x16xf32>
    %450 = vector.extract_strided_slice %446 {offsets = [0, 0], sizes = [2, 16], strides = [1, 1]} : vector<2x48xf32> to vector<2x16xf32>
    %451 = arith.addf %449, %450 : vector<2x16xf32>
    %452 = arith.negf %451 : vector<2x16xf32>
    %453 = math.exp %452 : vector<2x16xf32>
    %cst_94 = arith.constant 1.000000e+00 : f32
    %454 = vector.broadcast %cst_94 : f32 to vector<2x16xf32>
    %455 = arith.addf %454, %453 : vector<2x16xf32>
    %456 = arith.divf %454, %455 : vector<2x16xf32>
    %457 = vector.extract_strided_slice %448 {offsets = [0, 16], sizes = [2, 16], strides = [1, 1]} : vector<2x48xf32> to vector<2x16xf32>
    %458 = vector.extract_strided_slice %446 {offsets = [0, 16], sizes = [2, 16], strides = [1, 1]} : vector<2x48xf32> to vector<2x16xf32>
    %459 = arith.addf %457, %458 : vector<2x16xf32>
    %460 = arith.negf %459 : vector<2x16xf32>
    %461 = math.exp %460 : vector<2x16xf32>
    %cst_95 = arith.constant 1.000000e+00 : f32
    %462 = vector.broadcast %cst_95 : f32 to vector<2x16xf32>
    %463 = arith.addf %462, %461 : vector<2x16xf32>
    %464 = arith.divf %462, %463 : vector<2x16xf32>
    %465 = vector.extract_strided_slice %448 {offsets = [0, 32], sizes = [2, 16], strides = [1, 1]} : vector<2x48xf32> to vector<2x16xf32>
    %466 = vector.extract_strided_slice %446 {offsets = [0, 32], sizes = [2, 16], strides = [1, 1]} : vector<2x48xf32> to vector<2x16xf32>
    %467 = arith.mulf %456, %466 : vector<2x16xf32>
    %468 = arith.addf %465, %467 : vector<2x16xf32>
    %469 = math.tanh %468 : vector<2x16xf32>
    %cst_96 = arith.constant 1.000000e+00 : f32
    %470 = vector.broadcast %cst_96 : f32 to vector<2x16xf32>
    %471 = arith.subf %470, %464 : vector<2x16xf32>
    %472 = arith.mulf %471, %469 : vector<2x16xf32>
    %473 = arith.mulf %464, %404 : vector<2x16xf32>
    %474 = arith.addf %472, %473 : vector<2x16xf32>
    %c6 = arith.constant 6 : index
    %c0_97 = arith.constant 0 : index
    %c0_98 = arith.constant 0 : index
    %475 = vector.load %arg9[%c6, %c0_97, %c0_98] : memref<16x2x32xf32, #tpu.memory_space<vmem>>, vector<1x2x16xf32>
    %476 = vector.shape_cast %475 : vector<1x2x16xf32> to vector<2x16xf32>
    %477 = vector.shape_cast %474 : vector<2x16xf32> to vector<1x2x16xf32>
    tpu.vector_store %arg9[%c6, %c0_97, %c0_98], %477 {strides = array<i32>} : memref<16x2x32xf32, #tpu.memory_space<vmem>>, vector<1x2x16xf32>,
    %478 = arith.truncf %439 : vector<2x16xf32> to vector<2x16xbf16>
    %cst_99 = arith.constant dense<0.000000e+00> : vector<2x48xf32>
    %479 = tpu.matmul %478, %18, %cst_99 {dimension_numbers = #tpu.dot_dimension_numbers<[1], [0], [0], [1], [0, 0, 1, 1], [], []>} : vector<2x16xbf16>, vector<16x48xbf16>, vector<2x48xf32> -> vector<2x48xf32>
    %480 = vector.broadcast %20 : vector<1x48xf32> to vector<2x48xf32>
    %481 = arith.addf %479, %480 : vector<2x48xf32>
    %482 = vector.extract_strided_slice %16 {offsets = [9, 0, 0], sizes = [1, 2, 48], strides = [1, 1, 1]} : vector<16x2x48xf32> to vector<1x2x48xf32>
    %483 = vector.shape_cast %482 : vector<1x2x48xf32> to vector<2x48xf32>
    %484 = vector.extract_strided_slice %483 {offsets = [0, 0], sizes = [2, 16], strides = [1, 1]} : vector<2x48xf32> to vector<2x16xf32>
    %485 = vector.extract_strided_slice %481 {offsets = [0, 0], sizes = [2, 16], strides = [1, 1]} : vector<2x48xf32> to vector<2x16xf32>
    %486 = arith.addf %484, %485 : vector<2x16xf32>
    %487 = arith.negf %486 : vector<2x16xf32>
    %488 = math.exp %487 : vector<2x16xf32>
    %cst_100 = arith.constant 1.000000e+00 : f32
    %489 = vector.broadcast %cst_100 : f32 to vector<2x16xf32>
    %490 = arith.addf %489, %488 : vector<2x16xf32>
    %491 = arith.divf %489, %490 : vector<2x16xf32>
    %492 = vector.extract_strided_slice %483 {offsets = [0, 16], sizes = [2, 16], strides = [1, 1]} : vector<2x48xf32> to vector<2x16xf32>
    %493 = vector.extract_strided_slice %481 {offsets = [0, 16], sizes = [2, 16], strides = [1, 1]} : vector<2x48xf32> to vector<2x16xf32>
    %494 = arith.addf %492, %493 : vector<2x16xf32>
    %495 = arith.negf %494 : vector<2x16xf32>
    %496 = math.exp %495 : vector<2x16xf32>
    %cst_101 = arith.constant 1.000000e+00 : f32
    %497 = vector.broadcast %cst_101 : f32 to vector<2x16xf32>
    %498 = arith.addf %497, %496 : vector<2x16xf32>
    %499 = arith.divf %497, %498 : vector<2x16xf32>
    %500 = vector.extract_strided_slice %483 {offsets = [0, 32], sizes = [2, 16], strides = [1, 1]} : vector<2x48xf32> to vector<2x16xf32>
    %501 = vector.extract_strided_slice %481 {offsets = [0, 32], sizes = [2, 16], strides = [1, 1]} : vector<2x48xf32> to vector<2x16xf32>
    %502 = arith.mulf %491, %501 : vector<2x16xf32>
    %503 = arith.addf %500, %502 : vector<2x16xf32>
    %504 = math.tanh %503 : vector<2x16xf32>
    %cst_102 = arith.constant 1.000000e+00 : f32
    %505 = vector.broadcast %cst_102 : f32 to vector<2x16xf32>
    %506 = arith.subf %505, %499 : vector<2x16xf32>
    %507 = arith.mulf %506, %504 : vector<2x16xf32>
    %508 = arith.mulf %499, %439 : vector<2x16xf32>
    %509 = arith.addf %507, %508 : vector<2x16xf32>
    %c9 = arith.constant 9 : index
    %c0_103 = arith.constant 0 : index
    %c16_104 = arith.constant 16 : index
    %510 = vector.load %arg9[%c9, %c0_103, %c16_104] : memref<16x2x32xf32, #tpu.memory_space<vmem>>, vector<1x2x16xf32>
    %511 = vector.shape_cast %510 : vector<1x2x16xf32> to vector<2x16xf32>
    %512 = vector.shape_cast %509 : vector<2x16xf32> to vector<1x2x16xf32>
    tpu.vector_store %arg9[%c9, %c0_103, %c16_104], %512 {strides = array<i32>} : memref<16x2x32xf32, #tpu.memory_space<vmem>>, vector<1x2x16xf32>,
    %513 = arith.truncf %474 : vector<2x16xf32> to vector<2x16xbf16>
    %cst_105 = arith.constant dense<0.000000e+00> : vector<2x48xf32>
    %514 = tpu.matmul %513, %17, %cst_105 {dimension_numbers = #tpu.dot_dimension_numbers<[1], [0], [0], [1], [0, 0, 1, 1], [], []>} : vector<2x16xbf16>, vector<16x48xbf16>, vector<2x48xf32> -> vector<2x48xf32>
    %515 = vector.broadcast %19 : vector<1x48xf32> to vector<2x48xf32>
    %516 = arith.addf %514, %515 : vector<2x48xf32>
    %517 = vector.extract_strided_slice %9 {offsets = [7, 0, 0], sizes = [1, 2, 48], strides = [1, 1, 1]} : vector<16x2x48xf32> to vector<1x2x48xf32>
    %518 = vector.shape_cast %517 : vector<1x2x48xf32> to vector<2x48xf32>
    %519 = vector.extract_strided_slice %518 {offsets = [0, 0], sizes = [2, 16], strides = [1, 1]} : vector<2x48xf32> to vector<2x16xf32>
    %520 = vector.extract_strided_slice %516 {offsets = [0, 0], sizes = [2, 16], strides = [1, 1]} : vector<2x48xf32> to vector<2x16xf32>
    %521 = arith.addf %519, %520 : vector<2x16xf32>
    %522 = arith.negf %521 : vector<2x16xf32>
    %523 = math.exp %522 : vector<2x16xf32>
    %cst_106 = arith.constant 1.000000e+00 : f32
    %524 = vector.broadcast %cst_106 : f32 to vector<2x16xf32>
    %525 = arith.addf %524, %523 : vector<2x16xf32>
    %526 = arith.divf %524, %525 : vector<2x16xf32>
    %527 = vector.extract_strided_slice %518 {offsets = [0, 16], sizes = [2, 16], strides = [1, 1]} : vector<2x48xf32> to vector<2x16xf32>
    %528 = vector.extract_strided_slice %516 {offsets = [0, 16], sizes = [2, 16], strides = [1, 1]} : vector<2x48xf32> to vector<2x16xf32>
    %529 = arith.addf %527, %528 : vector<2x16xf32>
    %530 = arith.negf %529 : vector<2x16xf32>
    %531 = math.exp %530 : vector<2x16xf32>
    %cst_107 = arith.constant 1.000000e+00 : f32
    %532 = vector.broadcast %cst_107 : f32 to vector<2x16xf32>
    %533 = arith.addf %532, %531 : vector<2x16xf32>
    %534 = arith.divf %532, %533 : vector<2x16xf32>
    %535 = vector.extract_strided_slice %518 {offsets = [0, 32], sizes = [2, 16], strides = [1, 1]} : vector<2x48xf32> to vector<2x16xf32>
    %536 = vector.extract_strided_slice %516 {offsets = [0, 32], sizes = [2, 16], strides = [1, 1]} : vector<2x48xf32> to vector<2x16xf32>
    %537 = arith.mulf %526, %536 : vector<2x16xf32>
    %538 = arith.addf %535, %537 : vector<2x16xf32>
    %539 = math.tanh %538 : vector<2x16xf32>
    %cst_108 = arith.constant 1.000000e+00 : f32
    %540 = vector.broadcast %cst_108 : f32 to vector<2x16xf32>
    %541 = arith.subf %540, %534 : vector<2x16xf32>
    %542 = arith.mulf %541, %539 : vector<2x16xf32>
    %543 = arith.mulf %534, %474 : vector<2x16xf32>
    %544 = arith.addf %542, %543 : vector<2x16xf32>
    %c7 = arith.constant 7 : index
    %c0_109 = arith.constant 0 : index
    %c0_110 = arith.constant 0 : index
    %545 = vector.load %arg9[%c7, %c0_109, %c0_110] : memref<16x2x32xf32, #tpu.memory_space<vmem>>, vector<1x2x16xf32>
    %546 = vector.shape_cast %545 : vector<1x2x16xf32> to vector<2x16xf32>
    %547 = vector.shape_cast %544 : vector<2x16xf32> to vector<1x2x16xf32>
    tpu.vector_store %arg9[%c7, %c0_109, %c0_110], %547 {strides = array<i32>} : memref<16x2x32xf32, #tpu.memory_space<vmem>>, vector<1x2x16xf32>,
    %548 = arith.truncf %509 : vector<2x16xf32> to vector<2x16xbf16>
    %cst_111 = arith.constant dense<0.000000e+00> : vector<2x48xf32>
    %549 = tpu.matmul %548, %18, %cst_111 {dimension_numbers = #tpu.dot_dimension_numbers<[1], [0], [0], [1], [0, 0, 1, 1], [], []>} : vector<2x16xbf16>, vector<16x48xbf16>, vector<2x48xf32> -> vector<2x48xf32>
    %550 = vector.broadcast %20 : vector<1x48xf32> to vector<2x48xf32>
    %551 = arith.addf %549, %550 : vector<2x48xf32>
    %552 = vector.extract_strided_slice %16 {offsets = [8, 0, 0], sizes = [1, 2, 48], strides = [1, 1, 1]} : vector<16x2x48xf32> to vector<1x2x48xf32>
    %553 = vector.shape_cast %552 : vector<1x2x48xf32> to vector<2x48xf32>
    %554 = vector.extract_strided_slice %553 {offsets = [0, 0], sizes = [2, 16], strides = [1, 1]} : vector<2x48xf32> to vector<2x16xf32>
    %555 = vector.extract_strided_slice %551 {offsets = [0, 0], sizes = [2, 16], strides = [1, 1]} : vector<2x48xf32> to vector<2x16xf32>
    %556 = arith.addf %554, %555 : vector<2x16xf32>
    %557 = arith.negf %556 : vector<2x16xf32>
    %558 = math.exp %557 : vector<2x16xf32>
    %cst_112 = arith.constant 1.000000e+00 : f32
    %559 = vector.broadcast %cst_112 : f32 to vector<2x16xf32>
    %560 = arith.addf %559, %558 : vector<2x16xf32>
    %561 = arith.divf %559, %560 : vector<2x16xf32>
    %562 = vector.extract_strided_slice %553 {offsets = [0, 16], sizes = [2, 16], strides = [1, 1]} : vector<2x48xf32> to vector<2x16xf32>
    %563 = vector.extract_strided_slice %551 {offsets = [0, 16], sizes = [2, 16], strides = [1, 1]} : vector<2x48xf32> to vector<2x16xf32>
    %564 = arith.addf %562, %563 : vector<2x16xf32>
    %565 = arith.negf %564 : vector<2x16xf32>
    %566 = math.exp %565 : vector<2x16xf32>
    %cst_113 = arith.constant 1.000000e+00 : f32
    %567 = vector.broadcast %cst_113 : f32 to vector<2x16xf32>
    %568 = arith.addf %567, %566 : vector<2x16xf32>
    %569 = arith.divf %567, %568 : vector<2x16xf32>
    %570 = vector.extract_strided_slice %553 {offsets = [0, 32], sizes = [2, 16], strides = [1, 1]} : vector<2x48xf32> to vector<2x16xf32>
    %571 = vector.extract_strided_slice %551 {offsets = [0, 32], sizes = [2, 16], strides = [1, 1]} : vector<2x48xf32> to vector<2x16xf32>
    %572 = arith.mulf %561, %571 : vector<2x16xf32>
    %573 = arith.addf %570, %572 : vector<2x16xf32>
    %574 = math.tanh %573 : vector<2x16xf32>
    %cst_114 = arith.constant 1.000000e+00 : f32
    %575 = vector.broadcast %cst_114 : f32 to vector<2x16xf32>
    %576 = arith.subf %575, %569 : vector<2x16xf32>
    %577 = arith.mulf %576, %574 : vector<2x16xf32>
    %578 = arith.mulf %569, %509 : vector<2x16xf32>
    %579 = arith.addf %577, %578 : vector<2x16xf32>
    %c8 = arith.constant 8 : index
    %c0_115 = arith.constant 0 : index
    %c16_116 = arith.constant 16 : index
    %580 = vector.load %arg9[%c8, %c0_115, %c16_116] : memref<16x2x32xf32, #tpu.memory_space<vmem>>, vector<1x2x16xf32>
    %581 = vector.shape_cast %580 : vector<1x2x16xf32> to vector<2x16xf32>
    %582 = vector.shape_cast %579 : vector<2x16xf32> to vector<1x2x16xf32>
    tpu.vector_store %arg9[%c8, %c0_115, %c16_116], %582 {strides = array<i32>} : memref<16x2x32xf32, #tpu.memory_space<vmem>>, vector<1x2x16xf32>,
    %583 = arith.truncf %544 : vector<2x16xf32> to vector<2x16xbf16>
    %cst_117 = arith.constant dense<0.000000e+00> : vector<2x48xf32>
    %584 = tpu.matmul %583, %17, %cst_117 {dimension_numbers = #tpu.dot_dimension_numbers<[1], [0], [0], [1], [0, 0, 1, 1], [], []>} : vector<2x16xbf16>, vector<16x48xbf16>, vector<2x48xf32> -> vector<2x48xf32>
    %585 = vector.broadcast %19 : vector<1x48xf32> to vector<2x48xf32>
    %586 = arith.addf %584, %585 : vector<2x48xf32>
    %587 = vector.extract_strided_slice %9 {offsets = [8, 0, 0], sizes = [1, 2, 48], strides = [1, 1, 1]} : vector<16x2x48xf32> to vector<1x2x48xf32>
    %588 = vector.shape_cast %587 : vector<1x2x48xf32> to vector<2x48xf32>
    %589 = vector.extract_strided_slice %588 {offsets = [0, 0], sizes = [2, 16], strides = [1, 1]} : vector<2x48xf32> to vector<2x16xf32>
    %590 = vector.extract_strided_slice %586 {offsets = [0, 0], sizes = [2, 16], strides = [1, 1]} : vector<2x48xf32> to vector<2x16xf32>
    %591 = arith.addf %589, %590 : vector<2x16xf32>
    %592 = arith.negf %591 : vector<2x16xf32>
    %593 = math.exp %592 : vector<2x16xf32>
    %cst_118 = arith.constant 1.000000e+00 : f32
    %594 = vector.broadcast %cst_118 : f32 to vector<2x16xf32>
    %595 = arith.addf %594, %593 : vector<2x16xf32>
    %596 = arith.divf %594, %595 : vector<2x16xf32>
    %597 = vector.extract_strided_slice %588 {offsets = [0, 16], sizes = [2, 16], strides = [1, 1]} : vector<2x48xf32> to vector<2x16xf32>
    %598 = vector.extract_strided_slice %586 {offsets = [0, 16], sizes = [2, 16], strides = [1, 1]} : vector<2x48xf32> to vector<2x16xf32>
    %599 = arith.addf %597, %598 : vector<2x16xf32>
    %600 = arith.negf %599 : vector<2x16xf32>
    %601 = math.exp %600 : vector<2x16xf32>
    %cst_119 = arith.constant 1.000000e+00 : f32
    %602 = vector.broadcast %cst_119 : f32 to vector<2x16xf32>
    %603 = arith.addf %602, %601 : vector<2x16xf32>
    %604 = arith.divf %602, %603 : vector<2x16xf32>
    %605 = vector.extract_strided_slice %588 {offsets = [0, 32], sizes = [2, 16], strides = [1, 1]} : vector<2x48xf32> to vector<2x16xf32>
    %606 = vector.extract_strided_slice %586 {offsets = [0, 32], sizes = [2, 16], strides = [1, 1]} : vector<2x48xf32> to vector<2x16xf32>
    %607 = arith.mulf %596, %606 : vector<2x16xf32>
    %608 = arith.addf %605, %607 : vector<2x16xf32>
    %609 = math.tanh %608 : vector<2x16xf32>
    %cst_120 = arith.constant 1.000000e+00 : f32
    %610 = vector.broadcast %cst_120 : f32 to vector<2x16xf32>
    %611 = arith.subf %610, %604 : vector<2x16xf32>
    %612 = arith.mulf %611, %609 : vector<2x16xf32>
    %613 = arith.mulf %604, %544 : vector<2x16xf32>
    %614 = arith.addf %612, %613 : vector<2x16xf32>
    %c8_121 = arith.constant 8 : index
    %c0_122 = arith.constant 0 : index
    %c0_123 = arith.constant 0 : index
    %615 = vector.load %arg9[%c8_121, %c0_122, %c0_123] : memref<16x2x32xf32, #tpu.memory_space<vmem>>, vector<1x2x16xf32>
    %616 = vector.shape_cast %615 : vector<1x2x16xf32> to vector<2x16xf32>
    %617 = vector.shape_cast %614 : vector<2x16xf32> to vector<1x2x16xf32>
    tpu.vector_store %arg9[%c8_121, %c0_122, %c0_123], %617 {strides = array<i32>} : memref<16x2x32xf32, #tpu.memory_space<vmem>>, vector<1x2x16xf32>,
    %618 = arith.truncf %579 : vector<2x16xf32> to vector<2x16xbf16>
    %cst_124 = arith.constant dense<0.000000e+00> : vector<2x48xf32>
    %619 = tpu.matmul %618, %18, %cst_124 {dimension_numbers = #tpu.dot_dimension_numbers<[1], [0], [0], [1], [0, 0, 1, 1], [], []>} : vector<2x16xbf16>, vector<16x48xbf16>, vector<2x48xf32> -> vector<2x48xf32>
    %620 = vector.broadcast %20 : vector<1x48xf32> to vector<2x48xf32>
    %621 = arith.addf %619, %620 : vector<2x48xf32>
    %622 = vector.extract_strided_slice %16 {offsets = [7, 0, 0], sizes = [1, 2, 48], strides = [1, 1, 1]} : vector<16x2x48xf32> to vector<1x2x48xf32>
    %623 = vector.shape_cast %622 : vector<1x2x48xf32> to vector<2x48xf32>
    %624 = vector.extract_strided_slice %623 {offsets = [0, 0], sizes = [2, 16], strides = [1, 1]} : vector<2x48xf32> to vector<2x16xf32>
    %625 = vector.extract_strided_slice %621 {offsets = [0, 0], sizes = [2, 16], strides = [1, 1]} : vector<2x48xf32> to vector<2x16xf32>
    %626 = arith.addf %624, %625 : vector<2x16xf32>
    %627 = arith.negf %626 : vector<2x16xf32>
    %628 = math.exp %627 : vector<2x16xf32>
    %cst_125 = arith.constant 1.000000e+00 : f32
    %629 = vector.broadcast %cst_125 : f32 to vector<2x16xf32>
    %630 = arith.addf %629, %628 : vector<2x16xf32>
    %631 = arith.divf %629, %630 : vector<2x16xf32>
    %632 = vector.extract_strided_slice %623 {offsets = [0, 16], sizes = [2, 16], strides = [1, 1]} : vector<2x48xf32> to vector<2x16xf32>
    %633 = vector.extract_strided_slice %621 {offsets = [0, 16], sizes = [2, 16], strides = [1, 1]} : vector<2x48xf32> to vector<2x16xf32>
    %634 = arith.addf %632, %633 : vector<2x16xf32>
    %635 = arith.negf %634 : vector<2x16xf32>
    %636 = math.exp %635 : vector<2x16xf32>
    %cst_126 = arith.constant 1.000000e+00 : f32
    %637 = vector.broadcast %cst_126 : f32 to vector<2x16xf32>
    %638 = arith.addf %637, %636 : vector<2x16xf32>
    %639 = arith.divf %637, %638 : vector<2x16xf32>
    %640 = vector.extract_strided_slice %623 {offsets = [0, 32], sizes = [2, 16], strides = [1, 1]} : vector<2x48xf32> to vector<2x16xf32>
    %641 = vector.extract_strided_slice %621 {offsets = [0, 32], sizes = [2, 16], strides = [1, 1]} : vector<2x48xf32> to vector<2x16xf32>
    %642 = arith.mulf %631, %641 : vector<2x16xf32>
    %643 = arith.addf %640, %642 : vector<2x16xf32>
    %644 = math.tanh %643 : vector<2x16xf32>
    %cst_127 = arith.constant 1.000000e+00 : f32
    %645 = vector.broadcast %cst_127 : f32 to vector<2x16xf32>
    %646 = arith.subf %645, %639 : vector<2x16xf32>
    %647 = arith.mulf %646, %644 : vector<2x16xf32>
    %648 = arith.mulf %639, %579 : vector<2x16xf32>
    %649 = arith.addf %647, %648 : vector<2x16xf32>
    %c7_128 = arith.constant 7 : index
    %c0_129 = arith.constant 0 : index
    %c16_130 = arith.constant 16 : index
    %650 = vector.load %arg9[%c7_128, %c0_129, %c16_130] : memref<16x2x32xf32, #tpu.memory_space<vmem>>, vector<1x2x16xf32>
    %651 = vector.shape_cast %650 : vector<1x2x16xf32> to vector<2x16xf32>
    %652 = vector.shape_cast %649 : vector<2x16xf32> to vector<1x2x16xf32>
    tpu.vector_store %arg9[%c7_128, %c0_129, %c16_130], %652 {strides = array<i32>} : memref<16x2x32xf32, #tpu.memory_space<vmem>>, vector<1x2x16xf32>,
    %653 = arith.truncf %614 : vector<2x16xf32> to vector<2x16xbf16>
    %cst_131 = arith.constant dense<0.000000e+00> : vector<2x48xf32>
    %654 = tpu.matmul %653, %17, %cst_131 {dimension_numbers = #tpu.dot_dimension_numbers<[1], [0], [0], [1], [0, 0, 1, 1], [], []>} : vector<2x16xbf16>, vector<16x48xbf16>, vector<2x48xf32> -> vector<2x48xf32>
    %655 = vector.broadcast %19 : vector<1x48xf32> to vector<2x48xf32>
    %656 = arith.addf %654, %655 : vector<2x48xf32>
    %657 = vector.extract_strided_slice %9 {offsets = [9, 0, 0], sizes = [1, 2, 48], strides = [1, 1, 1]} : vector<16x2x48xf32> to vector<1x2x48xf32>
    %658 = vector.shape_cast %657 : vector<1x2x48xf32> to vector<2x48xf32>
    %659 = vector.extract_strided_slice %658 {offsets = [0, 0], sizes = [2, 16], strides = [1, 1]} : vector<2x48xf32> to vector<2x16xf32>
    %660 = vector.extract_strided_slice %656 {offsets = [0, 0], sizes = [2, 16], strides = [1, 1]} : vector<2x48xf32> to vector<2x16xf32>
    %661 = arith.addf %659, %660 : vector<2x16xf32>
    %662 = arith.negf %661 : vector<2x16xf32>
    %663 = math.exp %662 : vector<2x16xf32>
    %cst_132 = arith.constant 1.000000e+00 : f32
    %664 = vector.broadcast %cst_132 : f32 to vector<2x16xf32>
    %665 = arith.addf %664, %663 : vector<2x16xf32>
    %666 = arith.divf %664, %665 : vector<2x16xf32>
    %667 = vector.extract_strided_slice %658 {offsets = [0, 16], sizes = [2, 16], strides = [1, 1]} : vector<2x48xf32> to vector<2x16xf32>
    %668 = vector.extract_strided_slice %656 {offsets = [0, 16], sizes = [2, 16], strides = [1, 1]} : vector<2x48xf32> to vector<2x16xf32>
    %669 = arith.addf %667, %668 : vector<2x16xf32>
    %670 = arith.negf %669 : vector<2x16xf32>
    %671 = math.exp %670 : vector<2x16xf32>
    %cst_133 = arith.constant 1.000000e+00 : f32
    %672 = vector.broadcast %cst_133 : f32 to vector<2x16xf32>
    %673 = arith.addf %672, %671 : vector<2x16xf32>
    %674 = arith.divf %672, %673 : vector<2x16xf32>
    %675 = vector.extract_strided_slice %658 {offsets = [0, 32], sizes = [2, 16], strides = [1, 1]} : vector<2x48xf32> to vector<2x16xf32>
    %676 = vector.extract_strided_slice %656 {offsets = [0, 32], sizes = [2, 16], strides = [1, 1]} : vector<2x48xf32> to vector<2x16xf32>
    %677 = arith.mulf %666, %676 : vector<2x16xf32>
    %678 = arith.addf %675, %677 : vector<2x16xf32>
    %679 = math.tanh %678 : vector<2x16xf32>
    %cst_134 = arith.constant 1.000000e+00 : f32
    %680 = vector.broadcast %cst_134 : f32 to vector<2x16xf32>
    %681 = arith.subf %680, %674 : vector<2x16xf32>
    %682 = arith.mulf %681, %679 : vector<2x16xf32>
    %683 = arith.mulf %674, %614 : vector<2x16xf32>
    %684 = arith.addf %682, %683 : vector<2x16xf32>
    %c9_135 = arith.constant 9 : index
    %c0_136 = arith.constant 0 : index
    %c0_137 = arith.constant 0 : index
    %685 = vector.load %arg9[%c9_135, %c0_136, %c0_137] : memref<16x2x32xf32, #tpu.memory_space<vmem>>, vector<1x2x16xf32>
    %686 = vector.shape_cast %685 : vector<1x2x16xf32> to vector<2x16xf32>
    %687 = vector.shape_cast %684 : vector<2x16xf32> to vector<1x2x16xf32>
    tpu.vector_store %arg9[%c9_135, %c0_136, %c0_137], %687 {strides = array<i32>} : memref<16x2x32xf32, #tpu.memory_space<vmem>>, vector<1x2x16xf32>,
    %688 = arith.truncf %649 : vector<2x16xf32> to vector<2x16xbf16>
    %cst_138 = arith.constant dense<0.000000e+00> : vector<2x48xf32>
    %689 = tpu.matmul %688, %18, %cst_138 {dimension_numbers = #tpu.dot_dimension_numbers<[1], [0], [0], [1], [0, 0, 1, 1], [], []>} : vector<2x16xbf16>, vector<16x48xbf16>, vector<2x48xf32> -> vector<2x48xf32>
    %690 = vector.broadcast %20 : vector<1x48xf32> to vector<2x48xf32>
    %691 = arith.addf %689, %690 : vector<2x48xf32>
    %692 = vector.extract_strided_slice %16 {offsets = [6, 0, 0], sizes = [1, 2, 48], strides = [1, 1, 1]} : vector<16x2x48xf32> to vector<1x2x48xf32>
    %693 = vector.shape_cast %692 : vector<1x2x48xf32> to vector<2x48xf32>
    %694 = vector.extract_strided_slice %693 {offsets = [0, 0], sizes = [2, 16], strides = [1, 1]} : vector<2x48xf32> to vector<2x16xf32>
    %695 = vector.extract_strided_slice %691 {offsets = [0, 0], sizes = [2, 16], strides = [1, 1]} : vector<2x48xf32> to vector<2x16xf32>
    %696 = arith.addf %694, %695 : vector<2x16xf32>
    %697 = arith.negf %696 : vector<2x16xf32>
    %698 = math.exp %697 : vector<2x16xf32>
    %cst_139 = arith.constant 1.000000e+00 : f32
    %699 = vector.broadcast %cst_139 : f32 to vector<2x16xf32>
    %700 = arith.addf %699, %698 : vector<2x16xf32>
    %701 = arith.divf %699, %700 : vector<2x16xf32>
    %702 = vector.extract_strided_slice %693 {offsets = [0, 16], sizes = [2, 16], strides = [1, 1]} : vector<2x48xf32> to vector<2x16xf32>
    %703 = vector.extract_strided_slice %691 {offsets = [0, 16], sizes = [2, 16], strides = [1, 1]} : vector<2x48xf32> to vector<2x16xf32>
    %704 = arith.addf %702, %703 : vector<2x16xf32>
    %705 = arith.negf %704 : vector<2x16xf32>
    %706 = math.exp %705 : vector<2x16xf32>
    %cst_140 = arith.constant 1.000000e+00 : f32
    %707 = vector.broadcast %cst_140 : f32 to vector<2x16xf32>
    %708 = arith.addf %707, %706 : vector<2x16xf32>
    %709 = arith.divf %707, %708 : vector<2x16xf32>
    %710 = vector.extract_strided_slice %693 {offsets = [0, 32], sizes = [2, 16], strides = [1, 1]} : vector<2x48xf32> to vector<2x16xf32>
    %711 = vector.extract_strided_slice %691 {offsets = [0, 32], sizes = [2, 16], strides = [1, 1]} : vector<2x48xf32> to vector<2x16xf32>
    %712 = arith.mulf %701, %711 : vector<2x16xf32>
    %713 = arith.addf %710, %712 : vector<2x16xf32>
    %714 = math.tanh %713 : vector<2x16xf32>
    %cst_141 = arith.constant 1.000000e+00 : f32
    %715 = vector.broadcast %cst_141 : f32 to vector<2x16xf32>
    %716 = arith.subf %715, %709 : vector<2x16xf32>
    %717 = arith.mulf %716, %714 : vector<2x16xf32>
    %718 = arith.mulf %709, %649 : vector<2x16xf32>
    %719 = arith.addf %717, %718 : vector<2x16xf32>
    %c6_142 = arith.constant 6 : index
    %c0_143 = arith.constant 0 : index
    %c16_144 = arith.constant 16 : index
    %720 = vector.load %arg9[%c6_142, %c0_143, %c16_144] : memref<16x2x32xf32, #tpu.memory_space<vmem>>, vector<1x2x16xf32>
    %721 = vector.shape_cast %720 : vector<1x2x16xf32> to vector<2x16xf32>
    %722 = vector.shape_cast %719 : vector<2x16xf32> to vector<1x2x16xf32>
    tpu.vector_store %arg9[%c6_142, %c0_143, %c16_144], %722 {strides = array<i32>} : memref<16x2x32xf32, #tpu.memory_space<vmem>>, vector<1x2x16xf32>,
    %723 = arith.truncf %684 : vector<2x16xf32> to vector<2x16xbf16>
    %cst_145 = arith.constant dense<0.000000e+00> : vector<2x48xf32>
    %724 = tpu.matmul %723, %17, %cst_145 {dimension_numbers = #tpu.dot_dimension_numbers<[1], [0], [0], [1], [0, 0, 1, 1], [], []>} : vector<2x16xbf16>, vector<16x48xbf16>, vector<2x48xf32> -> vector<2x48xf32>
    %725 = vector.broadcast %19 : vector<1x48xf32> to vector<2x48xf32>
    %726 = arith.addf %724, %725 : vector<2x48xf32>
    %727 = vector.extract_strided_slice %9 {offsets = [10, 0, 0], sizes = [1, 2, 48], strides = [1, 1, 1]} : vector<16x2x48xf32> to vector<1x2x48xf32>
    %728 = vector.shape_cast %727 : vector<1x2x48xf32> to vector<2x48xf32>
    %729 = vector.extract_strided_slice %728 {offsets = [0, 0], sizes = [2, 16], strides = [1, 1]} : vector<2x48xf32> to vector<2x16xf32>
    %730 = vector.extract_strided_slice %726 {offsets = [0, 0], sizes = [2, 16], strides = [1, 1]} : vector<2x48xf32> to vector<2x16xf32>
    %731 = arith.addf %729, %730 : vector<2x16xf32>
    %732 = arith.negf %731 : vector<2x16xf32>
    %733 = math.exp %732 : vector<2x16xf32>
    %cst_146 = arith.constant 1.000000e+00 : f32
    %734 = vector.broadcast %cst_146 : f32 to vector<2x16xf32>
    %735 = arith.addf %734, %733 : vector<2x16xf32>
    %736 = arith.divf %734, %735 : vector<2x16xf32>
    %737 = vector.extract_strided_slice %728 {offsets = [0, 16], sizes = [2, 16], strides = [1, 1]} : vector<2x48xf32> to vector<2x16xf32>
    %738 = vector.extract_strided_slice %726 {offsets = [0, 16], sizes = [2, 16], strides = [1, 1]} : vector<2x48xf32> to vector<2x16xf32>
    %739 = arith.addf %737, %738 : vector<2x16xf32>
    %740 = arith.negf %739 : vector<2x16xf32>
    %741 = math.exp %740 : vector<2x16xf32>
    %cst_147 = arith.constant 1.000000e+00 : f32
    %742 = vector.broadcast %cst_147 : f32 to vector<2x16xf32>
    %743 = arith.addf %742, %741 : vector<2x16xf32>
    %744 = arith.divf %742, %743 : vector<2x16xf32>
    %745 = vector.extract_strided_slice %728 {offsets = [0, 32], sizes = [2, 16], strides = [1, 1]} : vector<2x48xf32> to vector<2x16xf32>
    %746 = vector.extract_strided_slice %726 {offsets = [0, 32], sizes = [2, 16], strides = [1, 1]} : vector<2x48xf32> to vector<2x16xf32>
    %747 = arith.mulf %736, %746 : vector<2x16xf32>
    %748 = arith.addf %745, %747 : vector<2x16xf32>
    %749 = math.tanh %748 : vector<2x16xf32>
    %cst_148 = arith.constant 1.000000e+00 : f32
    %750 = vector.broadcast %cst_148 : f32 to vector<2x16xf32>
    %751 = arith.subf %750, %744 : vector<2x16xf32>
    %752 = arith.mulf %751, %749 : vector<2x16xf32>
    %753 = arith.mulf %744, %684 : vector<2x16xf32>
    %754 = arith.addf %752, %753 : vector<2x16xf32>
    %c10_149 = arith.constant 10 : index
    %c0_150 = arith.constant 0 : index
    %c0_151 = arith.constant 0 : index
    %755 = vector.load %arg9[%c10_149, %c0_150, %c0_151] : memref<16x2x32xf32, #tpu.memory_space<vmem>>, vector<1x2x16xf32>
    %756 = vector.shape_cast %755 : vector<1x2x16xf32> to vector<2x16xf32>
    %757 = vector.shape_cast %754 : vector<2x16xf32> to vector<1x2x16xf32>
    tpu.vector_store %arg9[%c10_149, %c0_150, %c0_151], %757 {strides = array<i32>} : memref<16x2x32xf32, #tpu.memory_space<vmem>>, vector<1x2x16xf32>,
    %758 = arith.truncf %719 : vector<2x16xf32> to vector<2x16xbf16>
    %cst_152 = arith.constant dense<0.000000e+00> : vector<2x48xf32>
    %759 = tpu.matmul %758, %18, %cst_152 {dimension_numbers = #tpu.dot_dimension_numbers<[1], [0], [0], [1], [0, 0, 1, 1], [], []>} : vector<2x16xbf16>, vector<16x48xbf16>, vector<2x48xf32> -> vector<2x48xf32>
    %760 = vector.broadcast %20 : vector<1x48xf32> to vector<2x48xf32>
    %761 = arith.addf %759, %760 : vector<2x48xf32>
    %762 = vector.extract_strided_slice %16 {offsets = [5, 0, 0], sizes = [1, 2, 48], strides = [1, 1, 1]} : vector<16x2x48xf32> to vector<1x2x48xf32>
    %763 = vector.shape_cast %762 : vector<1x2x48xf32> to vector<2x48xf32>
    %764 = vector.extract_strided_slice %763 {offsets = [0, 0], sizes = [2, 16], strides = [1, 1]} : vector<2x48xf32> to vector<2x16xf32>
    %765 = vector.extract_strided_slice %761 {offsets = [0, 0], sizes = [2, 16], strides = [1, 1]} : vector<2x48xf32> to vector<2x16xf32>
    %766 = arith.addf %764, %765 : vector<2x16xf32>
    %767 = arith.negf %766 : vector<2x16xf32>
    %768 = math.exp %767 : vector<2x16xf32>
    %cst_153 = arith.constant 1.000000e+00 : f32
    %769 = vector.broadcast %cst_153 : f32 to vector<2x16xf32>
    %770 = arith.addf %769, %768 : vector<2x16xf32>
    %771 = arith.divf %769, %770 : vector<2x16xf32>
    %772 = vector.extract_strided_slice %763 {offsets = [0, 16], sizes = [2, 16], strides = [1, 1]} : vector<2x48xf32> to vector<2x16xf32>
    %773 = vector.extract_strided_slice %761 {offsets = [0, 16], sizes = [2, 16], strides = [1, 1]} : vector<2x48xf32> to vector<2x16xf32>
    %774 = arith.addf %772, %773 : vector<2x16xf32>
    %775 = arith.negf %774 : vector<2x16xf32>
    %776 = math.exp %775 : vector<2x16xf32>
    %cst_154 = arith.constant 1.000000e+00 : f32
    %777 = vector.broadcast %cst_154 : f32 to vector<2x16xf32>
    %778 = arith.addf %777, %776 : vector<2x16xf32>
    %779 = arith.divf %777, %778 : vector<2x16xf32>
    %780 = vector.extract_strided_slice %763 {offsets = [0, 32], sizes = [2, 16], strides = [1, 1]} : vector<2x48xf32> to vector<2x16xf32>
    %781 = vector.extract_strided_slice %761 {offsets = [0, 32], sizes = [2, 16], strides = [1, 1]} : vector<2x48xf32> to vector<2x16xf32>
    %782 = arith.mulf %771, %781 : vector<2x16xf32>
    %783 = arith.addf %780, %782 : vector<2x16xf32>
    %784 = math.tanh %783 : vector<2x16xf32>
    %cst_155 = arith.constant 1.000000e+00 : f32
    %785 = vector.broadcast %cst_155 : f32 to vector<2x16xf32>
    %786 = arith.subf %785, %779 : vector<2x16xf32>
    %787 = arith.mulf %786, %784 : vector<2x16xf32>
    %788 = arith.mulf %779, %719 : vector<2x16xf32>
    %789 = arith.addf %787, %788 : vector<2x16xf32>
    %c5_156 = arith.constant 5 : index
    %c0_157 = arith.constant 0 : index
    %c16_158 = arith.constant 16 : index
    %790 = vector.load %arg9[%c5_156, %c0_157, %c16_158] : memref<16x2x32xf32, #tpu.memory_space<vmem>>, vector<1x2x16xf32>
    %791 = vector.shape_cast %790 : vector<1x2x16xf32> to vector<2x16xf32>
    %792 = vector.shape_cast %789 : vector<2x16xf32> to vector<1x2x16xf32>
    tpu.vector_store %arg9[%c5_156, %c0_157, %c16_158], %792 {strides = array<i32>} : memref<16x2x32xf32, #tpu.memory_space<vmem>>, vector<1x2x16xf32>,
    %793 = arith.truncf %754 : vector<2x16xf32> to vector<2x16xbf16>
    %cst_159 = arith.constant dense<0.000000e+00> : vector<2x48xf32>
    %794 = tpu.matmul %793, %17, %cst_159 {dimension_numbers = #tpu.dot_dimension_numbers<[1], [0], [0], [1], [0, 0, 1, 1], [], []>} : vector<2x16xbf16>, vector<16x48xbf16>, vector<2x48xf32> -> vector<2x48xf32>
    %795 = vector.broadcast %19 : vector<1x48xf32> to vector<2x48xf32>
    %796 = arith.addf %794, %795 : vector<2x48xf32>
    %797 = vector.extract_strided_slice %9 {offsets = [11, 0, 0], sizes = [1, 2, 48], strides = [1, 1, 1]} : vector<16x2x48xf32> to vector<1x2x48xf32>
    %798 = vector.shape_cast %797 : vector<1x2x48xf32> to vector<2x48xf32>
    %799 = vector.extract_strided_slice %798 {offsets = [0, 0], sizes = [2, 16], strides = [1, 1]} : vector<2x48xf32> to vector<2x16xf32>
    %800 = vector.extract_strided_slice %796 {offsets = [0, 0], sizes = [2, 16], strides = [1, 1]} : vector<2x48xf32> to vector<2x16xf32>
    %801 = arith.addf %799, %800 : vector<2x16xf32>
    %802 = arith.negf %801 : vector<2x16xf32>
    %803 = math.exp %802 : vector<2x16xf32>
    %cst_160 = arith.constant 1.000000e+00 : f32
    %804 = vector.broadcast %cst_160 : f32 to vector<2x16xf32>
    %805 = arith.addf %804, %803 : vector<2x16xf32>
    %806 = arith.divf %804, %805 : vector<2x16xf32>
    %807 = vector.extract_strided_slice %798 {offsets = [0, 16], sizes = [2, 16], strides = [1, 1]} : vector<2x48xf32> to vector<2x16xf32>
    %808 = vector.extract_strided_slice %796 {offsets = [0, 16], sizes = [2, 16], strides = [1, 1]} : vector<2x48xf32> to vector<2x16xf32>
    %809 = arith.addf %807, %808 : vector<2x16xf32>
    %810 = arith.negf %809 : vector<2x16xf32>
    %811 = math.exp %810 : vector<2x16xf32>
    %cst_161 = arith.constant 1.000000e+00 : f32
    %812 = vector.broadcast %cst_161 : f32 to vector<2x16xf32>
    %813 = arith.addf %812, %811 : vector<2x16xf32>
    %814 = arith.divf %812, %813 : vector<2x16xf32>
    %815 = vector.extract_strided_slice %798 {offsets = [0, 32], sizes = [2, 16], strides = [1, 1]} : vector<2x48xf32> to vector<2x16xf32>
    %816 = vector.extract_strided_slice %796 {offsets = [0, 32], sizes = [2, 16], strides = [1, 1]} : vector<2x48xf32> to vector<2x16xf32>
    %817 = arith.mulf %806, %816 : vector<2x16xf32>
    %818 = arith.addf %815, %817 : vector<2x16xf32>
    %819 = math.tanh %818 : vector<2x16xf32>
    %cst_162 = arith.constant 1.000000e+00 : f32
    %820 = vector.broadcast %cst_162 : f32 to vector<2x16xf32>
    %821 = arith.subf %820, %814 : vector<2x16xf32>
    %822 = arith.mulf %821, %819 : vector<2x16xf32>
    %823 = arith.mulf %814, %754 : vector<2x16xf32>
    %824 = arith.addf %822, %823 : vector<2x16xf32>
    %c11_163 = arith.constant 11 : index
    %c0_164 = arith.constant 0 : index
    %c0_165 = arith.constant 0 : index
    %825 = vector.load %arg9[%c11_163, %c0_164, %c0_165] : memref<16x2x32xf32, #tpu.memory_space<vmem>>, vector<1x2x16xf32>
    %826 = vector.shape_cast %825 : vector<1x2x16xf32> to vector<2x16xf32>
    %827 = vector.shape_cast %824 : vector<2x16xf32> to vector<1x2x16xf32>
    tpu.vector_store %arg9[%c11_163, %c0_164, %c0_165], %827 {strides = array<i32>} : memref<16x2x32xf32, #tpu.memory_space<vmem>>, vector<1x2x16xf32>,
    %828 = arith.truncf %789 : vector<2x16xf32> to vector<2x16xbf16>
    %cst_166 = arith.constant dense<0.000000e+00> : vector<2x48xf32>
    %829 = tpu.matmul %828, %18, %cst_166 {dimension_numbers = #tpu.dot_dimension_numbers<[1], [0], [0], [1], [0, 0, 1, 1], [], []>} : vector<2x16xbf16>, vector<16x48xbf16>, vector<2x48xf32> -> vector<2x48xf32>
    %830 = vector.broadcast %20 : vector<1x48xf32> to vector<2x48xf32>
    %831 = arith.addf %829, %830 : vector<2x48xf32>
    %832 = vector.extract_strided_slice %16 {offsets = [4, 0, 0], sizes = [1, 2, 48], strides = [1, 1, 1]} : vector<16x2x48xf32> to vector<1x2x48xf32>
    %833 = vector.shape_cast %832 : vector<1x2x48xf32> to vector<2x48xf32>
    %834 = vector.extract_strided_slice %833 {offsets = [0, 0], sizes = [2, 16], strides = [1, 1]} : vector<2x48xf32> to vector<2x16xf32>
    %835 = vector.extract_strided_slice %831 {offsets = [0, 0], sizes = [2, 16], strides = [1, 1]} : vector<2x48xf32> to vector<2x16xf32>
    %836 = arith.addf %834, %835 : vector<2x16xf32>
    %837 = arith.negf %836 : vector<2x16xf32>
    %838 = math.exp %837 : vector<2x16xf32>
    %cst_167 = arith.constant 1.000000e+00 : f32
    %839 = vector.broadcast %cst_167 : f32 to vector<2x16xf32>
    %840 = arith.addf %839, %838 : vector<2x16xf32>
    %841 = arith.divf %839, %840 : vector<2x16xf32>
    %842 = vector.extract_strided_slice %833 {offsets = [0, 16], sizes = [2, 16], strides = [1, 1]} : vector<2x48xf32> to vector<2x16xf32>
    %843 = vector.extract_strided_slice %831 {offsets = [0, 16], sizes = [2, 16], strides = [1, 1]} : vector<2x48xf32> to vector<2x16xf32>
    %844 = arith.addf %842, %843 : vector<2x16xf32>
    %845 = arith.negf %844 : vector<2x16xf32>
    %846 = math.exp %845 : vector<2x16xf32>
    %cst_168 = arith.constant 1.000000e+00 : f32
    %847 = vector.broadcast %cst_168 : f32 to vector<2x16xf32>
    %848 = arith.addf %847, %846 : vector<2x16xf32>
    %849 = arith.divf %847, %848 : vector<2x16xf32>
    %850 = vector.extract_strided_slice %833 {offsets = [0, 32], sizes = [2, 16], strides = [1, 1]} : vector<2x48xf32> to vector<2x16xf32>
    %851 = vector.extract_strided_slice %831 {offsets = [0, 32], sizes = [2, 16], strides = [1, 1]} : vector<2x48xf32> to vector<2x16xf32>
    %852 = arith.mulf %841, %851 : vector<2x16xf32>
    %853 = arith.addf %850, %852 : vector<2x16xf32>
    %854 = math.tanh %853 : vector<2x16xf32>
    %cst_169 = arith.constant 1.000000e+00 : f32
    %855 = vector.broadcast %cst_169 : f32 to vector<2x16xf32>
    %856 = arith.subf %855, %849 : vector<2x16xf32>
    %857 = arith.mulf %856, %854 : vector<2x16xf32>
    %858 = arith.mulf %849, %789 : vector<2x16xf32>
    %859 = arith.addf %857, %858 : vector<2x16xf32>
    %c4_170 = arith.constant 4 : index
    %c0_171 = arith.constant 0 : index
    %c16_172 = arith.constant 16 : index
    %860 = vector.load %arg9[%c4_170, %c0_171, %c16_172] : memref<16x2x32xf32, #tpu.memory_space<vmem>>, vector<1x2x16xf32>
    %861 = vector.shape_cast %860 : vector<1x2x16xf32> to vector<2x16xf32>
    %862 = vector.shape_cast %859 : vector<2x16xf32> to vector<1x2x16xf32>
    tpu.vector_store %arg9[%c4_170, %c0_171, %c16_172], %862 {strides = array<i32>} : memref<16x2x32xf32, #tpu.memory_space<vmem>>, vector<1x2x16xf32>,
    %863 = arith.truncf %824 : vector<2x16xf32> to vector<2x16xbf16>
    %cst_173 = arith.constant dense<0.000000e+00> : vector<2x48xf32>
    %864 = tpu.matmul %863, %17, %cst_173 {dimension_numbers = #tpu.dot_dimension_numbers<[1], [0], [0], [1], [0, 0, 1, 1], [], []>} : vector<2x16xbf16>, vector<16x48xbf16>, vector<2x48xf32> -> vector<2x48xf32>
    %865 = vector.broadcast %19 : vector<1x48xf32> to vector<2x48xf32>
    %866 = arith.addf %864, %865 : vector<2x48xf32>
    %867 = vector.extract_strided_slice %9 {offsets = [12, 0, 0], sizes = [1, 2, 48], strides = [1, 1, 1]} : vector<16x2x48xf32> to vector<1x2x48xf32>
    %868 = vector.shape_cast %867 : vector<1x2x48xf32> to vector<2x48xf32>
    %869 = vector.extract_strided_slice %868 {offsets = [0, 0], sizes = [2, 16], strides = [1, 1]} : vector<2x48xf32> to vector<2x16xf32>
    %870 = vector.extract_strided_slice %866 {offsets = [0, 0], sizes = [2, 16], strides = [1, 1]} : vector<2x48xf32> to vector<2x16xf32>
    %871 = arith.addf %869, %870 : vector<2x16xf32>
    %872 = arith.negf %871 : vector<2x16xf32>
    %873 = math.exp %872 : vector<2x16xf32>
    %cst_174 = arith.constant 1.000000e+00 : f32
    %874 = vector.broadcast %cst_174 : f32 to vector<2x16xf32>
    %875 = arith.addf %874, %873 : vector<2x16xf32>
    %876 = arith.divf %874, %875 : vector<2x16xf32>
    %877 = vector.extract_strided_slice %868 {offsets = [0, 16], sizes = [2, 16], strides = [1, 1]} : vector<2x48xf32> to vector<2x16xf32>
    %878 = vector.extract_strided_slice %866 {offsets = [0, 16], sizes = [2, 16], strides = [1, 1]} : vector<2x48xf32> to vector<2x16xf32>
    %879 = arith.addf %877, %878 : vector<2x16xf32>
    %880 = arith.negf %879 : vector<2x16xf32>
    %881 = math.exp %880 : vector<2x16xf32>
    %cst_175 = arith.constant 1.000000e+00 : f32
    %882 = vector.broadcast %cst_175 : f32 to vector<2x16xf32>
    %883 = arith.addf %882, %881 : vector<2x16xf32>
    %884 = arith.divf %882, %883 : vector<2x16xf32>
    %885 = vector.extract_strided_slice %868 {offsets = [0, 32], sizes = [2, 16], strides = [1, 1]} : vector<2x48xf32> to vector<2x16xf32>
    %886 = vector.extract_strided_slice %866 {offsets = [0, 32], sizes = [2, 16], strides = [1, 1]} : vector<2x48xf32> to vector<2x16xf32>
    %887 = arith.mulf %876, %886 : vector<2x16xf32>
    %888 = arith.addf %885, %887 : vector<2x16xf32>
    %889 = math.tanh %888 : vector<2x16xf32>
    %cst_176 = arith.constant 1.000000e+00 : f32
    %890 = vector.broadcast %cst_176 : f32 to vector<2x16xf32>
    %891 = arith.subf %890, %884 : vector<2x16xf32>
    %892 = arith.mulf %891, %889 : vector<2x16xf32>
    %893 = arith.mulf %884, %824 : vector<2x16xf32>
    %894 = arith.addf %892, %893 : vector<2x16xf32>
    %c12_177 = arith.constant 12 : index
    %c0_178 = arith.constant 0 : index
    %c0_179 = arith.constant 0 : index
    %895 = vector.load %arg9[%c12_177, %c0_178, %c0_179] : memref<16x2x32xf32, #tpu.memory_space<vmem>>, vector<1x2x16xf32>
    %896 = vector.shape_cast %895 : vector<1x2x16xf32> to vector<2x16xf32>
    %897 = vector.shape_cast %894 : vector<2x16xf32> to vector<1x2x16xf32>
    tpu.vector_store %arg9[%c12_177, %c0_178, %c0_179], %897 {strides = array<i32>} : memref<16x2x32xf32, #tpu.memory_space<vmem>>, vector<1x2x16xf32>,
    %898 = arith.truncf %859 : vector<2x16xf32> to vector<2x16xbf16>
    %cst_180 = arith.constant dense<0.000000e+00> : vector<2x48xf32>
    %899 = tpu.matmul %898, %18, %cst_180 {dimension_numbers = #tpu.dot_dimension_numbers<[1], [0], [0], [1], [0, 0, 1, 1], [], []>} : vector<2x16xbf16>, vector<16x48xbf16>, vector<2x48xf32> -> vector<2x48xf32>
    %900 = vector.broadcast %20 : vector<1x48xf32> to vector<2x48xf32>
    %901 = arith.addf %899, %900 : vector<2x48xf32>
    %902 = vector.extract_strided_slice %16 {offsets = [3, 0, 0], sizes = [1, 2, 48], strides = [1, 1, 1]} : vector<16x2x48xf32> to vector<1x2x48xf32>
    %903 = vector.shape_cast %902 : vector<1x2x48xf32> to vector<2x48xf32>
    %904 = vector.extract_strided_slice %903 {offsets = [0, 0], sizes = [2, 16], strides = [1, 1]} : vector<2x48xf32> to vector<2x16xf32>
    %905 = vector.extract_strided_slice %901 {offsets = [0, 0], sizes = [2, 16], strides = [1, 1]} : vector<2x48xf32> to vector<2x16xf32>
    %906 = arith.addf %904, %905 : vector<2x16xf32>
    %907 = arith.negf %906 : vector<2x16xf32>
    %908 = math.exp %907 : vector<2x16xf32>
    %cst_181 = arith.constant 1.000000e+00 : f32
    %909 = vector.broadcast %cst_181 : f32 to vector<2x16xf32>
    %910 = arith.addf %909, %908 : vector<2x16xf32>
    %911 = arith.divf %909, %910 : vector<2x16xf32>
    %912 = vector.extract_strided_slice %903 {offsets = [0, 16], sizes = [2, 16], strides = [1, 1]} : vector<2x48xf32> to vector<2x16xf32>
    %913 = vector.extract_strided_slice %901 {offsets = [0, 16], sizes = [2, 16], strides = [1, 1]} : vector<2x48xf32> to vector<2x16xf32>
    %914 = arith.addf %912, %913 : vector<2x16xf32>
    %915 = arith.negf %914 : vector<2x16xf32>
    %916 = math.exp %915 : vector<2x16xf32>
    %cst_182 = arith.constant 1.000000e+00 : f32
    %917 = vector.broadcast %cst_182 : f32 to vector<2x16xf32>
    %918 = arith.addf %917, %916 : vector<2x16xf32>
    %919 = arith.divf %917, %918 : vector<2x16xf32>
    %920 = vector.extract_strided_slice %903 {offsets = [0, 32], sizes = [2, 16], strides = [1, 1]} : vector<2x48xf32> to vector<2x16xf32>
    %921 = vector.extract_strided_slice %901 {offsets = [0, 32], sizes = [2, 16], strides = [1, 1]} : vector<2x48xf32> to vector<2x16xf32>
    %922 = arith.mulf %911, %921 : vector<2x16xf32>
    %923 = arith.addf %920, %922 : vector<2x16xf32>
    %924 = math.tanh %923 : vector<2x16xf32>
    %cst_183 = arith.constant 1.000000e+00 : f32
    %925 = vector.broadcast %cst_183 : f32 to vector<2x16xf32>
    %926 = arith.subf %925, %919 : vector<2x16xf32>
    %927 = arith.mulf %926, %924 : vector<2x16xf32>
    %928 = arith.mulf %919, %859 : vector<2x16xf32>
    %929 = arith.addf %927, %928 : vector<2x16xf32>
    %c3_184 = arith.constant 3 : index
    %c0_185 = arith.constant 0 : index
    %c16_186 = arith.constant 16 : index
    %930 = vector.load %arg9[%c3_184, %c0_185, %c16_186] : memref<16x2x32xf32, #tpu.memory_space<vmem>>, vector<1x2x16xf32>
    %931 = vector.shape_cast %930 : vector<1x2x16xf32> to vector<2x16xf32>
    %932 = vector.shape_cast %929 : vector<2x16xf32> to vector<1x2x16xf32>
    tpu.vector_store %arg9[%c3_184, %c0_185, %c16_186], %932 {strides = array<i32>} : memref<16x2x32xf32, #tpu.memory_space<vmem>>, vector<1x2x16xf32>,
    %933 = arith.truncf %894 : vector<2x16xf32> to vector<2x16xbf16>
    %cst_187 = arith.constant dense<0.000000e+00> : vector<2x48xf32>
    %934 = tpu.matmul %933, %17, %cst_187 {dimension_numbers = #tpu.dot_dimension_numbers<[1], [0], [0], [1], [0, 0, 1, 1], [], []>} : vector<2x16xbf16>, vector<16x48xbf16>, vector<2x48xf32> -> vector<2x48xf32>
    %935 = vector.broadcast %19 : vector<1x48xf32> to vector<2x48xf32>
    %936 = arith.addf %934, %935 : vector<2x48xf32>
    %937 = vector.extract_strided_slice %9 {offsets = [13, 0, 0], sizes = [1, 2, 48], strides = [1, 1, 1]} : vector<16x2x48xf32> to vector<1x2x48xf32>
    %938 = vector.shape_cast %937 : vector<1x2x48xf32> to vector<2x48xf32>
    %939 = vector.extract_strided_slice %938 {offsets = [0, 0], sizes = [2, 16], strides = [1, 1]} : vector<2x48xf32> to vector<2x16xf32>
    %940 = vector.extract_strided_slice %936 {offsets = [0, 0], sizes = [2, 16], strides = [1, 1]} : vector<2x48xf32> to vector<2x16xf32>
    %941 = arith.addf %939, %940 : vector<2x16xf32>
    %942 = arith.negf %941 : vector<2x16xf32>
    %943 = math.exp %942 : vector<2x16xf32>
    %cst_188 = arith.constant 1.000000e+00 : f32
    %944 = vector.broadcast %cst_188 : f32 to vector<2x16xf32>
    %945 = arith.addf %944, %943 : vector<2x16xf32>
    %946 = arith.divf %944, %945 : vector<2x16xf32>
    %947 = vector.extract_strided_slice %938 {offsets = [0, 16], sizes = [2, 16], strides = [1, 1]} : vector<2x48xf32> to vector<2x16xf32>
    %948 = vector.extract_strided_slice %936 {offsets = [0, 16], sizes = [2, 16], strides = [1, 1]} : vector<2x48xf32> to vector<2x16xf32>
    %949 = arith.addf %947, %948 : vector<2x16xf32>
    %950 = arith.negf %949 : vector<2x16xf32>
    %951 = math.exp %950 : vector<2x16xf32>
    %cst_189 = arith.constant 1.000000e+00 : f32
    %952 = vector.broadcast %cst_189 : f32 to vector<2x16xf32>
    %953 = arith.addf %952, %951 : vector<2x16xf32>
    %954 = arith.divf %952, %953 : vector<2x16xf32>
    %955 = vector.extract_strided_slice %938 {offsets = [0, 32], sizes = [2, 16], strides = [1, 1]} : vector<2x48xf32> to vector<2x16xf32>
    %956 = vector.extract_strided_slice %936 {offsets = [0, 32], sizes = [2, 16], strides = [1, 1]} : vector<2x48xf32> to vector<2x16xf32>
    %957 = arith.mulf %946, %956 : vector<2x16xf32>
    %958 = arith.addf %955, %957 : vector<2x16xf32>
    %959 = math.tanh %958 : vector<2x16xf32>
    %cst_190 = arith.constant 1.000000e+00 : f32
    %960 = vector.broadcast %cst_190 : f32 to vector<2x16xf32>
    %961 = arith.subf %960, %954 : vector<2x16xf32>
    %962 = arith.mulf %961, %959 : vector<2x16xf32>
    %963 = arith.mulf %954, %894 : vector<2x16xf32>
    %964 = arith.addf %962, %963 : vector<2x16xf32>
    %c13_191 = arith.constant 13 : index
    %c0_192 = arith.constant 0 : index
    %c0_193 = arith.constant 0 : index
    %965 = vector.load %arg9[%c13_191, %c0_192, %c0_193] : memref<16x2x32xf32, #tpu.memory_space<vmem>>, vector<1x2x16xf32>
    %966 = vector.shape_cast %965 : vector<1x2x16xf32> to vector<2x16xf32>
    %967 = vector.shape_cast %964 : vector<2x16xf32> to vector<1x2x16xf32>
    tpu.vector_store %arg9[%c13_191, %c0_192, %c0_193], %967 {strides = array<i32>} : memref<16x2x32xf32, #tpu.memory_space<vmem>>, vector<1x2x16xf32>,
    %968 = arith.truncf %929 : vector<2x16xf32> to vector<2x16xbf16>
    %cst_194 = arith.constant dense<0.000000e+00> : vector<2x48xf32>
    %969 = tpu.matmul %968, %18, %cst_194 {dimension_numbers = #tpu.dot_dimension_numbers<[1], [0], [0], [1], [0, 0, 1, 1], [], []>} : vector<2x16xbf16>, vector<16x48xbf16>, vector<2x48xf32> -> vector<2x48xf32>
    %970 = vector.broadcast %20 : vector<1x48xf32> to vector<2x48xf32>
    %971 = arith.addf %969, %970 : vector<2x48xf32>
    %972 = vector.extract_strided_slice %16 {offsets = [2, 0, 0], sizes = [1, 2, 48], strides = [1, 1, 1]} : vector<16x2x48xf32> to vector<1x2x48xf32>
    %973 = vector.shape_cast %972 : vector<1x2x48xf32> to vector<2x48xf32>
    %974 = vector.extract_strided_slice %973 {offsets = [0, 0], sizes = [2, 16], strides = [1, 1]} : vector<2x48xf32> to vector<2x16xf32>
    %975 = vector.extract_strided_slice %971 {offsets = [0, 0], sizes = [2, 16], strides = [1, 1]} : vector<2x48xf32> to vector<2x16xf32>
    %976 = arith.addf %974, %975 : vector<2x16xf32>
    %977 = arith.negf %976 : vector<2x16xf32>
    %978 = math.exp %977 : vector<2x16xf32>
    %cst_195 = arith.constant 1.000000e+00 : f32
    %979 = vector.broadcast %cst_195 : f32 to vector<2x16xf32>
    %980 = arith.addf %979, %978 : vector<2x16xf32>
    %981 = arith.divf %979, %980 : vector<2x16xf32>
    %982 = vector.extract_strided_slice %973 {offsets = [0, 16], sizes = [2, 16], strides = [1, 1]} : vector<2x48xf32> to vector<2x16xf32>
    %983 = vector.extract_strided_slice %971 {offsets = [0, 16], sizes = [2, 16], strides = [1, 1]} : vector<2x48xf32> to vector<2x16xf32>
    %984 = arith.addf %982, %983 : vector<2x16xf32>
    %985 = arith.negf %984 : vector<2x16xf32>
    %986 = math.exp %985 : vector<2x16xf32>
    %cst_196 = arith.constant 1.000000e+00 : f32
    %987 = vector.broadcast %cst_196 : f32 to vector<2x16xf32>
    %988 = arith.addf %987, %986 : vector<2x16xf32>
    %989 = arith.divf %987, %988 : vector<2x16xf32>
    %990 = vector.extract_strided_slice %973 {offsets = [0, 32], sizes = [2, 16], strides = [1, 1]} : vector<2x48xf32> to vector<2x16xf32>
    %991 = vector.extract_strided_slice %971 {offsets = [0, 32], sizes = [2, 16], strides = [1, 1]} : vector<2x48xf32> to vector<2x16xf32>
    %992 = arith.mulf %981, %991 : vector<2x16xf32>
    %993 = arith.addf %990, %992 : vector<2x16xf32>
    %994 = math.tanh %993 : vector<2x16xf32>
    %cst_197 = arith.constant 1.000000e+00 : f32
    %995 = vector.broadcast %cst_197 : f32 to vector<2x16xf32>
    %996 = arith.subf %995, %989 : vector<2x16xf32>
    %997 = arith.mulf %996, %994 : vector<2x16xf32>
    %998 = arith.mulf %989, %929 : vector<2x16xf32>
    %999 = arith.addf %997, %998 : vector<2x16xf32>
    %c2_198 = arith.constant 2 : index
    %c0_199 = arith.constant 0 : index
    %c16_200 = arith.constant 16 : index
    %1000 = vector.load %arg9[%c2_198, %c0_199, %c16_200] : memref<16x2x32xf32, #tpu.memory_space<vmem>>, vector<1x2x16xf32>
    %1001 = vector.shape_cast %1000 : vector<1x2x16xf32> to vector<2x16xf32>
    %1002 = vector.shape_cast %999 : vector<2x16xf32> to vector<1x2x16xf32>
    tpu.vector_store %arg9[%c2_198, %c0_199, %c16_200], %1002 {strides = array<i32>} : memref<16x2x32xf32, #tpu.memory_space<vmem>>, vector<1x2x16xf32>,
    %1003 = arith.truncf %964 : vector<2x16xf32> to vector<2x16xbf16>
    %cst_201 = arith.constant dense<0.000000e+00> : vector<2x48xf32>
    %1004 = tpu.matmul %1003, %17, %cst_201 {dimension_numbers = #tpu.dot_dimension_numbers<[1], [0], [0], [1], [0, 0, 1, 1], [], []>} : vector<2x16xbf16>, vector<16x48xbf16>, vector<2x48xf32> -> vector<2x48xf32>
    %1005 = vector.broadcast %19 : vector<1x48xf32> to vector<2x48xf32>
    %1006 = arith.addf %1004, %1005 : vector<2x48xf32>
    %1007 = vector.extract_strided_slice %9 {offsets = [14, 0, 0], sizes = [1, 2, 48], strides = [1, 1, 1]} : vector<16x2x48xf32> to vector<1x2x48xf32>
    %1008 = vector.shape_cast %1007 : vector<1x2x48xf32> to vector<2x48xf32>
    %1009 = vector.extract_strided_slice %1008 {offsets = [0, 0], sizes = [2, 16], strides = [1, 1]} : vector<2x48xf32> to vector<2x16xf32>
    %1010 = vector.extract_strided_slice %1006 {offsets = [0, 0], sizes = [2, 16], strides = [1, 1]} : vector<2x48xf32> to vector<2x16xf32>
    %1011 = arith.addf %1009, %1010 : vector<2x16xf32>
    %1012 = arith.negf %1011 : vector<2x16xf32>
    %1013 = math.exp %1012 : vector<2x16xf32>
    %cst_202 = arith.constant 1.000000e+00 : f32
    %1014 = vector.broadcast %cst_202 : f32 to vector<2x16xf32>
    %1015 = arith.addf %1014, %1013 : vector<2x16xf32>
    %1016 = arith.divf %1014, %1015 : vector<2x16xf32>
    %1017 = vector.extract_strided_slice %1008 {offsets = [0, 16], sizes = [2, 16], strides = [1, 1]} : vector<2x48xf32> to vector<2x16xf32>
    %1018 = vector.extract_strided_slice %1006 {offsets = [0, 16], sizes = [2, 16], strides = [1, 1]} : vector<2x48xf32> to vector<2x16xf32>
    %1019 = arith.addf %1017, %1018 : vector<2x16xf32>
    %1020 = arith.negf %1019 : vector<2x16xf32>
    %1021 = math.exp %1020 : vector<2x16xf32>
    %cst_203 = arith.constant 1.000000e+00 : f32
    %1022 = vector.broadcast %cst_203 : f32 to vector<2x16xf32>
    %1023 = arith.addf %1022, %1021 : vector<2x16xf32>
    %1024 = arith.divf %1022, %1023 : vector<2x16xf32>
    %1025 = vector.extract_strided_slice %1008 {offsets = [0, 32], sizes = [2, 16], strides = [1, 1]} : vector<2x48xf32> to vector<2x16xf32>
    %1026 = vector.extract_strided_slice %1006 {offsets = [0, 32], sizes = [2, 16], strides = [1, 1]} : vector<2x48xf32> to vector<2x16xf32>
    %1027 = arith.mulf %1016, %1026 : vector<2x16xf32>
    %1028 = arith.addf %1025, %1027 : vector<2x16xf32>
    %1029 = math.tanh %1028 : vector<2x16xf32>
    %cst_204 = arith.constant 1.000000e+00 : f32
    %1030 = vector.broadcast %cst_204 : f32 to vector<2x16xf32>
    %1031 = arith.subf %1030, %1024 : vector<2x16xf32>
    %1032 = arith.mulf %1031, %1029 : vector<2x16xf32>
    %1033 = arith.mulf %1024, %964 : vector<2x16xf32>
    %1034 = arith.addf %1032, %1033 : vector<2x16xf32>
    %c14_205 = arith.constant 14 : index
    %c0_206 = arith.constant 0 : index
    %c0_207 = arith.constant 0 : index
    %1035 = vector.load %arg9[%c14_205, %c0_206, %c0_207] : memref<16x2x32xf32, #tpu.memory_space<vmem>>, vector<1x2x16xf32>
    %1036 = vector.shape_cast %1035 : vector<1x2x16xf32> to vector<2x16xf32>
    %1037 = vector.shape_cast %1034 : vector<2x16xf32> to vector<1x2x16xf32>
    tpu.vector_store %arg9[%c14_205, %c0_206, %c0_207], %1037 {strides = array<i32>} : memref<16x2x32xf32, #tpu.memory_space<vmem>>, vector<1x2x16xf32>,
    %1038 = arith.truncf %999 : vector<2x16xf32> to vector<2x16xbf16>
    %cst_208 = arith.constant dense<0.000000e+00> : vector<2x48xf32>
    %1039 = tpu.matmul %1038, %18, %cst_208 {dimension_numbers = #tpu.dot_dimension_numbers<[1], [0], [0], [1], [0, 0, 1, 1], [], []>} : vector<2x16xbf16>, vector<16x48xbf16>, vector<2x48xf32> -> vector<2x48xf32>
    %1040 = vector.broadcast %20 : vector<1x48xf32> to vector<2x48xf32>
    %1041 = arith.addf %1039, %1040 : vector<2x48xf32>
    %1042 = vector.extract_strided_slice %16 {offsets = [1, 0, 0], sizes = [1, 2, 48], strides = [1, 1, 1]} : vector<16x2x48xf32> to vector<1x2x48xf32>
    %1043 = vector.shape_cast %1042 : vector<1x2x48xf32> to vector<2x48xf32>
    %1044 = vector.extract_strided_slice %1043 {offsets = [0, 0], sizes = [2, 16], strides = [1, 1]} : vector<2x48xf32> to vector<2x16xf32>
    %1045 = vector.extract_strided_slice %1041 {offsets = [0, 0], sizes = [2, 16], strides = [1, 1]} : vector<2x48xf32> to vector<2x16xf32>
    %1046 = arith.addf %1044, %1045 : vector<2x16xf32>
    %1047 = arith.negf %1046 : vector<2x16xf32>
    %1048 = math.exp %1047 : vector<2x16xf32>
    %cst_209 = arith.constant 1.000000e+00 : f32
    %1049 = vector.broadcast %cst_209 : f32 to vector<2x16xf32>
    %1050 = arith.addf %1049, %1048 : vector<2x16xf32>
    %1051 = arith.divf %1049, %1050 : vector<2x16xf32>
    %1052 = vector.extract_strided_slice %1043 {offsets = [0, 16], sizes = [2, 16], strides = [1, 1]} : vector<2x48xf32> to vector<2x16xf32>
    %1053 = vector.extract_strided_slice %1041 {offsets = [0, 16], sizes = [2, 16], strides = [1, 1]} : vector<2x48xf32> to vector<2x16xf32>
    %1054 = arith.addf %1052, %1053 : vector<2x16xf32>
    %1055 = arith.negf %1054 : vector<2x16xf32>
    %1056 = math.exp %1055 : vector<2x16xf32>
    %cst_210 = arith.constant 1.000000e+00 : f32
    %1057 = vector.broadcast %cst_210 : f32 to vector<2x16xf32>
    %1058 = arith.addf %1057, %1056 : vector<2x16xf32>
    %1059 = arith.divf %1057, %1058 : vector<2x16xf32>
    %1060 = vector.extract_strided_slice %1043 {offsets = [0, 32], sizes = [2, 16], strides = [1, 1]} : vector<2x48xf32> to vector<2x16xf32>
    %1061 = vector.extract_strided_slice %1041 {offsets = [0, 32], sizes = [2, 16], strides = [1, 1]} : vector<2x48xf32> to vector<2x16xf32>
    %1062 = arith.mulf %1051, %1061 : vector<2x16xf32>
    %1063 = arith.addf %1060, %1062 : vector<2x16xf32>
    %1064 = math.tanh %1063 : vector<2x16xf32>
    %cst_211 = arith.constant 1.000000e+00 : f32
    %1065 = vector.broadcast %cst_211 : f32 to vector<2x16xf32>
    %1066 = arith.subf %1065, %1059 : vector<2x16xf32>
    %1067 = arith.mulf %1066, %1064 : vector<2x16xf32>
    %1068 = arith.mulf %1059, %999 : vector<2x16xf32>
    %1069 = arith.addf %1067, %1068 : vector<2x16xf32>
    %c1_212 = arith.constant 1 : index
    %c0_213 = arith.constant 0 : index
    %c16_214 = arith.constant 16 : index
    %1070 = vector.load %arg9[%c1_212, %c0_213, %c16_214] : memref<16x2x32xf32, #tpu.memory_space<vmem>>, vector<1x2x16xf32>
    %1071 = vector.shape_cast %1070 : vector<1x2x16xf32> to vector<2x16xf32>
    %1072 = vector.shape_cast %1069 : vector<2x16xf32> to vector<1x2x16xf32>
    tpu.vector_store %arg9[%c1_212, %c0_213, %c16_214], %1072 {strides = array<i32>} : memref<16x2x32xf32, #tpu.memory_space<vmem>>, vector<1x2x16xf32>,
    %1073 = arith.truncf %1034 : vector<2x16xf32> to vector<2x16xbf16>
    %cst_215 = arith.constant dense<0.000000e+00> : vector<2x48xf32>
    %1074 = tpu.matmul %1073, %17, %cst_215 {dimension_numbers = #tpu.dot_dimension_numbers<[1], [0], [0], [1], [0, 0, 1, 1], [], []>} : vector<2x16xbf16>, vector<16x48xbf16>, vector<2x48xf32> -> vector<2x48xf32>
    %1075 = vector.broadcast %19 : vector<1x48xf32> to vector<2x48xf32>
    %1076 = arith.addf %1074, %1075 : vector<2x48xf32>
    %1077 = vector.extract_strided_slice %9 {offsets = [15, 0, 0], sizes = [1, 2, 48], strides = [1, 1, 1]} : vector<16x2x48xf32> to vector<1x2x48xf32>
    %1078 = vector.shape_cast %1077 : vector<1x2x48xf32> to vector<2x48xf32>
    %1079 = vector.extract_strided_slice %1078 {offsets = [0, 0], sizes = [2, 16], strides = [1, 1]} : vector<2x48xf32> to vector<2x16xf32>
    %1080 = vector.extract_strided_slice %1076 {offsets = [0, 0], sizes = [2, 16], strides = [1, 1]} : vector<2x48xf32> to vector<2x16xf32>
    %1081 = arith.addf %1079, %1080 : vector<2x16xf32>
    %1082 = arith.negf %1081 : vector<2x16xf32>
    %1083 = math.exp %1082 : vector<2x16xf32>
    %cst_216 = arith.constant 1.000000e+00 : f32
    %1084 = vector.broadcast %cst_216 : f32 to vector<2x16xf32>
    %1085 = arith.addf %1084, %1083 : vector<2x16xf32>
    %1086 = arith.divf %1084, %1085 : vector<2x16xf32>
    %1087 = vector.extract_strided_slice %1078 {offsets = [0, 16], sizes = [2, 16], strides = [1, 1]} : vector<2x48xf32> to vector<2x16xf32>
    %1088 = vector.extract_strided_slice %1076 {offsets = [0, 16], sizes = [2, 16], strides = [1, 1]} : vector<2x48xf32> to vector<2x16xf32>
    %1089 = arith.addf %1087, %1088 : vector<2x16xf32>
    %1090 = arith.negf %1089 : vector<2x16xf32>
    %1091 = math.exp %1090 : vector<2x16xf32>
    %cst_217 = arith.constant 1.000000e+00 : f32
    %1092 = vector.broadcast %cst_217 : f32 to vector<2x16xf32>
    %1093 = arith.addf %1092, %1091 : vector<2x16xf32>
    %1094 = arith.divf %1092, %1093 : vector<2x16xf32>
    %1095 = vector.extract_strided_slice %1078 {offsets = [0, 32], sizes = [2, 16], strides = [1, 1]} : vector<2x48xf32> to vector<2x16xf32>
    %1096 = vector.extract_strided_slice %1076 {offsets = [0, 32], sizes = [2, 16], strides = [1, 1]} : vector<2x48xf32> to vector<2x16xf32>
    %1097 = arith.mulf %1086, %1096 : vector<2x16xf32>
    %1098 = arith.addf %1095, %1097 : vector<2x16xf32>
    %1099 = math.tanh %1098 : vector<2x16xf32>
    %cst_218 = arith.constant 1.000000e+00 : f32
    %1100 = vector.broadcast %cst_218 : f32 to vector<2x16xf32>
    %1101 = arith.subf %1100, %1094 : vector<2x16xf32>
    %1102 = arith.mulf %1101, %1099 : vector<2x16xf32>
    %1103 = arith.mulf %1094, %1034 : vector<2x16xf32>
    %1104 = arith.addf %1102, %1103 : vector<2x16xf32>
    %c15_219 = arith.constant 15 : index
    %c0_220 = arith.constant 0 : index
    %c0_221 = arith.constant 0 : index
    %1105 = vector.load %arg9[%c15_219, %c0_220, %c0_221] : memref<16x2x32xf32, #tpu.memory_space<vmem>>, vector<1x2x16xf32>
    %1106 = vector.shape_cast %1105 : vector<1x2x16xf32> to vector<2x16xf32>
    %1107 = vector.shape_cast %1104 : vector<2x16xf32> to vector<1x2x16xf32>
    tpu.vector_store %arg9[%c15_219, %c0_220, %c0_221], %1107 {strides = array<i32>} : memref<16x2x32xf32, #tpu.memory_space<vmem>>, vector<1x2x16xf32>,
    %1108 = arith.truncf %1069 : vector<2x16xf32> to vector<2x16xbf16>
    %cst_222 = arith.constant dense<0.000000e+00> : vector<2x48xf32>
    %1109 = tpu.matmul %1108, %18, %cst_222 {dimension_numbers = #tpu.dot_dimension_numbers<[1], [0], [0], [1], [0, 0, 1, 1], [], []>} : vector<2x16xbf16>, vector<16x48xbf16>, vector<2x48xf32> -> vector<2x48xf32>
    %1110 = vector.broadcast %20 : vector<1x48xf32> to vector<2x48xf32>
    %1111 = arith.addf %1109, %1110 : vector<2x48xf32>
    %1112 = vector.extract_strided_slice %16 {offsets = [0, 0, 0], sizes = [1, 2, 48], strides = [1, 1, 1]} : vector<16x2x48xf32> to vector<1x2x48xf32>
    %1113 = vector.shape_cast %1112 : vector<1x2x48xf32> to vector<2x48xf32>
    %1114 = vector.extract_strided_slice %1113 {offsets = [0, 0], sizes = [2, 16], strides = [1, 1]} : vector<2x48xf32> to vector<2x16xf32>
    %1115 = vector.extract_strided_slice %1111 {offsets = [0, 0], sizes = [2, 16], strides = [1, 1]} : vector<2x48xf32> to vector<2x16xf32>
    %1116 = arith.addf %1114, %1115 : vector<2x16xf32>
    %1117 = arith.negf %1116 : vector<2x16xf32>
    %1118 = math.exp %1117 : vector<2x16xf32>
    %cst_223 = arith.constant 1.000000e+00 : f32
    %1119 = vector.broadcast %cst_223 : f32 to vector<2x16xf32>
    %1120 = arith.addf %1119, %1118 : vector<2x16xf32>
    %1121 = arith.divf %1119, %1120 : vector<2x16xf32>
    %1122 = vector.extract_strided_slice %1113 {offsets = [0, 16], sizes = [2, 16], strides = [1, 1]} : vector<2x48xf32> to vector<2x16xf32>
    %1123 = vector.extract_strided_slice %1111 {offsets = [0, 16], sizes = [2, 16], strides = [1, 1]} : vector<2x48xf32> to vector<2x16xf32>
    %1124 = arith.addf %1122, %1123 : vector<2x16xf32>
    %1125 = arith.negf %1124 : vector<2x16xf32>
    %1126 = math.exp %1125 : vector<2x16xf32>
    %cst_224 = arith.constant 1.000000e+00 : f32
    %1127 = vector.broadcast %cst_224 : f32 to vector<2x16xf32>
    %1128 = arith.addf %1127, %1126 : vector<2x16xf32>
    %1129 = arith.divf %1127, %1128 : vector<2x16xf32>
    %1130 = vector.extract_strided_slice %1113 {offsets = [0, 32], sizes = [2, 16], strides = [1, 1]} : vector<2x48xf32> to vector<2x16xf32>
    %1131 = vector.extract_strided_slice %1111 {offsets = [0, 32], sizes = [2, 16], strides = [1, 1]} : vector<2x48xf32> to vector<2x16xf32>
    %1132 = arith.mulf %1121, %1131 : vector<2x16xf32>
    %1133 = arith.addf %1130, %1132 : vector<2x16xf32>
    %1134 = math.tanh %1133 : vector<2x16xf32>
    %cst_225 = arith.constant 1.000000e+00 : f32
    %1135 = vector.broadcast %cst_225 : f32 to vector<2x16xf32>
    %1136 = arith.subf %1135, %1129 : vector<2x16xf32>
    %1137 = arith.mulf %1136, %1134 : vector<2x16xf32>
    %1138 = arith.mulf %1129, %1069 : vector<2x16xf32>
    %1139 = arith.addf %1137, %1138 : vector<2x16xf32>
    %c0_226 = arith.constant 0 : index
    %c0_227 = arith.constant 0 : index
    %c16_228 = arith.constant 16 : index
    %1140 = vector.load %arg9[%c0_226, %c0_227, %c16_228] : memref<16x2x32xf32, #tpu.memory_space<vmem>>, vector<1x2x16xf32>
    %1141 = vector.shape_cast %1140 : vector<1x2x16xf32> to vector<2x16xf32>
    %1142 = vector.shape_cast %1139 : vector<2x16xf32> to vector<1x2x16xf32>
    tpu.vector_store %arg9[%c0_226, %c0_227, %c16_228], %1142 {strides = array<i32>} : memref<16x2x32xf32, #tpu.memory_space<vmem>>, vector<1x2x16xf32>,
    return
  }
}

</mosaic_0001>

<bundles_post_ra>
// kernel: cbhg_forward.4
= control target key start
LH: loop header
LB: loop body
LE: loop exit
PB: predicated region body
PF: predicated region fallthrough
CT: control target
= control target key end

     0   :  { %v92_v0 = vlaneseq  ;;  %v3955_v2 = vmov 1966171168   ;;  %v3956_v29 = vmov 0.0   ;;  %vm195_vm0 = vcmask 261120   ;;  %s3960_s12 = smov 96   ;;  %s3961_s13 = smov 32   ;;  %s5041_s1 = inlined_call_operand.vmem [shape: bf16[32,48], index: 1, kind: input, shape index: {}]   ;;  %s5042_s5 = inlined_call_operand.vmem [shape: bf16[32,48], index: 5, kind: input, shape index: {}]   ;;  %s5043_s0 = inlined_call_operand.vmem [shape: f32[16,2,32], index: 0, kind: input, shape index: {}]   ;;  %s5044_s2 = inlined_call_operand.vmem [shape: bf16[16,48], index: 2, kind: input, shape index: {}]   ;;  %s5045_s6 = inlined_call_operand.vmem [shape: bf16[16,48], index: 6, kind: input, shape index: {}]   ;;  %s5046_s3 = inlined_call_operand.vmem [shape: f32[1,48], index: 3, kind: input, shape index: {}]   ;;  %s5047_s7 = inlined_call_operand.vmem [shape: f32[1,48], index: 7, kind: input, shape index: {}]   ;;  %s5048_s4 = inlined_call_operand.vmem [shape: f32[1,48], index: 4, kind: input, shape index: {}]   ;;  %s5049_s8 = inlined_call_operand.vmem [shape: f32[1,48], index: 8, kind: input, shape index: {}]   ;;  %s5050_s9 = inlined_call_operand.vmem [shape: f32[16,2,32], index: 9, kind: output, shape index: {}]  }
   0x1   :  { %v3749_v1 = vld [vmem:[%s5041_s1 + $0x8] sm:$0xff]   ;;  %v90_v3 = vunpack.c.l.s4 %v3955_v2  ;;  %v3751_v6 = vld [vmem:[%s5041_s1] sm:$0xff]   ;;  %v41_v21 = vld [vmem:[%s5043_s0 + $0x10] sm:$0x3]  ;;  %vm3957_vm1 = vmmov 0   ;;  %v3958_v55 = vmov 0  }
   0x2   :  { %v3750_v4 = vld [vmem:[%s5042_s5 + $0x8] sm:$0xff]   ;;  %v4019_v5 = vshrl.u32 %v92_v0, 7  ;;  %3533 = vmatprep.subr.bf16.mxu0 %v3749_v1  ;;  %v3752_v8 = vld [vmem:[%s5042_s5] sm:$0xff]   ;;  %v42_v24 = vld [vmem:[%s5043_s0 + $0x12] sm:$0x3]  ;;  %s3962_s14 = smov 112  }
   0x3   :  { %v91_v7 = vunpack.c.0.s8 %v90_v3  ;;  %3534 = vmatpush3.bf16.msra.mxu0 %v3749_v1  ;;  %3541 = vmatprep.subr.bf16.mxu1 %v3750_v4  ;;  %v33_v9 = vld [vmem:[%s5043_s0] sm:$0x3]  ;;  %v34_v10 = vld [vmem:[%s5043_s0 + $0x2] sm:$0x3]  ;;  %v35_v11 = vld [vmem:[%s5043_s0 + $0x4] sm:$0x3]  ;;  %v3351_v33 = vpack.c.bf16 %v42_v24, %v41_v21 }
   0x4   :  { %3542 = vmatpush3.bf16.msra.mxu1 %v3750_v4  ;;  %3535 = vmatprep.subr.bf16.mxu0 %v3751_v6  ;;  %v36_v13 = vld [vmem:[%s5043_s0 + $0x6] sm:$0x3]  ;;  %v37_v14 = vld [vmem:[%s5043_s0 + $0x8] sm:$0x3]  ;;  %v38_v15 = vld [vmem:[%s5043_s0 + $0xa] sm:$0x3]  ;;  %v3347_v16 = vpack.c.bf16 %v34_v10, %v33_v9 }
   0x5   :  { %v94_v12 = vsub.s32 %v91_v7, %v4019_v5  ;;  %3543 = vmatprep.subr.bf16.mxu1 %v3752_v8  ;;  %v39_v17 = vld [vmem:[%s5043_s0 + $0xc] sm:$0x3]  ;;  %v40_v18 = vld [vmem:[%s5043_s0 + $0xe] sm:$0x3]  ;;  %v3348_v19 = vpack.c.bf16 %v36_v13, %v35_v11  ;;  %v3349_v20 = vpack.c.bf16 %v38_v15, %v37_v14  ;;  %v43_v25 = vld [vmem:[%s5043_s0 + $0x14] sm:$0x3] }
   0x6   :  { %v3350_v22 = vpack.c.bf16 %v40_v18, %v39_v17  ;;  %v44_v26 = vld [vmem:[%s5043_s0 + $0x16] sm:$0x3]  ;;  %v45_v30 = vld [vmem:[%s5043_s0 + $0x18] sm:$0x3]  ;;  %v46_v31 = vld [vmem:[%s5043_s0 + $0x1a] sm:$0x3] }
   0x7   :  { %3536 = vmatpush3.bf16.msra.mxu0 %v3751_v6  ;;  %v95_v23 = vrot.slane %v3347_v16, %v94_v12  ;;  %v102_v27 = vrot.slane %v3348_v19, %v94_v12  ;;  %v109_v28 = vrot.slane %v3349_v20, %v94_v12  ;;  %v47_v32 = vld [vmem:[%s5043_s0 + $0x1c] sm:$0x3]  ;;  %v48_v35 = vld [vmem:[%s5043_s0 + $0x1e] sm:$0x3]  ;;  %v3352_v36 = vpack.c.bf16 %v44_v26, %v43_v25  ;;  %v4081_v52 = vld [vmem:[%s5044_s2] sm:$0xff]  }
   0x8   :  { %3544 = vmatpush3.bf16.msra.mxu1 %v3752_v8  ;;  %3549 = vmatprep.subr.bf16.mxu0 %v3956_v29  ;;  %v116_v34 = vrot.slane %v3350_v22, %v94_v12  ;;  %v3353_v37 = vpack.c.bf16 %v46_v31, %v45_v30  ;;  %v3354_v39 = vpack.c.bf16 %v48_v35, %v47_v32  ;;  %v4086_v53 = vld [vmem:[%s5045_s6] sm:$0xff]   ;;  %v3959_v56 = vmov 1983009808  }
   0x9   :  { %3555 = vmatprep.subr.bf16.mxu1 %v3956_v29  ;;  %v117_v38 = vcombine.low %v95_v23, %v102_v27  ;;  %v144_v40 = vrot.slane %v3351_v33, %v94_v12  ;;  %v151_v42 = vrot.slane %v3352_v36, %v94_v12  ;;  %v257_v57 = vunpack.c.l.s4 %v3959_v56  ;;  %v4110_v61 = vld [vmem:[%s5046_s3] ss:$0 sm:$0xff] }
   0xa   :  { %v118_v41 = vcombine.low %v109_v28, %v116_v34  ;;  %v158_v43 = vrot.slane %v3353_v37, %v94_v12  ;;  %v165_v45 = vrot.slane %v3354_v39, %v94_v12  ;;  %v4125_v6 = vld [vmem:[%s5047_s7] ss:$0 sm:$0xff]  ;;  %vm732_vm2 = vcmask 255104  }
   0xb   :  { %v125_v44 = vrot.slane %v117_v38, %v94_v12  ;;  %v166_v47 = vcombine.low %v144_v40, %v151_v42  ;;  %v258_v58 = vunpack.c.0.s8 %v257_v57  ;;  %v4169_v33 = vld [vmem:[%s5048_s4] ss:$0 sm:$0xff]  ;;  %vm556_vm3 = vcmask 130048  }
   0xc   :  { %v132_v46 = vrot.slane %v118_v41, %v94_v12  ;;  %v167_v48 = vcombine.low %v158_v43, %v165_v45  ;;  %v4174_v34 = vld [vmem:[%s5049_s8] ss:$0 sm:$0xff]  ;;  %vm644_vm4 = vcmask 123904  }
   0xd   :  { %v174_v50 = vrot.slane %v166_v47, %v94_v12  ;;  %v4105_v59 = vsub.s32 %v258_v58, %v4019_v5 }
   0xe   :  { %v133_v49 = vcombine.low %v125_v44, %v132_v46  ;;  %v181_v51 = vrot.slane %v167_v48, %v94_v12 }
  0x10   :  { %3537 = vmatprep.mubr.msk.bf16.mxu0 %vm195_vm0, %v133_v49  ;;  %3545 = vmatprep.mubr.msk.bf16.mxu1 %vm195_vm0, %v133_v49  ;;  %v182_v54 = vcombine.low %v174_v50, %v181_v51 }
  0x12   :  { %3538 = vmatmul.mubr.msk.bf16.vlgmr.msra.gmra.mxu0 %vm195_vm0, %v182_v54  ;;  %3546 = vmatmul.mubr.msk.bf16.vlgmr.msra.gmra.mxu1 %vm195_vm0, %v182_v54 }
  0x13   :  { %3550 = vmatpush3.bf16.msra.mxu0 %v4081_v52  ;;  %3556 = vmatpush3.bf16.msra.mxu1 %v4086_v53 }
  0x14   :  { %3551 = vmatprep.mubr.msk.bf16.mxu0 %vm3957_vm1, %v3956_v29  ;;  %3557 = vmatprep.mubr.msk.bf16.mxu1 %vm3957_vm1, %v3956_v29 }
  0x15   :  { %3561 = vmatprep.subr.bf16.mxu0 %v3956_v29  ;;  %3567 = vmatprep.subr.bf16.mxu1 %v3956_v29 }
  0x1a   :  { %3552 = vmatmul.mubr.bf16.vlgmr.msra.gmra.mxu0 %v3958_v55  ;;  %3558 = vmatmul.mubr.bf16.vlgmr.msra.gmra.mxu1 %v3958_v55 }
  0x1b   :  { %3562 = vmatpush3.bf16.msra.mxu0 %v4081_v52  ;;  %3568 = vmatpush3.bf16.msra.mxu1 %v4086_v53 }
  0x1c   :  { %3569 = vmatprep.mubr.msk.bf16.mxu1 %vm3957_vm1, %v3956_v29  ;;  %3563 = vmatprep.mubr.msk.bf16.mxu0 %vm3957_vm1, %v3956_v29 }
  0x1d   :  { %3573 = vmatprep.subr.bf16.mxu0 %v3956_v29  ;;  %3579 = vmatprep.subr.bf16.mxu1 %v3956_v29 }
  0xd2   :  { %v3539_v60 = vpop.f32.mrf.mxu0  ;;  %v3547_v62 = vpop.f32.mrf.mxu1 }
  0xd3   :  { %v289_v63 = vcombine.high %v3539_v60, %v3539_v60  ;;  %v4113_v0 = vrot.slane %v3539_v60, %v4105_v59  ;;  %v465_v1 = vcombine.high %v3547_v62, %v3547_v62  ;;  %v4116_v2 = vrot.slane %v3547_v62, %v4105_v59 }
  0xd4   :  { %v236_v3 = vpop.f32.mrf.mxu0  ;;  %v412_v4 = vpop.f32.mrf.mxu1 }
  0xd5   :  { %v4120_v5 = vadd.f32 %v4110_v61, %v4113_v0  ;;  %v4128_v7 = vrot.slane %v289_v63, %v4105_v59  ;;  %v4132_v8 = vadd.f32 %v4125_v6, %v4116_v2  ;;  %v255_v9 = vcombine.high %v236_v3, %v236_v3 }
  0xd6   :  { %v4135_v10 = vrot.slane %v236_v3, %v4105_v59  ;;  %v3540_v11 = vpop.f32.mrf.mxu0  ;;  %v3548_v12 = vpop.f32.mrf.mxu1  ;;  %v4138_v13 = vrot.slane %v465_v1, %v4105_v59  ;;  %v4141_v14 = vrot.slane %v412_v4, %v4105_v59  ;;  %v431_v16 = vcombine.high %v412_v4, %v412_v4 }
  0xd7   :  { %v269_v15 = vrot.slane %v255_v9, %v4105_v59  ;;  %v304_v19 = vcombine.high %v4113_v0, %v4113_v0  ;;  %v4151_v21 = vrot.slane %v3540_v11, %v4105_v59  ;;  %v305_v22 = vcombine.high %v4128_v7, %v4128_v7 }
  0xd8   :  { %v239_v17 = vpop.f32.mrf.mxu0  ;;  %v415_v18 = vpop.f32.mrf.mxu1  ;;  %v4148_v20 = vadd.f32 %v4125_v6, %v4141_v14  ;;  %v480_v23 = vcombine.high %v4116_v2, %v4116_v2  ;;  %v270_v24 = vcombine.high %v4135_v10, %v4135_v10  ;;  %v489_v25 = vrot.slane %v3548_v12, %v4105_v59 }
  0xd9   :  { %v481_v28 = vcombine.high %v4138_v13, %v4138_v13  ;;  %v4164_v30 = vadd.f32 %v4110_v61, %v4151_v21  ;;  %v482_v31 = vcombine.high %v3548_v12, %v3548_v12  ;;  %v272_v32 = vcombine.high %v239_v17, %v239_v17 }
  0xda   :  { %v594_v26 = vpop.f32.mrf.mxu0  ;;  %v692_v27 = vpop.f32.mrf.mxu1  ;;  %v271_v35 = vcombine.high %v269_v15, %v269_v15  ;;  %v445_v36 = vrot.slane %v431_v16, %v4105_v59  ;;  %v306_v37 = vcombine.high %v3540_v11, %v3540_v11  ;;  %v4178_v38 = vadd.f32 %v4125_v6, %v489_v25 }
  0xdb   :  { %v279_v41 = vrot.slane %v239_v17, %v4105_v59  ;;  %v286_v42 = vrot.slane %v272_v32, %v4105_v59  ;;  %v448_v43 = vcombine.high %v415_v18, %v415_v18  ;;  %v455_v44 = vrot.slane %v415_v18, %v4105_v59 }
  0xdc   :  { %v3553_v39 = vpop.f32.mrf.mxu0  ;;  %v3559_v40 = vpop.f32.mrf.mxu1  ;;  %v497_v45 = vcombine.high %v489_v25, %v489_v25  ;;  %v595_v46 = vadd.f32 %v4169_v33, %v594_v26  ;;  %v693_v47 = vadd.f32 %v4174_v34, %v692_v27  ;;  %v4186_v50 = vadd.f32 %v4110_v61, %v270_v24 }
  0xdd   :  { %v496_v51 = vrot.slane %v482_v31, %v4105_v59  ;;  %v287_v54 = vcombine.high %v279_v41, %v279_v41  ;;  %v4190_v55 = vadd.f32 %v4110_v61, %v279_v41  ;;  %v462_v56 = vrot.slane %v448_v43, %v4105_v59 }
  0xde   :  { %v597_v48 = vpop.f32.mrf.mxu0  ;;  %v695_v49 = vpop.f32.mrf.mxu1  ;;  %v447_v57 = vcombine.high %v445_v36, %v445_v36  ;;  %v320_v58 = vrot.slane %v306_v37, %v4105_v59  ;;  %v288_v60 = vcombine.high %v286_v42, %v286_v42  ;;  %v4195_v62 = vadd.f32 %v4125_v6, %v455_v44 }
  0xdf   :  { %v464_v1 = vcombine.high %v462_v56, %v462_v56  ;;  %v712_v2 = vrot.slane %v693_v47, %v4105_v59  ;;  %v614_v3 = vrot.slane %v595_v46, %v4105_v59  ;;  %v4200_v4 = vadd.f32 %v4125_v6, %v496_v51 }
  0xe0   :  { %v3554_v63 = vpop.f32.mrf.mxu0  ;;  %v3560_v0 = vpop.f32.mrf.mxu1  ;;  %v321_v9 = vcombine.high %v4151_v21, %v4151_v21  ;;  %v463_v11 = vcombine.high %v455_v44, %v455_v44  ;;  %v4205_v12 = vadd.f32 %v4110_v61, %v269_v15  ;;  %v4208_v16 = vadd.f32 %v4125_v6, %v497_v45 }
  0xe1   :  { %713 = vrot.lane.b32.xlu1 %v712_v2, %s3960_s12  ;;  %615 = vrot.lane.b32.xlu0 %v614_v3, %s3960_s12  ;;  %v4213_v17 = vadd.f32 %v4110_v61, %v271_v35  ;;  %v4216_v18 = vadd.f32 %v4125_v6, %v481_v28  ;;  %v4219_v21 = vadd.f32 %v4110_v61, %v287_v54 }
  0xe2   :  { %v446_v15 = vcombine.high %v4141_v14, %v4141_v14  ;;  %v322_v24 = vcombine.high %v320_v58, %v320_v58  ;;  %v4225_v25 = vadd.f32 %v4125_v6, %v4138_v13  ;;  %v4228_v26 = vadd.f32 %v4110_v61, %v286_v42 }
  0xe3   :  { %v4231_v27 = vadd.f32 %v4125_v6, %v480_v23  ;;  %v4234_v28 = vadd.f32 %v4110_v61, %v288_v60  ;;  %v4237_v31 = vadd.f32 %v4125_v6, %v464_v1  ;;  %v4240_v32 = vadd.f32 %v4110_v61, %v304_v19 }
  0xe4   :  { %v4243_v14 = vadd.f32 %v4125_v6, %v462_v56  ;;  %v4247_v13 = vadd.f32 %v4110_v61, %v4128_v7  ;;  %v4250_v35 = vadd.f32 %v4125_v6, %v463_v11  ;;  %v4256_v23 = vadd.f32 %v4110_v61, %v305_v22 }
  0xe5   :  { %v4259_v37 = vadd.f32 %v4125_v6, %v447_v57  ;;  %v4262_v19 = vadd.f32 %v4110_v61, %v321_v9  ;;  %v4265_v39 = vadd.f32 %v4125_v6, %v445_v36  ;;  %v4268_v40 = vadd.f32 %v4110_v61, %v320_v58 }
  0xe6   :  { %v4271_v41 = vadd.f32 %v4125_v6, %v446_v15  ;;  %v4274_v7 = vadd.f32 %v4110_v61, %v322_v24  ;;  %v498_v22 = vcombine.high %v496_v51, %v496_v51  ;;  %v346_v43 = vadd.f32 %v4110_v61, %v4135_v10 }
  0xe8   :  { %v537_v42 = vadd.f32 %v4125_v6, %v498_v22  ;;  %v600_v45 = vadd.f32 %v595_v46, %v346_v43 }
  0xea   :  { %v698_v44 = vadd.f32 %v693_v47, %v537_v42  ;;  %v3367_v36 = vmul.f32 -1.442695, %v600_v45 }
  0xec   :  { %v3370_v48 = vmul.f32 -1.442695, %v698_v44 }
  0xee   :  { %3755 = vpow2.f32 %v3370_v48 }
  0xef   :  { %3757 = vpow2.f32 %v3367_v36 }
  0xfb   :  { %v3756_v49 = vpop.eup %3755 }
  0xfc   :  { %v3758_v54 = vpop.eup %3757  ;;  %v702_v56 = vadd.f32 1.0, %v3756_v49 }
  0xfd   :  { %v604_v57 = vadd.f32 1.0, %v3758_v54 }
  0xfe   :  { %3759 = vrcp.f32 %v702_v56 }
  0xff   :  { %3761 = vrcp.f32 %v604_v57 }
 0x10b   :  { %v3760_v58 = vpop.eup %3759 }
 0x10c   :  { %v3762_v60 = vpop.eup %3761  ;;  %v723_v3 = vsub.f32 1.0, %v3760_v58  ;;  %v729_v15 = vmul.f32 0.0, %v3760_v58 }
 0x10d   :  { %v625_v11 = vsub.f32 1.0, %v3762_v60  ;;  %v631_v44 = vmul.f32 0.0, %v3762_v60 }
 0x153   :  { %v714_v51 = vpop.permute.xlu1 %713  ;;  %v616_v63 = vpop.permute.xlu0 %615 }
 0x154   :  { %v716_v6 = vmul.f32 %v3760_v58, %v714_v51  ;;  %v618_v0 = vmul.f32 %v3762_v60, %v616_v63 }
 0x156   :  { %718 = vrot.lane.b32.xlu1 %v716_v6, %s3961_s13  ;;  %620 = vrot.lane.b32.xlu0 %v618_v0, %s3961_s13 }
 0x1c8   :  { %v719_v61 = vpop.permute.xlu1 %718  ;;  %v621_v10 = vpop.permute.xlu0 %620 }
 0x1c9   :  { %v721_v46 = vadd.f32 %v719_v61, %v537_v42  ;;  %v623_v47 = vadd.f32 %v621_v10, %v346_v43 }
 0x1cb   :  { %3763 = vtanh.f32 %v721_v46 }
 0x1cc   :  { %3765 = vtanh.f32 %v623_v47 }
 0x1d8   :  { %v3764_v1 = vpop.eup %3763 }
 0x1d9   :  { %v3766_v2 = vpop.eup %3765  ;;  %725 = vrot.lane.b32.xlu1 %v3764_v1, %s3962_s14 }
 0x1da   :  { %627 = vrot.lane.b32.xlu0 %v3766_v2, %s3962_s14 }
 0x24b   :  { %v726_v9 = vpop.permute.xlu1 %725 }
 0x24c   :  { %v728_v24 = vmul.f32 %v726_v9, %v723_v3  ;;  %v628_v22 = vpop.permute.xlu0 %627 }
 0x24d   :  { %v630_v45 = vmul.f32 %v628_v22, %v625_v11 }
 0x24e   :  { %v4283_v42 = vadd.f32 %v729_v15, %v728_v24 }
 0x24f   :  { %v4285_v43 = vadd.f32 %v631_v44, %v630_v45 }
 0x250   :  { %v827_v48 = vpack.c.bf16 %v4283_v42, %v4283_v42  ;;  %3371 = vst.msk [vmem:[%s5050_s9 + $0x1e] sm:$0x3] %vm732_vm2, %v4283_v42 }
 0x251   :  { %v734_v36 = vpack.c.bf16 %v4285_v43, %v4285_v43 }
 0x252   :  { %829 = vrot.lane.b32.xlu1 %v827_v48, %s3962_s14 }
 0x253   :  { %736 = vrot.lane.b32.xlu0 %v734_v36, %s3962_s14 }
 0x2c4   :  { %v830_v49 = vpop.permute.xlu1 %829 }
 0x2c5   :  { %v737_v54 = vpop.permute.xlu0 %736  ;;  %3570 = vmatmul.mubr.msk.bf16.vlgmr.msra.gmra.mxu1 %vm556_vm3, %v830_v49 }
 0x2c6   :  { %3564 = vmatmul.mubr.msk.bf16.vlgmr.msra.gmra.mxu0 %vm556_vm3, %v737_v54  ;;  %3580 = vmatpush3.bf16.msra.mxu1 %v4086_v53 }
 0x2c7   :  { %3574 = vmatpush3.bf16.msra.mxu0 %v4081_v52  ;;  %3575 = vmatprep.mubr.msk.bf16.mxu0 %vm3957_vm1, %v3956_v29 }
 0x2c8   :  { %3581 = vmatprep.mubr.msk.bf16.mxu1 %vm3957_vm1, %v3956_v29  ;;  %3585 = vmatprep.subr.bf16.mxu0 %v3956_v29 }
 0x2c9   :  { %3591 = vmatprep.subr.bf16.mxu1 %v3956_v29 }
 0x385   :  { %v868_v56 = vpop.f32.mrf.mxu1 }
 0x386   :  { %v775_v57 = vpop.f32.mrf.mxu0  ;;  %v869_v6 = vadd.f32 %v4174_v34, %v868_v56 }
 0x387   :  { %v776_v58 = vadd.f32 %v4169_v33, %v775_v57  ;;  %v3571_v60 = vpop.f32.mrf.mxu1 }
 0x388   :  { %v3565_v51 = vpop.f32.mrf.mxu0  ;;  %v888_v47 = vrot.slane %v869_v6, %v4105_v59  ;;  %v874_v3 = vadd.f32 %v869_v6, %v4200_v4 }
 0x389   :  { %v795_v63 = vrot.slane %v776_v58, %v4105_v59  ;;  %v871_v0 = vpop.f32.mrf.mxu1  ;;  %v781_v1 = vadd.f32 %v776_v58, %v4186_v50 }
 0x38a   :  { %v778_v61 = vpop.f32.mrf.mxu0  ;;  %v3376_v9 = vmul.f32 -1.442695, %v874_v3 }
 0x38b   :  { %796 = vrot.lane.b32.xlu0 %v795_v63, %s3960_s12  ;;  %v3572_v10 = vpop.f32.mrf.mxu1  ;;  %v3373_v2 = vmul.f32 -1.442695, %v781_v1 }
 0x38c   :  { %v3566_v46 = vpop.f32.mrf.mxu0 }
 0x38d   :  { %3767 = vpow2.f32 %v3373_v2 }
 0x38e   :  { %3769 = vpow2.f32 %v3376_v9 }
 0x38f   :  { %889 = vrot.lane.b32.xlu0 %v888_v47, %s3960_s12 }
 0x39a   :  { %v3768_v11 = vpop.eup %3767 }
 0x39b   :  { %v785_v15 = vadd.f32 1.0, %v3768_v11  ;;  %v3770_v24 = vpop.eup %3769 }
 0x39c   :  { %v878_v22 = vadd.f32 1.0, %v3770_v24 }
 0x39d   :  { %3771 = vrcp.f32 %v785_v15 }
 0x39e   :  { %3773 = vrcp.f32 %v878_v22 }
 0x3aa   :  { %v3772_v44 = vpop.eup %3771 }
 0x3ab   :  { %v3774_v36 = vpop.eup %3773  ;;  %v806_v6 = vsub.f32 1.0, %v3772_v44  ;;  %v812_v61 = vmul.f32 %v3772_v44, %v4285_v43 }
 0x3ac   :  { %v899_v47 = vsub.f32 1.0, %v3774_v36  ;;  %v905_v1 = vmul.f32 %v3774_v36, %v4283_v42 }
 0x3fd   :  { %v797_v45 = vpop.permute.xlu0 %796 }
 0x3fe   :  { %v799_v48 = vmul.f32 %v3772_v44, %v797_v45 }
 0x400   :  { %801 = vrot.lane.b32.xlu1 %v799_v48, %s3961_s13 }
 0x401   :  { %v890_v49 = vpop.permute.xlu0 %889 }
 0x402   :  { %v892_v54 = vmul.f32 %v3774_v36, %v890_v49 }
 0x404   :  { %894 = vrot.lane.b32.xlu1 %v892_v54, %s3961_s13 }
 0x472   :  { %v802_v56 = vpop.permute.xlu1 %801 }
 0x473   :  { %v804_v57 = vadd.f32 %v802_v56, %v4186_v50 }
 0x475   :  { %3775 = vtanh.f32 %v804_v57 }
 0x476   :  { %v895_v58 = vpop.permute.xlu1 %894 }
 0x477   :  { %v897_v60 = vadd.f32 %v895_v58, %v4200_v4 }
 0x479   :  { %3777 = vtanh.f32 %v897_v60 }
 0x482   :  { %v3776_v51 = vpop.eup %3775 }
 0x483   :  { %808 = vrot.lane.b32.xlu0 %v3776_v51, %s3962_s14 }
 0x486   :  { %v3778_v63 = vpop.eup %3777 }
 0x487   :  { %901 = vrot.lane.b32.xlu1 %v3778_v63, %s3962_s14 }
 0x4f5   :  { %v809_v0 = vpop.permute.xlu0 %808 }
 0x4f6   :  { %v811_v10 = vmul.f32 %v809_v0, %v806_v6 }
 0x4f8   :  { %v4323_v46 = vadd.f32 %v812_v61, %v811_v10 }
 0x4f9   :  { %v902_v50 = vpop.permute.xlu1 %901 }
 0x4fa   :  { %v904_v2 = vmul.f32 %v902_v50, %v899_v47  ;;  %v909_v4 = vpack.c.bf16 %v4323_v46, %v4323_v46 }
 0x4fc   :  { %v4328_v3 = vadd.f32 %v905_v1, %v904_v2  ;;  %911 = vrot.lane.b32.xlu0 %v909_v4, %s3962_s14 }
 0x4fe   :  { %v1002_v9 = vpack.c.bf16 %v4328_v3, %v4328_v3  ;;  %3377 = vst.msk [vmem:[%s5050_s9 + $0x1c] sm:$0x3] %vm732_vm2, %v4328_v3 }
 0x500   :  { %1004 = vrot.lane.b32.xlu1 %v1002_v9, %s3962_s14 }
 0x56e   :  { %v912_v42 = vpop.permute.xlu0 %911 }
 0x56f   :  { %3576 = vmatmul.mubr.msk.bf16.vlgmr.msra.gmra.mxu0 %vm556_vm3, %v912_v42 }
 0x570   :  { %3586 = vmatpush3.bf16.msra.mxu0 %v4081_v52  ;;  %3587 = vmatprep.mubr.msk.bf16.mxu0 %vm3957_vm1, %v3956_v29 }
 0x571   :  { %3597 = vmatprep.subr.bf16.mxu0 %v3956_v29 }
 0x572   :  { %v1005_v11 = vpop.permute.xlu1 %1004 }
 0x573   :  { %3582 = vmatmul.mubr.msk.bf16.vlgmr.msra.gmra.mxu1 %vm556_vm3, %v1005_v11 }
 0x574   :  { %3592 = vmatpush3.bf16.msra.mxu1 %v4086_v53  ;;  %3593 = vmatprep.mubr.msk.bf16.mxu1 %vm3957_vm1, %v3956_v29 }
 0x575   :  { %3603 = vmatprep.subr.bf16.mxu1 %v3956_v29 }
 0x62f   :  { %v950_v15 = vpop.f32.mrf.mxu0 }
 0x630   :  { %v951_v24 = vadd.f32 %v4169_v33, %v950_v15 }
 0x631   :  { %v3577_v22 = vpop.f32.mrf.mxu0 }
 0x632   :  { %v970_v44 = vrot.slane %v951_v24, %v4105_v59  ;;  %v956_v60 = vadd.f32 %v951_v24, %v4205_v12 }
 0x633   :  { %v953_v45 = vpop.f32.mrf.mxu0  ;;  %v1043_v48 = vpop.f32.mrf.mxu1 }
 0x634   :  { %v1044_v36 = vadd.f32 %v4174_v34, %v1043_v48  ;;  %971 = vrot.lane.b32.xlu0 %v970_v44, %s3960_s12  ;;  %v3379_v51 = vmul.f32 -1.442695, %v956_v60 }
 0x635   :  { %v3578_v49 = vpop.f32.mrf.mxu0  ;;  %v3583_v54 = vpop.f32.mrf.mxu1 }
 0x636   :  { %v1063_v56 = vrot.slane %v1044_v36, %v4105_v59  ;;  %v1049_v63 = vadd.f32 %v1044_v36, %v4208_v16  ;;  %3779 = vpow2.f32 %v3379_v51 }
 0x637   :  { %v1046_v57 = vpop.f32.mrf.mxu1 }
 0x638   :  { %1064 = vrot.lane.b32.xlu0 %v1063_v56, %s3960_s12  ;;  %v3382_v6 = vmul.f32 -1.442695, %v1049_v63 }
 0x639   :  { %v3584_v58 = vpop.f32.mrf.mxu1 }
 0x63a   :  { %3781 = vpow2.f32 %v3382_v6 }
 0x643   :  { %v3780_v0 = vpop.eup %3779 }
 0x644   :  { %v960_v61 = vadd.f32 1.0, %v3780_v0 }
 0x646   :  { %3783 = vrcp.f32 %v960_v61 }
 0x647   :  { %v3782_v10 = vpop.eup %3781 }
 0x648   :  { %v1053_v47 = vadd.f32 1.0, %v3782_v10 }
 0x64a   :  { %3785 = vrcp.f32 %v1053_v47 }
 0x653   :  { %v3784_v50 = vpop.eup %3783 }
 0x654   :  { %v981_v48 = vsub.f32 1.0, %v3784_v50  ;;  %v987_v49 = vmul.f32 %v3784_v50, %v4323_v46 }
 0x657   :  { %v3786_v4 = vpop.eup %3785 }
 0x658   :  { %v1074_v57 = vsub.f32 1.0, %v3786_v4  ;;  %v1080_v58 = vmul.f32 %v3786_v4, %v4328_v3 }
 0x6a6   :  { %v972_v1 = vpop.permute.xlu0 %971 }
 0x6a7   :  { %v974_v2 = vmul.f32 %v3784_v50, %v972_v1 }
 0x6a9   :  { %976 = vrot.lane.b32.xlu1 %v974_v2, %s3961_s13 }
 0x6aa   :  { %v1065_v9 = vpop.permute.xlu0 %1064 }
 0x6ab   :  { %v1067_v42 = vmul.f32 %v3786_v4, %v1065_v9 }
 0x6ad   :  { %1069 = vrot.lane.b32.xlu1 %v1067_v42, %s3961_s13 }
 0x71b   :  { %v977_v11 = vpop.permute.xlu1 %976 }
 0x71c   :  { %v979_v15 = vadd.f32 %v977_v11, %v4205_v12 }
 0x71e   :  { %3787 = vtanh.f32 %v979_v15 }
 0x71f   :  { %v1070_v24 = vpop.permute.xlu1 %1069 }
 0x720   :  { %v1072_v22 = vadd.f32 %v1070_v24, %v4208_v16 }
 0x722   :  { %3789 = vtanh.f32 %v1072_v22 }
 0x72b   :  { %v3788_v44 = vpop.eup %3787 }
 0x72c   :  { %983 = vrot.lane.b32.xlu0 %v3788_v44, %s3962_s14 }
 0x72f   :  { %v3790_v45 = vpop.eup %3789 }
 0x730   :  { %1076 = vrot.lane.b32.xlu1 %v3790_v45, %s3962_s14 }
 0x79e   :  { %v984_v36 = vpop.permute.xlu0 %983 }
 0x79f   :  { %v986_v54 = vmul.f32 %v984_v36, %v981_v48 }
 0x7a1   :  { %v4364_v56 = vadd.f32 %v987_v49, %v986_v54 }
 0x7a2   :  { %v1077_v12 = vpop.permute.xlu1 %1076 }
 0x7a3   :  { %v1079_v60 = vmul.f32 %v1077_v12, %v1074_v57  ;;  %v1084_v16 = vpack.c.bf16 %v4364_v56, %v4364_v56 }
 0x7a5   :  { %v4369_v51 = vadd.f32 %v1080_v58, %v1079_v60  ;;  %1086 = vrot.lane.b32.xlu0 %v1084_v16, %s3962_s14 }
 0x7a7   :  { %v1177_v63 = vpack.c.bf16 %v4369_v51, %v4369_v51  ;;  %3383 = vst.msk [vmem:[%s5050_s9 + $0x1a] sm:$0x3] %vm732_vm2, %v4369_v51 }
 0x7a9   :  { %1179 = vrot.lane.b32.xlu1 %v1177_v63, %s3962_s14 }
 0x817   :  { %v1087_v3 = vpop.permute.xlu0 %1086 }
 0x818   :  { %3588 = vmatmul.mubr.msk.bf16.vlgmr.msra.gmra.mxu0 %vm556_vm3, %v1087_v3 }
 0x819   :  { %3598 = vmatpush3.bf16.msra.mxu0 %v4081_v52  ;;  %3599 = vmatprep.mubr.msk.bf16.mxu0 %vm3957_vm1, %v3956_v29 }
 0x81a   :  { %3609 = vmatprep.subr.bf16.mxu0 %v3956_v29 }
 0x81b   :  { %v1180_v6 = vpop.permute.xlu1 %1179 }
 0x81c   :  { %3594 = vmatmul.mubr.msk.bf16.vlgmr.msra.gmra.mxu1 %vm556_vm3, %v1180_v6 }
 0x81d   :  { %3604 = vmatpush3.bf16.msra.mxu1 %v4086_v53  ;;  %3605 = vmatprep.mubr.msk.bf16.mxu1 %vm3957_vm1, %v3956_v29 }
 0x81e   :  { %3615 = vmatprep.subr.bf16.mxu1 %v3956_v29 }
 0x8d8   :  { %v1125_v0 = vpop.f32.mrf.mxu0 }
 0x8d9   :  { %v1126_v61 = vadd.f32 %v4169_v33, %v1125_v0 }
 0x8da   :  { %v3589_v10 = vpop.f32.mrf.mxu0 }
 0x8db   :  { %v1145_v47 = vrot.slane %v1126_v61, %v4105_v59  ;;  %v1131_v24 = vadd.f32 %v1126_v61, %v4213_v17 }
 0x8dc   :  { %v1128_v50 = vpop.f32.mrf.mxu0  ;;  %v1218_v1 = vpop.f32.mrf.mxu1 }
 0x8dd   :  { %v1219_v2 = vadd.f32 %v4174_v34, %v1218_v1  ;;  %1146 = vrot.lane.b32.xlu0 %v1145_v47, %s3960_s12  ;;  %v3385_v22 = vmul.f32 -1.442695, %v1131_v24 }
 0x8de   :  { %v3590_v4 = vpop.f32.mrf.mxu0  ;;  %v3595_v9 = vpop.f32.mrf.mxu1 }
 0x8df   :  { %v1238_v42 = vrot.slane %v1219_v2, %v4105_v59  ;;  %v1224_v44 = vadd.f32 %v1219_v2, %v4178_v38  ;;  %3791 = vpow2.f32 %v3385_v22 }
 0x8e0   :  { %v1221_v11 = vpop.f32.mrf.mxu1 }
 0x8e1   :  { %1239 = vrot.lane.b32.xlu0 %v1238_v42, %s3960_s12  ;;  %v3388_v45 = vmul.f32 -1.442695, %v1224_v44 }
 0x8e2   :  { %v3596_v15 = vpop.f32.mrf.mxu1 }
 0x8e3   :  { %3793 = vpow2.f32 %v3388_v45 }
 0x8ec   :  { %v3792_v48 = vpop.eup %3791 }
 0x8ed   :  { %v1135_v36 = vadd.f32 1.0, %v3792_v48 }
 0x8ef   :  { %3795 = vrcp.f32 %v1135_v36 }
 0x8f0   :  { %v3794_v49 = vpop.eup %3793 }
 0x8f1   :  { %v1228_v54 = vadd.f32 1.0, %v3794_v49 }
 0x8f3   :  { %3797 = vrcp.f32 %v1228_v54 }
 0x8fc   :  { %v3796_v57 = vpop.eup %3795 }
 0x8fd   :  { %v1156_v50 = vsub.f32 1.0, %v3796_v57  ;;  %v1162_v2 = vmul.f32 %v3796_v57, %v4364_v56 }
 0x900   :  { %v3798_v60 = vpop.eup %3797 }
 0x901   :  { %v1249_v42 = vsub.f32 1.0, %v3798_v60  ;;  %v1255_v11 = vmul.f32 %v3798_v60, %v4369_v51 }
 0x94f   :  { %v1147_v12 = vpop.permute.xlu0 %1146 }
 0x950   :  { %v1149_v58 = vmul.f32 %v3796_v57, %v1147_v12 }
 0x952   :  { %1151 = vrot.lane.b32.xlu1 %v1149_v58, %s3961_s13 }
 0x953   :  { %v1240_v16 = vpop.permute.xlu0 %1239 }
 0x954   :  { %v1242_v63 = vmul.f32 %v3798_v60, %v1240_v16 }
 0x956   :  { %1244 = vrot.lane.b32.xlu1 %v1242_v63, %s3961_s13 }
 0x9c4   :  { %v1152_v3 = vpop.permute.xlu1 %1151 }
 0x9c5   :  { %v1154_v6 = vadd.f32 %v1152_v3, %v4213_v17 }
 0x9c7   :  { %3799 = vtanh.f32 %v1154_v6 }
 0x9c8   :  { %v1245_v0 = vpop.permute.xlu1 %1244 }
 0x9c9   :  { %v1247_v61 = vadd.f32 %v1245_v0, %v4178_v38 }
 0x9cb   :  { %3801 = vtanh.f32 %v1247_v61 }
 0x9d4   :  { %v3800_v10 = vpop.eup %3799 }
 0x9d5   :  { %1158 = vrot.lane.b32.xlu0 %v3800_v10, %s3962_s14 }
 0x9d8   :  { %v3802_v47 = vpop.eup %3801 }
 0x9d9   :  { %1251 = vrot.lane.b32.xlu1 %v3802_v47, %s3962_s14 }
 0xa47   :  { %v1159_v1 = vpop.permute.xlu0 %1158 }
 0xa48   :  { %v1161_v4 = vmul.f32 %v1159_v1, %v1156_v50 }
 0xa4a   :  { %v4405_v9 = vadd.f32 %v1162_v2, %v1161_v4 }
 0xa4b   :  { %v1252_v17 = vpop.permute.xlu1 %1251 }
 0xa4c   :  { %v1254_v15 = vmul.f32 %v1252_v17, %v1249_v42  ;;  %v1259_v38 = vpack.c.bf16 %v4405_v9, %v4405_v9 }
 0xa4e   :  { %v4410_v24 = vadd.f32 %v1255_v11, %v1254_v15  ;;  %1261 = vrot.lane.b32.xlu0 %v1259_v38, %s3962_s14 }
 0xa50   :  { %v1352_v22 = vpack.c.bf16 %v4410_v24, %v4410_v24  ;;  %3389 = vst.msk [vmem:[%s5050_s9 + $0x18] sm:$0x3] %vm732_vm2, %v4410_v24 }
 0xa52   :  { %1354 = vrot.lane.b32.xlu1 %v1352_v22, %s3962_s14 }
 0xac0   :  { %v1262_v51 = vpop.permute.xlu0 %1261 }
 0xac1   :  { %3600 = vmatmul.mubr.msk.bf16.vlgmr.msra.gmra.mxu0 %vm556_vm3, %v1262_v51 }
 0xac2   :  { %3610 = vmatpush3.bf16.msra.mxu0 %v4081_v52  ;;  %3611 = vmatprep.mubr.msk.bf16.mxu0 %vm3957_vm1, %v3956_v29 }
 0xac3   :  { %3621 = vmatprep.subr.bf16.mxu0 %v3956_v29 }
 0xac4   :  { %v1355_v44 = vpop.permute.xlu1 %1354 }
 0xac5   :  { %3606 = vmatmul.mubr.msk.bf16.vlgmr.msra.gmra.mxu1 %vm556_vm3, %v1355_v44 }
 0xac6   :  { %3616 = vmatpush3.bf16.msra.mxu1 %v4086_v53  ;;  %3617 = vmatprep.mubr.msk.bf16.mxu1 %vm3957_vm1, %v3956_v29 }
 0xac7   :  { %3627 = vmatprep.subr.bf16.mxu1 %v3956_v29 }
 0xb81   :  { %v1300_v45 = vpop.f32.mrf.mxu0 }
 0xb82   :  { %v1301_v48 = vadd.f32 %v4169_v33, %v1300_v45 }
 0xb83   :  { %v3601_v36 = vpop.f32.mrf.mxu0 }
 0xb84   :  { %v1320_v49 = vrot.slane %v1301_v48, %v4105_v59  ;;  %v1306_v6 = vadd.f32 %v1301_v48, %v4190_v55 }
 0xb85   :  { %v1303_v54 = vpop.f32.mrf.mxu0  ;;  %v1393_v57 = vpop.f32.mrf.mxu1 }
 0xb86   :  { %v1394_v12 = vadd.f32 %v4174_v34, %v1393_v57  ;;  %1321 = vrot.lane.b32.xlu0 %v1320_v49, %s3960_s12  ;;  %v3391_v0 = vmul.f32 -1.442695, %v1306_v6 }
 0xb87   :  { %v3602_v58 = vpop.f32.mrf.mxu0  ;;  %v3607_v60 = vpop.f32.mrf.mxu1 }
 0xb88   :  { %v1413_v16 = vrot.slane %v1394_v12, %v4105_v59  ;;  %v1399_v61 = vadd.f32 %v1394_v12, %v4216_v18  ;;  %3803 = vpow2.f32 %v3391_v0 }
 0xb89   :  { %v1396_v63 = vpop.f32.mrf.mxu1 }
 0xb8a   :  { %1414 = vrot.lane.b32.xlu0 %v1413_v16, %s3960_s12  ;;  %v3394_v10 = vmul.f32 -1.442695, %v1399_v61 }
 0xb8b   :  { %v3608_v3 = vpop.f32.mrf.mxu1 }
 0xb8c   :  { %3805 = vpow2.f32 %v3394_v10 }
 0xb95   :  { %v3804_v47 = vpop.eup %3803 }
 0xb96   :  { %v1310_v50 = vadd.f32 1.0, %v3804_v47 }
 0xb98   :  { %3807 = vrcp.f32 %v1310_v50 }
 0xb99   :  { %v3806_v1 = vpop.eup %3805 }
 0xb9a   :  { %v1403_v2 = vadd.f32 1.0, %v3806_v1 }
 0xb9c   :  { %3809 = vrcp.f32 %v1403_v2 }
 0xba5   :  { %v3808_v4 = vpop.eup %3807 }
 0xba6   :  { %v1331_v49 = vsub.f32 1.0, %v3808_v4  ;;  %v1337_v57 = vmul.f32 %v3808_v4, %v4405_v9 }
 0xba9   :  { %v3810_v11 = vpop.eup %3809 }
 0xbaa   :  { %v1424_v60 = vsub.f32 1.0, %v3810_v11  ;;  %v1430_v16 = vmul.f32 %v3810_v11, %v4410_v24 }
 0xbf8   :  { %v1322_v42 = vpop.permute.xlu0 %1321 }
 0xbf9   :  { %v1324_v17 = vmul.f32 %v3808_v4, %v1322_v42 }
 0xbfb   :  { %1326 = vrot.lane.b32.xlu1 %v1324_v17, %s3961_s13 }
 0xbfc   :  { %v1415_v15 = vpop.permute.xlu0 %1414 }
 0xbfd   :  { %v1417_v38 = vmul.f32 %v3810_v11, %v1415_v15 }
 0xbff   :  { %1419 = vrot.lane.b32.xlu1 %v1417_v38, %s3961_s13 }
 0xc6d   :  { %v1327_v22 = vpop.permute.xlu1 %1326 }
 0xc6e   :  { %v1329_v51 = vadd.f32 %v1327_v22, %v4190_v55 }
 0xc70   :  { %3811 = vtanh.f32 %v1329_v51 }
 0xc71   :  { %v1420_v44 = vpop.permute.xlu1 %1419 }
 0xc72   :  { %v1422_v45 = vadd.f32 %v1420_v44, %v4216_v18 }
 0xc74   :  { %3813 = vtanh.f32 %v1422_v45 }
 0xc7d   :  { %v3812_v48 = vpop.eup %3811 }
 0xc7e   :  { %1333 = vrot.lane.b32.xlu0 %v3812_v48, %s3962_s14 }
 0xc81   :  { %v3814_v36 = vpop.eup %3813 }
 0xc82   :  { %1426 = vrot.lane.b32.xlu1 %v3814_v36, %s3962_s14 }
 0xcf0   :  { %v1334_v54 = vpop.permute.xlu0 %1333 }
 0xcf1   :  { %v1336_v12 = vmul.f32 %v1334_v54, %v1331_v49 }
 0xcf3   :  { %v4446_v58 = vadd.f32 %v1337_v57, %v1336_v12 }
 0xcf4   :  { %v1427_v55 = vpop.permute.xlu1 %1426 }
 0xcf5   :  { %v1429_v63 = vmul.f32 %v1427_v55, %v1424_v60  ;;  %v1434_v18 = vpack.c.bf16 %v4446_v58, %v4446_v58 }
 0xcf7   :  { %v4451_v3 = vadd.f32 %v1430_v16, %v1429_v63  ;;  %1436 = vrot.lane.b32.xlu0 %v1434_v18, %s3962_s14 }
 0xcf9   :  { %v1527_v6 = vpack.c.bf16 %v4451_v3, %v4451_v3  ;;  %3395 = vst.msk [vmem:[%s5050_s9 + $0x16] sm:$0x3] %vm732_vm2, %v4451_v3 }
 0xcfb   :  { %1529 = vrot.lane.b32.xlu1 %v1527_v6, %s3962_s14 }
 0xd69   :  { %v1437_v24 = vpop.permute.xlu0 %1436 }
 0xd6a   :  { %3612 = vmatmul.mubr.msk.bf16.vlgmr.msra.gmra.mxu0 %vm556_vm3, %v1437_v24 }
 0xd6b   :  { %3622 = vmatpush3.bf16.msra.mxu0 %v4081_v52  ;;  %3623 = vmatprep.mubr.msk.bf16.mxu0 %vm3957_vm1, %v3956_v29 }
 0xd6c   :  { %3633 = vmatprep.subr.bf16.mxu0 %v3956_v29 }
 0xd6d   :  { %v1530_v0 = vpop.permute.xlu1 %1529 }
 0xd6e   :  { %3618 = vmatmul.mubr.msk.bf16.vlgmr.msra.gmra.mxu1 %vm556_vm3, %v1530_v0 }
 0xd6f   :  { %3628 = vmatpush3.bf16.msra.mxu1 %v4086_v53  ;;  %3629 = vmatprep.mubr.msk.bf16.mxu1 %vm3957_vm1, %v3956_v29 }
 0xd70   :  { %3639 = vmatprep.subr.bf16.mxu1 %v3956_v29 }
 0xe2a   :  { %v1475_v61 = vpop.f32.mrf.mxu0 }
 0xe2b   :  { %v1476_v10 = vadd.f32 %v4169_v33, %v1475_v61 }
 0xe2c   :  { %v3613_v47 = vpop.f32.mrf.mxu0 }
 0xe2d   :  { %v1495_v52 = vrot.slane %v1476_v10, %v4105_v59  ;;  %v1481_v15 = vadd.f32 %v1476_v10, %v4219_v21 }
 0xe2e   :  { %v1478_v50 = vpop.f32.mrf.mxu0  ;;  %v1568_v1 = vpop.f32.mrf.mxu1 }
 0xe2f   :  { %v1569_v2 = vadd.f32 %v4174_v34, %v1568_v1  ;;  %1496 = vrot.lane.b32.xlu0 %v1495_v52, %s3960_s12  ;;  %v3397_v38 = vmul.f32 -1.442695, %v1481_v15  ;;  %v4517_v15 = vld [vmem:[%s5045_s6] sm:$0xff]  }
 0xe30   :  { %v3614_v4 = vpop.f32.mrf.mxu0  ;;  %v3619_v42 = vpop.f32.mrf.mxu1 }
 0xe31   :  { %v1588_v53 = vrot.slane %v1569_v2, %v4105_v59  ;;  %v1574_v22 = vadd.f32 %v1569_v2, %v4225_v25  ;;  %3815 = vpow2.f32 %v3397_v38 }
 0xe32   :  { %v1571_v17 = vpop.f32.mrf.mxu1 }
 0xe33   :  { %1589 = vrot.lane.b32.xlu0 %v1588_v53, %s3960_s12  ;;  %v3400_v51 = vmul.f32 -1.442695, %v1574_v22  ;;  %v4507_v17 = vld [vmem:[%s5044_s2] sm:$0xff]  }
 0xe34   :  { %v3620_v11 = vpop.f32.mrf.mxu1 }
 0xe35   :  { %3817 = vpow2.f32 %v3400_v51 }
 0xe3e   :  { %v3816_v44 = vpop.eup %3815 }
 0xe3f   :  { %v1485_v45 = vadd.f32 1.0, %v3816_v44 }
 0xe41   :  { %3819 = vrcp.f32 %v1485_v45 }
 0xe42   :  { %v3818_v48 = vpop.eup %3817 }
 0xe43   :  { %v1578_v36 = vadd.f32 1.0, %v3818_v48 }
 0xe45   :  { %3821 = vrcp.f32 %v1578_v36 }
 0xe4e   :  { %v3820_v49 = vpop.eup %3819 }
 0xe4f   :  { %v1506_v61 = vsub.f32 1.0, %v3820_v49  ;;  %v1512_v47 = vmul.f32 %v3820_v49, %v4446_v58 }
 0xe52   :  { %v3822_v12 = vpop.eup %3821 }
 0xe53   :  { %v1599_v1 = vsub.f32 1.0, %v3822_v12  ;;  %v1605_v2 = vmul.f32 %v3822_v12, %v4451_v3 }
 0xea1   :  { %v1497_v54 = vpop.permute.xlu0 %1496 }
 0xea2   :  { %v1499_v57 = vmul.f32 %v3820_v49, %v1497_v54 }
 0xea4   :  { %1501 = vrot.lane.b32.xlu1 %v1499_v57, %s3961_s13 }
 0xea5   :  { %v1590_v60 = vpop.permute.xlu0 %1589 }
 0xea6   :  { %v1592_v55 = vmul.f32 %v3822_v12, %v1590_v60 }
 0xea8   :  { %1594 = vrot.lane.b32.xlu1 %v1592_v55, %s3961_s13 }
 0xf16   :  { %v1502_v16 = vpop.permute.xlu1 %1501 }
 0xf17   :  { %v1504_v63 = vadd.f32 %v1502_v16, %v4219_v21 }
 0xf19   :  { %3823 = vtanh.f32 %v1504_v63 }
 0xf1a   :  { %v1595_v18 = vpop.permute.xlu1 %1594 }
 0xf1b   :  { %v1597_v6 = vadd.f32 %v1595_v18, %v4225_v25 }
 0xf1d   :  { %3825 = vtanh.f32 %v1597_v6 }
 0xf26   :  { %v3824_v24 = vpop.eup %3823 }
 0xf27   :  { %1508 = vrot.lane.b32.xlu0 %v3824_v24, %s3962_s14 }
 0xf2a   :  { %v3826_v0 = vpop.eup %3825 }
 0xf2b   :  { %1601 = vrot.lane.b32.xlu1 %v3826_v0, %s3962_s14 }
 0xf99   :  { %v1509_v10 = vpop.permute.xlu0 %1508 }
 0xf9a   :  { %v1511_v52 = vmul.f32 %v1509_v10, %v1506_v61 }
 0xf9c   :  { %v4487_v50 = vadd.f32 %v1512_v47, %v1511_v52 }
 0xf9d   :  { %v1602_v21 = vpop.permute.xlu1 %1601 }
 0xf9e   :  { %v1604_v4 = vmul.f32 %v1602_v21, %v1599_v1  ;;  %v1609_v25 = vpack.c.bf16 %v4487_v50, %v4487_v50 }
 0xfa0   :  { %v4492_v42 = vadd.f32 %v1605_v2, %v1604_v4  ;;  %1611 = vrot.lane.b32.xlu0 %v1609_v25, %s3962_s14 }
 0xfa2   :  { %3401 = vst.msk [vmem:[%s5050_s9 + $0x14] sm:$0x3] %vm732_vm2, %v4492_v42  ;;  %v1702_v53 = vpack.c.bf16 %v4492_v42, %v4492_v42 }
 0xfa4   :  { %1704 = vrot.lane.b32.xlu1 %v1702_v53, %s3962_s14 }
0x1012   :  { %v1612_v3 = vpop.permute.xlu0 %1611 }
0x1013   :  { %3624 = vmatmul.mubr.msk.bf16.vlgmr.msra.gmra.mxu0 %vm556_vm3, %v1612_v3 }
0x1014   :  { %3634 = vmatpush3.bf16.msra.mxu0 %v4507_v17  ;;  %3635 = vmatprep.mubr.msk.bf16.mxu0 %vm3957_vm1, %v3956_v29 }
0x1015   :  { %3645 = vmatprep.subr.bf16.mxu0 %v3956_v29 }
0x1016   :  { %v1705_v11 = vpop.permute.xlu1 %1704 }
0x1017   :  { %3630 = vmatmul.mubr.msk.bf16.vlgmr.msra.gmra.mxu1 %vm556_vm3, %v1705_v11 }
0x1018   :  { %3640 = vmatpush3.bf16.msra.mxu1 %v4517_v15  ;;  %3641 = vmatprep.mubr.msk.bf16.mxu1 %vm3957_vm1, %v3956_v29 }
0x1019   :  { %3651 = vmatprep.subr.bf16.mxu1 %v3956_v29 }
0x10d3   :  { %v1650_v38 = vpop.f32.mrf.mxu0 }
0x10d4   :  { %v1651_v22 = vadd.f32 %v4169_v33, %v1650_v38 }
0x10d5   :  { %v3625_v51 = vpop.f32.mrf.mxu0 }
0x10d6   :  { %v1670_v44 = vrot.slane %v1651_v22, %v4105_v59  ;;  %v1656_v55 = vadd.f32 %v1651_v22, %v4228_v26 }
0x10d7   :  { %v1653_v45 = vpop.f32.mrf.mxu0  ;;  %v1743_v48 = vpop.f32.mrf.mxu1 }
0x10d8   :  { %v1744_v36 = vadd.f32 %v4174_v34, %v1743_v48  ;;  %1671 = vrot.lane.b32.xlu0 %v1670_v44, %s3960_s12  ;;  %v3403_v33 = vmul.f32 -1.442695, %v1656_v55 }
0x10d9   :  { %v3626_v49 = vpop.f32.mrf.mxu0  ;;  %v3631_v54 = vpop.f32.mrf.mxu1 }
0x10da   :  { %v1763_v57 = vrot.slane %v1744_v36, %v4105_v59  ;;  %v1749_v16 = vadd.f32 %v1744_v36, %v4231_v27  ;;  %3827 = vpow2.f32 %v3403_v33 }
0x10db   :  { %v1746_v12 = vpop.f32.mrf.mxu1 }
0x10dc   :  { %1764 = vrot.lane.b32.xlu0 %v1763_v57, %s3960_s12  ;;  %v3406_v63 = vmul.f32 -1.442695, %v1749_v16 }
0x10dd   :  { %v3632_v60 = vpop.f32.mrf.mxu1 }
0x10de   :  { %3829 = vpow2.f32 %v3406_v63  ;;  %v4567_v60 = vld [vmem:[%s5048_s4] ss:$0 sm:$0xff] }
0x10e7   :  { %v3828_v18 = vpop.eup %3827 }
0x10e8   :  { %v1660_v34 = vadd.f32 1.0, %v3828_v18 }
0x10ea   :  { %3831 = vrcp.f32 %v1660_v34  ;;  %v4574_v34 = vld [vmem:[%s5049_s8] ss:$0 sm:$0xff] }
0x10eb   :  { %v3830_v6 = vpop.eup %3829 }
0x10ec   :  { %v1753_v24 = vadd.f32 1.0, %v3830_v6 }
0x10ee   :  { %3833 = vrcp.f32 %v1753_v24 }
0x10f7   :  { %v3832_v0 = vpop.eup %3831 }
0x10f8   :  { %v1681_v11 = vsub.f32 1.0, %v3832_v0  ;;  %v1687_v22 = vmul.f32 %v3832_v0, %v4487_v50 }
0x10fb   :  { %v3834_v47 = vpop.eup %3833 }
0x10fc   :  { %v1774_v45 = vsub.f32 1.0, %v3834_v47  ;;  %v1780_v48 = vmul.f32 %v3834_v47, %v4492_v42 }
0x114a   :  { %v1672_v61 = vpop.permute.xlu0 %1671 }
0x114b   :  { %v1674_v10 = vmul.f32 %v3832_v0, %v1672_v61 }
0x114d   :  { %1676 = vrot.lane.b32.xlu1 %v1674_v10, %s3961_s13 }
0x114e   :  { %v1765_v52 = vpop.permute.xlu0 %1764 }
0x114f   :  { %v1767_v1 = vmul.f32 %v3834_v47, %v1765_v52 }
0x1151   :  { %1769 = vrot.lane.b32.xlu1 %v1767_v1, %s3961_s13 }
0x11bf   :  { %v1677_v21 = vpop.permute.xlu1 %1676 }
0x11c0   :  { %v1679_v2 = vadd.f32 %v1677_v21, %v4228_v26 }
0x11c2   :  { %3835 = vtanh.f32 %v1679_v2 }
0x11c3   :  { %v1770_v4 = vpop.permute.xlu1 %1769 }
0x11c4   :  { %v1772_v25 = vadd.f32 %v1770_v4, %v4231_v27 }
0x11c6   :  { %3837 = vtanh.f32 %v1772_v25 }
0x11cf   :  { %v3836_v53 = vpop.eup %3835 }
0x11d0   :  { %1683 = vrot.lane.b32.xlu0 %v3836_v53, %s3962_s14 }
0x11d3   :  { %v3838_v3 = vpop.eup %3837 }
0x11d4   :  { %1776 = vrot.lane.b32.xlu1 %v3838_v3, %s3962_s14 }
0x1242   :  { %v1684_v38 = vpop.permute.xlu0 %1683 }
0x1243   :  { %v1686_v51 = vmul.f32 %v1684_v38, %v1681_v11 }
0x1245   :  { %v4538_v44 = vadd.f32 %v1687_v22, %v1686_v51 }
0x1246   :  { %v1777_v26 = vpop.permute.xlu1 %1776 }
0x1247   :  { %v1779_v36 = vmul.f32 %v1777_v26, %v1774_v45  ;;  %v1784_v27 = vpack.c.bf16 %v4538_v44, %v4538_v44 }
0x1249   :  { %v4543_v49 = vadd.f32 %v1780_v48, %v1779_v36  ;;  %1786 = vrot.lane.b32.xlu0 %v1784_v27, %s3962_s14 }
0x124b   :  { %3407 = vst.msk [vmem:[%s5050_s9 + $0x12] sm:$0x3] %vm732_vm2, %v4543_v49  ;;  %v1877_v54 = vpack.c.bf16 %v4543_v49, %v4543_v49 }
0x124d   :  { %1879 = vrot.lane.b32.xlu1 %v1877_v54, %s3962_s14 }
0x12bb   :  { %v1787_v42 = vpop.permute.xlu0 %1786 }
0x12bc   :  { %3636 = vmatmul.mubr.msk.bf16.vlgmr.msra.gmra.mxu0 %vm556_vm3, %v1787_v42 }
0x12bd   :  { %3646 = vmatpush3.bf16.msra.mxu0 %v4507_v17  ;;  %3647 = vmatprep.mubr.msk.bf16.mxu0 %vm3957_vm1, %v3956_v29 }
0x12be   :  { %3657 = vmatprep.subr.bf16.mxu0 %v3956_v29 }
0x12bf   :  { %v1880_v57 = vpop.permute.xlu1 %1879 }
0x12c0   :  { %3642 = vmatmul.mubr.msk.bf16.vlgmr.msra.gmra.mxu1 %vm556_vm3, %v1880_v57 }
0x12c1   :  { %3652 = vmatpush3.bf16.msra.mxu1 %v4517_v15  ;;  %3653 = vmatprep.mubr.msk.bf16.mxu1 %vm3957_vm1, %v3956_v29 }
0x12c2   :  { %3663 = vmatprep.subr.bf16.mxu1 %v3956_v29 }
0x137c   :  { %v1825_v12 = vpop.f32.mrf.mxu0 }
0x137d   :  { %v1826_v55 = vadd.f32 %v4567_v60, %v1825_v12 }
0x137e   :  { %v3637_v33 = vpop.f32.mrf.mxu0 }
0x137f   :  { %v1845_v16 = vrot.slane %v1826_v55, %v4105_v59  ;;  %v1831_v52 = vadd.f32 %v1826_v55, %v4234_v28 }
0x1380   :  { %v1828_v63 = vpop.f32.mrf.mxu0  ;;  %v1918_v18 = vpop.f32.mrf.mxu1 }
0x1381   :  { %v1919_v6 = vadd.f32 %v4574_v34, %v1918_v18  ;;  %1846 = vrot.lane.b32.xlu0 %v1845_v16, %s3960_s12  ;;  %v3409_v1 = vmul.f32 -1.442695, %v1831_v52 }
0x1382   :  { %v3638_v24 = vpop.f32.mrf.mxu0  ;;  %v3643_v0 = vpop.f32.mrf.mxu1 }
0x1383   :  { %v1938_v61 = vrot.slane %v1919_v6, %v4105_v59  ;;  %v1924_v21 = vadd.f32 %v1919_v6, %v4132_v8  ;;  %3839 = vpow2.f32 %v3409_v1 }
0x1384   :  { %v1921_v10 = vpop.f32.mrf.mxu1 }
0x1385   :  { %1939 = vrot.lane.b32.xlu0 %v1938_v61, %s3960_s12  ;;  %v3412_v2 = vmul.f32 -1.442695, %v1924_v21 }
0x1386   :  { %v3644_v47 = vpop.f32.mrf.mxu1 }
0x1387   :  { %3841 = vpow2.f32 %v3412_v2 }
0x1390   :  { %v3840_v4 = vpop.eup %3839 }
0x1391   :  { %v1835_v25 = vadd.f32 1.0, %v3840_v4 }
0x1393   :  { %3843 = vrcp.f32 %v1835_v25 }
0x1394   :  { %v3842_v53 = vpop.eup %3841 }
0x1395   :  { %v1928_v3 = vadd.f32 1.0, %v3842_v53 }
0x1397   :  { %3845 = vrcp.f32 %v1928_v3 }
0x13a0   :  { %v3844_v11 = vpop.eup %3843 }
0x13a1   :  { %v1856_v12 = vsub.f32 1.0, %v3844_v11  ;;  %v1862_v33 = vmul.f32 %v3844_v11, %v4538_v44 }
0x13a4   :  { %v3846_v51 = vpop.eup %3845 }
0x13a5   :  { %v1949_v18 = vsub.f32 1.0, %v3846_v51  ;;  %v1955_v6 = vmul.f32 %v3846_v51, %v4543_v49 }
0x13f3   :  { %v1847_v38 = vpop.permute.xlu0 %1846 }
0x13f4   :  { %v1849_v22 = vmul.f32 %v3844_v11, %v1847_v38 }
0x13f6   :  { %1851 = vrot.lane.b32.xlu1 %v1849_v22, %s3961_s13 }
0x13f7   :  { %v1940_v45 = vpop.permute.xlu0 %1939 }
0x13f8   :  { %v1942_v26 = vmul.f32 %v3846_v51, %v1940_v45 }
0x13fa   :  { %1944 = vrot.lane.b32.xlu1 %v1942_v26, %s3961_s13 }
0x1468   :  { %v1852_v48 = vpop.permute.xlu1 %1851 }
0x1469   :  { %v1854_v36 = vadd.f32 %v1852_v48, %v4234_v28 }
0x146b   :  { %3847 = vtanh.f32 %v1854_v36 }
0x146c   :  { %v1945_v27 = vpop.permute.xlu1 %1944 }
0x146d   :  { %v1947_v54 = vadd.f32 %v1945_v27, %v4132_v8 }
0x146f   :  { %3849 = vtanh.f32 %v1947_v54 }
0x1478   :  { %v3848_v42 = vpop.eup %3847 }
0x1479   :  { %1858 = vrot.lane.b32.xlu0 %v3848_v42, %s3962_s14 }
0x147c   :  { %v3850_v57 = vpop.eup %3849 }
0x147d   :  { %1951 = vrot.lane.b32.xlu1 %v3850_v57, %s3962_s14 }
0x14eb   :  { %v1859_v55 = vpop.permute.xlu0 %1858 }
0x14ec   :  { %v1861_v16 = vmul.f32 %v1859_v55, %v1856_v12 }
0x14ee   :  { %v4589_v63 = vadd.f32 %v1862_v33, %v1861_v16 }
0x14ef   :  { %v1952_v28 = vpop.permute.xlu1 %1951 }
0x14f0   :  { %v1954_v24 = vmul.f32 %v1952_v28, %v1949_v18  ;;  %v1959_v8 = vpack.c.bf16 %v4589_v63, %v4589_v63 }
0x14f2   :  { %v4594_v0 = vadd.f32 %v1955_v6, %v1954_v24  ;;  %1961 = vrot.lane.b32.xlu0 %v1959_v8, %s3962_s14 }
0x14f4   :  { %3413 = vst.msk [vmem:[%s5050_s9 + $0x10] sm:$0x3] %vm732_vm2, %v4594_v0  ;;  %v2051_v61 = vpack.c.bf16 %v4594_v0, %v4594_v0 }
0x14f6   :  { %2053 = vrot.lane.b32.xlu1 %v2051_v61, %s3962_s14 }
0x1564   :  { %v1962_v49 = vpop.permute.xlu0 %1961 }
0x1565   :  { %3648 = vmatmul.mubr.msk.bf16.vlgmr.msra.gmra.mxu0 %vm556_vm3, %v1962_v49 }
0x1566   :  { %3658 = vmatpush3.bf16.msra.mxu0 %v4507_v17  ;;  %3659 = vmatprep.mubr.msk.bf16.mxu0 %vm3957_vm1, %v3956_v29 }
0x1567   :  { %3669 = vmatprep.subr.bf16.mxu0 %v3956_v29 }
0x1568   :  { %v2054_v10 = vpop.permute.xlu1 %2053 }
0x1569   :  { %3654 = vmatmul.mubr.msk.bf16.vlgmr.msra.gmra.mxu1 %vm556_vm3, %v2054_v10 }
0x156a   :  { %3664 = vmatpush3.bf16.msra.mxu1 %v4517_v15  ;;  %3665 = vmatprep.mubr.msk.bf16.mxu1 %vm3957_vm1, %v3956_v29 }
0x156b   :  { %3675 = vmatprep.subr.bf16.mxu1 %v3956_v29 }
0x1625   :  { %v2000_v47 = vpop.f32.mrf.mxu0 }
0x1626   :  { %v2001_v52 = vadd.f32 %v4567_v60, %v2000_v47 }
0x1627   :  { %v3649_v1 = vpop.f32.mrf.mxu0 }
0x1628   :  { %v2020_v21 = vrot.slane %v2001_v52, %v4105_v59  ;;  %v2006_v51 = vadd.f32 %v2001_v52, %v4120_v5 }
0x1629   :  { %v2003_v2 = vpop.f32.mrf.mxu0  ;;  %v2092_v4 = vpop.f32.mrf.mxu1 }
0x162a   :  { %v2093_v25 = vadd.f32 %v4574_v34, %v2092_v4  ;;  %2021 = vrot.lane.b32.xlu0 %v2020_v21, %s3960_s12  ;;  %v3415_v45 = vmul.f32 -1.442695, %v2006_v51 }
0x162b   :  { %v3650_v53 = vpop.f32.mrf.mxu0  ;;  %v3655_v3 = vpop.f32.mrf.mxu1 }
0x162c   :  { %v2112_v11 = vrot.slane %v2093_v25, %v4105_v59  ;;  %v2098_v26 = vadd.f32 %v2093_v25, %v4237_v31  ;;  %3851 = vpow2.f32 %v3415_v45 }
0x162d   :  { %v2095_v38 = vpop.f32.mrf.mxu1 }
0x162e   :  { %2113 = vrot.lane.b32.xlu0 %v2112_v11, %s3960_s12  ;;  %v3418_v48 = vmul.f32 -1.442695, %v2098_v26 }
0x162f   :  { %v3656_v22 = vpop.f32.mrf.mxu1 }
0x1630   :  { %3853 = vpow2.f32 %v3418_v48 }
0x1639   :  { %v3852_v36 = vpop.eup %3851 }
0x163a   :  { %v2010_v27 = vadd.f32 1.0, %v3852_v36 }
0x163c   :  { %3855 = vrcp.f32 %v2010_v27 }
0x163d   :  { %v3854_v54 = vpop.eup %3853 }
0x163e   :  { %v2102_v42 = vadd.f32 1.0, %v3854_v54 }
0x1640   :  { %3857 = vrcp.f32 %v2102_v42 }
0x1649   :  { %v3856_v57 = vpop.eup %3855 }
0x164a   :  { %v2031_v10 = vsub.f32 1.0, %v3856_v57  ;;  %v2037_v52 = vmul.f32 %v3856_v57, %v4589_v63 }
0x164d   :  { %v3858_v33 = vpop.eup %3857 }
0x164e   :  { %v2123_v2 = vsub.f32 1.0, %v3858_v33  ;;  %v2129_v4 = vmul.f32 %v3858_v33, %v4594_v0 }
0x169c   :  { %v2022_v12 = vpop.permute.xlu0 %2021 }
0x169d   :  { %v2024_v55 = vmul.f32 %v3856_v57, %v2022_v12 }
0x169f   :  { %2026 = vrot.lane.b32.xlu1 %v2024_v55, %s3961_s13 }
0x16a0   :  { %v2114_v16 = vpop.permute.xlu0 %2113 }
0x16a1   :  { %v2116_v18 = vmul.f32 %v3858_v33, %v2114_v16 }
0x16a3   :  { %2118 = vrot.lane.b32.xlu1 %v2116_v18, %s3961_s13 }
0x1711   :  { %v2027_v28 = vpop.permute.xlu1 %2026 }
0x1712   :  { %v2029_v6 = vadd.f32 %v2027_v28, %v4120_v5 }
0x1714   :  { %3859 = vtanh.f32 %v2029_v6 }
0x1715   :  { %v2119_v24 = vpop.permute.xlu1 %2118 }
0x1716   :  { %v2121_v8 = vadd.f32 %v2119_v24, %v4237_v31 }
0x1718   :  { %3861 = vtanh.f32 %v2121_v8 }
0x1721   :  { %v3860_v61 = vpop.eup %3859 }
0x1722   :  { %2033 = vrot.lane.b32.xlu0 %v3860_v61, %s3962_s14 }
0x1725   :  { %v3862_v49 = vpop.eup %3861 }
0x1726   :  { %2125 = vrot.lane.b32.xlu1 %v3862_v49, %s3962_s14 }
0x1794   :  { %v2034_v47 = vpop.permute.xlu0 %2033 }
0x1795   :  { %v2036_v1 = vmul.f32 %v2034_v47, %v2031_v10 }
0x1797   :  { %v4630_v21 = vadd.f32 %v2037_v52, %v2036_v1 }
0x1798   :  { %v2126_v5 = vpop.permute.xlu1 %2125 }
0x1799   :  { %v2128_v25 = vmul.f32 %v2126_v5, %v2123_v2  ;;  %v2132_v31 = vpack.c.bf16 %v4630_v21, %v4630_v21 }
0x179b   :  { %v4635_v53 = vadd.f32 %v2129_v4, %v2128_v25  ;;  %2134 = vrot.lane.b32.xlu0 %v2132_v31, %s3962_s14 }
0x179d   :  { %v2224_v3 = vpack.c.bf16 %v4635_v53, %v4635_v53 }
0x179f   :  { %2226 = vrot.lane.b32.xlu1 %v2224_v3, %s3962_s14 }
0x180d   :  { %v2135_v11 = vpop.permute.xlu0 %2134 }
0x180e   :  { %3660 = vmatmul.mubr.msk.bf16.vlgmr.msra.gmra.mxu0 %vm556_vm3, %v2135_v11 }
0x180f   :  { %3670 = vmatpush3.bf16.msra.mxu0 %v4507_v17  ;;  %3671 = vmatprep.mubr.msk.bf16.mxu0 %vm3957_vm1, %v3956_v29 }
0x1810   :  { %3681 = vmatprep.subr.bf16.mxu0 %v3956_v29 }
0x1811   :  { %v2227_v0 = vpop.permute.xlu1 %2226 }
0x1812   :  { %3666 = vmatmul.mubr.msk.bf16.vlgmr.msra.gmra.mxu1 %vm556_vm3, %v2227_v0 }
0x1813   :  { %3676 = vmatpush3.bf16.msra.mxu1 %v4517_v15  ;;  %3677 = vmatprep.mubr.msk.bf16.mxu1 %vm3957_vm1, %v3956_v29 }
0x1814   :  { %3687 = vmatprep.subr.bf16.mxu1 %v3956_v29 }
0x18ce   :  { %v2173_v38 = vpop.f32.mrf.mxu0 }
0x18cf   :  { %v2174_v22 = vadd.f32 %v4567_v60, %v2173_v38 }
0x18d0   :  { %v3661_v51 = vpop.f32.mrf.mxu0 }
0x18d1   :  { %v2193_v45 = vrot.slane %v2174_v22, %v4105_v59  ;;  %v2179_v55 = vadd.f32 %v2174_v22, %v4240_v32 }
0x18d2   :  { %v2176_v26 = vpop.f32.mrf.mxu0  ;;  %v2265_v48 = vpop.f32.mrf.mxu1 }
0x18d3   :  { %v2266_v36 = vadd.f32 %v4574_v34, %v2265_v48  ;;  %2194 = vrot.lane.b32.xlu0 %v2193_v45, %s3960_s12  ;;  %v3421_v33 = vmul.f32 -1.442695, %v2179_v55 }
0x18d4   :  { %v3662_v27 = vpop.f32.mrf.mxu0  ;;  %v3667_v54 = vpop.f32.mrf.mxu1 }
0x18d5   :  { %v2285_v42 = vrot.slane %v2266_v36, %v4105_v59  ;;  %v2271_v16 = vadd.f32 %v2266_v36, %v4243_v14  ;;  %3863 = vpow2.f32 %v3421_v33 }
0x18d6   :  { %v2268_v57 = vpop.f32.mrf.mxu1 }
0x18d7   :  { %2286 = vrot.lane.b32.xlu0 %v2285_v42, %s3960_s12  ;;  %v3424_v18 = vmul.f32 -1.442695, %v2271_v16 }
0x18d8   :  { %v3668_v12 = vpop.f32.mrf.mxu1 }
0x18d9   :  { %3865 = vpow2.f32 %v3424_v18 }
0x18e2   :  { %v3864_v28 = vpop.eup %3863 }
0x18e3   :  { %v2183_v6 = vadd.f32 1.0, %v3864_v28 }
0x18e5   :  { %3867 = vrcp.f32 %v2183_v6 }
0x18e6   :  { %v3866_v24 = vpop.eup %3865 }
0x18e7   :  { %v2275_v8 = vadd.f32 1.0, %v3866_v24 }
0x18e9   :  { %3869 = vrcp.f32 %v2275_v8 }
0x18f2   :  { %v3868_v61 = vpop.eup %3867 }
0x18f3   :  { %v2204_v11 = vsub.f32 1.0, %v3868_v61  ;;  %v2210_v38 = vmul.f32 %v3868_v61, %v4630_v21 }
0x18f6   :  { %v3870_v47 = vpop.eup %3869 }
0x18f7   :  { %v2296_v45 = vsub.f32 1.0, %v3870_v47  ;;  %v2302_v26 = vmul.f32 %v3870_v47, %v4635_v53 }
0x1945   :  { %v2195_v49 = vpop.permute.xlu0 %2194 }
0x1946   :  { %v2197_v10 = vmul.f32 %v3868_v61, %v2195_v49 }
0x1948   :  { %2199 = vrot.lane.b32.xlu1 %v2197_v10, %s3961_s13 }
0x1949   :  { %v2287_v52 = vpop.permute.xlu0 %2286 }
0x194a   :  { %v2289_v1 = vmul.f32 %v3870_v47, %v2287_v52 }
0x194c   :  { %2291 = vrot.lane.b32.xlu1 %v2289_v1, %s3961_s13 }
0x19ba   :  { %v2200_v2 = vpop.permute.xlu1 %2199 }
0x19bb   :  { %v2202_v5 = vadd.f32 %v2200_v2, %v4240_v32 }
0x19bd   :  { %3871 = vtanh.f32 %v2202_v5 }
0x19be   :  { %v2292_v4 = vpop.permute.xlu1 %2291 }
0x19bf   :  { %v2294_v25 = vadd.f32 %v2292_v4, %v4243_v14 }
0x19c1   :  { %3873 = vtanh.f32 %v2294_v25 }
0x19ca   :  { %v3872_v31 = vpop.eup %3871 }
0x19cb   :  { %2206 = vrot.lane.b32.xlu0 %v3872_v31, %s3962_s14 }
0x19ce   :  { %v3874_v3 = vpop.eup %3873 }
0x19cf   :  { %2298 = vrot.lane.b32.xlu1 %v3874_v3, %s3962_s14 }
0x1a3d   :  { %v2207_v0 = vpop.permute.xlu0 %2206 }
0x1a3e   :  { %v2209_v22 = vmul.f32 %v2207_v0, %v2204_v11 }
0x1a40   :  { %v4666_v51 = vadd.f32 %v2210_v38, %v2209_v22 }
0x1a41   :  { %v2299_v32 = vpop.permute.xlu1 %2298 }
0x1a42   :  { %v2301_v48 = vmul.f32 %v2299_v32, %v2296_v45  ;;  %v2305_v14 = vpack.c.bf16 %v4666_v51, %v4666_v51 }
0x1a44   :  { %v4671_v36 = vadd.f32 %v2302_v26, %v2301_v48  ;;  %2307 = vrot.lane.b32.xlu0 %v2305_v14, %s3962_s14 }
0x1a46   :  { %v2397_v27 = vpack.c.bf16 %v4671_v36, %v4671_v36 }
0x1a48   :  { %2399 = vrot.lane.b32.xlu1 %v2397_v27, %s3962_s14 }
0x1ab6   :  { %v2308_v54 = vpop.permute.xlu0 %2307 }
0x1ab7   :  { %3672 = vmatmul.mubr.msk.bf16.vlgmr.msra.gmra.mxu0 %vm556_vm3, %v2308_v54 }
0x1ab8   :  { %3682 = vmatpush3.bf16.msra.mxu0 %v4507_v17  ;;  %3683 = vmatprep.mubr.msk.bf16.mxu0 %vm3957_vm1, %v3956_v29 }
0x1ab9   :  { %3693 = vmatprep.subr.bf16.mxu0 %v3956_v29 }
0x1aba   :  { %v2400_v42 = vpop.permute.xlu1 %2399 }
0x1abb   :  { %3678 = vmatmul.mubr.msk.bf16.vlgmr.msra.gmra.mxu1 %vm556_vm3, %v2400_v42 }
0x1abc   :  { %3688 = vmatpush3.bf16.msra.mxu1 %v4517_v15  ;;  %3689 = vmatprep.mubr.msk.bf16.mxu1 %vm3957_vm1, %v3956_v29 }
0x1abd   :  { %3699 = vmatprep.subr.bf16.mxu1 %v3956_v29 }
0x1b77   :  { %v2346_v57 = vpop.f32.mrf.mxu0 }
0x1b78   :  { %v2347_v12 = vadd.f32 %v4567_v60, %v2346_v57 }
0x1b79   :  { %v3673_v55 = vpop.f32.mrf.mxu0 }
0x1b7a   :  { %v2366_v33 = vrot.slane %v2347_v12, %v4105_v59  ;;  %v2352_v10 = vadd.f32 %v2347_v12, %v4247_v13 }
0x1b7b   :  { %v2349_v16 = vpop.f32.mrf.mxu0  ;;  %v2438_v18 = vpop.f32.mrf.mxu1 }
0x1b7c   :  { %v2439_v28 = vadd.f32 %v4574_v34, %v2438_v18  ;;  %2367 = vrot.lane.b32.xlu0 %v2366_v33, %s3960_s12  ;;  %v3427_v47 = vmul.f32 -1.442695, %v2352_v10 }
0x1b7d   :  { %v3674_v6 = vpop.f32.mrf.mxu0  ;;  %v3679_v24 = vpop.f32.mrf.mxu1 }
0x1b7e   :  { %v2458_v8 = vrot.slane %v2439_v28, %v4105_v59  ;;  %v2444_v52 = vadd.f32 %v2439_v28, %v4250_v35  ;;  %3875 = vpow2.f32 %v3427_v47 }
0x1b7f   :  { %v2441_v61 = vpop.f32.mrf.mxu1 }
0x1b80   :  { %2459 = vrot.lane.b32.xlu0 %v2458_v8, %s3960_s12  ;;  %v3430_v1 = vmul.f32 -1.442695, %v2444_v52 }
0x1b81   :  { %v3680_v49 = vpop.f32.mrf.mxu1 }
0x1b82   :  { %3877 = vpow2.f32 %v3430_v1 }
0x1b8b   :  { %v3876_v2 = vpop.eup %3875 }
0x1b8c   :  { %v2356_v5 = vadd.f32 1.0, %v3876_v2 }
0x1b8e   :  { %3879 = vrcp.f32 %v2356_v5 }
0x1b8f   :  { %v3878_v4 = vpop.eup %3877 }
0x1b90   :  { %v2448_v25 = vadd.f32 1.0, %v3878_v4 }
0x1b92   :  { %3881 = vrcp.f32 %v2448_v25 }
0x1b9b   :  { %v3880_v31 = vpop.eup %3879 }
0x1b9c   :  { %v2377_v54 = vsub.f32 1.0, %v3880_v31  ;;  %v2383_v57 = vmul.f32 %v3880_v31, %v4666_v51 }
0x1b9f   :  { %v3882_v0 = vpop.eup %3881 }
0x1ba0   :  { %v2469_v33 = vsub.f32 1.0, %v3882_v0  ;;  %v2475_v16 = vmul.f32 %v3882_v0, %v4671_v36 }
0x1bee   :  { %v2368_v3 = vpop.permute.xlu0 %2367 }
0x1bef   :  { %v2370_v11 = vmul.f32 %v3880_v31, %v2368_v3 }
0x1bf1   :  { %2372 = vrot.lane.b32.xlu1 %v2370_v11, %s3961_s13 }
0x1bf2   :  { %v2460_v38 = vpop.permute.xlu0 %2459 }
0x1bf3   :  { %v2462_v22 = vmul.f32 %v3882_v0, %v2460_v38 }
0x1bf5   :  { %2464 = vrot.lane.b32.xlu1 %v2462_v22, %s3961_s13 }
0x1c63   :  { %v2373_v45 = vpop.permute.xlu1 %2372 }
0x1c64   :  { %v2375_v32 = vadd.f32 %v2373_v45, %v4247_v13 }
0x1c66   :  { %3883 = vtanh.f32 %v2375_v32 }
0x1c67   :  { %v2465_v26 = vpop.permute.xlu1 %2464 }
0x1c68   :  { %v2467_v48 = vadd.f32 %v2465_v26, %v4250_v35 }
0x1c6a   :  { %3885 = vtanh.f32 %v2467_v48 }
0x1c73   :  { %v3884_v14 = vpop.eup %3883 }
0x1c74   :  { %2379 = vrot.lane.b32.xlu0 %v3884_v14, %s3962_s14 }
0x1c77   :  { %v3886_v27 = vpop.eup %3885 }
0x1c78   :  { %2471 = vrot.lane.b32.xlu1 %v3886_v27, %s3962_s14 }
0x1ce6   :  { %v2380_v42 = vpop.permute.xlu0 %2379 }
0x1ce7   :  { %v2382_v12 = vmul.f32 %v2380_v42, %v2377_v54 }
0x1ce9   :  { %v4702_v55 = vadd.f32 %v2383_v57, %v2382_v12 }
0x1cea   :  { %v2472_v13 = vpop.permute.xlu1 %2471 }
0x1ceb   :  { %v2474_v18 = vmul.f32 %v2472_v13, %v2469_v33  ;;  %v2478_v35 = vpack.c.bf16 %v4702_v55, %v4702_v55 }
0x1ced   :  { %v4707_v28 = vadd.f32 %v2475_v16, %v2474_v18  ;;  %2480 = vrot.lane.b32.xlu0 %v2478_v35, %s3962_s14 }
0x1cef   :  { %v2570_v6 = vpack.c.bf16 %v4707_v28, %v4707_v28 }
0x1cf1   :  { %2572 = vrot.lane.b32.xlu1 %v2570_v6, %s3962_s14 }
0x1d5f   :  { %v2481_v24 = vpop.permute.xlu0 %2480 }
0x1d60   :  { %3684 = vmatmul.mubr.msk.bf16.vlgmr.msra.gmra.mxu0 %vm556_vm3, %v2481_v24 }
0x1d61   :  { %3694 = vmatpush3.bf16.msra.mxu0 %v4507_v17  ;;  %3695 = vmatprep.mubr.msk.bf16.mxu0 %vm3957_vm1, %v3956_v29 }
0x1d62   :  { %3705 = vmatprep.subr.bf16.mxu0 %v3956_v29 }
0x1d63   :  { %v2573_v8 = vpop.permute.xlu1 %2572 }
0x1d64   :  { %3690 = vmatmul.mubr.msk.bf16.vlgmr.msra.gmra.mxu1 %vm556_vm3, %v2573_v8 }
0x1d65   :  { %3700 = vmatpush3.bf16.msra.mxu1 %v4517_v15  ;;  %3701 = vmatprep.mubr.msk.bf16.mxu1 %vm3957_vm1, %v3956_v29 }
0x1d66   :  { %3711 = vmatprep.subr.bf16.mxu1 %v3956_v29 }
0x1e20   :  { %v2519_v61 = vpop.f32.mrf.mxu0 }
0x1e21   :  { %v2520_v49 = vadd.f32 %v4567_v60, %v2519_v61 }
0x1e22   :  { %v3685_v10 = vpop.f32.mrf.mxu0 }
0x1e23   :  { %v2539_v47 = vrot.slane %v2520_v49, %v4105_v59  ;;  %v2525_v11 = vadd.f32 %v2520_v49, %v4256_v23 }
0x1e24   :  { %v2522_v52 = vpop.f32.mrf.mxu0  ;;  %v2611_v1 = vpop.f32.mrf.mxu1 }
0x1e25   :  { %v2612_v2 = vadd.f32 %v4574_v34, %v2611_v1  ;;  %2540 = vrot.lane.b32.xlu0 %v2539_v47, %s3960_s12  ;;  %v3433_v0 = vmul.f32 -1.442695, %v2525_v11 }
0x1e26   :  { %v3686_v5 = vpop.f32.mrf.mxu0  ;;  %v3691_v4 = vpop.f32.mrf.mxu1 }
0x1e27   :  { %v2631_v25 = vrot.slane %v2612_v2, %v4105_v59  ;;  %v2617_v38 = vadd.f32 %v2612_v2, %v4195_v62  ;;  %3887 = vpow2.f32 %v3433_v0 }
0x1e28   :  { %v2614_v31 = vpop.f32.mrf.mxu1 }
0x1e29   :  { %2632 = vrot.lane.b32.xlu0 %v2631_v25, %s3960_s12  ;;  %v3436_v22 = vmul.f32 -1.442695, %v2617_v38 }
0x1e2a   :  { %v3692_v3 = vpop.f32.mrf.mxu1 }
0x1e2b   :  { %3889 = vpow2.f32 %v3436_v22 }
0x1e34   :  { %v3888_v45 = vpop.eup %3887 }
0x1e35   :  { %v2529_v32 = vadd.f32 1.0, %v3888_v45 }
0x1e37   :  { %3891 = vrcp.f32 %v2529_v32 }
0x1e38   :  { %v3890_v26 = vpop.eup %3889 }
0x1e39   :  { %v2621_v48 = vadd.f32 1.0, %v3890_v26 }
0x1e3b   :  { %3893 = vrcp.f32 %v2621_v48 }
0x1e44   :  { %v3892_v14 = vpop.eup %3891 }
0x1e45   :  { %v2550_v24 = vsub.f32 1.0, %v3892_v14  ;;  %v2556_v61 = vmul.f32 %v3892_v14, %v4702_v55 }
0x1e48   :  { %v3894_v42 = vpop.eup %3893 }
0x1e49   :  { %v2642_v47 = vsub.f32 1.0, %v3894_v42  ;;  %v2648_v52 = vmul.f32 %v3894_v42, %v4707_v28 }
0x1e97   :  { %v2541_v27 = vpop.permute.xlu0 %2540 }
0x1e98   :  { %v2543_v54 = vmul.f32 %v3892_v14, %v2541_v27 }
0x1e9a   :  { %2545 = vrot.lane.b32.xlu1 %v2543_v54, %s3961_s13 }
0x1e9b   :  { %v2633_v57 = vpop.permute.xlu0 %2632 }
0x1e9c   :  { %v2635_v12 = vmul.f32 %v3894_v42, %v2633_v57 }
0x1e9e   :  { %2637 = vrot.lane.b32.xlu1 %v2635_v12, %s3961_s13 }
0x1f0c   :  { %v2546_v33 = vpop.permute.xlu1 %2545 }
0x1f0d   :  { %v2548_v13 = vadd.f32 %v2546_v33, %v4256_v23 }
0x1f0f   :  { %3895 = vtanh.f32 %v2548_v13 }
0x1f10   :  { %v2638_v16 = vpop.permute.xlu1 %2637 }
0x1f11   :  { %v2640_v18 = vadd.f32 %v2638_v16, %v4195_v62 }
0x1f13   :  { %3897 = vtanh.f32 %v2640_v18 }
0x1f1c   :  { %v3896_v35 = vpop.eup %3895 }
0x1f1d   :  { %2552 = vrot.lane.b32.xlu0 %v3896_v35, %s3962_s14 }
0x1f20   :  { %v3898_v6 = vpop.eup %3897 }
0x1f21   :  { %2644 = vrot.lane.b32.xlu1 %v3898_v6, %s3962_s14 }
0x1f8f   :  { %v2553_v8 = vpop.permute.xlu0 %2552 }
0x1f90   :  { %v2555_v49 = vmul.f32 %v2553_v8, %v2550_v24 }
0x1f92   :  { %v4738_v10 = vadd.f32 %v2556_v61, %v2555_v49 }
0x1f93   :  { %v2645_v23 = vpop.permute.xlu1 %2644 }
0x1f94   :  { %v2647_v1 = vmul.f32 %v2645_v23, %v2642_v47  ;;  %v2651_v62 = vpack.c.bf16 %v4738_v10, %v4738_v10 }
0x1f96   :  { %v4743_v2 = vadd.f32 %v2648_v52, %v2647_v1  ;;  %2653 = vrot.lane.b32.xlu0 %v2651_v62, %s3962_s14 }
0x1f98   :  { %v2743_v5 = vpack.c.bf16 %v4743_v2, %v4743_v2 }
0x1f9a   :  { %2745 = vrot.lane.b32.xlu1 %v2743_v5, %s3962_s14 }
0x2008   :  { %v2654_v4 = vpop.permute.xlu0 %2653 }
0x2009   :  { %3696 = vmatmul.mubr.msk.bf16.vlgmr.msra.gmra.mxu0 %vm556_vm3, %v2654_v4 }
0x200a   :  { %3706 = vmatpush3.bf16.msra.mxu0 %v4507_v17  ;;  %3707 = vmatprep.mubr.msk.bf16.mxu0 %vm3957_vm1, %v3956_v29 }
0x200b   :  { %3717 = vmatprep.subr.bf16.mxu0 %v3956_v29 }
0x200c   :  { %v2746_v25 = vpop.permute.xlu1 %2745 }
0x200d   :  { %3702 = vmatmul.mubr.msk.bf16.vlgmr.msra.gmra.mxu1 %vm556_vm3, %v2746_v25 }
0x200e   :  { %3712 = vmatpush3.bf16.msra.mxu1 %v4517_v15  ;;  %3713 = vmatprep.mubr.msk.bf16.mxu1 %vm3957_vm1, %v3956_v29 }
0x200f   :  { %3723 = vmatprep.subr.bf16.mxu1 %v3956_v29 }
0x20c9   :  { %v2692_v31 = vpop.f32.mrf.mxu0 }
0x20ca   :  { %v2693_v3 = vadd.f32 %v4567_v60, %v2692_v31 }
0x20cb   :  { %v3697_v11 = vpop.f32.mrf.mxu0 }
0x20cc   :  { %v2712_v0 = vrot.slane %v2693_v3, %v4105_v59  ;;  %v2698_v54 = vadd.f32 %v2693_v3, %v4164_v30 }
0x20cd   :  { %v2695_v38 = vpop.f32.mrf.mxu0  ;;  %v2784_v22 = vpop.f32.mrf.mxu1 }
0x20ce   :  { %v2785_v45 = vadd.f32 %v4574_v34, %v2784_v22  ;;  %2713 = vrot.lane.b32.xlu0 %v2712_v0, %s3960_s12  ;;  %v3439_v42 = vmul.f32 -1.442695, %v2698_v54 }
0x20cf   :  { %v3698_v32 = vpop.f32.mrf.mxu0  ;;  %v3703_v26 = vpop.f32.mrf.mxu1 }
0x20d0   :  { %v2804_v48 = vrot.slane %v2785_v45, %v4105_v59  ;;  %v2790_v57 = vadd.f32 %v2785_v45, %v4259_v37  ;;  %3899 = vpow2.f32 %v3439_v42 }
0x20d1   :  { %v2787_v14 = vpop.f32.mrf.mxu1 }
0x20d2   :  { %2805 = vrot.lane.b32.xlu0 %v2804_v48, %s3960_s12  ;;  %v3442_v12 = vmul.f32 -1.442695, %v2790_v57 }
0x20d3   :  { %v3704_v27 = vpop.f32.mrf.mxu1 }
0x20d4   :  { %3901 = vpow2.f32 %v3442_v12 }
0x20dd   :  { %v3900_v33 = vpop.eup %3899 }
0x20de   :  { %v2702_v13 = vadd.f32 1.0, %v3900_v33 }
0x20e0   :  { %3903 = vrcp.f32 %v2702_v13 }
0x20e1   :  { %v3902_v16 = vpop.eup %3901 }
0x20e2   :  { %v2794_v18 = vadd.f32 1.0, %v3902_v16 }
0x20e4   :  { %3905 = vrcp.f32 %v2794_v18 }
0x20ed   :  { %v3904_v35 = vpop.eup %3903 }
0x20ee   :  { %v2723_v4 = vsub.f32 1.0, %v3904_v35  ;;  %v2729_v31 = vmul.f32 %v3904_v35, %v4738_v10 }
0x20f1   :  { %v3906_v8 = vpop.eup %3905 }
0x20f2   :  { %v2815_v0 = vsub.f32 1.0, %v3906_v8 }
0x2140   :  { %v2714_v6 = vpop.permute.xlu0 %2713 }
0x2141   :  { %v2716_v24 = vmul.f32 %v3904_v35, %v2714_v6 }
0x2143   :  { %2718 = vrot.lane.b32.xlu1 %v2716_v24, %s3961_s13 }
0x2144   :  { %v2806_v61 = vpop.permute.xlu0 %2805 }
0x2145   :  { %v2808_v49 = vmul.f32 %v3906_v8, %v2806_v61 }
0x2147   :  { %2810 = vrot.lane.b32.xlu1 %v2808_v49, %s3961_s13 }
0x21b5   :  { %v2719_v47 = vpop.permute.xlu1 %2718 }
0x21b6   :  { %v2721_v23 = vadd.f32 %v2719_v47, %v4164_v30 }
0x21b8   :  { %3907 = vtanh.f32 %v2721_v23 }
0x21b9   :  { %v2811_v52 = vpop.permute.xlu1 %2810 }
0x21ba   :  { %v2813_v1 = vadd.f32 %v2811_v52, %v4259_v37  ;;  %v2821_v37 = vmul.f32 %v3906_v8, %v4743_v2 }
0x21bc   :  { %3909 = vtanh.f32 %v2813_v1 }
0x21c5   :  { %v3908_v62 = vpop.eup %3907 }
0x21c6   :  { %2725 = vrot.lane.b32.xlu0 %v3908_v62, %s3962_s14 }
0x21c9   :  { %v3910_v5 = vpop.eup %3909 }
0x21ca   :  { %2817 = vrot.lane.b32.xlu1 %v3910_v5, %s3962_s14 }
0x2238   :  { %v2726_v25 = vpop.permute.xlu0 %2725 }
0x2239   :  { %v2728_v3 = vmul.f32 %v2726_v25, %v2723_v4 }
0x223b   :  { %v4774_v11 = vadd.f32 %v2729_v31, %v2728_v3 }
0x223c   :  { %v2818_v30 = vpop.permute.xlu1 %2817 }
0x223d   :  { %v2824_v38 = vpack.c.bf16 %v4774_v11, %v4774_v11  ;;  %v2820_v22 = vmul.f32 %v2818_v30, %v2815_v0 }
0x223f   :  { %v4779_v45 = vadd.f32 %v2821_v37, %v2820_v22  ;;  %2826 = vrot.lane.b32.xlu0 %v2824_v38, %s3962_s14 }
0x2241   :  { %v2916_v32 = vpack.c.bf16 %v4779_v45, %v4779_v45 }
0x2243   :  { %2918 = vrot.lane.b32.xlu1 %v2916_v32, %s3962_s14 }
0x22b1   :  { %v2827_v26 = vpop.permute.xlu0 %2826 }
0x22b2   :  { %3708 = vmatmul.mubr.msk.bf16.vlgmr.msra.gmra.mxu0 %vm556_vm3, %v2827_v26 }
0x22b3   :  { %3718 = vmatpush3.bf16.msra.mxu0 %v4507_v17  ;;  %3719 = vmatprep.mubr.msk.bf16.mxu0 %vm3957_vm1, %v3956_v29 }
0x22b4   :  { %3729 = vmatprep.subr.bf16.mxu0 %v3956_v29 }
0x22b5   :  { %v2919_v48 = vpop.permute.xlu1 %2918 }
0x22b6   :  { %3714 = vmatmul.mubr.msk.bf16.vlgmr.msra.gmra.mxu1 %vm556_vm3, %v2919_v48 }
0x22b7   :  { %3724 = vmatpush3.bf16.msra.mxu1 %v4517_v15  ;;  %3725 = vmatprep.mubr.msk.bf16.mxu1 %vm3957_vm1, %v3956_v29 }
0x22b8   :  { %3735 = vmatprep.subr.bf16.mxu1 %v3956_v29 }
0x2372   :  { %v2865_v14 = vpop.f32.mrf.mxu0 }
0x2373   :  { %v2866_v27 = vadd.f32 %v4567_v60, %v2865_v14 }
0x2374   :  { %v3709_v54 = vpop.f32.mrf.mxu0 }
0x2375   :  { %v2885_v17 = vrot.slane %v2866_v27, %v4105_v59  ;;  %v2871_v35 = vadd.f32 %v2866_v27, %v4262_v19 }
0x2376   :  { %v2868_v42 = vpop.f32.mrf.mxu0  ;;  %v2957_v57 = vpop.f32.mrf.mxu1 }
0x2377   :  { %v2958_v12 = vadd.f32 %v4574_v34, %v2957_v57  ;;  %2886 = vrot.lane.b32.xlu0 %v2885_v17, %s3960_s12  ;;  %v3445_v6 = vmul.f32 -1.442695, %v2871_v35 }
0x2378   :  { %v3710_v33 = vpop.f32.mrf.mxu0  ;;  %v3715_v13 = vpop.f32.mrf.mxu1 }
0x2379   :  { %v2977_v15 = vrot.slane %v2958_v12, %v4105_v59  ;;  %v2963_v24 = vadd.f32 %v2958_v12, %v4265_v39  ;;  %3911 = vpow2.f32 %v3445_v6  ;;  %v3951_v33 = vld [vmem:[%s5044_s2] sm:$0xff]  }
0x237a   :  { %v2960_v16 = vpop.f32.mrf.mxu1 }
0x237b   :  { %2978 = vrot.lane.b32.xlu0 %v2977_v15, %s3960_s12  ;;  %v3448_v8 = vmul.f32 -1.442695, %v2963_v24  ;;  %v3952_v15 = vld [vmem:[%s5045_s6] sm:$0xff]  }
0x237c   :  { %v3716_v18 = vpop.f32.mrf.mxu1 }
0x237d   :  { %3913 = vpow2.f32 %v3448_v8 }
0x2386   :  { %v3912_v61 = vpop.eup %3911 }
0x2387   :  { %v2875_v49 = vadd.f32 1.0, %v3912_v61 }
0x2389   :  { %3915 = vrcp.f32 %v2875_v49 }
0x238a   :  { %v3914_v47 = vpop.eup %3913 }
0x238b   :  { %v2967_v23 = vadd.f32 1.0, %v3914_v47 }
0x238d   :  { %3917 = vrcp.f32 %v2967_v23 }
0x2396   :  { %v3916_v52 = vpop.eup %3915 }
0x2397   :  { %v2896_v22 = vsub.f32 1.0, %v3916_v52  ;;  %v2902_v26 = vmul.f32 %v3916_v52, %v4774_v11 }
0x239a   :  { %v3918_v5 = vpop.eup %3917 }
0x239b   :  { %v2988_v27 = vsub.f32 1.0, %v3918_v5 }
0x23e9   :  { %v2887_v1 = vpop.permute.xlu0 %2886 }
0x23ea   :  { %v2889_v62 = vmul.f32 %v3916_v52, %v2887_v1 }
0x23ec   :  { %2891 = vrot.lane.b32.xlu1 %v2889_v62, %s3961_s13 }
0x23ed   :  { %v2979_v4 = vpop.permute.xlu0 %2978 }
0x23ee   :  { %v2981_v25 = vmul.f32 %v3918_v5, %v2979_v4 }
0x23f0   :  { %2983 = vrot.lane.b32.xlu1 %v2981_v25, %s3961_s13 }
0x245e   :  { %v2892_v31 = vpop.permute.xlu1 %2891 }
0x245f   :  { %v2894_v3 = vadd.f32 %v2892_v31, %v4262_v19 }
0x2461   :  { %3919 = vtanh.f32 %v2894_v3 }
0x2462   :  { %v2984_v0 = vpop.permute.xlu1 %2983 }
0x2463   :  { %v2986_v30 = vadd.f32 %v2984_v0, %v4265_v39  ;;  %v2994_v39 = vmul.f32 %v3918_v5, %v4779_v45 }
0x2465   :  { %3921 = vtanh.f32 %v2986_v30 }
0x246e   :  { %v3920_v38 = vpop.eup %3919 }
0x246f   :  { %2898 = vrot.lane.b32.xlu0 %v3920_v38, %s3962_s14 }
0x2472   :  { %v3922_v37 = vpop.eup %3921 }
0x2473   :  { %2990 = vrot.lane.b32.xlu1 %v3922_v37, %s3962_s14 }
0x24e1   :  { %v2899_v32 = vpop.permute.xlu0 %2898 }
0x24e2   :  { %v2901_v48 = vmul.f32 %v2899_v32, %v2896_v22 }
0x24e4   :  { %v4810_v14 = vadd.f32 %v2902_v26, %v2901_v48 }
0x24e5   :  { %v2991_v19 = vpop.permute.xlu1 %2990 }
0x24e6   :  { %v2997_v54 = vpack.c.bf16 %v4810_v14, %v4810_v14  ;;  %v2993_v17 = vmul.f32 %v2991_v19, %v2988_v27 }
0x24e8   :  { %v4815_v42 = vadd.f32 %v2994_v39, %v2993_v17  ;;  %2999 = vrot.lane.b32.xlu0 %v2997_v54, %s3962_s14 }
0x24ea   :  { %v3089_v57 = vpack.c.bf16 %v4815_v42, %v4815_v42 }
0x24ec   :  { %3091 = vrot.lane.b32.xlu1 %v3089_v57, %s3962_s14 }
0x255a   :  { %v3000_v12 = vpop.permute.xlu0 %2999 }
0x255b   :  { %3720 = vmatmul.mubr.msk.bf16.vlgmr.msra.gmra.mxu0 %vm556_vm3, %v3000_v12 }
0x255c   :  { %3730 = vmatpush3.bf16.msra.mxu0 %v3951_v33  ;;  %3731 = vmatprep.mubr.msk.bf16.mxu0 %vm3957_vm1, %v3956_v29 }
0x255e   :  { %v3092_v13 = vpop.permute.xlu1 %3091 }
0x255f   :  { %3726 = vmatmul.mubr.msk.bf16.vlgmr.msra.gmra.mxu1 %vm556_vm3, %v3092_v13 }
0x2560   :  { %3736 = vmatpush3.bf16.msra.mxu1 %v3952_v15  ;;  %3737 = vmatprep.mubr.msk.bf16.mxu1 %vm3957_vm1, %v3956_v29 }
0x261b   :  { %v3038_v16 = vpop.f32.mrf.mxu0 }
0x261c   :  { %v3039_v18 = vadd.f32 %v4567_v60, %v3038_v16 }
0x261d   :  { %v3721_v35 = vpop.f32.mrf.mxu0 }
0x261e   :  { %v3058_v6 = vrot.slane %v3039_v18, %v4105_v59  ;;  %v3044_v1 = vadd.f32 %v3039_v18, %v4268_v40 }
0x261f   :  { %v3041_v24 = vpop.f32.mrf.mxu0  ;;  %v3130_v8 = vpop.f32.mrf.mxu1 }
0x2620   :  { %v3131_v61 = vadd.f32 %v4574_v34, %v3130_v8  ;;  %3059 = vrot.lane.b32.xlu0 %v3058_v6, %s3960_s12  ;;  %v3451_v60 = vmul.f32 -1.442695, %v3044_v1  ;;  %v3954_v1 = vld [vmem:[%s5049_s8] ss:$0 sm:$0xff] }
0x2621   :  { %v3722_v49 = vpop.f32.mrf.mxu0  ;;  %v3727_v47 = vpop.f32.mrf.mxu1 }
0x2622   :  { %v3150_v23 = vrot.slane %v3131_v61, %v4105_v59  ;;  %v3136_v62 = vadd.f32 %v3131_v61, %v4271_v41  ;;  %3923 = vpow2.f32 %v3451_v60  ;;  %v3953_v61 = vld [vmem:[%s5048_s4] ss:$0 sm:$0xff] }
0x2623   :  { %v3133_v52 = vpop.f32.mrf.mxu1 }
0x2624   :  { %3151 = vrot.lane.b32.xlu0 %v3150_v23, %s3960_s12  ;;  %v3454_v5 = vmul.f32 -1.442695, %v3136_v62 }
0x2625   :  { %v3728_v29 = vpop.f32.mrf.mxu1 }
0x2626   :  { %3925 = vpow2.f32 %v3454_v5 }
0x262f   :  { %v3924_v4 = vpop.eup %3923 }
0x2630   :  { %v3048_v34 = vadd.f32 1.0, %v3924_v4 }
0x2632   :  { %3927 = vrcp.f32 %v3048_v34 }
0x2633   :  { %v3926_v25 = vpop.eup %3925 }
0x2634   :  { %v3140_v31 = vadd.f32 1.0, %v3926_v25 }
0x2636   :  { %3929 = vrcp.f32 %v3140_v31 }
0x263f   :  { %v3928_v3 = vpop.eup %3927 }
0x2640   :  { %v3069_v39 = vsub.f32 1.0, %v3928_v3  ;;  %v3075_v57 = vmul.f32 %v3928_v3, %v4810_v14 }
0x2643   :  { %v3930_v38 = vpop.eup %3929 }
0x2644   :  { %v3161_v13 = vsub.f32 1.0, %v3930_v38 }
0x2692   :  { %v3060_v0 = vpop.permute.xlu0 %3059 }
0x2693   :  { %v3062_v30 = vmul.f32 %v3928_v3, %v3060_v0 }
0x2695   :  { %3064 = vrot.lane.b32.xlu1 %v3062_v30, %s3961_s13 }
0x2696   :  { %v3152_v37 = vpop.permute.xlu0 %3151 }
0x2697   :  { %v3154_v22 = vmul.f32 %v3930_v38, %v3152_v37 }
0x2699   :  { %3156 = vrot.lane.b32.xlu1 %v3154_v22, %s3961_s13 }
0x2707   :  { %v3065_v32 = vpop.permute.xlu1 %3064 }
0x2708   :  { %v3067_v26 = vadd.f32 %v3065_v32, %v4268_v40 }
0x270a   :  { %3931 = vtanh.f32 %v3067_v26 }
0x270b   :  { %v3157_v48 = vpop.permute.xlu1 %3156 }
0x270c   :  { %v3159_v27 = vadd.f32 %v3157_v48, %v4271_v41  ;;  %v3167_v41 = vmul.f32 %v3930_v38, %v4815_v42 }
0x270e   :  { %3933 = vtanh.f32 %v3159_v27 }
0x2717   :  { %v3932_v19 = vpop.eup %3931 }
0x2718   :  { %3071 = vrot.lane.b32.xlu0 %v3932_v19, %s3962_s14 }
0x271b   :  { %v3934_v54 = vpop.eup %3933 }
0x271c   :  { %3163 = vrot.lane.b32.xlu1 %v3934_v54, %s3962_s14 }
0x278a   :  { %v3072_v17 = vpop.permute.xlu0 %3071 }
0x278b   :  { %v3074_v12 = vmul.f32 %v3072_v17, %v3069_v39  ;;  %v821_v17 = vrot.slane %v4323_v46, %v4105_v59  ;;  %v2219_v46 = vrot.slane %v4666_v51, %v4105_v59 }
0x278d   :  { %v4848_v33 = vadd.f32 %v3075_v57, %v3074_v12  ;;  %v1171_v57 = vrot.slane %v4405_v9, %v4105_v59  ;;  %v1521_v12 = vrot.slane %v4487_v50, %v4105_v59  ;;  %v2565_v9 = vrot.slane %v4738_v10, %v4105_v59 }
0x278e   :  { %v3164_v40 = vpop.permute.xlu1 %3163  ;;  %v2911_v50 = vrot.slane %v4810_v14, %v4105_v59  ;;  %v640_v14 = vrot.slane %v4285_v43, %v4105_v59  ;;  %v996_v43 = vrot.slane %v4364_v56, %v4105_v59  ;;  %v1696_v56 = vrot.slane %v4538_v44, %v4105_v59 }
0x278f   :  { %v3170_v15 = vpack.c.bf16 %v4848_v33, %v4848_v33  ;;  %v3166_v16 = vmul.f32 %v3164_v40, %v3161_v13  ;;  %v1871_v13 = vrot.slane %v4589_v63, %v4105_v59  ;;  %v2738_v44 = vrot.slane %v4774_v11, %v4105_v59 }
0x2791   :  { %v4853_v18 = vadd.f32 %v3167_v41, %v3166_v16  ;;  %3172 = vrot.lane.b32.xlu0 %v3170_v15, %s3962_s14 }
0x2793   :  { %v3262_v35 = vpack.c.bf16 %v4853_v18, %v4853_v18 }
0x2795   :  { %3264 = vrot.lane.b32.xlu1 %v3262_v35, %s3962_s14  ;;  %v1346_v35 = vrot.slane %v4446_v58, %v4105_v59  ;;  %v2046_v58 = vrot.slane %v4630_v21, %v4105_v59 }
0x2803   :  { %v3173_v6 = vpop.permute.xlu0 %3172 }
0x2804   :  { %3732 = vmatmul.mubr.msk.bf16.vlgmr.msra.gmra.mxu0 %vm556_vm3, %v3173_v6 }
0x2807   :  { %v3265_v24 = vpop.permute.xlu1 %3264 }
0x2808   :  { %3738 = vmatmul.mubr.msk.bf16.vlgmr.msra.gmra.mxu1 %vm556_vm3, %v3265_v24  ;;  %v2392_v24 = vrot.slane %v4702_v55, %v4105_v59 }
0x28c4   :  { %v3211_v8 = vpop.f32.mrf.mxu0 }
0x28c5   :  { %v3212_v49 = vadd.f32 %v3953_v61, %v3211_v8  ;;  %v3084_v8 = vrot.slane %v4848_v33, %v4105_v59 }
0x28c6   :  { %v3733_v47 = vpop.f32.mrf.mxu0 }
0x28c7   :  { %v3231_v23 = vrot.slane %v3212_v49, %v4105_v59  ;;  %v3217_v31 = vadd.f32 %v3212_v49, %v4274_v7 }
0x28c8   :  { %v3214_v52 = vpop.f32.mrf.mxu0  ;;  %v3303_v29 = vpop.f32.mrf.mxu1 }
0x28c9   :  { %v3304_v60 = vadd.f32 %v3954_v1, %v3303_v29  ;;  %3232 = vrot.lane.b32.xlu0 %v3231_v23, %s3960_s12  ;;  %v3457_v3 = vmul.f32 -1.442695, %v3217_v31 }
0x28ca   :  { %v3734_v62 = vpop.f32.mrf.mxu0  ;;  %v3739_v5 = vpop.f32.mrf.mxu1 }
0x28cb   :  { %v3323_v4 = vrot.slane %v3304_v60, %v4105_v59  ;;  %v3309_v0 = vadd.f32 %v3304_v60, %v4148_v20  ;;  %3935 = vpow2.f32 %v3457_v3 }
0x28cc   :  { %v3306_v34 = vpop.f32.mrf.mxu1 }
0x28cd   :  { %3324 = vrot.lane.b32.xlu0 %v3323_v4, %s3960_s12  ;;  %v3460_v30 = vmul.f32 -1.442695, %v3309_v0 }
0x28ce   :  { %v3740_v25 = vpop.f32.mrf.mxu1 }
0x28cf   :  { %3937 = vpow2.f32 %v3460_v30 }
0x28d8   :  { %v3936_v38 = vpop.eup %3935 }
0x28d9   :  { %v3221_v37 = vadd.f32 1.0, %v3936_v38 }
0x28db   :  { %3939 = vrcp.f32 %v3221_v37 }
0x28dc   :  { %v3938_v22 = vpop.eup %3937 }
0x28dd   :  { %v3313_v32 = vadd.f32 1.0, %v3938_v22 }
0x28df   :  { %3941 = vrcp.f32 %v3313_v32 }
0x28e8   :  { %v4873_v26 = vpop.eup %3939 }
0x28e9   :  { %v3242_v61 = vsub.f32 1.0, %v4873_v26  ;;  %v3248_v49 = vmul.f32 %v4873_v26, %v4848_v33 }
0x28ec   :  { %v4877_v19 = vpop.eup %3941 }
0x28ed   :  { %v3334_v23 = vsub.f32 1.0, %v4877_v19  ;;  %v3340_v1 = vmul.f32 %v4877_v19, %v4853_v18 }
0x293b   :  { %v3233_v48 = vpop.permute.xlu0 %3232 }
0x293c   :  { %v3235_v27 = vmul.f32 %v4873_v26, %v3233_v48 }
0x293e   :  { %3237 = vrot.lane.b32.xlu1 %v3235_v27, %s3961_s13 }
0x293f   :  { %v3325_v54 = vpop.permute.xlu0 %3324 }
0x2940   :  { %v3327_v39 = vmul.f32 %v4877_v19, %v3325_v54 }
0x2942   :  { %3329 = vrot.lane.b32.xlu1 %v3327_v39, %s3961_s13 }
0x2946   :  { %822 = vrot.lane.b32.xlu1 %v821_v17, %s3962_s14 }
0x294a   :  { %1172 = vrot.lane.b32.xlu1 %v1171_v57, %s3962_s14 }
0x294e   :  { %1522 = vrot.lane.b32.xlu1 %v1521_v12, %s3962_s14 }
0x2952   :  { %1872 = vrot.lane.b32.xlu1 %v1871_v13, %s3962_s14 }
0x2956   :  { %2220 = vrot.lane.b32.xlu1 %v2219_v46, %s3962_s14 }
0x295a   :  { %2566 = vrot.lane.b32.xlu1 %v2565_v9, %s3962_s14 }
0x295e   :  { %2912 = vrot.lane.b32.xlu1 %v2911_v50, %s3962_s14 }
0x29b0   :  { %v3238_v40 = vpop.permute.xlu1 %3237 }
0x29b1   :  { %v3240_v63 = vadd.f32 %v3238_v40, %v4274_v7 }
0x29b3   :  { %3943 = vtanh.f32 %v3240_v63 }
0x29b4   :  { %v3330_v15 = vpop.permute.xlu1 %3329 }
0x29b5   :  { %v3332_v41 = vadd.f32 %v3330_v15, %v4148_v20 }
0x29b7   :  { %3945 = vtanh.f32 %v3332_v41 }
0x29b8   :  { %v823_v51 = vpop.permute.xlu1 %822 }
0x29b9   :  { %3374 = vst.msk [vmem:[%s5050_s9 + $0x2] sm:$0x3] %vm644_vm4, %v823_v51 }
0x29ba   :  { %3455 = vst.msk [vmem:[%s5050_s9 + $0x2] sm:$0x3] %vm732_vm2, %v4853_v18 }
0x29bc   :  { %v1173_v10 = vpop.permute.xlu1 %1172 }
0x29bd   :  { %3386 = vst.msk [vmem:[%s5050_s9 + $0x6] sm:$0x3] %vm644_vm4, %v1173_v10 }
0x29be   :  { %3443 = vst.msk [vmem:[%s5050_s9 + $0x6] sm:$0x3] %vm732_vm2, %v4779_v45 }
0x29c0   :  { %v3944_v20 = vpop.eup %3943  ;;  %v1523_v7 = vpop.permute.xlu1 %1522 }
0x29c1   :  { %3398 = vst.msk [vmem:[%s5050_s9 + $0xa] sm:$0x3] %vm644_vm4, %v1523_v7  ;;  %3244 = vrot.lane.b32.xlu0 %v3944_v20, %s3962_s14 }
0x29c2   :  { %3431 = vst.msk [vmem:[%s5050_s9 + $0xa] sm:$0x3] %vm732_vm2, %v4707_v28 }
0x29c4   :  { %v3946_v16 = vpop.eup %3945  ;;  %v1873_v45 = vpop.permute.xlu1 %1872 }
0x29c5   :  { %3410 = vst.msk [vmem:[%s5050_s9 + $0xe] sm:$0x3] %vm644_vm4, %v1873_v45  ;;  %641 = vrot.lane.b32.xlu0 %v640_v14, %s3962_s14  ;;  %3336 = vrot.lane.b32.xlu1 %v3946_v16, %s3962_s14 }
0x29c6   :  { %3419 = vst.msk [vmem:[%s5050_s9 + $0xe] sm:$0x3] %vm732_vm2, %v4635_v53 }
0x29c8   :  { %v2221_v28 = vpop.permute.xlu1 %2220 }
0x29c9   :  { %3422 = vst.msk [vmem:[%s5050_s9 + $0x12] sm:$0x3] %vm644_vm4, %v2221_v28  ;;  %997 = vrot.lane.b32.xlu0 %v996_v43, %s3962_s14 }
0x29cc   :  { %v2567_v6 = vpop.permute.xlu1 %2566 }
0x29cd   :  { %3434 = vst.msk [vmem:[%s5050_s9 + $0x16] sm:$0x3] %vm644_vm4, %v2567_v6  ;;  %1347 = vrot.lane.b32.xlu0 %v1346_v35, %s3962_s14 }
0x29d0   :  { %v2913_v53 = vpop.permute.xlu1 %2912 }
0x29d1   :  { %3446 = vst.msk [vmem:[%s5050_s9 + $0x1a] sm:$0x3] %vm644_vm4, %v2913_v53  ;;  %1697 = vrot.lane.b32.xlu0 %v1696_v56, %s3962_s14 }
0x29d5   :  { %2047 = vrot.lane.b32.xlu0 %v2046_v58, %s3962_s14 }
0x29d9   :  { %2393 = vrot.lane.b32.xlu0 %v2392_v24, %s3962_s14 }
0x29dd   :  { %2739 = vrot.lane.b32.xlu0 %v2738_v44, %s3962_s14 }
0x29e1   :  { %3085 = vrot.lane.b32.xlu0 %v3084_v8, %s3962_s14 }
0x2a33   :  { %v3245_v21 = vpop.permute.xlu0 %3244 }
0x2a34   :  { %v3247_v47 = vmul.f32 %v3245_v21, %v3242_v61 }
0x2a36   :  { %v3249_v55 = vadd.f32 %v3248_v49, %v3247_v47 }
0x2a37   :  { %v642_v52 = vpop.permute.xlu0 %641  ;;  %v3337_v29 = vpop.permute.xlu1 %3336 }
0x2a38   :  { %v3257_v11 = vrot.slane %v3249_v55, %v4105_v59  ;;  %645 = vst.msk [vmem:[%s5050_s9] sm:$0x3] %vm644_vm4, %v642_v52  ;;  %v3339_v60 = vmul.f32 %v3337_v29, %v3334_v23 }
0x2a3a   :  { %v3341_v62 = vadd.f32 %v3340_v1, %v3339_v60  ;;  %3258 = vrot.lane.b32.xlu1 %v3257_v11, %s3962_s14 }
0x2a3b   :  { %v998_v33 = vpop.permute.xlu0 %997 }
0x2a3c   :  { %3342 = vst.msk [vmem:[%s5050_s9] sm:$0x3] %vm732_vm2, %v3341_v62 }
0x2a3d   :  { %3380 = vst.msk [vmem:[%s5050_s9 + $0x4] sm:$0x3] %vm644_vm4, %v998_v33 }
0x2a3e   :  { %3449 = vst.msk [vmem:[%s5050_s9 + $0x4] sm:$0x3] %vm732_vm2, %v4815_v42 }
0x2a3f   :  { %v1348_v59 = vpop.permute.xlu0 %1347 }
0x2a40   :  { %3392 = vst.msk [vmem:[%s5050_s9 + $0x8] sm:$0x3] %vm644_vm4, %v1348_v59 }
0x2a41   :  { %3437 = vst.msk [vmem:[%s5050_s9 + $0x8] sm:$0x3] %vm732_vm2, %v4743_v2 }
0x2a43   :  { %v1698_v18 = vpop.permute.xlu0 %1697 }
0x2a44   :  { %3404 = vst.msk [vmem:[%s5050_s9 + $0xc] sm:$0x3] %vm644_vm4, %v1698_v18 }
0x2a45   :  { %3425 = vst.msk [vmem:[%s5050_s9 + $0xc] sm:$0x3] %vm732_vm2, %v4671_v36 }
0x2a47   :  { %v2048_v42 = vpop.permute.xlu0 %2047 }
0x2a48   :  { %3416 = vst.msk [vmem:[%s5050_s9 + $0x10] sm:$0x3] %vm644_vm4, %v2048_v42 }
0x2a4b   :  { %v2394_v5 = vpop.permute.xlu0 %2393 }
0x2a4c   :  { %3428 = vst.msk [vmem:[%s5050_s9 + $0x14] sm:$0x3] %vm644_vm4, %v2394_v5 }
0x2a4f   :  { %v2740_v2 = vpop.permute.xlu0 %2739 }
0x2a50   :  { %3440 = vst.msk [vmem:[%s5050_s9 + $0x18] sm:$0x3] %vm644_vm4, %v2740_v2 }
0x2a53   :  { %v3086_v4 = vpop.permute.xlu0 %3085 }
0x2a54   :  { %3452 = vst.msk [vmem:[%s5050_s9 + $0x1c] sm:$0x3] %vm644_vm4, %v3086_v4 }
0x2aac   :  { %v3259_v36 = vpop.permute.xlu1 %3258 }
0x2aad   :  { %3458 = vst.msk [vmem:[%s5050_s9 + $0x1e] sm:$0x3] %vm644_vm4, %v3259_v36 }

// kernel: cbhg_forward.3
= control target key start
LH: loop header
LB: loop body
LE: loop exit
PB: predicated region body
PF: predicated region fallthrough
CT: control target
= control target key end

     0   :  { %vm97_vm0 = vcmask 261120   ;;  %v203_v54 = vlaneseq  ;;  %vm244_vm1 = vcmask 1040384   ;;  %vm259_vm2 = vcmask 1046528   ;;  %s7088_s1 = inlined_call_operand.vmem [shape: bf16[32,32], index: 1, kind: input, shape index: {}]   ;;  %s7089_s0 = inlined_call_operand.vmem [shape: f32[2,16,32], index: 0, kind: input, shape index: {}]   ;;  %s7090_s2 = inlined_call_operand.vmem [shape: bf16[64,32], index: 2, kind: input, shape index: {}]   ;;  %s7091_s9 = inlined_call_operand.vmem [shape: f32[8,1,32], index: 9, kind: input, shape index: {}]   ;;  %s7092_s10 = inlined_call_operand.vmem [shape: f32[8,1,32], index: 10, kind: input, shape index: {}]   ;;  %s7093_s11 = inlined_call_operand.vmem [shape: f32[8,1,32], index: 11, kind: input, shape index: {}]   ;;  %s7094_s3 = inlined_call_operand.vmem [shape: bf16[96,32], index: 3, kind: input, shape index: {}]   ;;  %s7095_s4 = inlined_call_operand.vmem [shape: bf16[128,32], index: 4, kind: input, shape index: {}]   ;;  %s7096_s5 = inlined_call_operand.vmem [shape: bf16[160,32], index: 5, kind: input, shape index: {}]   ;;  %s7097_s6 = inlined_call_operand.vmem [shape: bf16[192,32], index: 6, kind: input, shape index: {}]   ;;  %s7098_s7 = inlined_call_operand.vmem [shape: bf16[224,32], index: 7, kind: input, shape index: {}]   ;;  %s7099_s8 = inlined_call_operand.vmem [shape: bf16[256,32], index: 8, kind: input, shape index: {}]   ;;  %s7100_s12 = inlined_call_operand.vmem [shape: bf16[768,32], index: 12, kind: input, shape index: {}]   ;;  %s7101_s16 = inlined_call_operand.vmem [shape: bf16[96,32], index: 16, kind: input, shape index: {}]   ;;  %s7102_s13 = inlined_call_operand.vmem [shape: f32[1,1,32], index: 13, kind: input, shape index: {}]   ;;  %s7103_s14 = inlined_call_operand.vmem [shape: f32[1,1,32], index: 14, kind: input, shape index: {}]   ;;  %s7104_s15 = inlined_call_operand.vmem [shape: f32[1,1,32], index: 15, kind: input, shape index: {}]   ;;  %s7105_s20 = inlined_call_operand.vmem [shape: bf16[4,32,64], index: 20, kind: input, shape index: {}]   ;;  %s7106_s17 = inlined_call_operand.vmem [shape: f32[1,1,32], index: 17, kind: input, shape index: {}]   ;;  %s7107_s18 = inlined_call_operand.vmem [shape: f32[1,1,32], index: 18, kind: input, shape index: {}]   ;;  %s7108_s19 = inlined_call_operand.vmem [shape: f32[1,1,32], index: 19, kind: input, shape index: {}]   ;;  %s7109_s21 = inlined_call_operand.vmem [shape: f32[4,1,64], index: 21, kind: input, shape index: {}]   ;;  %s7110_s22 = inlined_call_operand.vmem [shape: f32[2,16,32], index: 22, kind: output, shape index: {}]  }
   0x1   :  { %7118 = sst [smem:[#allocation2_spill]] %s7088_s1  ;;  %vm312_vm3 = vcmask 523264   ;;  %vm505_vm4 = vcmask 1045504   ;;  %vm574_vm5 = vcmask 785408   ;;  %vm729_vm6 = vcmask 1041408   ;;  %vm4504_vm10 = vmneg %vm244_vm1 }
   0x2   :  { %7119 = sst [smem:[#allocation3_spill]] %s7089_s0  ;;  %v204_v55 = vshrl.u32 %v203_v54, 7  ;;  %vm794_vm7 = vcmask 1044480   ;;  %vm1117_vm8 = vcmask 1043456   ;;  %vm1370_vm9 = vcmask 1042432  }
   0x3   :  { %7120 = sst [smem:[#allocation4_spill]] %s7090_s2  ;;  %vm5400_vm11 = vmmov 1  }
   0x4   :  { %7121 = sst [smem:[#allocation5_spill]] %s7091_s9  ;;  %v5556_v57 = vsub.s32 0, %v204_v55  ;;  %vm6705_vm12 = vmpackc.low %vm5400_vm11, %vm4504_vm10 }
   0x5   :  { %7122 = sst [smem:[#allocation6_spill]] %s7092_s10  ;;  %s5397_s10 = smov 64  }
   0x6   :  { %7123 = sst [smem:[#allocation7_spill]] %s7093_s11 }
   0x7   :  { %7124 = sst [smem:[#allocation8_spill]] %s7094_s3 }
   0x8   :  { %s7125_s29 = sld [smem:[#allocation2_spill]] }
   0x9   :  { %s7126_s0 = sld [smem:[#allocation3_spill]] }
   0xa   :  { %s7127_s28 = sld [smem:[#allocation4_spill]] }
   0xb   :  { %s7128_s23 = sld [smem:[#allocation5_spill]] }
   0xc   :  { %s7129_s3 = sld [smem:[#allocation6_spill]] }
   0xd   :  { %s7130_s2 = sld [smem:[#allocation7_spill]] }
   0xe   :  { %v5174_v0 = vld [vmem:[%s7125_s29 + $0x8] sm:$0xff]   ;;  %v5175_v1 = vld [vmem:[%s7125_s29] sm:$0xff]   ;;  %s7131_s11 = sld [smem:[#allocation8_spill]] }
   0xf   :  { %4745 = vmatprep.subr.bf16.mxu0 %v5174_v0  ;;  %v72_v2 = vld [vmem:[%s7126_s0] sm:$0xff]  ;;  %v73_v3 = vld [vmem:[%s7126_s0 + $0x8] sm:$0xff]  ;;  %v74_v5 = vld [vmem:[%s7126_s0 + $0x10] sm:$0xff] }
  0x10   :  { %4746 = vmatpush3.bf16.msra.mxu0 %v5174_v0  ;;  %v83_v4 = vpack.c.bf16 %v73_v3, %v72_v2  ;;  %v75_v6 = vld [vmem:[%s7126_s0 + $0x18] sm:$0xff]  ;;  %v5177_v9 = vld [vmem:[%s7127_s28 + $0x10] sm:$0xff]  }
  0x11   :  { %4747 = vmatprep.subr.bf16.mxu0 %v5175_v1  ;;  %v84_v7 = vpack.c.bf16 %v75_v6, %v74_v5  ;;  %v5176_v8 = vld [vmem:[%s7127_s28 + $0x18] sm:$0xff]   ;;  %v4347_v11 = vld [vmem:[%s7128_s23] ss:$0 sm:$0xff]  ;;  %v5178_v5 = vld [vmem:[%s7127_s28 + $0x8] sm:$0xff]  }
  0x12   :  { %4749 = vmatprep.mubr.msk.bf16.mxu0 %vm97_vm0, %v83_v4  ;;  %4753 = vmatprep.subr.bf16.mxu1 %v5176_v8  ;;  %v81_v56 = vld [vmem:[%s7129_s3] sm:$0x1] }
  0x13   :  { %4754 = vmatpush3.bf16.msra.mxu1 %v5176_v8  ;;  %v82_v60 = vld [vmem:[%s7130_s2] sm:$0x1] }
  0x14   :  { %4748 = vmatpush3.bf16.msra.mxu0 %v5175_v1  ;;  %4755 = vmatprep.subr.bf16.mxu1 %v5177_v9 }
  0x17   :  { %4750 = vmatmul.mubr.msk.bf16.vlgmr.msra.gmra.mxu0 %vm97_vm0, %v84_v7  ;;  %4756 = vmatpush3.bf16.msra.mxu1 %v5177_v9 }
  0x18   :  { %4757 = vmatprep.subr.bf16.mxu1 %v5178_v5 }
  0x1b   :  { %4758 = vmatpush3.bf16.msra.mxu1 %v5178_v5 }
  0xd7   :  { %v4751_v10 = vpop.f32.mrf.mxu0 }
  0xd8   :  { %v161_v15 = vadd.f32 %v4751_v10, %v4347_v11 }
  0xd9   :  { %v138_v12 = vpop.f32.mrf.mxu0 }
  0xda   :  { %v159_v13 = vadd.f32 %v4347_v11, %v138_v12  ;;  %v178_v20 = vmul.f32 %v161_v15, %v161_v15  ;;  %v166_v25 = vsel %vm97_vm0, %v161_v15, 0.0 }
  0xdb   :  { %v4752_v14 = vpop.f32.mrf.mxu0 }
  0xdc   :  { %v176_v17 = vmul.f32 %v159_v13, %v159_v13  ;;  %v162_v18 = vadd.f32 %v4752_v14, %v4347_v11  ;;  %v163_v21 = vsel %vm97_vm0, %v159_v13, 0.0  ;;  %v183_v31 = vsel %vm97_vm0, %v178_v20, 0.0 }
  0xdd   :  { %v141_v16 = vpop.f32.mrf.mxu0 }
  0xde   :  { %v160_v19 = vadd.f32 %v4347_v11, %v141_v16  ;;  %v180_v26 = vsel %vm97_vm0, %v176_v17, 0.0  ;;  %v179_v27 = vmul.f32 %v162_v18, %v162_v18  ;;  %v168_v32 = vsel %vm97_vm0, %v162_v18, 0.0 }
  0xe0   :  { %v164_v22 = vsel %vm97_vm0, %v160_v19, 0.0  ;;  %v177_v23 = vmul.f32 %v160_v19, %v160_v19  ;;  %v185_v35 = vsel %vm97_vm0, %v179_v27, 0.0 }
  0xe1   :  { %v165_v24 = vadd.f32 %v164_v22, %v163_v21 }
  0xe2   :  { %v181_v28 = vsel %vm97_vm0, %v177_v23, 0.0 }
  0xe3   :  { %v167_v29 = vadd.f32 %v166_v25, %v165_v24  ;;  %v182_v30 = vadd.f32 %v181_v28, %v180_v26 }
  0xe5   :  { %v169_v33 = vadd.f32 %v168_v32, %v167_v29  ;;  %v184_v34 = vadd.f32 %v183_v31, %v182_v30 }
  0xe7   :  { %v170_v36 = vrot.slane %v169_v33, 4  ;;  %v186_v37 = vadd.f32 %v185_v35, %v184_v34 }
  0xe9   :  { %v171_v38 = vadd.f32 %v170_v36, %v169_v33  ;;  %v187_v39 = vrot.slane %v186_v37, 4 }
  0xeb   :  { %v172_v40 = vrot.slane %v171_v38, 2  ;;  %v188_v41 = vadd.f32 %v187_v39, %v186_v37 }
  0xed   :  { %v173_v42 = vadd.f32 %v172_v40, %v171_v38  ;;  %v189_v43 = vrot.slane %v188_v41, 2 }
  0xef   :  { %v174_v44 = vrot.slane %v173_v42, 1  ;;  %v190_v45 = vadd.f32 %v189_v43, %v188_v41 }
  0xf1   :  { %v175_v46 = vadd.f32 %v174_v44, %v173_v42  ;;  %v191_v47 = vrot.slane %v190_v45, 1 }
  0xf3   :  { %v192_v48 = vadd.f32 %v191_v47, %v190_v45  ;;  %v193_v49 = vmul.f32 0.03125, %v175_v46  ;;  %v5180_v47 = vld [vmem:[%s7131_s11 + $0x28] sm:$0xff]  }
  0xf4   :  { %4765 = vmatprep.subr.bf16.mxu0 %v5180_v47 }
  0xf5   :  { %v194_v50 = vmul.f32 0.03125, %v192_v48  ;;  %v195_v51 = vmul.f32 %v193_v49, %v193_v49  ;;  %v5181_v48 = vld [vmem:[%s7131_s11 + $0x20] sm:$0xff]   ;;  %4766 = vmatpush3.bf16.msra.mxu0 %v5180_v47 }
  0xf6   :  { %4767 = vmatprep.subr.bf16.mxu0 %v5181_v48 }
  0xf7   :  { %v196_v52 = vsub.f32 %v194_v50, %v195_v51  ;;  %v4357_v51 = vld [vmem:[%s7128_s23 + $0x1] ss:$0 sm:$0xff] }
  0xf9   :  { %v197_v53 = vadd.f32 1e-05, %v196_v52  ;;  %4768 = vmatpush3.bf16.msra.mxu0 %v5181_v48 }
  0xfb   :  { %5308 = vrsqrt.f32 %v197_v53 }
 0x108   :  { %v5309_v58 = vpop.eup %5308 }
 0x109   :  { %v199_v59 = vmul.f32 %v5309_v58, %v81_v56 }
 0x10b   :  { %v200_v61 = vmul.f32 %v199_v59, %v193_v49  ;;  %v206_v62 = vrot.slane %v199_v59, %v5556_v57  ;;  %v5182_v49 = vld [vmem:[%s7131_s11 + $0x18] sm:$0xff]  }
 0x10c   :  { %4769 = vmatprep.subr.bf16.mxu0 %v5182_v49 }
 0x10d   :  { %v201_v63 = vsub.f32 %v82_v60, %v200_v61  ;;  %v209_v0 = vmul.f32 %v206_v62, %v160_v19  ;;  %v208_v2 = vmul.f32 %v206_v62, %v159_v13  ;;  %v210_v3 = vmul.f32 %v206_v62, %v161_v15  ;;  %4770 = vmatpush3.bf16.msra.mxu0 %v5182_v49 }
 0x10e   :  { %v211_v4 = vmul.f32 %v206_v62, %v162_v18  ;;  %v5179_v18 = vld [vmem:[%s7127_s28] sm:$0xff]   ;;  %s5396_s28 = smov 32  }
 0x10f   :  { %v216_v1 = vrot.slane %v201_v63, %v5556_v57  ;;  %4759 = vmatprep.subr.bf16.mxu1 %v5179_v18 }
 0x110   :  { %4760 = vmatpush3.bf16.msra.mxu1 %v5179_v18 }
 0x111   :  { %v5566_v6 = vadd.f32 %v216_v1, %v209_v0  ;;  %v5568_v7 = vadd.f32 %v216_v1, %v208_v2  ;;  %v5570_v8 = vadd.f32 %v216_v1, %v210_v3  ;;  %v5572_v9 = vadd.f32 %v216_v1, %v211_v4 }
 0x113   :  { %v223_v10 = vmax.f32 %v5566_v6, 0.0  ;;  %v222_v11 = vmax.f32 %v5568_v7, 0.0  ;;  %v224_v12 = vmax.f32 %v5570_v8, 0.0  ;;  %v225_v13 = vmax.f32 %v5572_v9, 0.0 }
 0x115   :  { %v245_v14 = vrot.slane %v222_v11, 7  ;;  %v246_v15 = vrot.slane %v223_v10, 7  ;;  %v248_v16 = vrot.slane %v224_v12, 7  ;;  %v249_v17 = vrot.slane %v225_v13, 7 }
 0x117   :  { %v247_v19 = vsel %vm244_vm1, %v245_v14, %v246_v15  ;;  %v255_v20 = vsel %vm244_vm1, 0.0, %v245_v14  ;;  %v263_v21 = vrot.slane %v246_v15, 1  ;;  %v250_v22 = vsel %vm244_vm1, %v248_v16, %v249_v17 }
 0x118   :  { %v260_v23 = vrot.slane %v255_v20, 1  ;;  %v261_v24 = vrot.slane %v247_v19, 1  ;;  %v256_v25 = vsel %vm244_vm1, 0.0, %v248_v16  ;;  %v266_v26 = vrot.slane %v250_v22, 1 }
 0x119   :  { %v265_v27 = vrot.slane %v256_v25, 1  ;;  %v268_v28 = vrot.slane %v249_v17, 1 }
 0x11a   :  { %v262_v29 = vsel %vm259_vm2, %v260_v23, %v261_v24  ;;  %v264_v30 = vsel %vm259_vm2, %v261_v24, %v263_v21 }
 0x11b   :  { %v4854_v31 = vpack.i.bf16 %v264_v30, %v262_v29  ;;  %v267_v32 = vsel %vm259_vm2, %v265_v27, %v266_v26  ;;  %v269_v33 = vsel %vm259_vm2, %v266_v26, %v268_v28 }
 0x11c   :  { %v4859_v34 = vpack.i.bf16 %v269_v33, %v267_v32 }
 0x11d   :  { %4855 = vrot.lane.b32.xlu0 %v4854_v31, %s5396_s28 }
 0x121   :  { %4860 = vrot.lane.b32.xlu0 %v4859_v34, %s5396_s28 }
 0x18f   :  { %v4856_v35 = vpop.permute.xlu0 %4855 }
 0x190   :  { %v4858_v36 = vunpack.i.h.bf16 %v4856_v35  ;;  %v4857_v37 = vunpack.i.l.bf16 %v4856_v35 }
 0x192   :  { %v282_v38 = vsel %vm97_vm0, %v255_v20, %v4857_v37  ;;  %v283_v39 = vsel %vm97_vm0, %v247_v19, %v4858_v36 }
 0x193   :  { %v4861_v40 = vpop.permute.xlu0 %4860  ;;  %v286_v41 = vpack.c.bf16 %v283_v39, %v282_v38  ;;  %v4349_v39 = vld [vmem:[%s7129_s3 + $0x1] sm:$0x1] }
 0x194   :  { %v4863_v42 = vunpack.i.h.bf16 %v4861_v40  ;;  %v4862_v43 = vunpack.i.l.bf16 %v4861_v40 }
 0x195   :  { %4761 = vmatprep.mubr.msk.bf16.mxu1 %vm312_vm3, %v286_v41 }
 0x196   :  { %v285_v44 = vsel %vm97_vm0, %v250_v22, %v4863_v42  ;;  %v284_v45 = vsel %vm97_vm0, %v256_v25, %v4862_v43  ;;  %v4350_v42 = vld [vmem:[%s7130_s2 + $0x1] sm:$0x1] }
 0x197   :  { %v287_v46 = vpack.c.bf16 %v285_v44, %v284_v45 }
 0x199   :  { %4762 = vmatmul.mubr.msk.bf16.vlgmr.msra.gmra.mxu1 %vm312_vm3, %v287_v46 }
 0x259   :  { %v4763_v50 = vpop.f32.mrf.mxu1 }
 0x25a   :  { %v376_v55 = vadd.f32 %v4763_v50, %v4357_v51 }
 0x25b   :  { %v353_v52 = vpop.f32.mrf.mxu1 }
 0x25c   :  { %v374_v53 = vadd.f32 %v4357_v51, %v353_v52  ;;  %v393_v61 = vmul.f32 %v376_v55, %v376_v55  ;;  %v381_v2 = vsel %vm97_vm0, %v376_v55, 0.0 }
 0x25d   :  { %v4764_v54 = vpop.f32.mrf.mxu1 }
 0x25e   :  { %v391_v58 = vmul.f32 %v374_v53, %v374_v53  ;;  %v377_v59 = vadd.f32 %v4764_v54, %v4357_v51  ;;  %v378_v62 = vsel %vm97_vm0, %v374_v53, 0.0  ;;  %v398_v16 = vsel %vm97_vm0, %v393_v61, 0.0 }
 0x25f   :  { %v356_v56 = vpop.f32.mrf.mxu1 }
 0x260   :  { %v375_v60 = vadd.f32 %v4357_v51, %v356_v56  ;;  %v395_v3 = vsel %vm97_vm0, %v391_v58, 0.0  ;;  %v394_v4 = vmul.f32 %v377_v59, %v377_v59  ;;  %v383_v17 = vsel %vm97_vm0, %v377_v59, 0.0 }
 0x262   :  { %v379_v63 = vsel %vm97_vm0, %v375_v60, 0.0  ;;  %v392_v0 = vmul.f32 %v375_v60, %v375_v60  ;;  %v400_v20 = vsel %vm97_vm0, %v394_v4, 0.0 }
 0x263   :  { %v380_v1 = vadd.f32 %v379_v63, %v378_v62 }
 0x264   :  { %v396_v5 = vsel %vm97_vm0, %v392_v0, 0.0  ;;  %v5183_v0 = vld [vmem:[%s7131_s11 + $0x10] sm:$0xff]  }
 0x265   :  { %v382_v14 = vadd.f32 %v381_v2, %v380_v1  ;;  %v397_v15 = vadd.f32 %v396_v5, %v395_v3  ;;  %4771 = vmatprep.subr.bf16.mxu0 %v5183_v0 }
 0x266   :  { %4772 = vmatpush3.bf16.msra.mxu0 %v5183_v0 }
 0x267   :  { %v384_v18 = vadd.f32 %v383_v17, %v382_v14  ;;  %v399_v19 = vadd.f32 %v398_v16, %v397_v15  ;;  %v5184_v15 = vld [vmem:[%s7131_s11 + $0x8] sm:$0xff]  }
 0x268   :  { %4773 = vmatprep.subr.bf16.mxu0 %v5184_v15 }
 0x269   :  { %v385_v21 = vrot.slane %v384_v18, 4  ;;  %v401_v22 = vadd.f32 %v400_v20, %v399_v19 }
 0x26a   :  { %4774 = vmatpush3.bf16.msra.mxu0 %v5184_v15  ;;  %v5189_v15 = vld [vmem:[%s7095_s4 + $0x20] sm:$0xff]  }
 0x26b   :  { %v386_v23 = vadd.f32 %v385_v21, %v384_v18  ;;  %v402_v24 = vrot.slane %v401_v22, 4 }
 0x26d   :  { %v387_v25 = vrot.slane %v386_v23, 2  ;;  %v403_v26 = vadd.f32 %v402_v24, %v401_v22 }
 0x26f   :  { %v388_v27 = vadd.f32 %v387_v25, %v386_v23  ;;  %v404_v28 = vrot.slane %v403_v26, 2 }
 0x271   :  { %v389_v29 = vrot.slane %v388_v27, 1  ;;  %v405_v30 = vadd.f32 %v404_v28, %v403_v26 }
 0x273   :  { %v390_v31 = vadd.f32 %v389_v29, %v388_v27  ;;  %v406_v32 = vrot.slane %v405_v30, 1 }
 0x275   :  { %v407_v33 = vadd.f32 %v406_v32, %v405_v30  ;;  %v408_v34 = vmul.f32 0.03125, %v390_v31 }
 0x277   :  { %v409_v35 = vmul.f32 0.03125, %v407_v33  ;;  %v410_v36 = vmul.f32 %v408_v34, %v408_v34 }
 0x279   :  { %v411_v37 = vsub.f32 %v409_v35, %v410_v36 }
 0x27b   :  { %v412_v38 = vadd.f32 1e-05, %v411_v37 }
 0x27d   :  { %5310 = vrsqrt.f32 %v412_v38 }
 0x28a   :  { %v5311_v40 = vpop.eup %5310 }
 0x28b   :  { %v414_v41 = vmul.f32 %v5311_v40, %v4349_v39 }
 0x28d   :  { %v415_v43 = vmul.f32 %v414_v41, %v408_v34  ;;  %v421_v44 = vrot.slane %v414_v41, %v5556_v57  ;;  %v5185_v34 = vld [vmem:[%s7131_s11] sm:$0xff]  }
 0x28e   :  { %4775 = vmatprep.subr.bf16.mxu0 %v5185_v34 }
 0x28f   :  { %v416_v45 = vsub.f32 %v4350_v42, %v415_v43  ;;  %v424_v46 = vmul.f32 %v421_v44, %v375_v60  ;;  %v423_v48 = vmul.f32 %v421_v44, %v374_v53  ;;  %v425_v49 = vmul.f32 %v421_v44, %v376_v55  ;;  %4776 = vmatpush3.bf16.msra.mxu0 %v5185_v34 }
 0x290   :  { %v426_v50 = vmul.f32 %v421_v44, %v377_v59 }
 0x291   :  { %v431_v47 = vrot.slane %v416_v45, %v5556_v57 }
 0x293   :  { %v434_v51 = vadd.f32 %v431_v47, %v424_v46  ;;  %v433_v52 = vadd.f32 %v431_v47, %v423_v48  ;;  %v435_v54 = vadd.f32 %v431_v47, %v425_v49  ;;  %v436_v56 = vadd.f32 %v431_v47, %v426_v50 }
 0x295   :  { %v438_v58 = vmax.f32 %v434_v51, 0.0  ;;  %v437_v61 = vmax.f32 %v433_v52, 0.0  ;;  %v439_v62 = vmax.f32 %v435_v54, 0.0  ;;  %v440_v63 = vmax.f32 %v436_v56, 0.0 }
 0x297   :  { %v464_v1 = vrot.slane %v438_v58, 7  ;;  %v463_v2 = vrot.slane %v437_v61, 7  ;;  %v466_v60 = vrot.slane %v439_v62, 7  ;;  %v467_v3 = vrot.slane %v440_v63, 7 }
 0x298   :  { %v5636_v53 = vpack.i.bf16 %v438_v58, %v437_v61  ;;  %v5638_v55 = vpack.i.bf16 %v440_v63, %v439_v62 }
 0x299   :  { %v465_v59 = vsel %vm244_vm1, %v463_v2, %v464_v1  ;;  %v475_v4 = vsel %vm244_vm1, 0.0, %v463_v2  ;;  %v477_v5 = vsel %vm244_vm1, %v464_v1, 0.0  ;;  %v468_v14 = vsel %vm244_vm1, %v466_v60, %v467_v3 }
 0x29a   :  { %v506_v16 = vrot.slane %v475_v4, 2  ;;  %v507_v17 = vrot.slane %v465_v59, 2  ;;  %v509_v18 = vrot.slane %v477_v5, 2  ;;  %v483_v19 = vrot.slane %v475_v4, 1 }
 0x29b   :  { %v484_v20 = vrot.slane %v465_v59, 1  ;;  %v486_v21 = vrot.slane %v477_v5, 1  ;;  %v476_v22 = vsel %vm244_vm1, 0.0, %v466_v60  ;;  %v478_v23 = vsel %vm244_vm1, %v467_v3, 0.0  ;;  %v5187_v5 = vld [vmem:[%s7095_s4 + $0x30] sm:$0xff]  }
 0x29c   :  { %v508_v24 = vsel %vm505_vm4, %v506_v16, %v507_v17  ;;  %v510_v25 = vsel %vm505_vm4, %v507_v17, %v509_v18  ;;  %v488_v26 = vrot.slane %v476_v22, 1  ;;  %v489_v27 = vrot.slane %v468_v14, 1  ;;  %v5190_v16 = vld [vmem:[%s7095_s4 + $0x18] sm:$0xff]   ;;  %v4369_v18 = vld [vmem:[%s7128_s23 + $0x2] ss:$0 sm:$0xff] }
 0x29d   :  { %v4874_v28 = vpack.i.bf16 %v510_v25, %v508_v24  ;;  %v485_v29 = vsel %vm259_vm2, %v483_v19, %v484_v20  ;;  %v487_v30 = vsel %vm259_vm2, %v484_v20, %v486_v21  ;;  %v491_v31 = vrot.slane %v478_v23, 1 }
 0x29e   :  { %v4864_v32 = vpack.i.bf16 %v487_v30, %v485_v29  ;;  %v490_v33 = vsel %vm259_vm2, %v488_v26, %v489_v27  ;;  %v511_v36 = vrot.slane %v476_v22, 2  ;;  %v512_v37 = vrot.slane %v468_v14, 2 }
 0x29f   :  { %4875 = vrot.lane.b32.xlu0 %v4874_v28, %s5397_s10  ;;  %v492_v35 = vsel %vm259_vm2, %v489_v27, %v491_v31  ;;  %v514_v38 = vrot.slane %v478_v23, 2 }
 0x2a0   :  { %4865 = vrot.lane.b32.xlu1 %v4864_v32, %s5396_s28  ;;  %v4869_v39 = vpack.i.bf16 %v492_v35, %v490_v33  ;;  %v513_v40 = vsel %vm505_vm4, %v511_v36, %v512_v37 }
 0x2a1   :  { %v515_v41 = vsel %vm505_vm4, %v512_v37, %v514_v38 }
 0x2a2   :  { %v4879_v42 = vpack.i.bf16 %v515_v41, %v513_v40 }
 0x2a4   :  { %4870 = vrot.lane.b32.xlu1 %v4869_v39, %s5396_s28 }
 0x2a8   :  { %4880 = vrot.lane.b32.xlu1 %v4879_v42, %s5397_s10 }
 0x311   :  { %v4876_v43 = vpop.permute.xlu0 %4875 }
 0x312   :  { %v4878_v44 = vunpack.i.h.bf16 %v4876_v43  ;;  %v4877_v45 = vunpack.i.l.bf16 %v4876_v43  ;;  %v4866_v46 = vpop.permute.xlu1 %4865 }
 0x313   :  { %v4868_v47 = vunpack.i.h.bf16 %v4866_v46  ;;  %v4867_v48 = vunpack.i.l.bf16 %v4866_v46 }
 0x315   :  { %v529_v49 = vsel %vm97_vm0, %v465_v59, %v4868_v47  ;;  %v528_v50 = vsel %vm97_vm0, %v475_v4, %v4867_v48  ;;  %v5186_v4 = vld [vmem:[%s7095_s4 + $0x38] sm:$0xff]  }
 0x316   :  { %v4871_v51 = vpop.permute.xlu1 %4870  ;;  %v532_v52 = vsel %vm312_vm3, %v528_v50, %v4877_v45  ;;  %v533_v54 = vsel %vm312_vm3, %v529_v49, %v4878_v44  ;;  %4781 = vmatprep.subr.bf16.mxu1 %v5186_v4 }
 0x317   :  { %v536_v56 = vpack.c.bf16 %v533_v54, %v532_v52  ;;  %v4873_v58 = vunpack.i.h.bf16 %v4871_v51  ;;  %v4872_v61 = vunpack.i.l.bf16 %v4871_v51  ;;  %4782 = vmatpush3.bf16.msra.mxu1 %v5186_v4 }
 0x318   :  { %4783 = vmatprep.subr.bf16.mxu1 %v5187_v5 }
 0x319   :  { %4777 = vmatprep.mubr.msk.bf16.mxu0 %vm574_vm5, %v536_v56  ;;  %v531_v1 = vsel %vm97_vm0, %v468_v14, %v4873_v58  ;;  %v530_v2 = vsel %vm97_vm0, %v476_v22, %v4872_v61  ;;  %v5188_v14 = vld [vmem:[%s7095_s4 + $0x28] sm:$0xff]  }
 0x31a   :  { %v4881_v62 = vpop.permute.xlu1 %4880 }
 0x31b   :  { %v4883_v63 = vunpack.i.h.bf16 %v4881_v62  ;;  %v4882_v0 = vunpack.i.l.bf16 %v4881_v62  ;;  %4784 = vmatpush3.bf16.msra.mxu1 %v5187_v5 }
 0x31c   :  { %4785 = vmatprep.subr.bf16.mxu1 %v5188_v14 }
 0x31d   :  { %v534_v60 = vsel %vm312_vm3, %v530_v2, %v4882_v0  ;;  %v535_v3 = vsel %vm312_vm3, %v531_v1, %v4883_v63  ;;  %v4359_v2 = vld [vmem:[%s7129_s3 + $0x2] sm:$0x1] }
 0x31e   :  { %v537_v59 = vpack.c.bf16 %v535_v3, %v534_v60 }
 0x31f   :  { %4786 = vmatpush3.bf16.msra.mxu1 %v5188_v14 }
 0x320   :  { %4778 = vmatmul.mubr.msk.bf16.vlgmr.msra.gmra.mxu0 %vm574_vm5, %v537_v59  ;;  %4787 = vmatprep.subr.bf16.mxu1 %v5189_v15  ;;  %v4360_v59 = vld [vmem:[%s7130_s2 + $0x2] sm:$0x1] }
 0x323   :  { %4788 = vmatpush3.bf16.msra.mxu1 %v5189_v15 }
 0x324   :  { %4789 = vmatprep.subr.bf16.mxu1 %v5190_v16 }
 0x327   :  { %4790 = vmatpush3.bf16.msra.mxu1 %v5190_v16 }
 0x3e0   :  { %v4779_v17 = vpop.f32.mrf.mxu0 }
 0x3e1   :  { %v638_v22 = vadd.f32 %v4779_v17, %v4369_v18 }
 0x3e2   :  { %v615_v19 = vpop.f32.mrf.mxu0 }
 0x3e3   :  { %v636_v20 = vadd.f32 %v4369_v18, %v615_v19  ;;  %v655_v27 = vmul.f32 %v638_v22, %v638_v22  ;;  %v643_v32 = vsel %vm97_vm0, %v638_v22, 0.0 }
 0x3e4   :  { %v4780_v21 = vpop.f32.mrf.mxu0 }
 0x3e5   :  { %v653_v24 = vmul.f32 %v636_v20, %v636_v20  ;;  %v639_v25 = vadd.f32 %v4780_v21, %v4369_v18  ;;  %v640_v28 = vsel %vm97_vm0, %v636_v20, 0.0  ;;  %v660_v38 = vsel %vm97_vm0, %v655_v27, 0.0 }
 0x3e6   :  { %v618_v23 = vpop.f32.mrf.mxu0 }
 0x3e7   :  { %v637_v26 = vadd.f32 %v4369_v18, %v618_v23  ;;  %v657_v33 = vsel %vm97_vm0, %v653_v24, 0.0  ;;  %v656_v34 = vmul.f32 %v639_v25, %v639_v25  ;;  %v645_v39 = vsel %vm97_vm0, %v639_v25, 0.0 }
 0x3e9   :  { %v641_v29 = vsel %vm97_vm0, %v637_v26, 0.0  ;;  %v654_v30 = vmul.f32 %v637_v26, %v637_v26  ;;  %v662_v42 = vsel %vm97_vm0, %v656_v34, 0.0 }
 0x3ea   :  { %v642_v31 = vadd.f32 %v641_v29, %v640_v28 }
 0x3eb   :  { %v658_v35 = vsel %vm97_vm0, %v654_v30, 0.0 }
 0x3ec   :  { %v644_v36 = vadd.f32 %v643_v32, %v642_v31  ;;  %v659_v37 = vadd.f32 %v658_v35, %v657_v33  ;;  %v5191_v32 = vld [vmem:[%s7095_s4 + $0x10] sm:$0xff]  }
 0x3ed   :  { %4791 = vmatprep.subr.bf16.mxu1 %v5191_v32 }
 0x3ee   :  { %v646_v40 = vadd.f32 %v645_v39, %v644_v36  ;;  %v661_v41 = vadd.f32 %v660_v38, %v659_v37  ;;  %4792 = vmatpush3.bf16.msra.mxu1 %v5191_v32 }
 0x3f0   :  { %v647_v43 = vrot.slane %v646_v40, 4  ;;  %v663_v44 = vadd.f32 %v662_v42, %v661_v41 }
 0x3f2   :  { %v648_v45 = vadd.f32 %v647_v43, %v646_v40  ;;  %v664_v46 = vrot.slane %v663_v44, 4  ;;  %v5192_v43 = vld [vmem:[%s7095_s4 + $0x8] sm:$0xff]  }
 0x3f3   :  { %4793 = vmatprep.subr.bf16.mxu1 %v5192_v43 }
 0x3f4   :  { %v649_v47 = vrot.slane %v648_v45, 2  ;;  %v665_v48 = vadd.f32 %v664_v46, %v663_v44  ;;  %4794 = vmatpush3.bf16.msra.mxu1 %v5192_v43 }
 0x3f6   :  { %v650_v49 = vadd.f32 %v649_v47, %v648_v45  ;;  %v666_v50 = vrot.slane %v665_v48, 2 }
 0x3f8   :  { %v651_v51 = vrot.slane %v650_v49, 1  ;;  %v667_v52 = vadd.f32 %v666_v50, %v665_v48 }
 0x3fa   :  { %v652_v54 = vadd.f32 %v651_v51, %v650_v49  ;;  %v668_v56 = vrot.slane %v667_v52, 1 }
 0x3fc   :  { %v669_v58 = vadd.f32 %v668_v56, %v667_v52  ;;  %v670_v61 = vmul.f32 0.03125, %v652_v54 }
 0x3fe   :  { %v671_v62 = vmul.f32 0.03125, %v669_v58  ;;  %v672_v63 = vmul.f32 %v670_v61, %v670_v61 }
 0x400   :  { %v673_v0 = vsub.f32 %v671_v62, %v672_v63 }
 0x402   :  { %v674_v1 = vadd.f32 1e-05, %v673_v0 }
 0x404   :  { %5312 = vrsqrt.f32 %v674_v1 }
 0x411   :  { %v5313_v60 = vpop.eup %5312 }
 0x412   :  { %v676_v3 = vmul.f32 %v5313_v60, %v4359_v2 }
 0x414   :  { %v677_v4 = vmul.f32 %v676_v3, %v670_v61  ;;  %v683_v5 = vrot.slane %v676_v3, %v5556_v57  ;;  %v5193_v61 = vld [vmem:[%s7095_s4] sm:$0xff]   ;;  %s5398_s4 = smov 96  }
 0x415   :  { %4795 = vmatprep.subr.bf16.mxu1 %v5193_v61 }
 0x416   :  { %v678_v14 = vsub.f32 %v4360_v59, %v677_v4  ;;  %v686_v15 = vmul.f32 %v683_v5, %v637_v26  ;;  %v687_v17 = vmul.f32 %v683_v5, %v638_v22  ;;  %v688_v18 = vmul.f32 %v683_v5, %v639_v25  ;;  %4796 = vmatpush3.bf16.msra.mxu1 %v5193_v61 }
 0x417   :  { %v685_v19 = vmul.f32 %v683_v5, %v636_v20 }
 0x418   :  { %v693_v16 = vrot.slane %v678_v14, %v5556_v57 }
 0x41a   :  { %v696_v21 = vadd.f32 %v693_v16, %v686_v15  ;;  %v697_v23 = vadd.f32 %v693_v16, %v687_v17  ;;  %v698_v24 = vadd.f32 %v693_v16, %v688_v18  ;;  %v695_v27 = vadd.f32 %v693_v16, %v685_v19 }
 0x41c   :  { %v700_v28 = vmax.f32 %v696_v21, 0.0  ;;  %v701_v29 = vmax.f32 %v697_v23, 0.0  ;;  %v702_v30 = vmax.f32 %v698_v24, 0.0  ;;  %v699_v31 = vmax.f32 %v695_v27, 0.0 }
 0x41e   :  { %v731_v33 = vrot.slane %v700_v28, 6  ;;  %v733_v26 = vrot.slane %v701_v29, 6  ;;  %v734_v34 = vrot.slane %v702_v30, 6  ;;  %v730_v35 = vrot.slane %v699_v31, 6 }
 0x41f   :  { %v5711_v20 = vpack.i.bf16 %v700_v28, %v699_v31  ;;  %v5713_v22 = vpack.i.bf16 %v702_v30, %v701_v29 }
 0x420   :  { %v744_v25 = vsel %vm729_vm6, %v731_v33, 0.0  ;;  %v5717_v36 = vsel %vm729_vm6, %v733_v26, %v734_v34  ;;  %v5720_v37 = vsel %vm729_vm6, 0.0, %v733_v26  ;;  %v745_v38 = vsel %vm729_vm6, %v734_v34, 0.0 }
 0x421   :  { %v755_v39 = vrot.slane %v5720_v37, 1  ;;  %v756_v40 = vrot.slane %v5717_v36, 1  ;;  %v758_v41 = vrot.slane %v745_v38, 1  ;;  %v5726_v42 = vsel %vm729_vm6, %v730_v35, %v731_v33 }
 0x422   :  { %v5732_v44 = vsel %vm729_vm6, 0.0, %v730_v35  ;;  %v751_v45 = vrot.slane %v5726_v42, 1  ;;  %v753_v46 = vrot.slane %v744_v25, 1  ;;  %v777_v47 = vrot.slane %v5720_v37, 2 }
 0x423   :  { %v757_v48 = vsel %vm259_vm2, %v755_v39, %v756_v40  ;;  %v759_v49 = vsel %vm259_vm2, %v756_v40, %v758_v41  ;;  %v750_v50 = vrot.slane %v5732_v44, 1  ;;  %v778_v51 = vrot.slane %v5717_v36, 2 }
 0x424   :  { %v4889_v52 = vpack.i.bf16 %v759_v49, %v757_v48  ;;  %v754_v54 = vsel %vm259_vm2, %v751_v45, %v753_v46  ;;  %v780_v56 = vrot.slane %v745_v38, 2  ;;  %v772_v58 = vrot.slane %v5732_v44, 2 }
 0x425   :  { %v752_v62 = vsel %vm259_vm2, %v750_v50, %v751_v45  ;;  %v779_v63 = vsel %vm505_vm4, %v777_v47, %v778_v51  ;;  %v773_v0 = vrot.slane %v5726_v42, 2  ;;  %v775_v1 = vrot.slane %v744_v25, 2 }
 0x426   :  { %4890 = vrot.lane.b32.xlu1 %v4889_v52, %s5396_s28  ;;  %v4884_v2 = vpack.i.bf16 %v754_v54, %v752_v62  ;;  %v781_v60 = vsel %vm505_vm4, %v778_v51, %v780_v56  ;;  %v800_v3 = vrot.slane %v5720_v37, 3  ;;  %v801_v59 = vrot.slane %v5717_v36, 3 }
 0x427   :  { %v774_v4 = vsel %vm505_vm4, %v772_v58, %v773_v0  ;;  %v776_v5 = vsel %vm505_vm4, %v773_v0, %v775_v1  ;;  %v803_v14 = vrot.slane %v745_v38, 3  ;;  %v4899_v15 = vpack.i.bf16 %v781_v60, %v779_v63  ;;  %v5195_v60 = vld [vmem:[%s7096_s5 + $0x30] sm:$0xff]  }
 0x428   :  { %4885 = vrot.lane.b32.xlu0 %v4884_v2, %s5396_s28  ;;  %v795_v16 = vrot.slane %v5732_v44, 3  ;;  %v796_v17 = vrot.slane %v5726_v42, 3  ;;  %v802_v18 = vsel %vm794_vm7, %v800_v3, %v801_v59  ;;  %v798_v21 = vrot.slane %v744_v25, 3  ;;  %v5194_v2 = vld [vmem:[%s7096_s5 + $0x38] sm:$0xff]   ;;  %v5196_v3 = vld [vmem:[%s7096_s5 + $0x28] sm:$0xff]  }
 0x429   :  { %v804_v19 = vsel %vm794_vm7, %v801_v59, %v803_v14  ;;  %v4894_v23 = vpack.i.bf16 %v776_v5, %v774_v4  ;;  %v5399_v1 = vmov 0   ;;  %v5197_v59 = vld [vmem:[%s7096_s5 + $0x20] sm:$0xff]   ;;  %v5198_v4 = vld [vmem:[%s7096_s5 + $0x18] sm:$0xff]   ;;  %v5199_v5 = vld [vmem:[%s7096_s5 + $0x10] sm:$0xff]  }
 0x42a   :  { %4900 = vrot.lane.b32.xlu1 %v4899_v15, %s5397_s10  ;;  %v797_v24 = vsel %vm794_vm7, %v795_v16, %v796_v17  ;;  %v799_v27 = vsel %vm794_vm7, %v796_v17, %v798_v21  ;;  %v4909_v28 = vpack.i.bf16 %v804_v19, %v802_v18  ;;  %1214 = vmatprep.subr.bf16.mxu0 %v5399_v1  ;;  %v5200_v14 = vld [vmem:[%s7096_s5 + $0x8] sm:$0xff]   ;;  %v5201_v15 = vld [vmem:[%s7096_s5] sm:$0xff]  }
 0x42b   :  { %v4904_v29 = vpack.i.bf16 %v799_v27, %v797_v24  ;;  %1591 = vmatprep.subr.bf16.mxu1 %v5399_v1  ;;  %1215 = vmatpush1.bf16.msra.mxu0 %v5194_v2  ;;  %v4381_v17 = vld [vmem:[%s7128_s23 + $0x3] ss:$0 sm:$0xff] }
 0x42c   :  { %4895 = vrot.lane.b32.xlu0 %v4894_v23, %s5397_s10  ;;  %1216 = vmatprep.subr.bf16.mxu0 %v5399_v1 }
 0x42e   :  { %4910 = vrot.lane.b32.xlu1 %v4909_v28, %s5398_s4 }
 0x42f   :  { %1217 = vmatpush1.bf16.msra.mxu0 %v5195_v60 }
 0x430   :  { %4905 = vrot.lane.b32.xlu0 %v4904_v29, %s5398_s4  ;;  %1218 = vmatprep.subr.bf16.mxu0 %v5399_v1 }
 0x433   :  { %1219 = vmatpush1.bf16.msra.mxu0 %v5196_v3  ;;  %v4371_v3 = vld [vmem:[%s7129_s3 + $0x3] sm:$0x1] }
 0x434   :  { %1220 = vmatprep.subr.bf16.mxu0 %v5399_v1 }
 0x437   :  { %1221 = vmatpush1.bf16.msra.mxu0 %v5197_v59 }
 0x438   :  { %1222 = vmatprep.subr.bf16.mxu0 %v5399_v1 }
 0x43b   :  { %1223 = vmatpush1.bf16.msra.mxu0 %v5198_v4 }
 0x43c   :  { %1224 = vmatprep.subr.bf16.mxu0 %v5399_v1 }
 0x43f   :  { %1225 = vmatpush1.bf16.msra.mxu0 %v5199_v5  ;;  %v4372_v5 = vld [vmem:[%s7130_s2 + $0x3] sm:$0x1] }
 0x440   :  { %1226 = vmatprep.subr.bf16.mxu0 %v5399_v1 }
 0x443   :  { %1227 = vmatpush1.bf16.msra.mxu0 %v5200_v14 }
 0x444   :  { %1228 = vmatprep.subr.bf16.mxu0 %v5399_v1 }
 0x447   :  { %1229 = vmatpush1.bf16.msra.mxu0 %v5201_v15 }
 0x448   :  { %1242 = vmatprep.subr.bf16.mxu0 %v5399_v1 }
 0x498   :  { %v4891_v30 = vpop.permute.xlu1 %4890 }
 0x499   :  { %v4893_v33 = vunpack.i.h.bf16 %v4891_v30  ;;  %v4892_v26 = vunpack.i.l.bf16 %v4891_v30 }
 0x49a   :  { %v4886_v31 = vpop.permute.xlu0 %4885 }
 0x49b   :  { %v4888_v34 = vunpack.i.h.bf16 %v4886_v31  ;;  %v4887_v35 = vunpack.i.l.bf16 %v4886_v31  ;;  %v820_v45 = vsel %vm97_vm0, %v5717_v36, %v4893_v33  ;;  %v819_v46 = vsel %vm97_vm0, %v5720_v37, %v4892_v26 }
 0x49c   :  { %v4901_v32 = vpop.permute.xlu1 %4900 }
 0x49d   :  { %v4903_v25 = vunpack.i.h.bf16 %v4901_v32  ;;  %v4902_v38 = vunpack.i.l.bf16 %v4901_v32  ;;  %v818_v49 = vsel %vm97_vm0, %v5726_v42, %v4888_v34  ;;  %v817_v50 = vsel %vm97_vm0, %v5732_v44, %v4887_v35 }
 0x49e   :  { %v4896_v39 = vpop.permute.xlu0 %4895 }
 0x49f   :  { %v4898_v40 = vunpack.i.h.bf16 %v4896_v39  ;;  %v4897_v41 = vunpack.i.l.bf16 %v4896_v39  ;;  %v823_v51 = vsel %vm312_vm3, %v819_v46, %v4902_v38  ;;  %v824_v52 = vsel %vm312_vm3, %v820_v45, %v4903_v25 }
 0x4a0   :  { %v4911_v43 = vpop.permute.xlu1 %4910 }
 0x4a1   :  { %v4913_v47 = vunpack.i.h.bf16 %v4911_v43  ;;  %v4912_v48 = vunpack.i.l.bf16 %v4911_v43  ;;  %v821_v37 = vsel %vm312_vm3, %v817_v50, %v4897_v41  ;;  %v822_v62 = vsel %vm312_vm3, %v818_v49, %v4898_v40 }
 0x4a2   :  { %v4906_v54 = vpop.permute.xlu0 %4905 }
 0x4a3   :  { %v827_v56 = vsel %vm574_vm5, %v823_v51, %v4912_v48  ;;  %v828_v36 = vsel %vm574_vm5, %v824_v52, %v4913_v47  ;;  %v4908_v58 = vunpack.i.h.bf16 %v4906_v54  ;;  %v4907_v61 = vunpack.i.l.bf16 %v4906_v54 }
 0x4a4   :  { %v830_v63 = vpack.c.bf16 %v828_v36, %v827_v56 }
 0x4a5   :  { %v825_v42 = vsel %vm574_vm5, %v821_v37, %v4907_v61  ;;  %v826_v44 = vsel %vm574_vm5, %v822_v62, %v4908_v58 }
 0x4a6   :  { %v829_v0 = vpack.c.bf16 %v826_v44, %v825_v42 }
 0x4a8   :  { %4797 = vmatprep.mubr.bf16.mxu1 %v829_v0 }
 0x4a9   :  { %4798 = vmatmul.mubr.bf16.vlgmr.msra.gmra.mxu1 %v830_v63 }
 0x569   :  { %v4799_v16 = vpop.f32.mrf.mxu1 }
 0x56a   :  { %v936_v23 = vadd.f32 %v4799_v16, %v4381_v17 }
 0x56b   :  { %v913_v18 = vpop.f32.mrf.mxu1 }
 0x56c   :  { %v934_v19 = vadd.f32 %v4381_v17, %v913_v18  ;;  %v953_v30 = vmul.f32 %v936_v23, %v936_v23  ;;  %v941_v34 = vsel %vm97_vm0, %v936_v23, 0.0 }
 0x56d   :  { %v4800_v21 = vpop.f32.mrf.mxu1 }
 0x56e   :  { %v951_v27 = vmul.f32 %v934_v19, %v934_v19  ;;  %v937_v28 = vadd.f32 %v4800_v21, %v4381_v17  ;;  %v938_v31 = vsel %vm97_vm0, %v934_v19, 0.0  ;;  %v958_v41 = vsel %vm97_vm0, %v953_v30, 0.0 }
 0x56f   :  { %v916_v24 = vpop.f32.mrf.mxu1 }
 0x570   :  { %v935_v29 = vadd.f32 %v4381_v17, %v916_v24  ;;  %v955_v35 = vsel %vm97_vm0, %v951_v27, 0.0  ;;  %v954_v25 = vmul.f32 %v937_v28, %v937_v28  ;;  %v943_v43 = vsel %vm97_vm0, %v937_v28, 0.0 }
 0x572   :  { %v939_v32 = vsel %vm97_vm0, %v935_v29, 0.0  ;;  %v952_v33 = vmul.f32 %v935_v29, %v935_v29  ;;  %v960_v47 = vsel %vm97_vm0, %v954_v25, 0.0 }
 0x573   :  { %v940_v26 = vadd.f32 %v939_v32, %v938_v31 }
 0x574   :  { %v956_v38 = vsel %vm97_vm0, %v952_v33, 0.0 }
 0x575   :  { %v942_v39 = vadd.f32 %v941_v34, %v940_v26  ;;  %v957_v40 = vadd.f32 %v956_v38, %v955_v35  ;;  %v5202_v38 = vld [vmem:[%s7096_s5 + $0x48] sm:$0xff]  }
 0x576   :  { %1243 = vmatpush2.bf16.msra.mxu0 %v5202_v38 }
 0x577   :  { %v944_v45 = vadd.f32 %v943_v43, %v942_v39  ;;  %v959_v46 = vadd.f32 %v958_v41, %v957_v40  ;;  %1244 = vmatprep.subr.bf16.mxu0 %v5399_v1 }
 0x579   :  { %v945_v48 = vrot.slane %v944_v45, 4  ;;  %v961_v49 = vadd.f32 %v960_v47, %v959_v46 }
 0x57b   :  { %v946_v50 = vadd.f32 %v945_v48, %v944_v45  ;;  %v962_v51 = vrot.slane %v961_v49, 4 }
 0x57d   :  { %v947_v52 = vrot.slane %v946_v50, 2  ;;  %v963_v54 = vadd.f32 %v962_v51, %v961_v49 }
 0x57f   :  { %v948_v56 = vadd.f32 %v947_v52, %v946_v50  ;;  %v964_v36 = vrot.slane %v963_v54, 2 }
 0x581   :  { %v949_v58 = vrot.slane %v948_v56, 1  ;;  %v965_v61 = vadd.f32 %v964_v36, %v963_v54  ;;  %v5203_v36 = vld [vmem:[%s7096_s5 + $0x40] sm:$0xff]  }
 0x582   :  { %1245 = vmatpush2.bf16.msra.mxu0 %v5203_v36 }
 0x583   :  { %v950_v37 = vadd.f32 %v949_v58, %v948_v56  ;;  %v966_v62 = vrot.slane %v965_v61, 1  ;;  %2009 = vmatprep.subr.bf16.mxu0 %v5399_v1 }
 0x585   :  { %v967_v63 = vadd.f32 %v966_v62, %v965_v61  ;;  %v968_v42 = vmul.f32 0.03125, %v950_v37 }
 0x587   :  { %v969_v44 = vmul.f32 0.03125, %v967_v63  ;;  %v970_v0 = vmul.f32 %v968_v42, %v968_v42 }
 0x589   :  { %v971_v2 = vsub.f32 %v969_v44, %v970_v0 }
 0x58b   :  { %v972_v60 = vadd.f32 1e-05, %v971_v2 }
 0x58d   :  { %5314 = vrsqrt.f32 %v972_v60 }
 0x59a   :  { %v5315_v59 = vpop.eup %5314 }
 0x59b   :  { %v974_v4 = vmul.f32 %v5315_v59, %v4371_v3 }
 0x59d   :  { %v975_v14 = vmul.f32 %v974_v4, %v968_v42  ;;  %v981_v15 = vrot.slane %v974_v4, %v5556_v57 }
 0x59f   :  { %v976_v16 = vsub.f32 %v4372_v5, %v975_v14  ;;  %v983_v17 = vmul.f32 %v981_v15, %v934_v19  ;;  %v984_v18 = vmul.f32 %v981_v15, %v935_v29  ;;  %v985_v21 = vmul.f32 %v981_v15, %v936_v23 }
 0x5a0   :  { %v986_v27 = vmul.f32 %v981_v15, %v937_v28 }
 0x5a1   :  { %v991_v24 = vrot.slane %v976_v16, %v5556_v57 }
 0x5a3   :  { %v993_v30 = vadd.f32 %v991_v24, %v983_v17  ;;  %v994_v31 = vadd.f32 %v991_v24, %v984_v18  ;;  %v995_v32 = vadd.f32 %v991_v24, %v985_v21  ;;  %v996_v33 = vadd.f32 %v991_v24, %v986_v27 }
 0x5a5   :  { %v997_v26 = vmax.f32 %v993_v30, 0.0  ;;  %v998_v34 = vmax.f32 %v994_v31, 0.0  ;;  %v999_v35 = vmax.f32 %v995_v32, 0.0  ;;  %v1000_v25 = vmax.f32 %v996_v33, 0.0 }
 0x5a7   :  { %v1031_v39 = vrot.slane %v997_v26, 6  ;;  %v1032_v40 = vrot.slane %v998_v34, 6  ;;  %v1034_v19 = vrot.slane %v999_v35, 6  ;;  %v1035_v29 = vrot.slane %v1000_v25, 6 }
 0x5a8   :  { %v5837_v23 = vpack.i.bf16 %v998_v34, %v997_v26  ;;  %v5839_v28 = vpack.i.bf16 %v1000_v25, %v999_v35 }
 0x5a9   :  { %v5842_v41 = vsel %vm729_vm6, %v1031_v39, %v1032_v40  ;;  %v1045_v43 = vsel %vm729_vm6, %v1032_v40, 0.0  ;;  %v5846_v45 = vsel %vm729_vm6, 0.0, %v1031_v39  ;;  %v5849_v46 = vsel %vm729_vm6, %v1034_v19, %v1035_v29 }
 0x5aa   :  { %v1118_v47 = vrot.slane %v5846_v45, 4  ;;  %v1119_v48 = vrot.slane %v5842_v41, 4  ;;  %v1121_v49 = vrot.slane %v1045_v43, 4  ;;  %v1073_v50 = vrot.slane %v5846_v45, 2 }
 0x5ab   :  { %v1074_v51 = vrot.slane %v5842_v41, 2  ;;  %v1076_v52 = vrot.slane %v1045_v43, 2  ;;  %v1051_v54 = vrot.slane %v5846_v45, 1  ;;  %v1052_v56 = vrot.slane %v5842_v41, 1 }
 0x5ac   :  { %v1120_v58 = vsel %vm1117_vm8, %v1118_v47, %v1119_v48  ;;  %v1122_v61 = vsel %vm1117_vm8, %v1119_v48, %v1121_v49  ;;  %v1054_v37 = vrot.slane %v1045_v43, 1  ;;  %v5864_v62 = vsel %vm729_vm6, 0.0, %v1034_v19 }
 0x5ad   :  { %v1145_v63 = vpack.c.bf16 %v1122_v61, %v1120_v58  ;;  %v1075_v42 = vsel %vm505_vm4, %v1073_v50, %v1074_v51  ;;  %v1077_v44 = vsel %vm505_vm4, %v1074_v51, %v1076_v52  ;;  %v1053_v0 = vsel %vm259_vm2, %v1051_v54, %v1052_v56 }
 0x5ae   :  { %v4919_v2 = vpack.i.bf16 %v1077_v44, %v1075_v42  ;;  %v1055_v60 = vsel %vm259_vm2, %v1052_v56, %v1054_v37  ;;  %v1046_v3 = vsel %vm729_vm6, %v1035_v29, 0.0  ;;  %v1056_v59 = vrot.slane %v5864_v62, 1 }
 0x5af   :  { %4395 = vmatprep.mubr.msk.bf16.mxu0 %vm97_vm0, %v1145_v63  ;;  %v4914_v4 = vpack.i.bf16 %v1055_v60, %v1053_v0  ;;  %v1057_v5 = vrot.slane %v5849_v46, 1  ;;  %v1059_v14 = vrot.slane %v1046_v3, 1  ;;  %v1095_v15 = vrot.slane %v5846_v45, 3 }
 0x5b0   :  { %4920 = vrot.lane.b32.xlu1 %v4919_v2, %s5397_s10  ;;  %v1096_v16 = vrot.slane %v5842_v41, 3  ;;  %v1098_v17 = vrot.slane %v1045_v43, 3  ;;  %v1100_v18 = vrot.slane %v5864_v62, 3  ;;  %v1101_v21 = vrot.slane %v5849_v46, 3 }
 0x5b1   :  { %4915 = vrot.lane.b32.xlu0 %v4914_v4, %s5396_s28  ;;  %v1058_v24 = vsel %vm259_vm2, %v1056_v59, %v1057_v5  ;;  %v1060_v27 = vsel %vm259_vm2, %v1057_v5, %v1059_v14  ;;  %v1103_v30 = vrot.slane %v1046_v3, 3  ;;  %v1078_v31 = vrot.slane %v5864_v62, 2 }
 0x5b2   :  { %v4929_v32 = vpack.i.bf16 %v1060_v27, %v1058_v24  ;;  %v1097_v33 = vsel %vm794_vm7, %v1095_v15, %v1096_v16  ;;  %v1099_v26 = vsel %vm794_vm7, %v1096_v16, %v1098_v17  ;;  %v1102_v34 = vsel %vm794_vm7, %v1100_v18, %v1101_v21 }
 0x5b3   :  { %v4924_v35 = vpack.i.bf16 %v1099_v26, %v1097_v33  ;;  %v1104_v25 = vsel %vm794_vm7, %v1101_v21, %v1103_v30  ;;  %v1079_v38 = vrot.slane %v5849_v46, 2  ;;  %v1081_v39 = vrot.slane %v1046_v3, 2 }
 0x5b4   :  { %4930 = vrot.lane.b32.xlu1 %v4929_v32, %s5396_s28  ;;  %v4939_v29 = vpack.i.bf16 %v1104_v25, %v1102_v34  ;;  %v1123_v49 = vrot.slane %v5864_v62, 4  ;;  %v1124_v52 = vrot.slane %v5849_v46, 4  ;;  %v1126_v54 = vrot.slane %v1046_v3, 4  ;;  %v5207_v25 = vld [vmem:[%s7097_s6 + $0x20] sm:$0xff]  }
 0x5b5   :  { %4925 = vrot.lane.b32.xlu0 %v4924_v35, %s5398_s4  ;;  %v1080_v40 = vsel %vm505_vm4, %v1078_v31, %v1079_v38  ;;  %v1082_v19 = vsel %vm505_vm4, %v1079_v38, %v1081_v39  ;;  %v5206_v35 = vld [vmem:[%s7097_s6 + $0x28] sm:$0xff]   ;;  %v5208_v38 = vld [vmem:[%s7097_s6 + $0x18] sm:$0xff]   ;;  %v5209_v39 = vld [vmem:[%s7097_s6 + $0x10] sm:$0xff]  }
 0x5b6   :  { %v4934_v43 = vpack.i.bf16 %v1082_v19, %v1080_v40  ;;  %v1125_v0 = vsel %vm1117_vm8, %v1123_v49, %v1124_v52  ;;  %v1127_v2 = vsel %vm1117_vm8, %v1124_v52, %v1126_v54  ;;  %v5210_v40 = vld [vmem:[%s7097_s6 + $0x8] sm:$0xff]   ;;  %v5211_v19 = vld [vmem:[%s7097_s6] sm:$0xff]  }
 0x5b7   :  { %v1147_v16 = vpack.c.bf16 %v1127_v2, %v1125_v0 }
 0x5b8   :  { %4940 = vrot.lane.b32.xlu1 %v4939_v29, %s5398_s4  ;;  %v5212_v29 = vld [vmem:[%s7097_s6 + $0x58] sm:$0xff]  }
 0x5b9   :  { %4935 = vrot.lane.b32.xlu0 %v4934_v43, %s5397_s10  ;;  %v5213_v43 = vld [vmem:[%s7097_s6 + $0x50] sm:$0xff]  }
 0x622   :  { %v4921_v47 = vpop.permute.xlu1 %4920 }
 0x623   :  { %v4916_v48 = vpop.permute.xlu0 %4915  ;;  %v4923_v56 = vunpack.i.h.bf16 %v4921_v47  ;;  %v4922_v36 = vunpack.i.l.bf16 %v4921_v47 }
 0x624   :  { %v4918_v50 = vunpack.i.h.bf16 %v4916_v48  ;;  %v4917_v51 = vunpack.i.l.bf16 %v4916_v48  ;;  %v4397_v48 = vld [vmem:[%s7128_s23 + $0x4] ss:$0 sm:$0xff] }
 0x626   :  { %v1133_v58 = vsel %vm97_vm0, %v5842_v41, %v4918_v50  ;;  %v1132_v61 = vsel %vm97_vm0, %v5846_v45, %v4917_v51  ;;  %v4931_v37 = vpop.permute.xlu1 %4930 }
 0x627   :  { %v4926_v63 = vpop.permute.xlu0 %4925  ;;  %v4933_v60 = vunpack.i.h.bf16 %v4931_v37  ;;  %v4932_v59 = vunpack.i.l.bf16 %v4931_v37  ;;  %v1136_v3 = vsel %vm312_vm3, %v1132_v61, %v4922_v36  ;;  %v1137_v4 = vsel %vm312_vm3, %v1133_v58, %v4923_v56 }
 0x628   :  { %v4928_v42 = vunpack.i.h.bf16 %v4926_v63  ;;  %v4927_v44 = vunpack.i.l.bf16 %v4926_v63 }
 0x629   :  { %v1135_v27 = vsel %vm97_vm0, %v5849_v46, %v4933_v60  ;;  %v1134_v30 = vsel %vm97_vm0, %v5864_v62, %v4932_v59  ;;  %v5204_v46 = vld [vmem:[%s7097_s6 + $0x38] sm:$0xff]   ;;  %v5205_v62 = vld [vmem:[%s7097_s6 + $0x30] sm:$0xff]  }
 0x62a   :  { %v1140_v5 = vsel %vm574_vm5, %v1136_v3, %v4927_v44  ;;  %v1141_v41 = vsel %vm574_vm5, %v1137_v4, %v4928_v42  ;;  %v4941_v14 = vpop.permute.xlu1 %4940  ;;  %1592 = vmatpush1.bf16.msra.mxu1 %v5204_v46 }
 0x62b   :  { %v1144_v45 = vpack.c.bf16 %v1141_v41, %v1140_v5  ;;  %v4936_v15 = vpop.permute.xlu0 %4935  ;;  %v4943_v17 = vunpack.i.h.bf16 %v4941_v14  ;;  %v4942_v18 = vunpack.i.l.bf16 %v4941_v14  ;;  %1593 = vmatprep.subr.bf16.mxu1 %v5399_v1 }
 0x62c   :  { %v4938_v21 = vunpack.i.h.bf16 %v4936_v15  ;;  %v4937_v24 = vunpack.i.l.bf16 %v4936_v15 }
 0x62d   :  { %1247 = vmatmul.mubr.bf16.vlgmr.msra.gmra.mxu0 %v1144_v45 }
 0x62e   :  { %v1139_v31 = vsel %vm312_vm3, %v1135_v27, %v4938_v21  ;;  %v1138_v32 = vsel %vm312_vm3, %v1134_v30, %v4937_v24  ;;  %4396 = vmatprep.mubr.msk.bf16.mxu0 %vm97_vm0, %v1147_v16  ;;  %1594 = vmatpush1.bf16.msra.mxu1 %v5205_v62 }
 0x62f   :  { %v1142_v33 = vsel %vm574_vm5, %v1138_v32, %v4942_v18  ;;  %v1143_v26 = vsel %vm574_vm5, %v1139_v31, %v4943_v17  ;;  %1595 = vmatprep.subr.bf16.mxu1 %v5399_v1 }
 0x630   :  { %v1146_v34 = vpack.c.bf16 %v1143_v26, %v1142_v33 }
 0x632   :  { %1596 = vmatpush1.bf16.msra.mxu1 %v5206_v35 }
 0x633   :  { %1597 = vmatprep.subr.bf16.mxu1 %v5399_v1 }
 0x635   :  { %1255 = vmatmul.mubr.bf16.gmra.mxu0 %v1146_v34 }
 0x636   :  { %1598 = vmatpush1.bf16.msra.mxu1 %v5207_v25 }
 0x637   :  { %1599 = vmatprep.subr.bf16.mxu1 %v5399_v1 }
 0x63a   :  { %1600 = vmatpush1.bf16.msra.mxu1 %v5208_v38 }
 0x63b   :  { %1601 = vmatprep.subr.bf16.mxu1 %v5399_v1 }
 0x63e   :  { %1602 = vmatpush1.bf16.msra.mxu1 %v5209_v39 }
 0x63f   :  { %1603 = vmatprep.subr.bf16.mxu1 %v5399_v1 }
 0x642   :  { %1604 = vmatpush1.bf16.msra.mxu1 %v5210_v40 }
 0x643   :  { %1605 = vmatprep.subr.bf16.mxu1 %v5399_v1 }
 0x646   :  { %1606 = vmatpush1.bf16.msra.mxu1 %v5211_v19 }
 0x647   :  { %1615 = vmatprep.subr.bf16.mxu1 %v5399_v1 }
 0x64a   :  { %1616 = vmatpush2.bf16.msra.mxu1 %v5212_v29 }
 0x64b   :  { %1617 = vmatprep.subr.bf16.mxu1 %v5399_v1 }
 0x64e   :  { %1618 = vmatpush2.bf16.msra.mxu1 %v5213_v43 }
 0x64f   :  { %1619 = vmatprep.subr.bf16.mxu1 %v5399_v1 }
 0x6ed   :  { %v1248_v47 = vpop.f32.mrf.mxu0 }
 0x6ee   :  { %v1269_v51 = vadd.f32 %v4397_v48, %v1248_v47  ;;  %v4383_v47 = vld [vmem:[%s7129_s3 + $0x4] sm:$0x1] }
 0x6ef   :  { %v1250_v49 = vpop.f32.mrf.mxu0 }
 0x6f0   :  { %v1286_v58 = vmul.f32 %v1269_v51, %v1269_v51  ;;  %v1273_v42 = vsel %vm97_vm0, %v1269_v51, 0.0 }
 0x6f1   :  { %v1251_v50 = vpop.f32.mrf.mxu0 }
 0x6f2   :  { %v1270_v52 = vadd.f32 %v4397_v48, %v1251_v50  ;;  %v1290_v3 = vsel %vm97_vm0, %v1286_v58, 0.0  ;;  %v4384_v50 = vld [vmem:[%s7130_s2 + $0x4] sm:$0x1] }
 0x6f3   :  { %v1253_v54 = vpop.f32.mrf.mxu0 }
 0x6f4   :  { %v1287_v56 = vmul.f32 %v1270_v52, %v1270_v52  ;;  %v1274_v61 = vsel %vm97_vm0, %v1270_v52, 0.0 }
 0x6f5   :  { %v1256_v36 = vpop.f32.mrf.mxu0  ;;  %v1275_v60 = vadd.f32 %v1274_v61, %v1273_v42 }
 0x6f6   :  { %v1271_v37 = vadd.f32 %v4397_v48, %v1256_v36  ;;  %v1291_v44 = vsel %vm97_vm0, %v1287_v56, 0.0 }
 0x6f7   :  { %v1258_v63 = vpop.f32.mrf.mxu0  ;;  %v1292_v41 = vadd.f32 %v1291_v44, %v1290_v3 }
 0x6f8   :  { %v1276_v0 = vsel %vm97_vm0, %v1271_v37, 0.0  ;;  %v1288_v2 = vmul.f32 %v1271_v37, %v1271_v37 }
 0x6f9   :  { %v1259_v59 = vpop.f32.mrf.mxu0  ;;  %v1277_v14 = vadd.f32 %v1276_v0, %v1275_v60 }
 0x6fa   :  { %v1293_v4 = vsel %vm97_vm0, %v1288_v2, 0.0  ;;  %v1272_v5 = vadd.f32 %v4397_v48, %v1259_v59 }
 0x6fb   :  { %v1261_v45 = vpop.f32.mrf.mxu0  ;;  %v1294_v17 = vadd.f32 %v1293_v4, %v1292_v41 }
 0x6fc   :  { %v1278_v15 = vsel %vm97_vm0, %v1272_v5, 0.0  ;;  %v1289_v16 = vmul.f32 %v1272_v5, %v1272_v5 }
 0x6fd   :  { %v1279_v18 = vadd.f32 %v1278_v15, %v1277_v14 }
 0x6fe   :  { %v1295_v21 = vsel %vm97_vm0, %v1289_v16, 0.0 }
 0x6ff   :  { %v1280_v24 = vrot.slane %v1279_v18, 4  ;;  %v1296_v27 = vadd.f32 %v1295_v21, %v1294_v17 }
 0x701   :  { %v1281_v30 = vadd.f32 %v1280_v24, %v1279_v18  ;;  %v1297_v31 = vrot.slane %v1296_v27, 4 }
 0x703   :  { %v1282_v32 = vrot.slane %v1281_v30, 2  ;;  %v1298_v33 = vadd.f32 %v1297_v31, %v1296_v27  ;;  %v5215_v31 = vld [vmem:[%s7097_s6 + $0x40] sm:$0xff]  }
 0x705   :  { %v1283_v26 = vadd.f32 %v1282_v32, %v1281_v30  ;;  %v1299_v34 = vrot.slane %v1298_v33, 2 }
 0x707   :  { %v1284_v46 = vrot.slane %v1283_v26, 1  ;;  %v1300_v62 = vadd.f32 %v1299_v34, %v1298_v33 }
 0x709   :  { %v1285_v35 = vadd.f32 %v1284_v46, %v1283_v26  ;;  %v1301_v25 = vrot.slane %v1300_v62, 1 }
 0x70b   :  { %v1302_v38 = vadd.f32 %v1301_v25, %v1300_v62  ;;  %v1303_v39 = vmul.f32 0.03125, %v1285_v35 }
 0x70d   :  { %v1304_v40 = vmul.f32 0.03125, %v1302_v38  ;;  %v1305_v19 = vmul.f32 %v1303_v39, %v1303_v39 }
 0x70f   :  { %v1306_v29 = vsub.f32 %v1304_v40, %v1305_v19 }
 0x711   :  { %v1307_v43 = vadd.f32 1e-05, %v1306_v29 }
 0x713   :  { %5316 = vrsqrt.f32 %v1307_v43 }
 0x720   :  { %v5317_v48 = vpop.eup %5316 }
 0x721   :  { %v1309_v49 = vmul.f32 %v5317_v48, %v4383_v47 }
 0x723   :  { %v1310_v54 = vmul.f32 %v1309_v49, %v1303_v39  ;;  %v1316_v56 = vrot.slane %v1309_v49, %v5556_v57 }
 0x725   :  { %v1311_v36 = vsub.f32 %v4384_v50, %v1310_v54  ;;  %v1318_v58 = vmul.f32 %v1316_v56, %v1269_v51  ;;  %v1319_v61 = vmul.f32 %v1316_v56, %v1270_v52  ;;  %v1320_v63 = vmul.f32 %v1316_v56, %v1271_v37  ;;  %v5214_v52 = vld [vmem:[%s7097_s6 + $0x48] sm:$0xff]  }
 0x726   :  { %v1321_v42 = vmul.f32 %v1316_v56, %v1272_v5  ;;  %1620 = vmatpush2.bf16.msra.mxu1 %v5214_v52 }
 0x727   :  { %v1326_v44 = vrot.slane %v1311_v36, %v5556_v57  ;;  %1621 = vmatprep.subr.bf16.mxu1 %v5399_v1 }
 0x729   :  { %v5975_v0 = vadd.f32 %v1326_v44, %v1320_v63  ;;  %v5977_v2 = vadd.f32 %v1326_v44, %v1321_v42  ;;  %v5979_v60 = vadd.f32 %v1326_v44, %v1318_v58  ;;  %v5981_v59 = vadd.f32 %v1326_v44, %v1319_v61 }
 0x72a   :  { %1622 = vmatpush2.bf16.msra.mxu1 %v5215_v31 }
 0x72b   :  { %v1334_v3 = vmax.f32 %v5975_v0, 0.0  ;;  %v1335_v4 = vmax.f32 %v5977_v2, 0.0  ;;  %v1332_v41 = vmax.f32 %v5979_v60, 0.0  ;;  %v1333_v51 = vmax.f32 %v5981_v59, 0.0 }
 0x72d   :  { %v1374_v37 = vrot.slane %v1334_v3, 5  ;;  %v1375_v5 = vrot.slane %v1335_v4, 5  ;;  %v1371_v14 = vrot.slane %v1332_v41, 5  ;;  %v1372_v45 = vrot.slane %v1333_v51, 5 }
 0x72f   :  { %v6000_v15 = vsel %vm1370_vm9, %v1374_v37, %v1375_v5  ;;  %v6003_v16 = vsel %vm1370_vm9, %v1375_v5, 0.0  ;;  %v6006_v17 = vsel %vm1370_vm9, %v1371_v14, %v1372_v45  ;;  %v6009_v18 = vsel %vm1370_vm9, 0.0, %v1371_v14 }
 0x730   :  { %v6012_v21 = vsel %vm1370_vm9, %v1372_v45, 0.0  ;;  %v1413_v24 = vrot.slane %v6009_v18, 2  ;;  %v1414_v27 = vrot.slane %v6006_v17, 2  ;;  %v1391_v30 = vrot.slane %v6009_v18, 1 }
 0x731   :  { %v1416_v32 = vrot.slane %v6012_v21, 2  ;;  %v1392_v33 = vrot.slane %v6006_v17, 1  ;;  %v1394_v26 = vrot.slane %v6012_v21, 1  ;;  %v1435_v34 = vrot.slane %v6009_v18, 3 }
 0x732   :  { %v1415_v46 = vsel %vm505_vm4, %v1413_v24, %v1414_v27  ;;  %v1436_v62 = vrot.slane %v6006_v17, 3  ;;  %v1438_v35 = vrot.slane %v6012_v21, 3  ;;  %v1471_v25 = vrot.slane %v6009_v18, 5 }
 0x733   :  { %v1417_v38 = vsel %vm505_vm4, %v1414_v27, %v1416_v32  ;;  %v1393_v39 = vsel %vm259_vm2, %v1391_v30, %v1392_v33  ;;  %v1395_v40 = vsel %vm259_vm2, %v1392_v33, %v1394_v26  ;;  %v1472_v19 = vrot.slane %v6006_v17, 5 }
 0x734   :  { %v4949_v29 = vpack.i.bf16 %v1417_v38, %v1415_v46  ;;  %v4944_v43 = vpack.i.bf16 %v1395_v40, %v1393_v39  ;;  %v1437_v47 = vsel %vm794_vm7, %v1435_v34, %v1436_v62  ;;  %v1439_v48 = vsel %vm794_vm7, %v1436_v62, %v1438_v35 }
 0x735   :  { %v1473_v49 = vsel %vm1370_vm9, %v1471_v25, %v1472_v19  ;;  %v1474_v50 = vrot.slane %v6012_v21, 5  ;;  %v6037_v54 = vsel %vm1370_vm9, 0.0, %v1374_v37  ;;  %v1419_v36 = vrot.slane %v6000_v15, 2 }
 0x736   :  { %4950 = vrot.lane.b32.xlu1 %v4949_v29, %s5397_s10  ;;  %4945 = vrot.lane.b32.xlu0 %v4944_v43, %s5396_s28  ;;  %v1418_v56 = vrot.slane %v6037_v54, 2  ;;  %v1421_v58 = vrot.slane %v6003_v16, 2  ;;  %v1396_v61 = vrot.slane %v6037_v54, 1  ;;  %v4959_v63 = vpack.i.bf16 %v1439_v48, %v1437_v47 }
 0x737   :  { %v1475_v42 = vsel %vm1370_vm9, %v1472_v19, %v1474_v50  ;;  %v1397_v44 = vrot.slane %v6000_v15, 1  ;;  %v1399_v52 = vrot.slane %v6003_v16, 1  ;;  %v1440_v45 = vrot.slane %v6037_v54, 3 }
 0x738   :  { %v4954_v37 = vpack.i.bf16 %v1475_v42, %v1473_v49  ;;  %v1420_v5 = vsel %vm505_vm4, %v1418_v56, %v1419_v36  ;;  %v1422_v14 = vsel %vm505_vm4, %v1419_v36, %v1421_v58  ;;  %v1441_v30 = vrot.slane %v6000_v15, 3 }
 0x739   :  { %v1398_v24 = vsel %vm259_vm2, %v1396_v61, %v1397_v44  ;;  %v1400_v27 = vsel %vm259_vm2, %v1397_v44, %v1399_v52  ;;  %v1443_v31 = vrot.slane %v6003_v16, 3  ;;  %v1476_v32 = vrot.slane %v6037_v54, 5 }
 0x73a   :  { %4960 = vrot.lane.b32.xlu1 %v4959_v63, %s5398_s4  ;;  %4955 = vrot.lane.b32.xlu0 %v4954_v37, %s5396_s28  ;;  %v1477_v33 = vrot.slane %v6000_v15, 5  ;;  %v1479_v26 = vrot.slane %v6003_v16, 5  ;;  %v4969_v34 = vpack.i.bf16 %v1422_v14, %v1420_v5  ;;  %v4964_v46 = vpack.i.bf16 %v1400_v27, %v1398_v24 }
 0x73b   :  { %v1442_v62 = vsel %vm794_vm7, %v1440_v45, %v1441_v30  ;;  %v1444_v35 = vsel %vm794_vm7, %v1441_v30, %v1443_v31  ;;  %v1457_v48 = vrot.slane %v6009_v18, 4  ;;  %v1458_v56 = vrot.slane %v6006_v17, 4 }
 0x73c   :  { %v1478_v25 = vsel %vm1370_vm9, %v1476_v32, %v1477_v33  ;;  %v1480_v38 = vsel %vm1370_vm9, %v1477_v33, %v1479_v26  ;;  %v4979_v39 = vpack.i.bf16 %v1444_v35, %v1442_v62  ;;  %v1460_v36 = vrot.slane %v6012_v21, 4 }
 0x73d   :  { %v4974_v40 = vpack.i.bf16 %v1480_v38, %v1478_v25  ;;  %v1459_v24 = vsel %vm1117_vm8, %v1457_v48, %v1458_v56  ;;  %v1462_v62 = vrot.slane %v6037_v54, 4  ;;  %v1463_v38 = vrot.slane %v6000_v15, 4 }
 0x73e   :  { %4970 = vrot.lane.b32.xlu1 %v4969_v34, %s5397_s10  ;;  %4965 = vrot.lane.b32.xlu0 %v4964_v46, %s5396_s28  ;;  %v1461_v21 = vsel %vm1117_vm8, %v1458_v56, %v1460_v36 }
 0x73f   :  { %v1464_v56 = vsel %vm1117_vm8, %v1462_v62, %v1463_v38 }
 0x742   :  { %4980 = vrot.lane.b32.xlu1 %v4979_v39, %s5398_s4  ;;  %4975 = vrot.lane.b32.xlu0 %v4974_v40, %s5396_s28  ;;  %v1465_v39 = vrot.slane %v6003_v16, 4 }
 0x744   :  { %v1466_v36 = vsel %vm1117_vm8, %v1463_v38, %v1465_v39 }
 0x7a8   :  { %v4951_v19 = vpop.permute.xlu1 %4950  ;;  %v4946_v29 = vpop.permute.xlu0 %4945 }
 0x7a9   :  { %v4948_v43 = vunpack.i.h.bf16 %v4946_v29  ;;  %v4947_v47 = vunpack.i.l.bf16 %v4946_v29  ;;  %v4953_v49 = vunpack.i.h.bf16 %v4951_v19  ;;  %v4952_v50 = vunpack.i.l.bf16 %v4951_v19 }
 0x7ab   :  { %v1494_v58 = vsel %vm97_vm0, %v6006_v17, %v4948_v43  ;;  %v1493_v61 = vsel %vm97_vm0, %v6009_v18, %v4947_v47 }
 0x7ac   :  { %v4961_v63 = vpop.permute.xlu1 %4960  ;;  %v4956_v42 = vpop.permute.xlu0 %4955  ;;  %v1497_v14 = vsel %vm312_vm3, %v1493_v61, %v4952_v50  ;;  %v1498_v45 = vsel %vm312_vm3, %v1494_v58, %v4953_v49 }
 0x7ad   :  { %v4963_v44 = vunpack.i.h.bf16 %v4961_v63  ;;  %v4962_v52 = vunpack.i.l.bf16 %v4961_v63  ;;  %v4958_v37 = vunpack.i.h.bf16 %v4956_v42  ;;  %v4957_v5 = vunpack.i.l.bf16 %v4956_v42 }
 0x7af   :  { %v1501_v27 = vsel %vm574_vm5, %v1497_v14, %v4962_v52  ;;  %v1502_v17 = vsel %vm574_vm5, %v1498_v45, %v4963_v44  ;;  %v1506_v18 = vsel %vm97_vm0, %v1461_v21, %v4958_v37  ;;  %v1505_v30 = vsel %vm97_vm0, %v1459_v24, %v4957_v5  ;;  %v5216_v52 = vld [vmem:[%s7098_s7 + $0x38] sm:$0xff]   ;;  %v5217_v37 = vld [vmem:[%s7098_s7 + $0x30] sm:$0xff]   ;;  %v5218_v5 = vld [vmem:[%s7098_s7 + $0x28] sm:$0xff]  }
 0x7b0   :  { %v1509_v31 = vpack.c.bf16 %v1502_v17, %v1501_v27  ;;  %v1510_v32 = vpack.c.bf16 %v1506_v18, %v1505_v30  ;;  %v4971_v33 = vpop.permute.xlu1 %4970  ;;  %v4966_v26 = vpop.permute.xlu0 %4965  ;;  %2010 = vmatpush1.bf16.msra.mxu0 %v5216_v52  ;;  %v5219_v14 = vld [vmem:[%s7098_s7 + $0x20] sm:$0xff]   ;;  %v5220_v45 = vld [vmem:[%s7098_s7 + $0x18] sm:$0xff]   ;;  %v5221_v24 = vld [vmem:[%s7098_s7 + $0x10] sm:$0xff]  }
 0x7b1   :  { %v4968_v34 = vunpack.i.h.bf16 %v4966_v26  ;;  %v4967_v46 = vunpack.i.l.bf16 %v4966_v26  ;;  %v4973_v35 = vunpack.i.h.bf16 %v4971_v33  ;;  %v4972_v25 = vunpack.i.l.bf16 %v4971_v33  ;;  %2011 = vmatprep.subr.bf16.mxu0 %v5399_v1  ;;  %v5222_v21 = vld [vmem:[%s7098_s7 + $0x8] sm:$0xff]   ;;  %v5223_v27 = vld [vmem:[%s7098_s7] sm:$0xff]  }
 0x7b2   :  { %4413 = vmatprep.mubr.msk.bf16.mxu1 %vm312_vm3, %v1510_v32  ;;  %v5224_v17 = vld [vmem:[%s7098_s7 + $0x68] sm:$0xff]   ;;  %v5225_v18 = vld [vmem:[%s7098_s7 + $0x60] sm:$0xff]  }
 0x7b3   :  { %v1496_v40 = vsel %vm97_vm0, %v6000_v15, %v4968_v34  ;;  %v1495_v19 = vsel %vm97_vm0, %v6037_v54, %v4967_v46  ;;  %1624 = vmatmul.mubr.bf16.vlgmr.msra.gmra.mxu1 %v1509_v31  ;;  %v5226_v31 = vld [vmem:[%s7098_s7 + $0x58] sm:$0xff]   ;;  %v4415_v32 = vld [vmem:[%s7128_s23 + $0x5] ss:$0 sm:$0xff] }
 0x7b4   :  { %v4981_v29 = vpop.permute.xlu1 %4980  ;;  %v4976_v43 = vpop.permute.xlu0 %4975  ;;  %v1499_v58 = vsel %vm312_vm3, %v1495_v19, %v4972_v25  ;;  %v1500_v16 = vsel %vm312_vm3, %v1496_v40, %v4973_v35  ;;  %2012 = vmatpush1.bf16.msra.mxu0 %v5217_v37 }
 0x7b5   :  { %v4983_v47 = vunpack.i.h.bf16 %v4981_v29  ;;  %v4982_v48 = vunpack.i.l.bf16 %v4981_v29  ;;  %v4978_v49 = vunpack.i.h.bf16 %v4976_v43  ;;  %v4977_v50 = vunpack.i.l.bf16 %v4976_v43  ;;  %2013 = vmatprep.subr.bf16.mxu0 %v5399_v1 }
 0x7b7   :  { %v1508_v15 = vsel %vm97_vm0, %v1466_v36, %v4978_v49  ;;  %v1507_v61 = vsel %vm97_vm0, %v1464_v56, %v4977_v50  ;;  %v1503_v54 = vsel %vm574_vm5, %v1499_v58, %v4982_v48  ;;  %v1504_v63 = vsel %vm574_vm5, %v1500_v16, %v4983_v47 }
 0x7b8   :  { %v1512_v42 = vpack.c.bf16 %v1508_v15, %v1507_v61  ;;  %v1511_v44 = vpack.c.bf16 %v1504_v63, %v1503_v54  ;;  %2014 = vmatpush1.bf16.msra.mxu0 %v5218_v5 }
 0x7b9   :  { %2015 = vmatprep.subr.bf16.mxu0 %v5399_v1 }
 0x7ba   :  { %4414 = vmatprep.mubr.msk.bf16.mxu1 %vm312_vm3, %v1512_v42 }
 0x7bb   :  { %1632 = vmatmul.mubr.bf16.gmra.mxu1 %v1511_v44 }
 0x7bc   :  { %2016 = vmatpush1.bf16.msra.mxu0 %v5219_v14 }
 0x7bd   :  { %2017 = vmatprep.subr.bf16.mxu0 %v5399_v1 }
 0x7c0   :  { %2018 = vmatpush1.bf16.msra.mxu0 %v5220_v45 }
 0x7c1   :  { %2019 = vmatprep.subr.bf16.mxu0 %v5399_v1 }
 0x7c4   :  { %2020 = vmatpush1.bf16.msra.mxu0 %v5221_v24 }
 0x7c5   :  { %2021 = vmatprep.subr.bf16.mxu0 %v5399_v1 }
 0x7c8   :  { %2022 = vmatpush1.bf16.msra.mxu0 %v5222_v21 }
 0x7c9   :  { %2023 = vmatprep.subr.bf16.mxu0 %v5399_v1 }
 0x7cc   :  { %2024 = vmatpush1.bf16.msra.mxu0 %v5223_v27 }
 0x7cd   :  { %2029 = vmatprep.subr.bf16.mxu0 %v5399_v1 }
 0x7d0   :  { %2030 = vmatpush2.bf16.msra.mxu0 %v5224_v17 }
 0x7d1   :  { %2031 = vmatprep.subr.bf16.mxu0 %v5399_v1 }
 0x7d4   :  { %2032 = vmatpush2.bf16.msra.mxu0 %v5225_v18 }
 0x7d5   :  { %2033 = vmatprep.subr.bf16.mxu0 %v5399_v1 }
 0x7d8   :  { %2034 = vmatpush2.bf16.msra.mxu0 %v5226_v31 }
 0x7d9   :  { %2035 = vmatprep.subr.bf16.mxu0 %v5399_v1 }
 0x873   :  { %v1625_v30 = vpop.f32.mrf.mxu1 }
 0x874   :  { %v1646_v34 = vadd.f32 %v4415_v32, %v1625_v30 }
 0x875   :  { %v1627_v33 = vpop.f32.mrf.mxu1 }
 0x876   :  { %v1663_v38 = vmul.f32 %v1646_v34, %v1646_v34  ;;  %v1650_v29 = vsel %vm97_vm0, %v1646_v34, 0.0 }
 0x877   :  { %v1628_v26 = vpop.f32.mrf.mxu1 }
 0x878   :  { %v1647_v46 = vadd.f32 %v4415_v32, %v1628_v26  ;;  %v1667_v56 = vsel %vm97_vm0, %v1663_v38, 0.0 }
 0x879   :  { %v1630_v62 = vpop.f32.mrf.mxu1 }
 0x87a   :  { %v1664_v35 = vmul.f32 %v1647_v46, %v1647_v46  ;;  %v1651_v39 = vsel %vm97_vm0, %v1647_v46, 0.0 }
 0x87b   :  { %v1633_v25 = vpop.f32.mrf.mxu1  ;;  %v1652_v49 = vadd.f32 %v1651_v39, %v1650_v29  ;;  %v4399_v39 = vld [vmem:[%s7129_s3 + $0x5] sm:$0x1] }
 0x87c   :  { %v1648_v40 = vadd.f32 %v4415_v32, %v1633_v25  ;;  %v1668_v43 = vsel %vm97_vm0, %v1664_v35, 0.0 }
 0x87d   :  { %v1635_v19 = vpop.f32.mrf.mxu1  ;;  %v1669_v16 = vadd.f32 %v1668_v43, %v1667_v56  ;;  %v4400_v43 = vld [vmem:[%s7130_s2 + $0x5] sm:$0x1] }
 0x87e   :  { %v1653_v47 = vsel %vm97_vm0, %v1648_v40, 0.0  ;;  %v1665_v48 = vmul.f32 %v1648_v40, %v1648_v40 }
 0x87f   :  { %v1636_v50 = vpop.f32.mrf.mxu1  ;;  %v1654_v15 = vadd.f32 %v1653_v47, %v1652_v49 }
 0x880   :  { %v1670_v36 = vsel %vm97_vm0, %v1665_v48, 0.0  ;;  %v1649_v58 = vadd.f32 %v4415_v32, %v1636_v50 }
 0x881   :  { %v1638_v61 = vpop.f32.mrf.mxu1  ;;  %v1671_v42 = vadd.f32 %v1670_v36, %v1669_v16 }
 0x882   :  { %v1655_v54 = vsel %vm97_vm0, %v1649_v58, 0.0  ;;  %v1666_v63 = vmul.f32 %v1649_v58, %v1649_v58 }
 0x883   :  { %v1656_v44 = vadd.f32 %v1655_v54, %v1654_v15 }
 0x884   :  { %v1672_v52 = vsel %vm97_vm0, %v1666_v63, 0.0 }
 0x885   :  { %v1657_v37 = vrot.slane %v1656_v44, 4  ;;  %v1673_v5 = vadd.f32 %v1672_v52, %v1671_v42 }
 0x887   :  { %v1658_v14 = vadd.f32 %v1657_v37, %v1656_v44  ;;  %v1674_v45 = vrot.slane %v1673_v5, 4 }
 0x889   :  { %v1659_v24 = vrot.slane %v1658_v14, 2  ;;  %v1675_v21 = vadd.f32 %v1674_v45, %v1673_v5 }
 0x88b   :  { %v1660_v27 = vadd.f32 %v1659_v24, %v1658_v14  ;;  %v1676_v17 = vrot.slane %v1675_v21, 2  ;;  %v5227_v14 = vld [vmem:[%s7098_s7 + $0x50] sm:$0xff]  }
 0x88c   :  { %2036 = vmatpush2.bf16.msra.mxu0 %v5227_v14 }
 0x88d   :  { %v1661_v18 = vrot.slane %v1660_v27, 1  ;;  %v1677_v30 = vadd.f32 %v1676_v17, %v1675_v21  ;;  %2037 = vmatprep.subr.bf16.mxu0 %v5399_v1 }
 0x88f   :  { %v1662_v31 = vadd.f32 %v1661_v18, %v1660_v27  ;;  %v1678_v32 = vrot.slane %v1677_v30, 1 }
 0x891   :  { %v1679_v33 = vadd.f32 %v1678_v32, %v1677_v30  ;;  %v1680_v26 = vmul.f32 0.03125, %v1662_v31 }
 0x893   :  { %v1681_v62 = vmul.f32 0.03125, %v1679_v33  ;;  %v1682_v35 = vmul.f32 %v1680_v26, %v1680_v26 }
 0x895   :  { %v1683_v25 = vsub.f32 %v1681_v62, %v1682_v35 }
 0x897   :  { %v1684_v38 = vadd.f32 1e-05, %v1683_v25 }
 0x899   :  { %5318 = vrsqrt.f32 %v1684_v38 }
 0x8a6   :  { %v5319_v19 = vpop.eup %5318 }
 0x8a7   :  { %v1686_v29 = vmul.f32 %v5319_v19, %v4399_v39 }
 0x8a9   :  { %v1687_v47 = vmul.f32 %v1686_v29, %v1680_v26  ;;  %v1693_v48 = vrot.slane %v1686_v29, %v5556_v57  ;;  %v5228_v26 = vld [vmem:[%s7098_s7 + $0x48] sm:$0xff]  }
 0x8aa   :  { %2038 = vmatpush2.bf16.msra.mxu0 %v5228_v26 }
 0x8ab   :  { %v1688_v49 = vsub.f32 %v4400_v43, %v1687_v47  ;;  %v1695_v50 = vmul.f32 %v1693_v48, %v1646_v34  ;;  %v1696_v56 = vmul.f32 %v1693_v48, %v1647_v46  ;;  %v1697_v36 = vmul.f32 %v1693_v48, %v1648_v40  ;;  %2039 = vmatprep.subr.bf16.mxu0 %v5399_v1 }
 0x8ac   :  { %v1698_v16 = vmul.f32 %v1693_v48, %v1649_v58 }
 0x8ad   :  { %v1703_v15 = vrot.slane %v1688_v49, %v5556_v57 }
 0x8af   :  { %v1705_v61 = vadd.f32 %v1703_v15, %v1695_v50  ;;  %v1707_v54 = vadd.f32 %v1703_v15, %v1697_v36  ;;  %v1708_v63 = vadd.f32 %v1703_v15, %v1698_v16  ;;  %v1706_v42 = vadd.f32 %v1703_v15, %v1696_v56 }
 0x8b1   :  { %v1709_v44 = vmax.f32 %v1705_v61, 0.0  ;;  %v1711_v52 = vmax.f32 %v1707_v54, 0.0  ;;  %v1712_v37 = vmax.f32 %v1708_v63, 0.0  ;;  %v1710_v5 = vmax.f32 %v1706_v42, 0.0  ;;  %v5229_v61 = vld [vmem:[%s7098_s7 + $0x40] sm:$0xff]  }
 0x8b2   :  { %2040 = vmatpush2.bf16.msra.mxu0 %v5229_v61 }
 0x8b3   :  { %v1754_v45 = vrot.slane %v1711_v52, 5  ;;  %v1755_v24 = vrot.slane %v1712_v37, 5  ;;  %v1751_v34 = vrot.slane %v1709_v44, 5  ;;  %v1752_v46 = vrot.slane %v1710_v5, 5 }
 0x8b4   :  { %v6167_v40 = vpack.i.bf16 %v1710_v5, %v1709_v44  ;;  %v6169_v58 = vpack.i.bf16 %v1712_v37, %v1711_v52 }
 0x8b5   :  { %v6172_v21 = vsel %vm1370_vm9, %v1754_v45, %v1755_v24  ;;  %v6175_v27 = vsel %vm1370_vm9, 0.0, %v1754_v45  ;;  %v6178_v17 = vsel %vm1370_vm9, %v1755_v24, 0.0  ;;  %v6181_v18 = vsel %vm1370_vm9, %v1751_v34, %v1752_v46 }
 0x8b6   :  { %v6184_v30 = vsel %vm1370_vm9, 0.0, %v1751_v34  ;;  %v6187_v31 = vsel %vm1370_vm9, %v1752_v46, 0.0  ;;  %v1852_v32 = vrot.slane %v6181_v18, 5  ;;  %v1772_v33 = vrot.slane %v6181_v18, 1 }
 0x8b7   :  { %v1851_v62 = vrot.slane %v6184_v30, 5  ;;  %v1854_v35 = vrot.slane %v6187_v31, 5  ;;  %v1771_v25 = vrot.slane %v6184_v30, 1  ;;  %v1774_v38 = vrot.slane %v6187_v31, 1 }
 0x8b8   :  { %v1873_v39 = vrot.slane %v6184_v30, 6  ;;  %v1874_v19 = vrot.slane %v6181_v18, 6  ;;  %v1876_v29 = vrot.slane %v6187_v31, 6  ;;  %v1793_v43 = vrot.slane %v6184_v30, 2 }
 0x8b9   :  { %v1853_v47 = vsel %vm1370_vm9, %v1851_v62, %v1852_v32  ;;  %v1855_v48 = vsel %vm1370_vm9, %v1852_v32, %v1854_v35  ;;  %v1773_v49 = vsel %vm259_vm2, %v1771_v25, %v1772_v33  ;;  %v1775_v50 = vsel %vm259_vm2, %v1772_v33, %v1774_v38 }
 0x8ba   :  { %v4989_v56 = vpack.i.bf16 %v1855_v48, %v1853_v47  ;;  %v4984_v36 = vpack.i.bf16 %v1775_v50, %v1773_v49  ;;  %v1875_v16 = vsel %vm729_vm6, %v1873_v39, %v1874_v19  ;;  %v1877_v15 = vsel %vm729_vm6, %v1874_v19, %v1876_v29 }
 0x8bb   :  { %v4999_v54 = vpack.i.bf16 %v1877_v15, %v1875_v16  ;;  %v1794_v63 = vrot.slane %v6181_v18, 2  ;;  %v1796_v42 = vrot.slane %v6187_v31, 2  ;;  %v1776_v44 = vrot.slane %v6175_v27, 1 }
 0x8bc   :  { %4990 = vrot.lane.b32.xlu1 %v4989_v56, %s5396_s28  ;;  %4985 = vrot.lane.b32.xlu0 %v4984_v36, %s5396_s28  ;;  %v1777_v1 = vrot.slane %v6172_v21, 1  ;;  %v1779_v52 = vrot.slane %v6178_v17, 1  ;;  %v1815_v37 = vrot.slane %v6184_v30, 3  ;;  %v1816_v5 = vrot.slane %v6181_v18, 3 }
 0x8bd   :  { %v1795_v14 = vsel %vm505_vm4, %v1793_v43, %v1794_v63  ;;  %v1797_v45 = vsel %vm505_vm4, %v1794_v63, %v1796_v42  ;;  %v1818_v24 = vrot.slane %v6187_v31, 3  ;;  %v1798_v34 = vrot.slane %v6175_v27, 2 }
 0x8be   :  { %v4994_v46 = vpack.i.bf16 %v1797_v45, %v1795_v14  ;;  %v1778_v32 = vsel %vm259_vm2, %v1776_v44, %v1777_v1  ;;  %v1780_v33 = vsel %vm259_vm2, %v1777_v1, %v1779_v52  ;;  %v1817_v26 = vsel %vm794_vm7, %v1815_v37, %v1816_v5 }
 0x8bf   :  { %v1819_v62 = vsel %vm794_vm7, %v1816_v5, %v1818_v24  ;;  %v1799_v35 = vrot.slane %v6172_v21, 2  ;;  %v1801_v25 = vrot.slane %v6178_v17, 2  ;;  %v1856_v38 = vrot.slane %v6175_v27, 5 }
 0x8c0   :  { %5000 = vrot.lane.b32.xlu1 %v4999_v54, %s5397_s10  ;;  %4995 = vrot.lane.b32.xlu0 %v4994_v46, %s5397_s10  ;;  %v1857_v39 = vrot.slane %v6172_v21, 5  ;;  %v1859_v19 = vrot.slane %v6178_v17, 5  ;;  %v5009_v29 = vpack.i.bf16 %v1780_v33, %v1778_v32  ;;  %v5004_v43 = vpack.i.bf16 %v1819_v62, %v1817_v26 }
 0x8c1   :  { %v1800_v47 = vsel %vm505_vm4, %v1798_v34, %v1799_v35  ;;  %v1802_v48 = vsel %vm505_vm4, %v1799_v35, %v1801_v25  ;;  %v1820_v50 = vrot.slane %v6175_v27, 3  ;;  %v1821_v56 = vrot.slane %v6172_v21, 3 }
 0x8c2   :  { %v1858_v49 = vsel %vm1370_vm9, %v1856_v38, %v1857_v39  ;;  %v1860_v36 = vsel %vm1370_vm9, %v1857_v39, %v1859_v19  ;;  %v1823_v16 = vrot.slane %v6178_v17, 3  ;;  %v1878_v15 = vrot.slane %v6175_v27, 6 }
 0x8c3   :  { %v1879_v61 = vrot.slane %v6172_v21, 6  ;;  %v1881_v54 = vrot.slane %v6178_v17, 6  ;;  %v5019_v63 = vpack.i.bf16 %v1802_v48, %v1800_v47  ;;  %v5014_v42 = vpack.i.bf16 %v1860_v36, %v1858_v49 }
 0x8c4   :  { %5010 = vrot.lane.b32.xlu1 %v5009_v29, %s5396_s28  ;;  %5005 = vrot.lane.b32.xlu0 %v5004_v43, %s5398_s4  ;;  %v1822_v44 = vsel %vm794_vm7, %v1820_v50, %v1821_v56  ;;  %v1824_v1 = vsel %vm794_vm7, %v1821_v56, %v1823_v16  ;;  %v1837_v45 = vrot.slane %v6184_v30, 4  ;;  %v1840_v24 = vrot.slane %v6187_v31, 4 }
 0x8c5   :  { %v1880_v52 = vsel %vm729_vm6, %v1878_v15, %v1879_v61  ;;  %v1882_v37 = vsel %vm729_vm6, %v1879_v61, %v1881_v54  ;;  %v5029_v5 = vpack.i.bf16 %v1824_v1, %v1822_v44  ;;  %v1838_v46 = vrot.slane %v6181_v18, 4 }
 0x8c6   :  { %v5024_v14 = vpack.i.bf16 %v1882_v37, %v1880_v52 }
 0x8c7   :  { %v1839_v62 = vsel %vm1117_vm8, %v1837_v45, %v1838_v46  ;;  %v1841_v35 = vsel %vm1117_vm8, %v1838_v46, %v1840_v24 }
 0x8c8   :  { %5020 = vrot.lane.b32.xlu1 %v5019_v63, %s5397_s10  ;;  %5015 = vrot.lane.b32.xlu0 %v5014_v42, %s5396_s28 }
 0x8cc   :  { %5030 = vrot.lane.b32.xlu1 %v5029_v5, %s5398_s4  ;;  %5025 = vrot.lane.b32.xlu0 %v5024_v14, %s5397_s10  ;;  %v1842_v5 = vrot.slane %v6175_v27, 4  ;;  %v1843_v14 = vrot.slane %v6172_v21, 4 }
 0x92e   :  { %v4991_v34 = vpop.permute.xlu1 %4990  ;;  %v4986_v32 = vpop.permute.xlu0 %4985 }
 0x92f   :  { %v4993_v33 = vunpack.i.h.bf16 %v4991_v34  ;;  %v4992_v26 = vunpack.i.l.bf16 %v4991_v34  ;;  %v4988_v39 = vunpack.i.h.bf16 %v4986_v32  ;;  %v4987_v19 = vunpack.i.l.bf16 %v4986_v32 }
 0x930   :  { %v1845_v34 = vrot.slane %v6178_v17, 4 }
 0x931   :  { %v1907_v47 = vsel %vm97_vm0, %v1839_v62, %v4992_v26  ;;  %v1908_v31 = vsel %vm97_vm0, %v1841_v35, %v4993_v33  ;;  %v1896_v61 = vsel %vm97_vm0, %v6181_v18, %v4988_v39  ;;  %v1895_v54 = vsel %vm97_vm0, %v6184_v30, %v4987_v19 }
 0x932   :  { %v5001_v25 = vpop.permute.xlu1 %5000  ;;  %v4996_v38 = vpop.permute.xlu0 %4995  ;;  %v1846_v39 = vsel %vm1117_vm8, %v1843_v14, %v1845_v34 }
 0x933   :  { %v5003_v29 = vunpack.i.h.bf16 %v5001_v25  ;;  %v5002_v43 = vunpack.i.l.bf16 %v5001_v25  ;;  %v4998_v48 = vunpack.i.h.bf16 %v4996_v38  ;;  %v4997_v49 = vunpack.i.l.bf16 %v4996_v38 }
 0x934   :  { %v1844_v38 = vsel %vm1117_vm8, %v1842_v5, %v1843_v14  ;;  %v5237_v14 = vld [vmem:[%s7099_s8 + $0x20] sm:$0xff]  }
 0x935   :  { %v1911_v50 = vsel %vm312_vm3, %v1907_v47, %v5002_v43  ;;  %v1912_v56 = vsel %vm312_vm3, %v1908_v31, %v5003_v29  ;;  %v1899_v44 = vsel %vm312_vm3, %v1895_v54, %v4997_v49  ;;  %v1900_v1 = vsel %vm312_vm3, %v1896_v61, %v4998_v48  ;;  %v5230_v54 = vld [vmem:[%s7099_s8 + $0x78] sm:$0xff]  }
 0x936   :  { %v1916_v36 = vpack.c.bf16 %v1912_v56, %v1911_v50  ;;  %v5011_v16 = vpop.permute.xlu1 %5010  ;;  %v5006_v15 = vpop.permute.xlu0 %5005  ;;  %4609 = vmatprep.subr.bf16.mxu1 %v5230_v54 }
 0x937   :  { %v5008_v63 = vunpack.i.h.bf16 %v5006_v15  ;;  %v5007_v42 = vunpack.i.l.bf16 %v5006_v15  ;;  %v5013_v18 = vunpack.i.h.bf16 %v5011_v16  ;;  %v5012_v45 = vunpack.i.l.bf16 %v5011_v16 }
 0x938   :  { %4433 = vmatprep.mubr.msk.bf16.mxu0 %vm574_vm5, %v1916_v36 }
 0x939   :  { %v1903_v52 = vsel %vm574_vm5, %v1899_v44, %v5007_v42  ;;  %v1904_v37 = vsel %vm574_vm5, %v1900_v1, %v5008_v63  ;;  %v1898_v35 = vsel %vm97_vm0, %v6172_v21, %v5013_v18  ;;  %v1897_v25 = vsel %vm97_vm0, %v6175_v27, %v5012_v45  ;;  %v5231_v63 = vld [vmem:[%s7099_s8 + $0x38] sm:$0xff]   ;;  %v5232_v42 = vld [vmem:[%s7099_s8 + $0x70] sm:$0xff]   ;;  %v5234_v1 = vld [vmem:[%s7099_s8 + $0x68] sm:$0xff]  }
 0x93a   :  { %v1915_v24 = vpack.c.bf16 %v1904_v37, %v1903_v52  ;;  %v5021_v30 = vpop.permute.xlu1 %5020  ;;  %v5016_v46 = vpop.permute.xlu0 %5015  ;;  %4610 = vmatpush3.bf16.msra.mxu1 %v5231_v63  ;;  %v5233_v44 = vld [vmem:[%s7099_s8 + $0x30] sm:$0xff]   ;;  %v5235_v52 = vld [vmem:[%s7099_s8 + $0x28] sm:$0xff]   ;;  %v5236_v37 = vld [vmem:[%s7099_s8 + $0x60] sm:$0xff]  }
 0x93b   :  { %v5023_v32 = vunpack.i.h.bf16 %v5021_v30  ;;  %v5022_v33 = vunpack.i.l.bf16 %v5021_v30  ;;  %v5018_v26 = vunpack.i.h.bf16 %v5016_v46  ;;  %v5017_v62 = vunpack.i.l.bf16 %v5016_v46  ;;  %4611 = vmatprep.subr.bf16.mxu1 %v5232_v42  ;;  %v4435_v18 = vld [vmem:[%s7128_s23 + $0x6] ss:$0 sm:$0xff] }
 0x93c   :  { %2042 = vmatmul.mubr.bf16.vlgmr.msra.gmra.mxu0 %v1915_v24  ;;  %v5238_v24 = vld [vmem:[%s7099_s8 + $0x58] sm:$0xff]  }
 0x93d   :  { %v1901_v48 = vsel %vm312_vm3, %v1897_v25, %v5022_v33  ;;  %v1902_v49 = vsel %vm312_vm3, %v1898_v35, %v5023_v32  ;;  %v1910_v50 = vsel %vm97_vm0, %v1846_v39, %v5018_v26  ;;  %v1909_v21 = vsel %vm97_vm0, %v1844_v38, %v5017_v62  ;;  %v5239_v33 = vld [vmem:[%s7099_s8 + $0x18] sm:$0xff]  }
 0x93e   :  { %v5031_v19 = vpop.permute.xlu1 %5030  ;;  %v5026_v29 = vpop.permute.xlu0 %5025  ;;  %4612 = vmatpush3.bf16.msra.mxu1 %v5233_v44 }
 0x93f   :  { %v5033_v43 = vunpack.i.h.bf16 %v5031_v19  ;;  %v5032_v17 = vunpack.i.l.bf16 %v5031_v19  ;;  %v5028_v47 = vunpack.i.h.bf16 %v5026_v29  ;;  %v5027_v31 = vunpack.i.l.bf16 %v5026_v29  ;;  %4613 = vmatprep.subr.bf16.mxu1 %v5234_v1 }
 0x941   :  { %v1913_v27 = vsel %vm312_vm3, %v1909_v21, %v5027_v31  ;;  %v1914_v56 = vsel %vm312_vm3, %v1910_v50, %v5028_v47  ;;  %v1905_v36 = vsel %vm574_vm5, %v1901_v48, %v5032_v17  ;;  %v1906_v16 = vsel %vm574_vm5, %v1902_v49, %v5033_v43 }
 0x942   :  { %v1918_v15 = vpack.c.bf16 %v1914_v56, %v1913_v27  ;;  %v1917_v61 = vpack.c.bf16 %v1906_v16, %v1905_v36  ;;  %4614 = vmatpush3.bf16.msra.mxu1 %v5235_v52 }
 0x943   :  { %4615 = vmatprep.subr.bf16.mxu1 %v5236_v37 }
 0x944   :  { %4434 = vmatprep.mubr.msk.bf16.mxu0 %vm574_vm5, %v1918_v15 }
 0x945   :  { %2050 = vmatmul.mubr.bf16.gmra.mxu0 %v1917_v61 }
 0x946   :  { %4616 = vmatpush3.bf16.msra.mxu1 %v5237_v14 }
 0x947   :  { %4617 = vmatprep.subr.bf16.mxu1 %v5238_v24 }
 0x94a   :  { %4618 = vmatpush3.bf16.msra.mxu1 %v5239_v33 }
 0x9fc   :  { %v2043_v5 = vpop.f32.mrf.mxu0 }
 0x9fd   :  { %v2064_v46 = vadd.f32 %v4435_v18, %v2043_v5 }
 0x9fe   :  { %v2045_v45 = vpop.f32.mrf.mxu0 }
 0x9ff   :  { %v2081_v35 = vmul.f32 %v2064_v46, %v2064_v46  ;;  %v2068_v19 = vsel %vm97_vm0, %v2064_v46, 0.0 }
 0xa00   :  { %v2046_v30 = vpop.f32.mrf.mxu0 }
 0xa01   :  { %v2065_v34 = vadd.f32 %v4435_v18, %v2046_v30  ;;  %v2085_v48 = vsel %vm97_vm0, %v2081_v35, 0.0 }
 0xa02   :  { %v2048_v32 = vpop.f32.mrf.mxu0 }
 0xa03   :  { %v2082_v26 = vmul.f32 %v2065_v34, %v2065_v34  ;;  %v2069_v25 = vsel %vm97_vm0, %v2065_v34, 0.0 }
 0xa04   :  { %v2070_v47 = vadd.f32 %v2069_v25, %v2068_v19 }
 0xa05   :  { %v2051_v62 = vpop.f32.mrf.mxu0  ;;  %v2086_v29 = vsel %vm97_vm0, %v2082_v26, 0.0 }
 0xa06   :  { %v2066_v38 = vadd.f32 %v4435_v18, %v2051_v62  ;;  %v2087_v21 = vadd.f32 %v2086_v29, %v2085_v48 }
 0xa07   :  { %v2053_v39 = vpop.f32.mrf.mxu0 }
 0xa08   :  { %v2071_v43 = vsel %vm97_vm0, %v2066_v38, 0.0  ;;  %v2083_v17 = vmul.f32 %v2066_v38, %v2066_v38  ;;  %v4417_v39 = vld [vmem:[%s7129_s3 + $0x6] sm:$0x1] }
 0xa09   :  { %v2054_v31 = vpop.f32.mrf.mxu0  ;;  %v2072_v27 = vadd.f32 %v2071_v43, %v2070_v47  ;;  %v4418_v43 = vld [vmem:[%s7130_s2 + $0x6] sm:$0x1] }
 0xa0a   :  { %v2088_v49 = vsel %vm97_vm0, %v2083_v17, 0.0  ;;  %v2067_v50 = vadd.f32 %v4435_v18, %v2054_v31 }
 0xa0b   :  { %v2056_v56 = vpop.f32.mrf.mxu0  ;;  %v2089_v15 = vadd.f32 %v2088_v49, %v2087_v21 }
 0xa0c   :  { %v2073_v36 = vsel %vm97_vm0, %v2067_v50, 0.0  ;;  %v2084_v16 = vmul.f32 %v2067_v50, %v2067_v50 }
 0xa0d   :  { %v2074_v61 = vadd.f32 %v2073_v36, %v2072_v27 }
 0xa0e   :  { %v2090_v54 = vsel %vm97_vm0, %v2084_v16, 0.0 }
 0xa0f   :  { %v2075_v63 = vrot.slane %v2074_v61, 4  ;;  %v2091_v42 = vadd.f32 %v2090_v54, %v2089_v15 }
 0xa11   :  { %v2076_v44 = vadd.f32 %v2075_v63, %v2074_v61  ;;  %v2092_v1 = vrot.slane %v2091_v42, 4 }
 0xa13   :  { %v2077_v52 = vrot.slane %v2076_v44, 2  ;;  %v2093_v37 = vadd.f32 %v2092_v1, %v2091_v42 }
 0xa15   :  { %v2078_v5 = vadd.f32 %v2077_v52, %v2076_v44  ;;  %v2094_v14 = vrot.slane %v2093_v37, 2 }
 0xa17   :  { %v2079_v45 = vrot.slane %v2078_v5, 1  ;;  %v2095_v18 = vadd.f32 %v2094_v14, %v2093_v37 }
 0xa19   :  { %v2080_v24 = vadd.f32 %v2079_v45, %v2078_v5  ;;  %v2096_v30 = vrot.slane %v2095_v18, 1 }
 0xa1b   :  { %v2097_v32 = vadd.f32 %v2096_v30, %v2095_v18  ;;  %v2098_v33 = vmul.f32 0.03125, %v2080_v24  ;;  %v5242_v24 = vld [vmem:[%s7099_s8 + $0x48] sm:$0xff]  }
 0xa1c   :  { %v5243_v30 = vld [vmem:[%s7099_s8 + $0x8] sm:$0xff]  }
 0xa1d   :  { %v2099_v26 = vmul.f32 0.03125, %v2097_v32  ;;  %v2100_v62 = vmul.f32 %v2098_v33, %v2098_v33 }
 0xa1f   :  { %v2101_v35 = vsub.f32 %v2099_v26, %v2100_v62 }
 0xa21   :  { %v2102_v25 = vadd.f32 1e-05, %v2101_v35 }
 0xa23   :  { %5320 = vrsqrt.f32 %v2102_v25 }
 0xa30   :  { %v5321_v19 = vpop.eup %5320 }
 0xa31   :  { %v2104_v29 = vmul.f32 %v5321_v19, %v4417_v39 }
 0xa33   :  { %v2105_v17 = vmul.f32 %v2104_v29, %v2098_v33  ;;  %v2111_v47 = vrot.slane %v2104_v29, %v5556_v57 }
 0xa35   :  { %v2106_v31 = vsub.f32 %v4418_v43, %v2105_v17  ;;  %v2113_v48 = vmul.f32 %v2111_v47, %v2064_v46  ;;  %v2114_v49 = vmul.f32 %v2111_v47, %v2065_v34  ;;  %v2115_v21 = vmul.f32 %v2111_v47, %v2066_v38  ;;  %v5240_v34 = vld [vmem:[%s7099_s8 + $0x50] sm:$0xff]  }
 0xa36   :  { %v2116_v27 = vmul.f32 %v2111_v47, %v2067_v50  ;;  %v5241_v46 = vld [vmem:[%s7099_s8 + $0x10] sm:$0xff]   ;;  %4619 = vmatprep.subr.bf16.mxu1 %v5240_v34 }
 0xa37   :  { %v2121_v56 = vrot.slane %v2106_v31, %v5556_v57  ;;  %4620 = vmatpush3.bf16.msra.mxu1 %v5241_v46 }
 0xa38   :  { %4621 = vmatprep.subr.bf16.mxu1 %v5242_v24 }
 0xa39   :  { %v6341_v36 = vadd.f32 %v2121_v56, %v2113_v48  ;;  %v6343_v16 = vadd.f32 %v2121_v56, %v2114_v49  ;;  %v2125_v15 = vadd.f32 %v2121_v56, %v2115_v21  ;;  %v2126_v61 = vadd.f32 %v2121_v56, %v2116_v27 }
 0xa3b   :  { %v2127_v54 = vmax.f32 %v6341_v36, 0.0  ;;  %v2128_v63 = vmax.f32 %v6343_v16, 0.0  ;;  %v2129_v42 = vmax.f32 %v2125_v15, 0.0  ;;  %v2130_v44 = vmax.f32 %v2126_v61, 0.0  ;;  %4622 = vmatpush3.bf16.msra.mxu1 %v5243_v30 }
 0xa3d   :  { %v2173_v38 = vrot.slane %v2127_v54, 4  ;;  %v2176_v50 = vrot.slane %v2129_v42, 4  ;;  %v2177_v1 = vrot.slane %v2130_v44, 4  ;;  %v2174_v52 = vrot.slane %v2128_v63, 4 }
 0xa3e   :  { %v6357_v37 = vpack.i.bf16 %v2130_v44, %v2129_v42  ;;  %v5244_v42 = vld [vmem:[%s7099_s8 + $0x40] sm:$0xff]  }
 0xa3f   :  { %v6360_v5 = vsel %vm1117_vm8, %v2176_v50, %v2177_v1  ;;  %v6363_v14 = vsel %vm1117_vm8, 0.0, %v2176_v50  ;;  %v6366_v45 = vsel %vm1117_vm8, %v2177_v1, 0.0  ;;  %v6369_v18 = vsel %vm1117_vm8, %v2173_v38, %v2174_v52  ;;  %v5245_v44 = vld [vmem:[%s7099_s8] sm:$0xff]   ;;  %4623 = vmatprep.subr.bf16.mxu1 %v5244_v42 }
 0xa40   :  { %v6378_v32 = vsel %vm1117_vm8, 0.0, %v2173_v38  ;;  %v6381_v33 = vsel %vm1117_vm8, %v2174_v52, 0.0  ;;  %v2274_v26 = vrot.slane %v6369_v18, 5  ;;  %v2194_v62 = vrot.slane %v6369_v18, 1  ;;  %4624 = vmatpush3.bf16.msra.mxu1 %v5245_v44 }
 0xa41   :  { %v2273_v35 = vrot.slane %v6378_v32, 5  ;;  %v2276_v25 = vrot.slane %v6381_v33, 5  ;;  %v2193_v39 = vrot.slane %v6378_v32, 1  ;;  %v2196_v19 = vrot.slane %v6381_v33, 1 }
 0xa42   :  { %v2295_v29 = vrot.slane %v6378_v32, 6  ;;  %v2296_v43 = vrot.slane %v6369_v18, 6  ;;  %v2298_v17 = vrot.slane %v6381_v33, 6  ;;  %v2215_v47 = vrot.slane %v6378_v32, 2 }
 0xa43   :  { %v2275_v31 = vsel %vm1370_vm9, %v2273_v35, %v2274_v26  ;;  %v2277_v48 = vsel %vm1370_vm9, %v2274_v26, %v2276_v25  ;;  %v2195_v49 = vsel %vm259_vm2, %v2193_v39, %v2194_v62  ;;  %v2197_v21 = vsel %vm259_vm2, %v2194_v62, %v2196_v19 }
 0xa44   :  { %v5034_v27 = vpack.i.bf16 %v2277_v48, %v2275_v31  ;;  %v5039_v56 = vpack.i.bf16 %v2197_v21, %v2195_v49  ;;  %v2297_v15 = vsel %vm729_vm6, %v2295_v29, %v2296_v43  ;;  %v2299_v61 = vsel %vm729_vm6, %v2296_v43, %v2298_v17 }
 0xa45   :  { %v5044_v34 = vpack.i.bf16 %v2299_v61, %v2297_v15  ;;  %v2216_v46 = vrot.slane %v6369_v18, 2  ;;  %v2218_v38 = vrot.slane %v6381_v33, 2  ;;  %v2317_v50 = vrot.slane %v6378_v32, 7 }
 0xa46   :  { %5035 = vrot.lane.b32.xlu0 %v5034_v27, %s5396_s28  ;;  %5040 = vrot.lane.b32.xlu1 %v5039_v56, %s5396_s28  ;;  %v2318_v1 = vrot.slane %v6369_v18, 7  ;;  %v2320_v52 = vrot.slane %v6381_v33, 7  ;;  %v2237_v24 = vrot.slane %v6378_v32, 3  ;;  %v2238_v30 = vrot.slane %v6369_v18, 3 }
 0xa47   :  { %v2217_v26 = vsel %vm505_vm4, %v2215_v47, %v2216_v46  ;;  %v2219_v62 = vsel %vm505_vm4, %v2216_v46, %v2218_v38  ;;  %v2240_v35 = vrot.slane %v6381_v33, 3  ;;  %v2278_v25 = vrot.slane %v6363_v14, 5 }
 0xa48   :  { %v5049_v39 = vpack.i.bf16 %v2219_v62, %v2217_v26  ;;  %v2319_v19 = vsel %vm244_vm1, %v2317_v50, %v2318_v1  ;;  %v2321_v29 = vsel %vm244_vm1, %v2318_v1, %v2320_v52  ;;  %v2239_v43 = vsel %vm794_vm7, %v2237_v24, %v2238_v30 }
 0xa49   :  { %v2241_v17 = vsel %vm794_vm7, %v2238_v30, %v2240_v35  ;;  %v2279_v31 = vrot.slane %v6360_v5, 5  ;;  %v2281_v47 = vrot.slane %v6366_v45, 5  ;;  %v5054_v48 = vpack.i.bf16 %v2321_v29, %v2319_v19 }
 0xa4a   :  { %5045 = vrot.lane.b32.xlu0 %v5044_v34, %s5397_s10  ;;  %5050 = vrot.lane.b32.xlu1 %v5049_v39, %s5397_s10  ;;  %v2198_v49 = vrot.slane %v6363_v14, 1  ;;  %v2199_v21 = vrot.slane %v6360_v5, 1  ;;  %v2201_v27 = vrot.slane %v6366_v45, 1  ;;  %v5059_v56 = vpack.i.bf16 %v2241_v17, %v2239_v43 }
 0xa4b   :  { %v2280_v15 = vsel %vm1370_vm9, %v2278_v25, %v2279_v31  ;;  %v2300_v61 = vrot.slane %v6363_v14, 6  ;;  %v2301_v42 = vrot.slane %v6360_v5, 6  ;;  %v2282_v44 = vsel %vm1370_vm9, %v2279_v31, %v2281_v47 }
 0xa4c   :  { %v2200_v34 = vsel %vm259_vm2, %v2198_v49, %v2199_v21  ;;  %v2202_v46 = vsel %vm259_vm2, %v2199_v21, %v2201_v27  ;;  %v2303_v38 = vrot.slane %v6366_v45, 6  ;;  %v2220_v50 = vrot.slane %v6363_v14, 2 }
 0xa4d   :  { %v2221_v1 = vrot.slane %v6360_v5, 2  ;;  %v2223_v52 = vrot.slane %v6366_v45, 2  ;;  %v5064_v24 = vpack.i.bf16 %v2282_v44, %v2280_v15  ;;  %v5069_v30 = vpack.i.bf16 %v2202_v46, %v2200_v34 }
 0xa4e   :  { %5055 = vrot.lane.b32.xlu0 %v5054_v48, %s5398_s4  ;;  %5060 = vrot.lane.b32.xlu1 %v5059_v56, %s5398_s4  ;;  %v2302_v26 = vsel %vm729_vm6, %v2300_v61, %v2301_v42  ;;  %v2304_v62 = vsel %vm729_vm6, %v2301_v42, %v2303_v38  ;;  %v2322_v25 = vrot.slane %v6363_v14, 7  ;;  %v2323_v39 = vrot.slane %v6360_v5, 7 }
 0xa4f   :  { %v2222_v35 = vsel %vm505_vm4, %v2220_v50, %v2221_v1  ;;  %v2325_v19 = vrot.slane %v6366_v45, 7  ;;  %v2224_v29 = vsel %vm505_vm4, %v2221_v1, %v2223_v52  ;;  %v2242_v43 = vrot.slane %v6363_v14, 3 }
 0xa50   :  { %v2243_v17 = vrot.slane %v6360_v5, 3  ;;  %v2245_v31 = vrot.slane %v6366_v45, 3  ;;  %v5074_v47 = vpack.i.bf16 %v2304_v62, %v2302_v26  ;;  %v5079_v48 = vpack.i.bf16 %v2224_v29, %v2222_v35 }
 0xa51   :  { %v2324_v49 = vsel %vm244_vm1, %v2322_v25, %v2323_v39  ;;  %v2326_v21 = vsel %vm244_vm1, %v2323_v39, %v2325_v19  ;;  %v5104_v42 = vpack.i.bf16 %v2128_v63, %v2127_v54  ;;  %v2259_v36 = vrot.slane %v6378_v32, 4 }
 0xa52   :  { %5065 = vrot.lane.b32.xlu0 %v5064_v24, %s5396_s28  ;;  %5070 = vrot.lane.b32.xlu1 %v5069_v30, %s5396_s28  ;;  %v2244_v27 = vsel %vm794_vm7, %v2242_v43, %v2243_v17  ;;  %v2246_v56 = vsel %vm794_vm7, %v2243_v17, %v2245_v31  ;;  %v5084_v15 = vpack.i.bf16 %v2326_v21, %v2324_v49  ;;  %v2262_v16 = vrot.slane %v6381_v33, 4 }
 0xa53   :  { %v5089_v61 = vpack.i.bf16 %v2246_v56, %v2244_v27 }
 0xa56   :  { %5075 = vrot.lane.b32.xlu0 %v5074_v47, %s5397_s10  ;;  %5080 = vrot.lane.b32.xlu1 %v5079_v48, %s5397_s10 }
 0xa5a   :  { %5085 = vrot.lane.b32.xlu0 %v5084_v15, %s5398_s4  ;;  %5090 = vrot.lane.b32.xlu1 %v5089_v61, %s5398_s4  ;;  %v2264_v15 = vrot.slane %v6363_v14, 4  ;;  %v2265_v61 = vrot.slane %v6360_v5, 4 }
 0xa5e   :  { %5095 = vrot.lane.b32.xlu0 %v6167_v40, %s5396_s28  ;;  %5100 = vrot.lane.b32.xlu1 %v5636_v53, %s5396_s28 }
 0xa62   :  { %5105 = vrot.lane.b32.xlu0 %v5104_v42, %s5397_s10  ;;  %5110 = vrot.lane.b32.xlu1 %v5711_v20, %s5397_s10  ;;  %v2260_v20 = vrot.slane %v6369_v18, 4  ;;  %v2267_v42 = vrot.slane %v6366_v45, 4 }
 0xa64   :  { %v2263_v1 = vsel %vm1117_vm8, %v2260_v20, %v2262_v16 }
 0xa66   :  { %5120 = vrot.lane.b32.xlu1 %v5837_v23, %s5398_s4 }
 0xa6a   :  { %5130 = vrot.lane.b32.xlu1 %v5638_v55, %s5396_s28 }
 0xa6e   :  { %5140 = vrot.lane.b32.xlu1 %v5713_v22, %s5397_s10 }
 0xa72   :  { %5150 = vrot.lane.b32.xlu1 %v5839_v28, %s5398_s4  ;;  %v2261_v28 = vsel %vm1117_vm8, %v2259_v36, %v2260_v20 }
 0xab8   :  { %v5036_v53 = vpop.permute.xlu0 %5035  ;;  %v5041_v40 = vpop.permute.xlu1 %5040 }
 0xab9   :  { %v5038_v54 = vunpack.i.h.bf16 %v5036_v53  ;;  %v5037_v63 = vunpack.i.l.bf16 %v5036_v53  ;;  %v5043_v23 = vunpack.i.h.bf16 %v5041_v40  ;;  %v5042_v44 = vunpack.i.l.bf16 %v5041_v40 }
 0xabb   :  { %v2351_v52 = vsel %vm97_vm0, %v2261_v28, %v5037_v63  ;;  %v2352_v33 = vsel %vm97_vm0, %v2263_v1, %v5038_v54  ;;  %v2340_v24 = vsel %vm97_vm0, %v6369_v18, %v5043_v23  ;;  %v2339_v30 = vsel %vm97_vm0, %v6378_v32, %v5042_v44 }
 0xabc   :  { %v5046_v34 = vpop.permute.xlu0 %5045  ;;  %v5051_v55 = vpop.permute.xlu1 %5050 }
 0xabd   :  { %v5048_v46 = vunpack.i.h.bf16 %v5046_v34  ;;  %v5047_v38 = vunpack.i.l.bf16 %v5046_v34  ;;  %v5053_v22 = vunpack.i.h.bf16 %v5051_v55  ;;  %v5052_v50 = vunpack.i.l.bf16 %v5051_v55 }
 0xabe   :  { %v2266_v55 = vsel %vm1117_vm8, %v2264_v15, %v2265_v61  ;;  %v5256_v15 = vld [vmem:[%s7100_s12 + $0x60] sm:$0xff]  }
 0xabf   :  { %v2355_v29 = vsel %vm312_vm3, %v2351_v52, %v5047_v38  ;;  %v2356_v43 = vsel %vm312_vm3, %v2352_v33, %v5048_v46  ;;  %v2343_v17 = vsel %vm312_vm3, %v2339_v30, %v5052_v50  ;;  %v2344_v31 = vsel %vm312_vm3, %v2340_v24, %v5053_v22 }
 0xac0   :  { %v5056_v26 = vpop.permute.xlu0 %5055  ;;  %v5061_v62 = vpop.permute.xlu1 %5060  ;;  %v2268_v46 = vsel %vm1117_vm8, %v2265_v61, %v2267_v42  ;;  %v5257_v61 = vld [vmem:[%s7100_s12 + $0xe8] sm:$0xff]   ;;  %v5258_v42 = vld [vmem:[%s7100_s12 + $0x20] sm:$0xff]  }
 0xac1   :  { %v5058_v35 = vunpack.i.h.bf16 %v5056_v26  ;;  %v5057_v25 = vunpack.i.l.bf16 %v5056_v26  ;;  %v5063_v39 = vunpack.i.h.bf16 %v5061_v62  ;;  %v5062_v19 = vunpack.i.l.bf16 %v5061_v62 }
 0xac3   :  { %v2347_v47 = vsel %vm574_vm5, %v2343_v17, %v5062_v19  ;;  %v2348_v18 = vsel %vm574_vm5, %v2344_v31, %v5063_v39  ;;  %v2359_v32 = vsel %vm574_vm5, %v2355_v29, %v5057_v25  ;;  %v2360_v48 = vsel %vm574_vm5, %v2356_v43, %v5058_v35  ;;  %v5246_v17 = vld [vmem:[%s7100_s12 + $0x78] sm:$0xff]  }
 0xac4   :  { %v2363_v49 = vpack.c.bf16 %v2348_v18, %v2347_v47  ;;  %v5066_v21 = vpop.permute.xlu0 %5065  ;;  %v5071_v27 = vpop.permute.xlu1 %5070  ;;  %v2364_v56 = vpack.c.bf16 %v2360_v48, %v2359_v32  ;;  %v5247_v31 = vld [vmem:[%s7100_s12 + $0x38] sm:$0xff]   ;;  %4637 = vmatprep.subr.bf16.mxu0 %v5246_v17  ;;  %v5248_v47 = vld [vmem:[%s7100_s12 + $0x70] sm:$0xff]  }
 0xac5   :  { %v5068_v53 = vunpack.i.h.bf16 %v5066_v21  ;;  %v5067_v40 = vunpack.i.l.bf16 %v5066_v21  ;;  %v5073_v36 = vunpack.i.h.bf16 %v5071_v27  ;;  %v5072_v16 = vunpack.i.l.bf16 %v5071_v27  ;;  %4638 = vmatpush3.bf16.msra.mxu0 %v5247_v31  ;;  %v5249_v18 = vld [vmem:[%s7100_s12 + $0xf8] sm:$0xff]   ;;  %v5250_v32 = vld [vmem:[%s7100_s12 + $0x30] sm:$0xff]   ;;  %v5254_v27 = vld [vmem:[%s7100_s12 + $0x28] sm:$0xff]  }
 0xac6   :  { %2495 = vmatprep.mubr.bf16.mxu1 %v2364_v56  ;;  %4639 = vmatprep.subr.bf16.mxu0 %v5248_v47  ;;  %v5251_v48 = vld [vmem:[%s7100_s12 + $0xb8] sm:$0xff]   ;;  %v5253_v21 = vld [vmem:[%s7100_s12 + $0xf0] sm:$0xff]  }
 0xac7   :  { %2496 = vmatmul.mubr.bf16.vlgmr.msra.gmra.mxu1 %v2363_v49  ;;  %v2354_v38 = vsel %vm97_vm0, %v2268_v46, %v5068_v53  ;;  %v2353_v22 = vsel %vm97_vm0, %v2266_v55, %v5067_v40  ;;  %v2342_v45 = vsel %vm97_vm0, %v6360_v5, %v5073_v36  ;;  %v2341_v50 = vsel %vm97_vm0, %v6363_v14, %v5072_v16  ;;  %v5252_v49 = vld [vmem:[%s7100_s12 + $0x68] sm:$0xff]   ;;  %v5255_v56 = vld [vmem:[%s7100_s12 + $0xb0] sm:$0xff]   ;;  %v5260_v40 = vld [vmem:[%s7100_s12 + $0x58] sm:$0xff]  }
 0xac8   :  { %v5076_v20 = vpop.permute.xlu0 %5075  ;;  %v5081_v54 = vpop.permute.xlu1 %5080  ;;  %4665 = vmatprep.subr.bf16.mxu1 %v5249_v18  ;;  %v5259_v53 = vld [vmem:[%s7100_s12 + $0xa8] sm:$0xff]   ;;  %v5261_v36 = vld [vmem:[%s7100_s12 + $0xe0] sm:$0xff]   ;;  %v5262_v16 = vld [vmem:[%s7100_s12 + $0x18] sm:$0xff]  }
 0xac9   :  { %v5078_v63 = vunpack.i.h.bf16 %v5076_v20  ;;  %v5077_v23 = vunpack.i.l.bf16 %v5076_v20  ;;  %v5083_v44 = vunpack.i.h.bf16 %v5081_v54  ;;  %v5082_v34 = vunpack.i.l.bf16 %v5081_v54  ;;  %4640 = vmatpush3.bf16.msra.mxu0 %v5250_v32  ;;  %4666 = vmatpush3.bf16.msra.mxu1 %v5251_v48  ;;  %v5263_v20 = vld [vmem:[%s7100_s12 + $0xa0] sm:$0xff]  }
 0xaca   :  { %4641 = vmatprep.subr.bf16.mxu0 %v5252_v49  ;;  %4667 = vmatprep.subr.bf16.mxu1 %v5253_v21  ;;  %v4455_v46 = vld [vmem:[%s7128_s23 + $0x7] ss:$0 sm:$0xff] }
 0xacb   :  { %v2357_v26 = vsel %vm312_vm3, %v2353_v22, %v5077_v23  ;;  %v2358_v62 = vsel %vm312_vm3, %v2354_v38, %v5078_v63  ;;  %v2345_v35 = vsel %vm312_vm3, %v2341_v50, %v5082_v34  ;;  %v2346_v25 = vsel %vm312_vm3, %v2342_v45, %v5083_v44 }
 0xacc   :  { %v5086_v28 = vpop.permute.xlu0 %5085  ;;  %v5091_v1 = vpop.permute.xlu1 %5090 }
 0xacd   :  { %v5088_v52 = vunpack.i.h.bf16 %v5086_v28  ;;  %v5087_v33 = vunpack.i.l.bf16 %v5086_v28  ;;  %v5093_v24 = vunpack.i.h.bf16 %v5091_v1  ;;  %v5092_v30 = vunpack.i.l.bf16 %v5091_v1  ;;  %4642 = vmatpush3.bf16.msra.mxu0 %v5254_v27  ;;  %4668 = vmatpush3.bf16.msra.mxu1 %v5255_v56 }
 0xace   :  { %4643 = vmatprep.subr.bf16.mxu0 %v5256_v15  ;;  %4669 = vmatprep.subr.bf16.mxu1 %v5257_v61 }
 0xacf   :  { %v2361_v39 = vsel %vm574_vm5, %v2357_v26, %v5087_v33  ;;  %v2362_v5 = vsel %vm574_vm5, %v2358_v62, %v5088_v52  ;;  %v2349_v14 = vsel %vm574_vm5, %v2345_v35, %v5092_v30  ;;  %v2350_v19 = vsel %vm574_vm5, %v2346_v25, %v5093_v24 }
 0xad0   :  { %v2366_v29 = vpack.c.bf16 %v2362_v5, %v2361_v39  ;;  %v2365_v43 = vpack.c.bf16 %v2350_v19, %v2349_v14 }
 0xad1   :  { %4644 = vmatpush3.bf16.msra.mxu0 %v5258_v42  ;;  %4670 = vmatpush3.bf16.msra.mxu1 %v5259_v53 }
 0xad2   :  { %2503 = vmatprep.mubr.bf16.mxu1 %v2366_v29  ;;  %4645 = vmatprep.subr.bf16.mxu0 %v5260_v40 }
 0xad3   :  { %2504 = vmatmul.mubr.bf16.gmra.mxu1 %v2365_v43  ;;  %4671 = vmatprep.subr.bf16.mxu1 %v5261_v36 }
 0xad5   :  { %4646 = vmatpush3.bf16.msra.mxu0 %v5262_v16  ;;  %4672 = vmatpush3.bf16.msra.mxu1 %v5263_v20 }
 0xb87   :  { %v4625_v54 = vpop.f32.mrf.mxu1 }
 0xb89   :  { %v4626_v63 = vpop.f32.mrf.mxu1 }
 0xb8a   :  { %v4627_v55 = vadd.f32 %v4626_v63, %v4625_v54 }
 0xb8b   :  { %v4628_v23 = vpop.f32.mrf.mxu1 }
 0xb8c   :  { %v2518_v45 = vadd.f32 %v4627_v55, %v4455_v46 }
 0xb8d   :  { %v4629_v44 = vpop.f32.mrf.mxu1 }
 0xb8e   :  { %v4630_v34 = vadd.f32 %v4629_v44, %v4628_v23  ;;  %v2535_v33 = vmul.f32 %v2518_v45, %v2518_v45  ;;  %v2522_v26 = vsel %vm97_vm0, %v2518_v45, 0.0 }
 0xb90   :  { %v2519_v38 = vadd.f32 %v4630_v34, %v4455_v46  ;;  %v2539_v19 = vsel %vm97_vm0, %v2535_v33, 0.0 }
 0xb92   :  { %v2536_v28 = vmul.f32 %v2519_v38, %v2519_v38  ;;  %v2523_v24 = vsel %vm97_vm0, %v2519_v38, 0.0 }
 0xb93   :  { %v4631_v22 = vpop.f32.mrf.mxu1  ;;  %v2524_v14 = vadd.f32 %v2523_v24, %v2522_v26 }
 0xb94   :  { %v2540_v35 = vsel %vm97_vm0, %v2536_v28, 0.0 }
 0xb95   :  { %v4632_v50 = vpop.f32.mrf.mxu1  ;;  %v2541_v17 = vadd.f32 %v2540_v35, %v2539_v19  ;;  %v5264_v19 = vld [vmem:[%s7100_s12 + $0x50] sm:$0xff]  }
 0xb96   :  { %v4633_v1 = vadd.f32 %v4632_v50, %v4631_v22  ;;  %v4437_v22 = vld [vmem:[%s7129_s3 + $0x7] sm:$0x1]  ;;  %4647 = vmatprep.subr.bf16.mxu0 %v5264_v19 }
 0xb97   :  { %v4634_v52 = vpop.f32.mrf.mxu1 }
 0xb98   :  { %v2520_v30 = vadd.f32 %v4633_v1, %v4455_v46  ;;  %v4438_v1 = vld [vmem:[%s7130_s2 + $0x7] sm:$0x1] }
 0xb99   :  { %v4635_v62 = vpop.f32.mrf.mxu1 }
 0xb9a   :  { %v2525_v25 = vsel %vm97_vm0, %v2520_v30, 0.0  ;;  %v2537_v39 = vmul.f32 %v2520_v30, %v2520_v30  ;;  %v4636_v5 = vadd.f32 %v4635_v62, %v4634_v52 }
 0xb9b   :  { %v2526_v31 = vadd.f32 %v2525_v25, %v2524_v14 }
 0xb9c   :  { %v2542_v29 = vsel %vm97_vm0, %v2537_v39, 0.0  ;;  %v2521_v43 = vadd.f32 %v4636_v5, %v4455_v46 }
 0xb9d   :  { %v2543_v32 = vadd.f32 %v2542_v29, %v2541_v17  ;;  %v5265_v29 = vld [vmem:[%s7100_s12 + $0xd8] sm:$0xff]   ;;  %v5266_v17 = vld [vmem:[%s7100_s12 + $0x10] sm:$0xff]  }
 0xb9e   :  { %v2527_v47 = vsel %vm97_vm0, %v2521_v43, 0.0  ;;  %v2538_v18 = vmul.f32 %v2521_v43, %v2521_v43  ;;  %4673 = vmatprep.subr.bf16.mxu1 %v5265_v29  ;;  %4648 = vmatpush3.bf16.msra.mxu0 %v5266_v17 }
 0xb9f   :  { %v2528_v48 = vadd.f32 %v2527_v47, %v2526_v31  ;;  %v5268_v31 = vld [vmem:[%s7100_s12 + $0x48] sm:$0xff]   ;;  %v5269_v47 = vld [vmem:[%s7100_s12 + $0xd0] sm:$0xff]  }
 0xba0   :  { %v2544_v49 = vsel %vm97_vm0, %v2538_v18, 0.0  ;;  %4649 = vmatprep.subr.bf16.mxu0 %v5268_v31 }
 0xba1   :  { %v2529_v21 = vrot.slane %v2528_v48, 4  ;;  %v2545_v27 = vadd.f32 %v2544_v49, %v2543_v32  ;;  %v5271_v49 = vld [vmem:[%s7100_s12 + $0x90] sm:$0xff]  }
 0xba3   :  { %v2530_v56 = vadd.f32 %v2529_v21, %v2528_v48  ;;  %v2546_v15 = vrot.slane %v2545_v27, 4  ;;  %v5270_v48 = vld [vmem:[%s7100_s12 + $0x8] sm:$0xff]   ;;  %v5272_v21 = vld [vmem:[%s7100_s12 + $0x40] sm:$0xff]  }
 0xba4   :  { %4650 = vmatpush3.bf16.msra.mxu0 %v5270_v48 }
 0xba5   :  { %v2531_v61 = vrot.slane %v2530_v56, 2  ;;  %v2547_v42 = vadd.f32 %v2546_v15, %v2545_v27  ;;  %4651 = vmatprep.subr.bf16.mxu0 %v5272_v21  ;;  %v5275_v15 = vld [vmem:[%s7100_s12 + $0x88] sm:$0xff]  }
 0xba7   :  { %v2532_v53 = vadd.f32 %v2531_v61, %v2530_v56  ;;  %v2548_v40 = vrot.slane %v2547_v42, 2  ;;  %v5274_v56 = vld [vmem:[%s7100_s12] sm:$0xff]  }
 0xba8   :  { %4652 = vmatpush3.bf16.msra.mxu0 %v5274_v56 }
 0xba9   :  { %v2533_v36 = vrot.slane %v2532_v53, 1  ;;  %v2549_v16 = vadd.f32 %v2548_v40, %v2547_v42 }
 0xbab   :  { %v2534_v20 = vadd.f32 %v2533_v36, %v2532_v53  ;;  %v2550_v54 = vrot.slane %v2549_v16, 1  ;;  %v5277_v53 = vld [vmem:[%s7100_s12 + $0x178] sm:$0xff]   ;;  %v5278_v36 = vld [vmem:[%s7100_s12 + $0x80] sm:$0xff]  }
 0xbac   :  { %4693 = vmatprep.subr.bf16.mxu0 %v5277_v53 }
 0xbad   :  { %v2551_v63 = vadd.f32 %v2550_v54, %v2549_v16  ;;  %v2552_v23 = vmul.f32 0.03125, %v2534_v20 }
 0xbaf   :  { %v2553_v44 = vmul.f32 0.03125, %v2551_v63  ;;  %v2554_v34 = vmul.f32 %v2552_v23, %v2552_v23 }
 0xbb1   :  { %v2555_v55 = vsub.f32 %v2553_v44, %v2554_v34 }
 0xbb3   :  { %v2556_v46 = vadd.f32 1e-05, %v2555_v55 }
 0xbb5   :  { %5322 = vrsqrt.f32 %v2556_v46 }
 0xbc2   :  { %v5323_v50 = vpop.eup %5322 }
 0xbc3   :  { %v2558_v28 = vmul.f32 %v5323_v50, %v4437_v22 }
 0xbc5   :  { %v2559_v52 = vmul.f32 %v2558_v28, %v2552_v23  ;;  %v2565_v33 = vrot.slane %v2558_v28, %v5556_v57 }
 0xbc7   :  { %v2560_v24 = vsub.f32 %v4438_v1, %v2559_v52  ;;  %v2567_v26 = vmul.f32 %v2565_v33, %v2518_v45  ;;  %v2568_v62 = vmul.f32 %v2565_v33, %v2519_v38  ;;  %v5267_v38 = vld [vmem:[%s7100_s12 + $0x98] sm:$0xff]   ;;  %v2570_v18 = vmul.f32 %v2565_v33, %v2521_v43 }
 0xbc8   :  { %v2569_v32 = vmul.f32 %v2565_v33, %v2520_v30  ;;  %4674 = vmatpush3.bf16.msra.mxu1 %v5267_v38  ;;  %v5273_v30 = vld [vmem:[%s7100_s12 + $0xc8] sm:$0xff]  }
 0xbc9   :  { %v2575_v35 = vrot.slane %v2560_v24, %v5556_v57  ;;  %4675 = vmatprep.subr.bf16.mxu1 %v5269_v47 }
 0xbcb   :  { %v2577_v25 = vadd.f32 %v2575_v35, %v2567_v26  ;;  %v2578_v39 = vadd.f32 %v2575_v35, %v2568_v62  ;;  %v2579_v27 = vadd.f32 %v2575_v35, %v2569_v32  ;;  %v2580_v43 = vadd.f32 %v2575_v35, %v2570_v18  ;;  %v5096_v35 = vpop.permute.xlu0 %5095 }
 0xbcc   :  { %4676 = vmatpush3.bf16.msra.mxu1 %v5271_v49  ;;  %v5098_v48 = vunpack.i.h.bf16 %v5096_v35  ;;  %v5097_v49 = vunpack.i.l.bf16 %v5096_v35 }
 0xbcd   :  { %v2581_v5 = vmax.f32 %v2577_v25, 0.0  ;;  %v2582_v14 = vmax.f32 %v2578_v39, 0.0  ;;  %v2583_v61 = vmax.f32 %v2579_v27, 0.0  ;;  %v2584_v42 = vmax.f32 %v2580_v43, 0.0  ;;  %4677 = vmatprep.subr.bf16.mxu1 %v5273_v30 }
 0xbcf   :  { %v5114_v45 = vpack.i.bf16 %v2582_v14, %v2581_v5  ;;  %v5144_v40 = vpack.i.bf16 %v2584_v42, %v2583_v61 }
 0xbd0   :  { %4678 = vmatpush3.bf16.msra.mxu1 %v5275_v15  ;;  %v2673_v15 = vsel %vm97_vm0, %v1332_v41, %v5097_v49 }
 0xbd1   :  { %5115 = vrot.lane.b32.xlu0 %v5114_v45, %s5398_s4  ;;  %v5106_v45 = vpop.permute.xlu0 %5105 }
 0xbd2   :  { %v5108_v27 = vunpack.i.h.bf16 %v5106_v45  ;;  %v5107_v8 = vunpack.i.l.bf16 %v5106_v45 }
 0xbd5   :  { %5125 = vrot.lane.b32.xlu0 %v6169_v58, %s5396_s28  ;;  %v5276_v58 = vld [vmem:[%s7100_s12 + $0xc0] sm:$0xff]  }
 0xbd6   :  { %4679 = vmatprep.subr.bf16.mxu1 %v5276_v58  ;;  %v2677_v58 = vsel %vm312_vm3, %v2673_v15, %v5107_v8  ;;  %v5282_v15 = vld [vmem:[%s7100_s12 + $0x168] sm:$0xff]  }
 0xbd7   :  { %4680 = vmatpush3.bf16.msra.mxu1 %v5278_v36 }
 0xbd9   :  { %5135 = vrot.lane.b32.xlu0 %v6357_v37, %s5397_s10  ;;  %v5101_v37 = vpop.permute.xlu1 %5100 }
 0xbda   :  { %v5102_v63 = vunpack.i.l.bf16 %v5101_v37  ;;  %v5103_v23 = vunpack.i.h.bf16 %v5101_v37 }
 0xbdc   :  { %v2661_v22 = vsel %vm97_vm0, %v222_v11, %v5102_v63  ;;  %v2662_v50 = vsel %vm97_vm0, %v223_v10, %v5103_v23 }
 0xbdd   :  { %5145 = vrot.lane.b32.xlu0 %v5144_v40, %s5398_s4  ;;  %v5111_v16 = vpop.permute.xlu1 %5110 }
 0xbde   :  { %v5112_v44 = vunpack.i.l.bf16 %v5111_v16  ;;  %v5113_v34 = vunpack.i.h.bf16 %v5111_v16 }
 0xbe0   :  { %v2665_v28 = vsel %vm312_vm3, %v2661_v22, %v5112_v44  ;;  %v2666_v52 = vsel %vm312_vm3, %v2662_v50, %v5113_v34 }
 0xbe1   :  { %v5121_v20 = vpop.permute.xlu1 %5120 }
 0xbe2   :  { %v5122_v55 = vunpack.i.l.bf16 %v5121_v20  ;;  %v5123_v46 = vunpack.i.h.bf16 %v5121_v20 }
 0xbe4   :  { %v2669_v33 = vsel %vm574_vm5, %v2665_v28, %v5122_v55  ;;  %v2670_v24 = vsel %vm574_vm5, %v2666_v52, %v5123_v46 }
 0xbe5   :  { %v5131_v54 = vpop.permute.xlu1 %5130  ;;  %v2693_v26 = vrot.slane %v2669_v33, 7  ;;  %v2695_v62 = vrot.slane %v2670_v24, 7 }
 0xbe6   :  { %v5132_v7 = vunpack.i.l.bf16 %v5131_v54  ;;  %v5133_v39 = vunpack.i.h.bf16 %v5131_v54 }
 0xbe7   :  { %v2713_v11 = vsel %vm244_vm1, %v2669_v33, %v2693_v26  ;;  %v2696_v10 = vsel %vm244_vm1, %v2693_v26, %v2695_v62 }
 0xbe8   :  { %v2717_v29 = vmax.f32 %v2669_v33, %v2713_v11  ;;  %v2663_v17 = vsel %vm97_vm0, %v224_v12, %v5132_v7  ;;  %v2719_v38 = vmax.f32 %v2670_v24, %v2696_v10  ;;  %v2664_v31 = vsel %vm97_vm0, %v225_v13, %v5133_v39 }
 0xbe9   :  { %v5141_v1 = vpop.permute.xlu1 %5140  ;;  %v2674_v13 = vsel %vm97_vm0, %v1333_v51, %v5098_v48 }
 0xbea   :  { %v5142_v6 = vunpack.i.l.bf16 %v5141_v1  ;;  %v5143_v5 = vunpack.i.h.bf16 %v5141_v1  ;;  %v6664_v43 = vrot.slane %v2717_v29, 7  ;;  %v2834_v12 = vrot.slane %v2719_v38, 7 }
 0xbeb   :  { %v2678_v53 = vsel %vm312_vm3, %v2674_v13, %v5108_v27 }
 0xbec   :  { %v2667_v47 = vsel %vm312_vm3, %v2663_v17, %v5142_v6  ;;  %v2668_v18 = vsel %vm312_vm3, %v2664_v31, %v5143_v5  ;;  %v6676_v40 = vsel %vm244_vm1, 0.0, %v6664_v43  ;;  %v6680_v36 = vsel %vm244_vm1, %v6664_v43, %v2834_v12  ;;  %v5279_v17 = vld [vmem:[%s7100_s12 + $0x138] sm:$0xff]  }
 0xbed   :  { %v5151_v25 = vpop.permute.xlu1 %5150  ;;  %v6687_v54 = vsel %vm244_vm1, %v2834_v12, 0.0  ;;  %v2872_v63 = vrot.slane %v6676_v40, 1  ;;  %v2873_v23 = vrot.slane %v6680_v36, 1  ;;  %v4510_v33 = vpack.c.bf16 %v6680_v36, %v6664_v43 }
 0xbee   :  { %v5152_v14 = vunpack.i.l.bf16 %v5151_v25  ;;  %v5153_v19 = vunpack.i.h.bf16 %v5151_v25  ;;  %v2878_v1 = vrot.slane %v6687_v54, 1 }
 0xbef   :  { %v2874_v11 = vsel %vm259_vm2, %v2872_v63, %v2873_v23 }
 0xbf0   :  { %v2671_v32 = vsel %vm574_vm5, %v2667_v47, %v5152_v14  ;;  %v2672_v21 = vsel %vm574_vm5, %v2668_v18, %v5153_v19  ;;  %v2879_v0 = vsel %vm259_vm2, %v2873_v23, %v2878_v1  ;;  %v5289_v14 = vld [vmem:[%s7100_s12 + $0x110] sm:$0xff]  }
 0xbf1   :  { %v2699_v30 = vrot.slane %v2671_v32, 7  ;;  %v2701_v56 = vrot.slane %v2672_v21, 7  ;;  %v2930_v13 = vpack.c.bf16 %v2879_v0, %v2874_v11 }
 0xbf3   :  { %v2715_v59 = vsel %vm244_vm1, %v2671_v32, %v2699_v30  ;;  %v2702_v51 = vsel %vm244_vm1, %v2699_v30, %v2701_v56  ;;  %v5281_v56 = vld [vmem:[%s7100_s12 + $0x130] sm:$0xff]  }
 0xbf4   :  { %v2721_v44 = vmax.f32 %v2671_v32, %v2715_v59  ;;  %v2723_v46 = vmax.f32 %v2672_v21, %v2702_v51  ;;  %v5280_v32 = vld [vmem:[%s7100_s12 + $0x170] sm:$0xff]  }
 0xbf6   :  { %v6697_v35 = vrot.slane %v2721_v44, 7  ;;  %v2840_v39 = vrot.slane %v2723_v46, 7  ;;  %v5284_v44 = vld [vmem:[%s7100_s12 + $0x160] sm:$0xff]  }
 0xc43   :  { %v5116_v9 = vpop.permute.xlu0 %5115 }
 0xc44   :  { %v5118_v61 = vunpack.i.h.bf16 %v5116_v9  ;;  %v5117_v42 = vunpack.i.l.bf16 %v5116_v9  ;;  %v6734_v9 = vsel %vm244_vm1, %v2840_v39, 0.0 }
 0xc46   :  { %v2682_v60 = vsel %vm574_vm5, %v2678_v53, %v5118_v61  ;;  %v2681_v41 = vsel %vm574_vm5, %v2677_v58, %v5117_v42  ;;  %v6741_v61 = vsel %vm244_vm1, %v6697_v35, %v2840_v39  ;;  %v6745_v42 = vsel %vm244_vm1, 0.0, %v6697_v35  ;;  %v5286_v39 = vld [vmem:[%s7100_s12 + $0x158] sm:$0xff]  }
 0xc47   :  { %v2697_v37 = vrot.slane %v2682_v60, 7  ;;  %v2694_v16 = vrot.slane %v2681_v41, 7  ;;  %v5126_v20 = vpop.permute.xlu0 %5125 }
 0xc48   :  { %v5128_v28 = vunpack.i.h.bf16 %v5126_v20  ;;  %v5127_v62 = vunpack.i.l.bf16 %v5126_v20  ;;  %v2882_v20 = vrot.slane %v6745_v42, 1 }
 0xc49   :  { %v2698_v34 = vsel %vm244_vm1, %v2694_v16, %v2697_v37  ;;  %v2714_v55 = vsel %vm244_vm1, %v2681_v41, %v2694_v16  ;;  %v5283_v16 = vld [vmem:[%s7100_s12 + $0x128] sm:$0xff]  }
 0xc4a   :  { %v2718_v22 = vmax.f32 %v2681_v41, %v2714_v55  ;;  %v2720_v50 = vmax.f32 %v2682_v60, %v2698_v34  ;;  %v2676_v10 = vsel %vm97_vm0, %v1335_v4, %v5128_v28  ;;  %v2675_v2 = vsel %vm97_vm0, %v1334_v3, %v5127_v62 }
 0xc4b   :  { %v5136_v52 = vpop.permute.xlu0 %5135  ;;  %v2883_v34 = vrot.slane %v6741_v61, 1  ;;  %v2888_v55 = vrot.slane %v6734_v9, 1 }
 0xc4c   :  { %v2833_v24 = vrot.slane %v2718_v22, 7  ;;  %v2836_v26 = vrot.slane %v2720_v50, 7  ;;  %v5138_v25 = vunpack.i.h.bf16 %v5136_v52  ;;  %v5137_v7 = vunpack.i.l.bf16 %v5136_v52 }
 0xc4d   :  { %v2889_v11 = vsel %vm259_vm2, %v2883_v34, %v2888_v55 }
 0xc4e   :  { %v2861_v6 = vsel %vm244_vm1, %v2836_v26, 0.0  ;;  %v2837_v5 = vsel %vm244_vm1, %v2833_v24, %v2836_v26  ;;  %v2857_v45 = vsel %vm244_vm1, 0.0, %v2833_v24  ;;  %v2679_v48 = vsel %vm312_vm3, %v2675_v2, %v5137_v7 }
 0xc4f   :  { %v5146_v19 = vpop.permute.xlu0 %5145  ;;  %v4506_v29 = vpack.c.bf16 %v2837_v5, %v2833_v24  ;;  %v2876_v38 = vrot.slane %v2837_v5, 1  ;;  %v2880_v31 = vrot.slane %v2861_v6, 1  ;;  %v2875_v18 = vrot.slane %v2857_v45, 1 }
 0xc50   :  { %v5148_v4 = vunpack.i.h.bf16 %v5146_v19  ;;  %v5147_v47 = vunpack.i.l.bf16 %v5146_v19  ;;  %v2680_v49 = vsel %vm312_vm3, %v2676_v10, %v5138_v25  ;;  %v2903_v59 = vrot.slane %v2857_v45, 2  ;;  %v5290_v45 = vld [vmem:[%s7100_s12 + $0x148] sm:$0xff]  }
 0xc51   :  { %4507 = vmatprep.mubr.msk.bf16.mxu0 %vm6705_vm12, %v4506_v29  ;;  %v2881_v21 = vsel %vm259_vm2, %v2876_v38, %v2880_v31  ;;  %v2877_v8 = vsel %vm259_vm2, %v2875_v18, %v2876_v38  ;;  %v2904_v60 = vrot.slane %v2837_v5, 2  ;;  %v2908_v37 = vrot.slane %v2861_v6, 2  ;;  %v5287_v29 = vld [vmem:[%s7100_s12 + $0x118] sm:$0xff]   ;;  %v5291_v38 = vld [vmem:[%s7100_s12 + $0x108] sm:$0xff]   ;;  %v5292_v31 = vld [vmem:[%s7100_s12 + $0x140] sm:$0xff]  }
 0xc52   :  { %v2683_v3 = vsel %vm574_vm5, %v2679_v48, %v5147_v47  ;;  %v2684_v27 = vsel %vm574_vm5, %v2680_v49, %v5148_v4  ;;  %4511 = vmatmul.mubr.msk.bf16.vlgmr.msra.gmra.mxu0 %vm6705_vm12, %v4510_v33  ;;  %v2931_v30 = vpack.c.bf16 %v2881_v21, %v2877_v8  ;;  %v5285_v33 = vld [vmem:[%s7100_s12 + $0x120] sm:$0xff]   ;;  %v4518_v25 = vpack.c.bf16 %v6741_v61, %v6697_v35 }
 0xc53   :  { %v2700_v43 = vrot.slane %v2683_v3, 7  ;;  %v2703_v12 = vrot.slane %v2684_v27, 7  ;;  %4694 = vmatpush3.bf16.msra.mxu0 %v5279_v17  ;;  %v2905_v46 = vsel %vm505_vm4, %v2903_v59, %v2904_v60  ;;  %v2909_v28 = vsel %vm505_vm4, %v2904_v60, %v2908_v37  ;;  %v5288_v17 = vld [vmem:[%s7100_s12 + $0x150] sm:$0xff]   ;;  %v5293_v49 = vld [vmem:[%s7100_s12 + $0x100] sm:$0xff]  }
 0xc54   :  { %4695 = vmatprep.subr.bf16.mxu0 %v5280_v32  ;;  %3309 = vmatprep.mubr.bf16.mxu1 %v2931_v30  ;;  %v2884_v7 = vsel %vm259_vm2, %v2882_v20, %v2883_v34  ;;  %v2933_v6 = vpack.c.bf16 %v2909_v28, %v2905_v46  ;;  %v2900_v2 = vrot.slane %v6676_v40, 2  ;;  %v2901_v4 = vrot.slane %v6680_v36, 2 }
 0xc55   :  { %v2704_v58 = vsel %vm244_vm1, %v2700_v43, %v2703_v12  ;;  %v2716_v53 = vsel %vm244_vm1, %v2683_v3, %v2700_v43  ;;  %3310 = vmatmul.mubr.bf16.vlgmr.msra.gmra.mxu1 %v2930_v13  ;;  %v2936_v19 = vpack.c.bf16 %v2889_v11, %v2884_v7  ;;  %v2906_v47 = vrot.slane %v6687_v54, 2  ;;  %v5294_v13 = vld [vmem:[%s7101_s16 + $0x28] sm:$0xff]  }
 0xc56   :  { %v2722_v41 = vmax.f32 %v2683_v3, %v2716_v53  ;;  %v2724_v51 = vmax.f32 %v2684_v27, %v2704_v58  ;;  %v2902_v21 = vsel %vm505_vm4, %v2900_v2, %v2901_v4  ;;  %v2910_v27 = vrot.slane %v6745_v42, 2  ;;  %4801 = vmatprep.subr.bf16.mxu1 %v5294_v13 }
 0xc57   :  { %4696 = vmatpush3.bf16.msra.mxu0 %v5281_v56  ;;  %v2907_v0 = vsel %vm505_vm4, %v2901_v4, %v2906_v47  ;;  %v2911_v8 = vrot.slane %v6741_v61, 2  ;;  %v2916_v43 = vrot.slane %v6734_v9, 2  ;;  %4802 = vmatpush3.bf16.msra.mxu1 %v5294_v13  ;;  %v5296_v9 = vld [vmem:[%s7101_s16 + $0x18] sm:$0xff]   ;;  %v5297_v61 = vld [vmem:[%s7101_s16 + $0x10] sm:$0xff]  }
 0xc58   :  { %v2839_v63 = vrot.slane %v2722_v41, 7  ;;  %v2842_v23 = vrot.slane %v2724_v51, 7  ;;  %4697 = vmatprep.subr.bf16.mxu0 %v5282_v15  ;;  %v2932_v36 = vpack.c.bf16 %v2907_v0, %v2902_v21  ;;  %v5295_v15 = vld [vmem:[%s7101_s16 + $0x20] sm:$0xff]  }
 0xc59   :  { %v2912_v12 = vsel %vm505_vm4, %v2910_v27, %v2911_v8  ;;  %v2917_v30 = vsel %vm505_vm4, %v2911_v8, %v2916_v43  ;;  %4803 = vmatprep.subr.bf16.mxu1 %v5295_v15 }
 0xc5a   :  { %v2863_v22 = vsel %vm244_vm1, %v2842_v23, 0.0  ;;  %v2843_v50 = vsel %vm244_vm1, %v2839_v63, %v2842_v23  ;;  %v2859_v1 = vsel %vm244_vm1, 0.0, %v2839_v63  ;;  %v2938_v56 = vpack.c.bf16 %v2917_v30, %v2912_v12 }
 0xc5b   :  { %4698 = vmatpush3.bf16.msra.mxu0 %v5283_v16  ;;  %v4514_v52 = vpack.c.bf16 %v2843_v50, %v2839_v63  ;;  %v2885_v24 = vrot.slane %v2859_v1, 1  ;;  %v2886_v26 = vrot.slane %v2843_v50, 1  ;;  %v2890_v62 = vrot.slane %v2863_v22, 1  ;;  %4804 = vmatpush3.bf16.msra.mxu1 %v5295_v15 }
 0xc5c   :  { %4699 = vmatprep.subr.bf16.mxu0 %v5284_v44  ;;  %v2913_v18 = vrot.slane %v2859_v1, 2  ;;  %v2914_v32 = vrot.slane %v2843_v50, 2  ;;  %v2918_v48 = vrot.slane %v2863_v22, 2  ;;  %4805 = vmatprep.subr.bf16.mxu1 %v5296_v9 }
 0xc5d   :  { %4515 = vmatprep.mubr.msk.bf16.mxu0 %vm6705_vm12, %v4514_v52  ;;  %v2887_v10 = vsel %vm259_vm2, %v2885_v24, %v2886_v26  ;;  %v2891_v5 = vsel %vm259_vm2, %v2886_v26, %v2890_v62 }
 0xc5e   :  { %4519 = vmatmul.mubr.msk.bf16.gmra.mxu0 %vm6705_vm12, %v4518_v25  ;;  %v2937_v35 = vpack.c.bf16 %v2891_v5, %v2887_v10  ;;  %v2915_v3 = vsel %vm505_vm4, %v2913_v18, %v2914_v32  ;;  %v2919_v40 = vsel %vm505_vm4, %v2914_v32, %v2918_v48  ;;  %v4520_v10 = vld [vmem:[%s7102_s13] ss:$0 sm:$0xff] }
 0xc5f   :  { %4700 = vmatpush3.bf16.msra.mxu0 %v5285_v33  ;;  %3358 = vmatprep.mubr.bf16.mxu0 %v2933_v6  ;;  %v2939_v54 = vpack.c.bf16 %v2919_v40, %v2915_v3 }
 0xc60   :  { %3317 = vmatprep.mubr.bf16.mxu1 %v2937_v35  ;;  %4701 = vmatprep.subr.bf16.mxu0 %v5286_v39 }
 0xc61   :  { %3318 = vmatmul.mubr.bf16.gmra.mxu1 %v2936_v19 }
 0xc62   :  { %4806 = vmatpush3.bf16.msra.mxu1 %v5296_v9 }
 0xc63   :  { %4702 = vmatpush3.bf16.msra.mxu0 %v5287_v29  ;;  %4807 = vmatprep.subr.bf16.mxu1 %v5297_v61 }
 0xc64   :  { %4703 = vmatprep.subr.bf16.mxu0 %v5288_v17 }
 0xc66   :  { %4808 = vmatpush3.bf16.msra.mxu1 %v5297_v61 }
 0xc67   :  { %4704 = vmatpush3.bf16.msra.mxu0 %v5289_v14 }
 0xc68   :  { %4705 = vmatprep.subr.bf16.mxu0 %v5290_v45 }
 0xc6b   :  { %4706 = vmatpush3.bf16.msra.mxu0 %v5291_v38 }
 0xc6c   :  { %4707 = vmatprep.subr.bf16.mxu0 %v5292_v31 }
 0xc6f   :  { %4708 = vmatpush3.bf16.msra.mxu0 %v5293_v49 }
 0xc72   :  { %3359 = vmatmul.mubr.bf16.vlgmr.msra.gmra.mxu0 %v2932_v36 }
 0xc73   :  { %3366 = vmatprep.mubr.bf16.mxu0 %v2939_v54 }
 0xc7a   :  { %3367 = vmatmul.mubr.bf16.gmra.mxu0 %v2938_v56 }
 0xd12   :  { %v4653_v42 = vpop.f32.mrf.mxu0 }
 0xd14   :  { %v4654_v58 = vpop.f32.mrf.mxu0 }
 0xd15   :  { %v4681_v59 = vpop.f32.mrf.mxu1  ;;  %v4655_v50 = vadd.f32 %v4654_v58, %v4653_v42 }
 0xd16   :  { %v4656_v53 = vpop.f32.mrf.mxu0 }
 0xd17   :  { %v4682_v41 = vpop.f32.mrf.mxu1 }
 0xd18   :  { %v4657_v60 = vpop.f32.mrf.mxu0  ;;  %v4683_v46 = vadd.f32 %v4682_v41, %v4681_v59 }
 0xd19   :  { %v4684_v37 = vpop.f32.mrf.mxu1  ;;  %v4658_v26 = vadd.f32 %v4657_v60, %v4656_v53 }
 0xd1a   :  { %v3312_v24 = vadd.f32 %v4683_v46, %v4655_v50 }
 0xd1b   :  { %v4685_v20 = vpop.f32.mrf.mxu1 }
 0xd1c   :  { %v4686_v28 = vadd.f32 %v4685_v20, %v4684_v37 }
 0xd1e   :  { %v4659_v51 = vpop.f32.mrf.mxu0  ;;  %v3315_v25 = vadd.f32 %v4686_v28, %v4658_v26 }
 0xd20   :  { %v4660_v16 = vpop.f32.mrf.mxu0 }
 0xd21   :  { %v4687_v23 = vpop.f32.mrf.mxu1  ;;  %v4661_v35 = vadd.f32 %v4660_v16, %v4659_v51 }
 0xd22   :  { %v4662_v63 = vpop.f32.mrf.mxu0 }
 0xd23   :  { %v4688_v34 = vpop.f32.mrf.mxu1 }
 0xd24   :  { %v4663_v44 = vpop.f32.mrf.mxu0  ;;  %v4689_v7 = vadd.f32 %v4688_v34, %v4687_v23 }
 0xd25   :  { %v4690_v1 = vpop.f32.mrf.mxu1  ;;  %v4664_v2 = vadd.f32 %v4663_v44, %v4662_v63 }
 0xd26   :  { %v3320_v14 = vadd.f32 %v4689_v7, %v4661_v35 }
 0xd27   :  { %v4691_v11 = vpop.f32.mrf.mxu1 }
 0xd28   :  { %v4692_v29 = vadd.f32 %v4691_v11, %v4690_v1 }
 0xd2a   :  { %v3323_v32 = vadd.f32 %v4692_v29, %v4664_v2 }
 0xd32   :  { %v4709_v55 = vpop.f32.mrf.mxu0 }
 0xd34   :  { %v4710_v22 = vpop.f32.mrf.mxu0 }
 0xd35   :  { %v4711_v52 = vadd.f32 %v4710_v22, %v4709_v55 }
 0xd36   :  { %v4712_v33 = vpop.f32.mrf.mxu0 }
 0xd37   :  { %v3361_v39 = vadd.f32 %v4711_v52, %v3312_v24 }
 0xd38   :  { %v4713_v62 = vpop.f32.mrf.mxu0 }
 0xd39   :  { %v4714_v6 = vadd.f32 %v4713_v62, %v4712_v33  ;;  %v3381_v45 = vadd.f32 %v4520_v10, %v3361_v39  ;;  %v2822_v33 = vld [vmem:[%s7103_s14] sm:$0x1] }
 0xd3a   :  { %v4715_v5 = vpop.f32.mrf.mxu0  ;;  %v2823_v62 = vld [vmem:[%s7104_s15] sm:$0x1] }
 0xd3b   :  { %v3364_v19 = vadd.f32 %v4714_v6, %v3315_v25  ;;  %v3398_v49 = vmul.f32 %v3381_v45, %v3381_v45  ;;  %v3385_v40 = vsel %vm97_vm0, %v3381_v45, 0.0 }
 0xd3c   :  { %v4716_v17 = vpop.f32.mrf.mxu0 }
 0xd3d   :  { %v3382_v38 = vadd.f32 %v4520_v10, %v3364_v19  ;;  %v4717_v31 = vadd.f32 %v4716_v17, %v4715_v5  ;;  %v3402_v12 = vsel %vm97_vm0, %v3398_v49, 0.0 }
 0xd3e   :  { %v4718_v4 = vpop.f32.mrf.mxu0 }
 0xd3f   :  { %v3399_v47 = vmul.f32 %v3382_v38, %v3382_v38  ;;  %v3369_v18 = vadd.f32 %v4717_v31, %v3320_v14  ;;  %v3386_v21 = vsel %vm97_vm0, %v3382_v38, 0.0 }
 0xd40   :  { %v4719_v48 = vpop.f32.mrf.mxu0  ;;  %v3387_v43 = vadd.f32 %v3386_v21, %v3385_v40 }
 0xd41   :  { %v3383_v0 = vadd.f32 %v4520_v10, %v3369_v18  ;;  %v4720_v3 = vadd.f32 %v4719_v48, %v4718_v4  ;;  %v3403_v36 = vsel %vm97_vm0, %v3399_v47, 0.0  ;;  %v5298_v18 = vld [vmem:[%s7101_s16 + $0x8] sm:$0xff]  }
 0xd42   :  { %v3404_v13 = vadd.f32 %v3403_v36, %v3402_v12  ;;  %4809 = vmatprep.subr.bf16.mxu1 %v5298_v18 }
 0xd43   :  { %v3388_v54 = vsel %vm97_vm0, %v3383_v0, 0.0  ;;  %v3400_v27 = vmul.f32 %v3383_v0, %v3383_v0  ;;  %v3372_v8 = vadd.f32 %v4720_v3, %v3323_v32  ;;  %4810 = vmatpush3.bf16.msra.mxu1 %v5298_v18 }
 0xd44   :  { %v3389_v15 = vadd.f32 %v3388_v54, %v3387_v43 }
 0xd45   :  { %v3405_v30 = vsel %vm97_vm0, %v3400_v27, 0.0  ;;  %v3384_v56 = vadd.f32 %v4520_v10, %v3372_v8 }
 0xd46   :  { %v3406_v42 = vadd.f32 %v3405_v30, %v3404_v13 }
 0xd47   :  { %v3390_v9 = vsel %vm97_vm0, %v3384_v56, 0.0  ;;  %v3401_v61 = vmul.f32 %v3384_v56, %v3384_v56 }
 0xd48   :  { %v3391_v58 = vadd.f32 %v3390_v9, %v3389_v15 }
 0xd49   :  { %v3407_v53 = vsel %vm97_vm0, %v3401_v61, 0.0 }
 0xd4a   :  { %v3392_v59 = vrot.slane %v3391_v58, 4  ;;  %v3408_v60 = vadd.f32 %v3407_v53, %v3406_v42 }
 0xd4c   :  { %v3393_v41 = vadd.f32 %v3392_v59, %v3391_v58  ;;  %v3409_v51 = vrot.slane %v3408_v60, 4 }
 0xd4e   :  { %v3394_v37 = vrot.slane %v3393_v41, 2  ;;  %v3410_v16 = vadd.f32 %v3409_v51, %v3408_v60 }
 0xd50   :  { %v3395_v20 = vadd.f32 %v3394_v37, %v3393_v41  ;;  %v3411_v63 = vrot.slane %v3410_v16, 2 }
 0xd52   :  { %v3396_v23 = vrot.slane %v3395_v20, 1  ;;  %v3412_v44 = vadd.f32 %v3411_v63, %v3410_v16 }
 0xd54   :  { %v3397_v34 = vadd.f32 %v3396_v23, %v3395_v20  ;;  %v3413_v55 = vrot.slane %v3412_v44, 1 }
 0xd56   :  { %v3414_v46 = vadd.f32 %v3413_v55, %v3412_v44  ;;  %v3415_v22 = vmul.f32 0.03125, %v3397_v34 }
 0xd58   :  { %v3416_v50 = vmul.f32 0.03125, %v3414_v46  ;;  %v3417_v28 = vmul.f32 %v3415_v22, %v3415_v22 }
 0xd5a   :  { %v3418_v1 = vsub.f32 %v3416_v50, %v3417_v28 }
 0xd5c   :  { %v3419_v52 = vadd.f32 1e-05, %v3418_v1 }
 0xd5e   :  { %5324 = vrsqrt.f32 %v3419_v52 }
 0xd6b   :  { %v5325_v24 = vpop.eup %5324 }
 0xd6c   :  { %v3421_v26 = vmul.f32 %v5325_v24, %v2822_v33 }
 0xd6e   :  { %v3422_v25 = vmul.f32 %v3421_v26, %v3415_v22  ;;  %v3428_v7 = vrot.slane %v3421_v26, %v5556_v57 }
 0xd70   :  { %v3423_v11 = vsub.f32 %v2823_v62, %v3422_v25  ;;  %v3433_v39 = vmul.f32 %v3428_v7, %v3384_v56  ;;  %v3432_v10 = vmul.f32 %v3428_v7, %v3383_v0  ;;  %v3430_v5 = vmul.f32 %v3428_v7, %v3381_v45  ;;  %v5299_v56 = vld [vmem:[%s7101_s16] sm:$0xff]  }
 0xd71   :  { %v3431_v35 = vmul.f32 %v3428_v7, %v3382_v38  ;;  %4811 = vmatprep.subr.bf16.mxu1 %v5299_v56 }
 0xd72   :  { %v3438_v6 = vrot.slane %v3423_v11, %v5556_v57  ;;  %4812 = vmatpush3.bf16.msra.mxu1 %v5299_v56 }
 0xd74   :  { %v3443_v19 = vadd.f32 %v3438_v6, %v3433_v39  ;;  %v3442_v29 = vadd.f32 %v3438_v6, %v3432_v10  ;;  %v3440_v17 = vadd.f32 %v3438_v6, %v3430_v5  ;;  %v3441_v14 = vadd.f32 %v3438_v6, %v3431_v35 }
 0xd76   :  { %v3447_v31 = vmax.f32 %v3443_v19, 0.0  ;;  %v3446_v2 = vmax.f32 %v3442_v29, 0.0  ;;  %v3444_v4 = vmax.f32 %v3440_v17, 0.0  ;;  %v3445_v47 = vmax.f32 %v3441_v14, 0.0  ;;  %v5300_v14 = vld [vmem:[%s7105_s20 + $0x8] sm:$0xff]  }
 0xd77   :  { %4817 = vmatprep.subr.bf16.mxu1 %v5300_v14 }
 0xd78   :  { %v3471_v32 = vrot.slane %v3447_v31, 7  ;;  %v3470_v48 = vrot.slane %v3446_v2, 7  ;;  %v3467_v49 = vrot.slane %v3444_v4, 7  ;;  %v3468_v21 = vrot.slane %v3445_v47, 7  ;;  %v5301_v31 = vld [vmem:[%s7105_s20] sm:$0xff]  }
 0xd79   :  { %v4529_v4 = vld [vmem:[%s7106_s17] ss:$0 sm:$0xff] }
 0xd7a   :  { %v3472_v45 = vsel %vm244_vm1, %v3470_v48, %v3471_v32  ;;  %v3480_v38 = vsel %vm244_vm1, 0.0, %v3470_v48  ;;  %v3482_v0 = vsel %vm244_vm1, %v3471_v32, 0.0  ;;  %v3469_v3 = vsel %vm244_vm1, %v3467_v49, %v3468_v21 }
 0xd7b   :  { %v3492_v40 = vrot.slane %v3480_v38, 1  ;;  %v3493_v36 = vrot.slane %v3472_v45, 1  ;;  %v3495_v54 = vrot.slane %v3482_v0, 1  ;;  %v3479_v27 = vsel %vm244_vm1, 0.0, %v3467_v49 }
 0xd7c   :  { %v3481_v8 = vsel %vm244_vm1, %v3468_v21, 0.0  ;;  %v3487_v43 = vrot.slane %v3479_v27, 1  ;;  %v3488_v12 = vrot.slane %v3469_v3, 1  ;;  %v3514_v30 = vrot.slane %v3480_v38, 2 }
 0xd7d   :  { %v3494_v13 = vsel %vm259_vm2, %v3492_v40, %v3493_v36  ;;  %v3496_v15 = vsel %vm259_vm2, %v3493_v36, %v3495_v54  ;;  %v3490_v9 = vrot.slane %v3481_v8, 1  ;;  %v3515_v61 = vrot.slane %v3472_v45, 2 }
 0xd7e   :  { %v5159_v42 = vpack.i.bf16 %v3496_v15, %v3494_v13  ;;  %v3489_v58 = vsel %vm259_vm2, %v3487_v43, %v3488_v12  ;;  %v3517_v53 = vrot.slane %v3482_v0, 2  ;;  %v3509_v59 = vrot.slane %v3479_v27, 2 }
 0xd7f   :  { %v3491_v60 = vsel %vm259_vm2, %v3488_v12, %v3490_v9  ;;  %v3516_v41 = vsel %vm505_vm4, %v3514_v30, %v3515_v61  ;;  %v3510_v51 = vrot.slane %v3469_v3, 2  ;;  %v3512_v37 = vrot.slane %v3481_v8, 2 }
 0xd80   :  { %5160 = vrot.lane.b32.xlu1 %v5159_v42, %s5396_s28  ;;  %v5154_v16 = vpack.i.bf16 %v3491_v60, %v3489_v58  ;;  %v3518_v20 = vsel %vm505_vm4, %v3515_v61, %v3517_v53 }
 0xd81   :  { %v3511_v63 = vsel %vm505_vm4, %v3509_v59, %v3510_v51  ;;  %v3513_v23 = vsel %vm505_vm4, %v3510_v51, %v3512_v37  ;;  %v5169_v44 = vpack.i.bf16 %v3518_v20, %v3516_v41 }
 0xd82   :  { %5155 = vrot.lane.b32.xlu0 %v5154_v16, %s5396_s28  ;;  %v5164_v34 = vpack.i.bf16 %v3513_v23, %v3511_v63 }
 0xd84   :  { %5170 = vrot.lane.b32.xlu1 %v5169_v44, %s5397_s10 }
 0xd86   :  { %5165 = vrot.lane.b32.xlu0 %v5164_v34, %s5397_s10 }
 0xdf2   :  { %v5161_v55 = vpop.permute.xlu1 %5160 }
 0xdf3   :  { %v5163_v46 = vunpack.i.h.bf16 %v5161_v55  ;;  %v5162_v22 = vunpack.i.l.bf16 %v5161_v55 }
 0xdf4   :  { %v5156_v50 = vpop.permute.xlu0 %5155 }
 0xdf5   :  { %v5158_v28 = vunpack.i.h.bf16 %v5156_v50  ;;  %v5157_v1 = vunpack.i.l.bf16 %v5156_v50  ;;  %v3534_v26 = vsel %vm97_vm0, %v3472_v45, %v5163_v46  ;;  %v3533_v62 = vsel %vm97_vm0, %v3480_v38, %v5162_v22 }
 0xdf6   :  { %v5171_v52 = vpop.permute.xlu1 %5170 }
 0xdf7   :  { %v5173_v33 = vunpack.i.h.bf16 %v5171_v52  ;;  %v5172_v24 = vunpack.i.l.bf16 %v5171_v52  ;;  %v3532_v10 = vsel %vm97_vm0, %v3469_v3, %v5158_v28  ;;  %v3531_v5 = vsel %vm97_vm0, %v3479_v27, %v5157_v1  ;;  %v3461_v1 = vld [vmem:[%s7107_s18] sm:$0x1] }
 0xdf8   :  { %v5166_v25 = vpop.permute.xlu0 %5165 }
 0xdf9   :  { %v3537_v7 = vsel %vm312_vm3, %v3533_v62, %v5172_v24  ;;  %v3538_v11 = vsel %vm312_vm3, %v3534_v26, %v5173_v33  ;;  %v5168_v39 = vunpack.i.h.bf16 %v5166_v25  ;;  %v5167_v6 = vunpack.i.l.bf16 %v5166_v25  ;;  %v3462_v24 = vld [vmem:[%s7108_s19] sm:$0x1] }
 0xdfa   :  { %v3540_v35 = vpack.c.bf16 %v3538_v11, %v3537_v7 }
 0xdfb   :  { %v3535_v19 = vsel %vm312_vm3, %v3531_v5, %v5167_v6  ;;  %v3536_v29 = vsel %vm312_vm3, %v3532_v10, %v5168_v39 }
 0xdfc   :  { %v3539_v17 = vpack.c.bf16 %v3536_v29, %v3535_v19 }
 0xdfe   :  { %4813 = vmatprep.mubr.msk.bf16.mxu1 %vm574_vm5, %v3539_v17  ;;  %v5392_v17 = vld [vmem:[%s7126_s0 + $0x8] sm:$0xff] }
 0xdff   :  { %4814 = vmatmul.mubr.msk.bf16.vlgmr.msra.gmra.mxu1 %vm574_vm5, %v3540_v35 }
 0xe00   :  { %4818 = vmatpush3.bf16.msra.mxu1 %v5300_v14 }
 0xe01   :  { %4819 = vmatprep.subr.bf16.mxu1 %v5301_v31 }
 0xe04   :  { %4820 = vmatpush3.bf16.msra.mxu1 %v5301_v31  ;;  %v5393_v31 = vld [vmem:[%s7126_s0] sm:$0xff] }
 0xebf   :  { %v4815_v2 = vpop.f32.mrf.mxu1 }
 0xec0   :  { %v3640_v48 = vadd.f32 %v4815_v2, %v4529_v4 }
 0xec1   :  { %v3617_v47 = vpop.f32.mrf.mxu1 }
 0xec2   :  { %v3638_v18 = vadd.f32 %v4529_v4, %v3617_v47  ;;  %v3657_v0 = vmul.f32 %v3640_v48, %v3640_v48  ;;  %v3645_v27 = vsel %vm97_vm0, %v3640_v48, 0.0  ;;  %v5395_v47 = vld [vmem:[%s7126_s0 + $0x18] sm:$0xff] }
 0xec3   :  { %v4816_v32 = vpop.f32.mrf.mxu1 }
 0xec4   :  { %v3655_v21 = vmul.f32 %v3638_v18, %v3638_v18  ;;  %v3641_v45 = vadd.f32 %v4816_v32, %v4529_v4  ;;  %v3642_v3 = vsel %vm97_vm0, %v3638_v18, 0.0  ;;  %v3662_v13 = vsel %vm97_vm0, %v3657_v0, 0.0 }
 0xec5   :  { %v3620_v49 = vpop.f32.mrf.mxu1 }
 0xec6   :  { %v3639_v38 = vadd.f32 %v4529_v4, %v3620_v49  ;;  %v3659_v8 = vsel %vm97_vm0, %v3655_v21, 0.0  ;;  %v3658_v43 = vmul.f32 %v3641_v45, %v3641_v45  ;;  %v3647_v15 = vsel %vm97_vm0, %v3641_v45, 0.0  ;;  %v4530_v49 = vld [vmem:[%s7109_s21] ss:$0 sm:$0xff] }
 0xec8   :  { %v3643_v40 = vsel %vm97_vm0, %v3639_v38, 0.0  ;;  %v3656_v36 = vmul.f32 %v3639_v38, %v3639_v38  ;;  %v3664_v42 = vsel %vm97_vm0, %v3658_v43, 0.0 }
 0xec9   :  { %v3644_v54 = vadd.f32 %v3643_v40, %v3642_v3 }
 0xeca   :  { %v3660_v12 = vsel %vm97_vm0, %v3656_v36, 0.0 }
 0xecb   :  { %v3646_v30 = vadd.f32 %v3645_v27, %v3644_v54  ;;  %v3661_v56 = vadd.f32 %v3660_v12, %v3659_v8 }
 0xecd   :  { %v3648_v9 = vadd.f32 %v3647_v15, %v3646_v30  ;;  %v3663_v61 = vadd.f32 %v3662_v13, %v3661_v56 }
 0xecf   :  { %v3649_v58 = vrot.slane %v3648_v9, 4  ;;  %v3665_v53 = vadd.f32 %v3664_v42, %v3663_v61 }
 0xed1   :  { %v3650_v59 = vadd.f32 %v3649_v58, %v3648_v9  ;;  %v3666_v60 = vrot.slane %v3665_v53, 4 }
 0xed3   :  { %v3651_v41 = vrot.slane %v3650_v59, 2  ;;  %v3667_v51 = vadd.f32 %v3666_v60, %v3665_v53 }
 0xed5   :  { %v3652_v37 = vadd.f32 %v3651_v41, %v3650_v59  ;;  %v3668_v16 = vrot.slane %v3667_v51, 2  ;;  %v5302_v41 = vld [vmem:[%s7105_s20 + $0x18] sm:$0xff]  }
 0xed6   :  { %4825 = vmatprep.subr.bf16.mxu1 %v5302_v41 }
 0xed7   :  { %v3653_v20 = vrot.slane %v3652_v37, 1  ;;  %v3669_v63 = vadd.f32 %v3668_v16, %v3667_v51  ;;  %v5303_v16 = vld [vmem:[%s7105_s20 + $0x10] sm:$0xff]  }
 0xed9   :  { %v3654_v23 = vadd.f32 %v3653_v20, %v3652_v37  ;;  %v3670_v44 = vrot.slane %v3669_v63, 1 }
 0xedb   :  { %v3671_v34 = vadd.f32 %v3670_v44, %v3669_v63  ;;  %v3672_v55 = vmul.f32 0.03125, %v3654_v23 }
 0xedd   :  { %v3673_v46 = vmul.f32 0.03125, %v3671_v34  ;;  %v3674_v22 = vmul.f32 %v3672_v55, %v3672_v55 }
 0xedf   :  { %v3675_v50 = vsub.f32 %v3673_v46, %v3674_v22 }
 0xee1   :  { %v3676_v28 = vadd.f32 1e-05, %v3675_v50 }
 0xee3   :  { %5326 = vrsqrt.f32 %v3676_v28 }
 0xef0   :  { %v5327_v52 = vpop.eup %5326 }
 0xef1   :  { %v3678_v33 = vmul.f32 %v5327_v52, %v3461_v1 }
 0xef3   :  { %v3679_v26 = vmul.f32 %v3678_v33, %v3672_v55  ;;  %v3685_v62 = vrot.slane %v3678_v33, %v5556_v57 }
 0xef5   :  { %v3680_v25 = vsub.f32 %v3462_v24, %v3679_v26  ;;  %v3688_v7 = vmul.f32 %v3685_v62, %v3639_v38  ;;  %v3687_v39 = vmul.f32 %v3685_v62, %v3638_v18  ;;  %v3689_v6 = vmul.f32 %v3685_v62, %v3640_v48 }
 0xef6   :  { %v3690_v10 = vmul.f32 %v3685_v62, %v3641_v45 }
 0xef7   :  { %v3695_v11 = vrot.slane %v3680_v25, %v5556_v57  ;;  %v5394_v57 = vld [vmem:[%s7126_s0 + $0x10] sm:$0xff] }
 0xef9   :  { %v3698_v5 = vadd.f32 %v3695_v11, %v3688_v7  ;;  %v3697_v35 = vadd.f32 %v3695_v11, %v3687_v39  ;;  %v3699_v19 = vadd.f32 %v3695_v11, %v3689_v6  ;;  %v3700_v29 = vadd.f32 %v3695_v11, %v3690_v10 }
 0xefb   :  { %v6905_v14 = vadd.f32 %v5392_v17, %v3698_v5  ;;  %v6910_v2 = vadd.f32 %v5393_v31, %v3697_v35  ;;  %v6915_v4 = vadd.f32 %v5394_v57, %v3699_v19  ;;  %v6920_v18 = vadd.f32 %v5395_v47, %v3700_v29 }
 0xefd   :  { %v3705_v32 = vpack.c.bf16 %v6905_v14, %v6910_v2  ;;  %v3706_v48 = vpack.c.bf16 %v6920_v18, %v6915_v4 }
 0xeff   :  { %4821 = vmatprep.mubr.msk.bf16.mxu1 %vm97_vm0, %v3705_v32 }
 0xf00   :  { %4822 = vmatmul.mubr.msk.bf16.vlgmr.msra.gmra.mxu1 %vm97_vm0, %v3706_v48 }
 0xf01   :  { %4826 = vmatpush3.bf16.msra.mxu1 %v5302_v41 }
 0xf02   :  { %4827 = vmatprep.subr.bf16.mxu1 %v5303_v16 }
 0xf05   :  { %4828 = vmatpush3.bf16.msra.mxu1 %v5303_v16 }
 0xfc0   :  { %v4823_v21 = vpop.f32.mrf.mxu1 }
 0xfc1   :  { %v6931_v45 = vadd.f32 %v4823_v21, %v4530_v49 }
 0xfc2   :  { %v3770_v38 = vpop.f32.mrf.mxu1 }
 0xfc3   :  { %v4537_v0 = vmul.f32 -1.442695, %v6931_v45  ;;  %v3771_v3 = vadd.f32 %v4530_v49, %v3770_v38  ;;  %v3787_v25 = vmax.f32 %v6931_v45, 0.0 }
 0xfc4   :  { %v4824_v40 = vpop.f32.mrf.mxu1 }
 0xfc5   :  { %5328 = vpow2.f32 %v4537_v0  ;;  %v4535_v36 = vmul.f32 -1.442695, %v3771_v3  ;;  %v6934_v54 = vadd.f32 %v4824_v40, %v4530_v49  ;;  %v3785_v50 = vmax.f32 %v3771_v3, 0.0 }
 0xfc6   :  { %v3773_v27 = vpop.f32.mrf.mxu1 }
 0xfc7   :  { %5330 = vpow2.f32 %v4535_v36  ;;  %v4538_v8 = vmul.f32 -1.442695, %v6934_v54  ;;  %v3774_v43 = vadd.f32 %v4530_v49, %v3773_v27  ;;  %v3788_v7 = vmax.f32 %v6934_v54, 0.0 }
 0xfc9   :  { %5332 = vpow2.f32 %v4538_v8  ;;  %v4536_v12 = vmul.f32 -1.442695, %v3774_v43  ;;  %v3786_v28 = vmax.f32 %v3774_v43, 0.0 }
 0xfcb   :  { %5334 = vpow2.f32 %v4536_v12 }
 0xfd2   :  { %v5329_v30 = vpop.eup %5328 }
 0xfd3   :  { %v3803_v56 = vadd.f32 1.0, %v5329_v30 }
 0xfd4   :  { %v5331_v13 = vpop.eup %5330 }
 0xfd5   :  { %5336 = vrcp.f32 %v3803_v56  ;;  %v3801_v15 = vadd.f32 1.0, %v5331_v13  ;;  %v5304_v56 = vld [vmem:[%s7105_s20 + $0x28] sm:$0xff]  }
 0xfd6   :  { %v5333_v9 = vpop.eup %5332  ;;  %4833 = vmatprep.subr.bf16.mxu0 %v5304_v56 }
 0xfd7   :  { %v3804_v61 = vadd.f32 1.0, %v5333_v9  ;;  %5338 = vrcp.f32 %v3801_v15  ;;  %4834 = vmatpush3.bf16.msra.mxu0 %v5304_v56 }
 0xfd8   :  { %v5335_v42 = vpop.eup %5334 }
 0xfd9   :  { %5340 = vrcp.f32 %v3804_v61  ;;  %v3802_v58 = vadd.f32 1.0, %v5335_v42  ;;  %v5305_v61 = vld [vmem:[%s7105_s20 + $0x20] sm:$0xff]  }
 0xfda   :  { %4835 = vmatprep.subr.bf16.mxu0 %v5305_v61 }
 0xfdb   :  { %5342 = vrcp.f32 %v3802_v58  ;;  %4836 = vmatpush3.bf16.msra.mxu0 %v5305_v61 }
 0xfe2   :  { %v5337_v53 = vpop.eup %5336 }
 0xfe3   :  { %3821 = vrot.lane.b32.xlu0 %v5337_v53, %s5398_s4  ;;  %v3835_v63 = vsub.f32 1.0, %v5337_v53 }
 0xfe4   :  { %v5339_v59 = vpop.eup %5338 }
 0xfe5   :  { %v3833_v51 = vsub.f32 1.0, %v5339_v59 }
 0xfe6   :  { %v5341_v60 = vpop.eup %5340 }
 0xfe7   :  { %3823 = vrot.lane.b32.xlu1 %v5341_v60, %s5398_s4  ;;  %3817 = vrot.lane.b32.xlu0 %v5339_v59, %s5398_s4  ;;  %v3836_v23 = vsub.f32 1.0, %v5341_v60 }
 0xfe8   :  { %v5343_v37 = vpop.eup %5342 }
 0xfe9   :  { %v3834_v20 = vsub.f32 1.0, %v5343_v37 }
 0xfeb   :  { %3819 = vrot.lane.b32.xlu1 %v5343_v37, %s5398_s4  ;;  %3841 = vrot.lane.b32.xlu0 %v3833_v51, %s5398_s4 }
 0xfef   :  { %3843 = vrot.lane.b32.xlu1 %v3834_v20, %s5398_s4  ;;  %3845 = vrot.lane.b32.xlu0 %v3835_v63, %s5398_s4 }
 0xff3   :  { %3847 = vrot.lane.b32.xlu1 %v3836_v23, %s5398_s4 }
0x1055   :  { %v3822_v44 = vpop.permute.xlu0 %3821 }
0x1056   :  { %v3831_v5 = vmul.f32 %v3822_v44, %v3787_v25 }
0x1059   :  { %v3824_v34 = vpop.permute.xlu1 %3823  ;;  %v3818_v55 = vpop.permute.xlu0 %3817 }
0x105a   :  { %v3829_v24 = vmul.f32 %v3818_v55, %v3785_v50  ;;  %v3832_v35 = vmul.f32 %v3824_v34, %v3788_v7 }
0x105d   :  { %v3820_v46 = vpop.permute.xlu1 %3819  ;;  %v3842_v22 = vpop.permute.xlu0 %3841 }
0x105e   :  { %v3853_v1 = vmul.f32 %v3842_v22, %v6910_v2  ;;  %v3830_v26 = vmul.f32 %v3820_v46, %v3786_v28  ;;  %v4544_v2 = vld [vmem:[%s7109_s21 + $0x1] ss:$0 sm:$0xff] }
0x1060   :  { %v6955_v11 = vadd.f32 %v3853_v1, %v3829_v24 }
0x1061   :  { %v3844_v52 = vpop.permute.xlu1 %3843  ;;  %v3846_v33 = vpop.permute.xlu0 %3845 }
0x1062   :  { %v3854_v62 = vmul.f32 %v3844_v52, %v6905_v14  ;;  %v3855_v6 = vmul.f32 %v3846_v33, %v6915_v4 }
0x1064   :  { %v6957_v39 = vadd.f32 %v3854_v62, %v3830_v26  ;;  %v6963_v17 = vadd.f32 %v3855_v6, %v3831_v5  ;;  %v4558_v5 = vld [vmem:[%s7109_s21 + $0x2] ss:$0 sm:$0xff] }
0x1065   :  { %v3848_v10 = vpop.permute.xlu1 %3847 }
0x1066   :  { %v3861_v19 = vpack.c.bf16 %v6957_v39, %v6955_v11  ;;  %v3856_v29 = vmul.f32 %v3848_v10, %v6920_v18 }
0x1068   :  { %v6965_v14 = vadd.f32 %v3856_v29, %v3832_v35  ;;  %4829 = vmatprep.mubr.msk.bf16.mxu1 %vm97_vm0, %v3861_v19 }
0x106a   :  { %v3862_v31 = vpack.c.bf16 %v6965_v14, %v6963_v17 }
0x106c   :  { %4830 = vmatmul.mubr.msk.bf16.vlgmr.msra.gmra.mxu1 %vm97_vm0, %v3862_v31 }
0x112c   :  { %v4831_v57 = vpop.f32.mrf.mxu1 }
0x112d   :  { %v6974_v4 = vadd.f32 %v4831_v57, %v4544_v2 }
0x112e   :  { %v3928_v47 = vpop.f32.mrf.mxu1 }
0x112f   :  { %v4551_v18 = vmul.f32 -1.442695, %v6974_v4  ;;  %v3929_v32 = vadd.f32 %v4544_v2, %v3928_v47  ;;  %v3945_v28 = vmax.f32 %v6974_v4, 0.0 }
0x1130   :  { %v4832_v48 = vpop.f32.mrf.mxu1 }
0x1131   :  { %5344 = vpow2.f32 %v4551_v18  ;;  %v4549_v49 = vmul.f32 -1.442695, %v3929_v32  ;;  %v6977_v21 = vadd.f32 %v4832_v48, %v4544_v2  ;;  %v3943_v63 = vmax.f32 %v3929_v32, 0.0 }
0x1132   :  { %v3931_v45 = vpop.f32.mrf.mxu1 }
0x1133   :  { %5346 = vpow2.f32 %v4549_v49  ;;  %v4552_v38 = vmul.f32 -1.442695, %v6977_v21  ;;  %v3932_v0 = vadd.f32 %v4544_v2, %v3931_v45  ;;  %v3946_v1 = vmax.f32 %v6977_v21, 0.0 }
0x1135   :  { %5348 = vpow2.f32 %v4552_v38  ;;  %v4550_v3 = vmul.f32 -1.442695, %v3932_v0  ;;  %v3944_v23 = vmax.f32 %v3932_v0, 0.0 }
0x1137   :  { %5350 = vpow2.f32 %v4550_v3 }
0x113e   :  { %v5345_v40 = vpop.eup %5344 }
0x113f   :  { %v3961_v36 = vadd.f32 1.0, %v5345_v40 }
0x1140   :  { %v5347_v54 = vpop.eup %5346 }
0x1141   :  { %5352 = vrcp.f32 %v3961_v36  ;;  %v3959_v27 = vadd.f32 1.0, %v5347_v54 }
0x1142   :  { %v5349_v8 = vpop.eup %5348 }
0x1143   :  { %v3962_v43 = vadd.f32 1.0, %v5349_v8  ;;  %5354 = vrcp.f32 %v3959_v27  ;;  %v5306_v8 = vld [vmem:[%s7105_s20 + $0x38] sm:$0xff]  }
0x1144   :  { %v5351_v12 = vpop.eup %5350  ;;  %4841 = vmatprep.subr.bf16.mxu1 %v5306_v8 }
0x1145   :  { %5356 = vrcp.f32 %v3962_v43  ;;  %v3960_v30 = vadd.f32 1.0, %v5351_v12  ;;  %4842 = vmatpush3.bf16.msra.mxu1 %v5306_v8 }
0x1147   :  { %5358 = vrcp.f32 %v3960_v30  ;;  %v5307_v30 = vld [vmem:[%s7105_s20 + $0x30] sm:$0xff]  }
0x1148   :  { %4843 = vmatprep.subr.bf16.mxu1 %v5307_v30 }
0x1149   :  { %4844 = vmatpush3.bf16.msra.mxu1 %v5307_v30 }
0x114e   :  { %v5353_v13 = vpop.eup %5352 }
0x114f   :  { %3979 = vrot.lane.b32.xlu0 %v5353_v13, %s5398_s4  ;;  %v3993_v59 = vsub.f32 1.0, %v5353_v13 }
0x1150   :  { %v5355_v15 = vpop.eup %5354 }
0x1151   :  { %v3991_v42 = vsub.f32 1.0, %v5355_v15 }
0x1152   :  { %v5357_v9 = vpop.eup %5356 }
0x1153   :  { %3981 = vrot.lane.b32.xlu1 %v5357_v9, %s5398_s4  ;;  %3975 = vrot.lane.b32.xlu0 %v5355_v15, %s5398_s4  ;;  %v3994_v60 = vsub.f32 1.0, %v5357_v9 }
0x1154   :  { %v5359_v58 = vpop.eup %5358 }
0x1155   :  { %v3992_v53 = vsub.f32 1.0, %v5359_v58 }
0x1157   :  { %3977 = vrot.lane.b32.xlu1 %v5359_v58, %s5398_s4  ;;  %3999 = vrot.lane.b32.xlu0 %v3991_v42, %s5398_s4 }
0x115b   :  { %4001 = vrot.lane.b32.xlu1 %v3992_v53, %s5398_s4  ;;  %4003 = vrot.lane.b32.xlu0 %v3993_v59, %s5398_s4 }
0x115f   :  { %4005 = vrot.lane.b32.xlu1 %v3994_v60, %s5398_s4 }
0x11c1   :  { %v3980_v41 = vpop.permute.xlu0 %3979 }
0x11c2   :  { %v3989_v62 = vmul.f32 %v3980_v41, %v3945_v28 }
0x11c5   :  { %v3982_v51 = vpop.permute.xlu1 %3981  ;;  %v3976_v37 = vpop.permute.xlu0 %3975 }
0x11c6   :  { %v3987_v46 = vmul.f32 %v3976_v37, %v3943_v63  ;;  %v3990_v25 = vmul.f32 %v3982_v51, %v3946_v1 }
0x11c9   :  { %v3978_v16 = vpop.permute.xlu1 %3977  ;;  %v4000_v20 = vpop.permute.xlu0 %3999 }
0x11ca   :  { %v4011_v44 = vmul.f32 %v4000_v20, %v6955_v11  ;;  %v3988_v22 = vmul.f32 %v3978_v16, %v3944_v23 }
0x11cc   :  { %v6998_v52 = vadd.f32 %v4011_v44, %v3987_v46 }
0x11cd   :  { %v4002_v34 = vpop.permute.xlu1 %4001  ;;  %v4004_v55 = vpop.permute.xlu0 %4003 }
0x11ce   :  { %v4012_v50 = vmul.f32 %v4002_v34, %v6957_v39  ;;  %v4013_v24 = vmul.f32 %v4004_v55, %v6963_v17 }
0x11d0   :  { %v7000_v33 = vadd.f32 %v4012_v50, %v3988_v22  ;;  %v7006_v6 = vadd.f32 %v4013_v24, %v3989_v62  ;;  %v4572_v62 = vld [vmem:[%s7109_s21 + $0x3] ss:$0 sm:$0xff] }
0x11d1   :  { %v4006_v26 = vpop.permute.xlu1 %4005 }
0x11d2   :  { %v4019_v7 = vpack.c.bf16 %v7000_v33, %v6998_v52  ;;  %v4014_v11 = vmul.f32 %v4006_v26, %v6965_v14 }
0x11d4   :  { %v7008_v39 = vadd.f32 %v4014_v11, %v3990_v25  ;;  %4837 = vmatprep.mubr.msk.bf16.mxu0 %vm97_vm0, %v4019_v7 }
0x11d6   :  { %v4020_v10 = vpack.c.bf16 %v7008_v39, %v7006_v6 }
0x11d8   :  { %4838 = vmatmul.mubr.msk.bf16.vlgmr.msra.gmra.mxu0 %vm97_vm0, %v4020_v10 }
0x1298   :  { %v4839_v35 = vpop.f32.mrf.mxu0 }
0x1299   :  { %v7017_v19 = vadd.f32 %v4839_v35, %v4558_v5 }
0x129a   :  { %v4086_v29 = vpop.f32.mrf.mxu0 }
0x129b   :  { %v4565_v17 = vmul.f32 -1.442695, %v7017_v19  ;;  %v4087_v14 = vadd.f32 %v4558_v5, %v4086_v29  ;;  %v4103_v23 = vmax.f32 %v7017_v19, 0.0 }
0x129c   :  { %v4840_v31 = vpop.f32.mrf.mxu0 }
0x129d   :  { %5360 = vpow2.f32 %v4565_v17  ;;  %v4563_v2 = vmul.f32 -1.442695, %v4087_v14  ;;  %v7020_v57 = vadd.f32 %v4840_v31, %v4558_v5  ;;  %v4101_v59 = vmax.f32 %v4087_v14, 0.0 }
0x129e   :  { %v4089_v4 = vpop.f32.mrf.mxu0 }
0x129f   :  { %5362 = vpow2.f32 %v4563_v2  ;;  %v4566_v47 = vmul.f32 -1.442695, %v7020_v57  ;;  %v4090_v18 = vadd.f32 %v4558_v5, %v4089_v4  ;;  %v4104_v44 = vmax.f32 %v7020_v57, 0.0 }
0x12a1   :  { %5364 = vpow2.f32 %v4566_v47  ;;  %v4564_v32 = vmul.f32 -1.442695, %v4090_v18  ;;  %v4102_v60 = vmax.f32 %v4090_v18, 0.0 }
0x12a3   :  { %5366 = vpow2.f32 %v4564_v32 }
0x12aa   :  { %v5361_v48 = vpop.eup %5360 }
0x12ab   :  { %v4119_v49 = vadd.f32 1.0, %v5361_v48 }
0x12ac   :  { %v5363_v21 = vpop.eup %5362 }
0x12ad   :  { %5368 = vrcp.f32 %v4119_v49  ;;  %v4117_v45 = vadd.f32 1.0, %v5363_v21 }
0x12ae   :  { %v5365_v38 = vpop.eup %5364 }
0x12af   :  { %v4120_v0 = vadd.f32 1.0, %v5365_v38  ;;  %5370 = vrcp.f32 %v4117_v45 }
0x12b0   :  { %v5367_v3 = vpop.eup %5366 }
0x12b1   :  { %5372 = vrcp.f32 %v4120_v0  ;;  %v4118_v40 = vadd.f32 1.0, %v5367_v3 }
0x12b3   :  { %5374 = vrcp.f32 %v4118_v40 }
0x12ba   :  { %v5369_v36 = vpop.eup %5368 }
0x12bb   :  { %4137 = vrot.lane.b32.xlu0 %v5369_v36, %s5398_s4  ;;  %v4151_v13 = vsub.f32 1.0, %v5369_v36 }
0x12bc   :  { %v5371_v54 = vpop.eup %5370 }
0x12bd   :  { %v4149_v43 = vsub.f32 1.0, %v5371_v54 }
0x12be   :  { %v5373_v27 = vpop.eup %5372 }
0x12bf   :  { %4139 = vrot.lane.b32.xlu1 %v5373_v27, %s5398_s4  ;;  %4133 = vrot.lane.b32.xlu0 %v5371_v54, %s5398_s4  ;;  %v4152_v15 = vsub.f32 1.0, %v5373_v27 }
0x12c0   :  { %v5375_v12 = vpop.eup %5374 }
0x12c1   :  { %v4150_v56 = vsub.f32 1.0, %v5375_v12 }
0x12c3   :  { %4135 = vrot.lane.b32.xlu1 %v5375_v12, %s5398_s4  ;;  %4157 = vrot.lane.b32.xlu0 %v4149_v43, %s5398_s4 }
0x12c7   :  { %4159 = vrot.lane.b32.xlu1 %v4150_v56, %s5398_s4  ;;  %4161 = vrot.lane.b32.xlu0 %v4151_v13, %s5398_s4 }
0x12cb   :  { %4163 = vrot.lane.b32.xlu1 %v4152_v15, %s5398_s4 }
0x132d   :  { %v4138_v9 = vpop.permute.xlu0 %4137 }
0x132e   :  { %v4147_v50 = vmul.f32 %v4138_v9, %v4103_v23 }
0x1331   :  { %v4140_v61 = vpop.permute.xlu1 %4139  ;;  %v4134_v42 = vpop.permute.xlu0 %4133 }
0x1332   :  { %v4145_v16 = vmul.f32 %v4134_v42, %v4101_v59  ;;  %v4148_v28 = vmul.f32 %v4140_v61, %v4104_v44 }
0x1335   :  { %v4136_v58 = vpop.permute.xlu1 %4135  ;;  %v4158_v53 = vpop.permute.xlu0 %4157 }
0x1336   :  { %v4169_v41 = vmul.f32 %v4158_v53, %v6998_v52  ;;  %v4146_v20 = vmul.f32 %v4136_v58, %v4102_v60 }
0x1338   :  { %v7041_v34 = vadd.f32 %v4169_v41, %v4145_v16 }
0x1339   :  { %v4160_v51 = vpop.permute.xlu1 %4159  ;;  %v4162_v37 = vpop.permute.xlu0 %4161 }
0x133a   :  { %v4170_v63 = vmul.f32 %v4160_v51, %v7000_v33  ;;  %v4171_v46 = vmul.f32 %v4162_v37, %v7006_v6 }
0x133c   :  { %v7043_v55 = vadd.f32 %v4170_v63, %v4146_v20  ;;  %v7049_v24 = vadd.f32 %v4171_v46, %v4147_v50 }
0x133d   :  { %v4164_v22 = vpop.permute.xlu1 %4163 }
0x133e   :  { %v4177_v1 = vpack.c.bf16 %v7043_v55, %v7041_v34  ;;  %v4172_v52 = vmul.f32 %v4164_v22, %v7008_v39 }
0x1340   :  { %v7051_v33 = vadd.f32 %v4172_v52, %v4148_v28  ;;  %4845 = vmatprep.mubr.msk.bf16.mxu1 %vm97_vm0, %v4177_v1 }
0x1342   :  { %v4178_v26 = vpack.c.bf16 %v7051_v33, %v7049_v24 }
0x1344   :  { %4846 = vmatmul.mubr.msk.bf16.vlgmr.msra.gmra.mxu1 %vm97_vm0, %v4178_v26 }
0x1404   :  { %v4847_v25 = vpop.f32.mrf.mxu1 }
0x1405   :  { %v4253_v7 = vadd.f32 %v4847_v25, %v4572_v62 }
0x1406   :  { %v4244_v11 = vpop.f32.mrf.mxu1 }
0x1407   :  { %v4579_v6 = vmul.f32 -1.442695, %v4253_v7  ;;  %v4245_v39 = vadd.f32 %v4572_v62, %v4244_v11  ;;  %v4261_v15 = vmax.f32 %v4253_v7, 0.0 }
0x1408   :  { %v4848_v10 = vpop.f32.mrf.mxu1 }
0x1409   :  { %5376 = vpow2.f32 %v4579_v6  ;;  %v4577_v5 = vmul.f32 -1.442695, %v4245_v39  ;;  %v4256_v35 = vadd.f32 %v4848_v10, %v4572_v62  ;;  %v4259_v43 = vmax.f32 %v4245_v39, 0.0 }
0x140a   :  { %v4247_v19 = vpop.f32.mrf.mxu1 }
0x140b   :  { %5378 = vpow2.f32 %v4577_v5  ;;  %v4580_v29 = vmul.f32 -1.442695, %v4256_v35  ;;  %v4248_v17 = vadd.f32 %v4572_v62, %v4247_v19  ;;  %v4262_v51 = vmax.f32 %v4256_v35, 0.0 }
0x140d   :  { %5380 = vpow2.f32 %v4580_v29  ;;  %v4578_v14 = vmul.f32 -1.442695, %v4248_v17  ;;  %v4260_v9 = vmax.f32 %v4248_v17, 0.0 }
0x140f   :  { %5382 = vpow2.f32 %v4578_v14 }
0x1416   :  { %v5377_v31 = vpop.eup %5376 }
0x1417   :  { %v4277_v2 = vadd.f32 1.0, %v5377_v31 }
0x1418   :  { %v5379_v57 = vpop.eup %5378 }
0x1419   :  { %5384 = vrcp.f32 %v4277_v2  ;;  %v4275_v4 = vadd.f32 1.0, %v5379_v57 }
0x141a   :  { %v5381_v47 = vpop.eup %5380 }
0x141b   :  { %v4278_v18 = vadd.f32 1.0, %v5381_v47  ;;  %5386 = vrcp.f32 %v4275_v4 }
0x141c   :  { %v5383_v32 = vpop.eup %5382 }
0x141d   :  { %5388 = vrcp.f32 %v4278_v18  ;;  %v4276_v48 = vadd.f32 1.0, %v5383_v32 }
0x141f   :  { %5390 = vrcp.f32 %v4276_v48 }
0x1426   :  { %v5385_v49 = vpop.eup %5384 }
0x1427   :  { %4295 = vrot.lane.b32.xlu0 %v5385_v49, %s5398_s4  ;;  %v4309_v40 = vsub.f32 1.0, %v5385_v49 }
0x1428   :  { %v5387_v21 = vpop.eup %5386 }
0x1429   :  { %v4307_v38 = vsub.f32 1.0, %v5387_v21 }
0x142a   :  { %v5389_v45 = vpop.eup %5388 }
0x142b   :  { %4297 = vrot.lane.b32.xlu1 %v5389_v45, %s5398_s4  ;;  %4291 = vrot.lane.b32.xlu0 %v5387_v21, %s5398_s4  ;;  %v4310_v36 = vsub.f32 1.0, %v5389_v45 }
0x142c   :  { %v5391_v0 = vpop.eup %5390 }
0x142d   :  { %v4308_v3 = vsub.f32 1.0, %v5391_v0 }
0x142f   :  { %4293 = vrot.lane.b32.xlu1 %v5391_v0, %s5398_s4  ;;  %4315 = vrot.lane.b32.xlu0 %v4307_v38, %s5398_s4 }
0x1433   :  { %4317 = vrot.lane.b32.xlu1 %v4308_v3, %s5398_s4  ;;  %4319 = vrot.lane.b32.xlu0 %v4309_v40, %s5398_s4 }
0x1437   :  { %4321 = vrot.lane.b32.xlu1 %v4310_v36, %s5398_s4 }
0x1499   :  { %v4296_v54 = vpop.permute.xlu0 %4295 }
0x149a   :  { %v4305_v53 = vmul.f32 %v4296_v54, %v4261_v15 }
0x149d   :  { %v4298_v27 = vpop.permute.xlu1 %4297  ;;  %v4292_v8 = vpop.permute.xlu0 %4291 }
0x149e   :  { %v4303_v56 = vmul.f32 %v4292_v8, %v4259_v43  ;;  %v4306_v63 = vmul.f32 %v4298_v27, %v4262_v51 }
0x14a1   :  { %v4294_v12 = vpop.permute.xlu1 %4293  ;;  %v4316_v30 = vpop.permute.xlu0 %4315 }
0x14a2   :  { %v4327_v13 = vmul.f32 %v4316_v30, %v7041_v34  ;;  %v4304_v59 = vmul.f32 %v4294_v12, %v4260_v9 }
0x14a4   :  { %v4331_v61 = vadd.f32 %v4327_v13, %v4303_v56 }
0x14a5   :  { %v4318_v42 = vpop.permute.xlu1 %4317  ;;  %v4320_v58 = vpop.permute.xlu0 %4319 }
0x14a6   :  { %4335 = vst.msk [vmem:[%s7110_s22] sm:$0xff] %vm97_vm0, %v4331_v61  ;;  %v4328_v60 = vmul.f32 %v4318_v42, %v7043_v55  ;;  %v4329_v41 = vmul.f32 %v4320_v58, %v7049_v24 }
0x14a8   :  { %v4332_v37 = vadd.f32 %v4328_v60, %v4304_v59  ;;  %v4333_v16 = vadd.f32 %v4329_v41, %v4305_v53 }
0x14a9   :  { %v4322_v20 = vpop.permute.xlu1 %4321 }
0x14aa   :  { %4336 = vst.msk [vmem:[%s7110_s22 + $0x8] sm:$0xff] %vm97_vm0, %v4332_v37  ;;  %4337 = vst.msk [vmem:[%s7110_s22 + $0x10] sm:$0xff] %vm97_vm0, %v4333_v16  ;;  %v4330_v23 = vmul.f32 %v4322_v20, %v7051_v33 }
0x14ac   :  { %v4334_v44 = vadd.f32 %v4330_v23, %v4306_v63 }
0x14ae   :  { %4338 = vst.msk [vmem:[%s7110_s22 + $0x18] sm:$0xff] %vm97_vm0, %v4334_v44 }

</bundles_post_ra>
